<compile_context>
chip_gen: v7x
topology: tpu7x:2x2x1
jax: 0.10.0
libtpu: 0.0.40
codegen_flags: <defaults>
</compile_context>

<pallas_src>
import functools

import jax
import jax.numpy as jnp
from jax.experimental import pallas as pl
from jax.experimental.pallas import tpu as pltpu


# ----------------------------------------------------------------------------
# Helpers (trace-time math used inside kernels)
# ----------------------------------------------------------------------------
def _erf_approx(x):
    # Abramowitz & Stegun 7.1.26, max abs error ~1.5e-7 (erf_p is not guaranteed
    # to lower in Mosaic, so build it from exp / mul / add which always do).
    a1, a2, a3, a4, a5 = 0.254829592, -0.284496736, 1.421413741, -1.453152027, 1.061405429
    p = 0.3275911
    sgn = jnp.where(x >= 0.0, 1.0, -1.0)
    z = jnp.abs(x)
    t = 1.0 / (1.0 + p * z)
    poly = ((((a5 * t + a4) * t + a3) * t + a2) * t + a1) * t
    return sgn * (1.0 - poly * jnp.exp(-z * z))


def _gelu_exact(x):
    # torch.nn.GELU() default: 0.5 * x * (1 + erf(x / sqrt(2)))
    return 0.5 * x * (1.0 + _erf_approx(x * 0.7071067811865476))


def _layer_norm(x, gamma, beta, eps):
    mu = jnp.mean(x, axis=-1, keepdims=True)
    xc = x - mu
    var = jnp.mean(xc * xc, axis=-1, keepdims=True)
    return xc * jax.lax.rsqrt(var + eps) * gamma + beta


# ----------------------------------------------------------------------------
# Kernel 1: fused  x + Proj(MHA(LayerNorm(x)))   for one batch element
# ----------------------------------------------------------------------------
def _mha_block_kernel(x_ref, g_ref, b_ref, wqkv_ref, bqkv_ref, wp_ref, bp_ref,
                      o_ref, ctx_ref, *, num_heads, head_dim, emb, eps):
    x = x_ref[0]                                                # (N, E) f32
    xn = _layer_norm(x, g_ref[...], b_ref[...], eps)            # PreNorm

    # Single deep-K MXU matmul for Q, K and V of all heads: (N,E) x (E,3E).
    qkv = jnp.dot(xn, wqkv_ref[...], preferred_element_type=jnp.float32)
    qkv = qkv + bqkv_ref[...]

    inv_scale = 1.0 / (float(emb) ** 0.5)   # reference divides by sqrt(emb_size)

    for h in range(num_heads):              # small static unroll (num_heads=8)
        lo = h * head_dim
        qh = qkv[:, lo:lo + head_dim]                           # (N, dh)
        kh = qkv[:, emb + lo:emb + lo + head_dim]               # (N, dh)
        vh = qkv[:, 2 * emb + lo:2 * emb + lo + head_dim]       # (N, dh)
        s = jax.lax.dot_general(qh, kh, (((1,), (1,)), ((), ())),
                                preferred_element_type=jnp.float32) * inv_scale
        s = s - jnp.max(s, axis=-1, keepdims=True)
        p = jnp.exp(s)
        p = p / jnp.sum(p, axis=-1, keepdims=True)              # softmax
        ctx_ref[:, lo:lo + head_dim] = jnp.dot(
            p, vh, preferred_element_type=jnp.float32)          # (N, dh)

    out = jnp.dot(ctx_ref[...], wp_ref[...], preferred_element_type=jnp.float32)
    out = out + bp_ref[...]
    o_ref[0] = (x + out).astype(o_ref.dtype)                    # residual


def mha_prenorm_residual(x, p, num_heads):
    B, N, E = x.shape
    kernel = functools.partial(_mha_block_kernel, num_heads=num_heads,
                               head_dim=E // num_heads, emb=E, eps=1e-5)
    return pl.pallas_call(
        kernel,
        out_shape=jax.ShapeDtypeStruct((B, N, E), jnp.float32),
        grid_spec=pltpu.PrefetchScalarGridSpec(
            num_scalar_prefetch=0,
            grid=(B,),
            in_specs=[
                pl.BlockSpec((1, N, E), lambda b: (b, 0, 0)),       # x
                pl.BlockSpec((1, E), lambda b: (0, 0)),             # ln gamma
                pl.BlockSpec((1, E), lambda b: (0, 0)),             # ln beta
                pl.BlockSpec((E, 3 * E), lambda b: (0, 0)),         # W_qkv
                pl.BlockSpec((1, 3 * E), lambda b: (0, 0)),         # b_qkv
                pl.BlockSpec((E, E), lambda b: (0, 0)),             # W_proj
                pl.BlockSpec((1, E), lambda b: (0, 0)),             # b_proj
            ],
            out_specs=pl.BlockSpec((1, N, E), lambda b: (b, 0, 0)),
            scratch_shapes=[pltpu.VMEM((N, E), jnp.float32)],       # head context
        ),
        compiler_params=pltpu.CompilerParams(dimension_semantics=("parallel",)),
    )(x, p["ln_g"], p["ln_b"], p["wqkv"], p["bqkv"], p["wproj"], p["bproj"])


# ----------------------------------------------------------------------------
# Kernel 2: fused  x + W2(GELU(W1(LayerNorm(x))))   for one batch element
# ----------------------------------------------------------------------------
def _ff_block_kernel(x_ref, g_ref, b_ref, w1_ref, b1_ref, w2_ref, b2_ref, o_ref,
                     *, eps):
    x = x_ref[0]                                                # (N, E)
    xn = _layer_norm(x, g_ref[...], b_ref[...], eps)
    h = jnp.dot(xn, w1_ref[...], preferred_element_type=jnp.float32) + b1_ref[...]
    h = _gelu_exact(h)                                          # (N, 4E)
    y = jnp.dot(h, w2_ref[...], preferred_element_type=jnp.float32) + b2_ref[...]
    o_ref[0] = (x + y).astype(o_ref.dtype)                      # residual


def ff_prenorm_residual(x, p):
    B, N, E = x.shape
    Eh = p["w1"].shape[1]
    kernel = functools.partial(_ff_block_kernel, eps=1e-5)
    return pl.pallas_call(
        kernel,
        out_shape=jax.ShapeDtypeStruct((B, N, E), jnp.float32),
        grid_spec=pltpu.PrefetchScalarGridSpec(
            num_scalar_prefetch=0,
            grid=(B,),
            in_specs=[
                pl.BlockSpec((1, N, E), lambda b: (b, 0, 0)),       # x
                pl.BlockSpec((1, E), lambda b: (0, 0)),             # ln gamma
                pl.BlockSpec((1, E), lambda b: (0, 0)),             # ln beta
                pl.BlockSpec((E, Eh), lambda b: (0, 0)),            # W1
                pl.BlockSpec((1, Eh), lambda b: (0, 0)),            # b1
                pl.BlockSpec((Eh, E), lambda b: (0, 0)),            # W2
                pl.BlockSpec((1, E), lambda b: (0, 0)),             # b2
            ],
            out_specs=pl.BlockSpec((1, N, E), lambda b: (b, 0, 0)),
        ),
        compiler_params=pltpu.CompilerParams(dimension_semantics=("parallel",)),
    )(x, p["ln_g"], p["ln_b"], p["w1"], p["b1"], p["w2"], p["b2"])


# ----------------------------------------------------------------------------
# TransformerBlock: parameters + forward
# ----------------------------------------------------------------------------
def init_transformer_params(key, depth, emb, expansion=4):
    def linear(k, fan_in, fan_out):
        kw, kb = jax.random.split(k)
        bound = 1.0 / (float(fan_in) ** 0.5)        # PyTorch nn.Linear default
        w = jax.random.uniform(kw, (fan_in, fan_out), jnp.float32, -bound, bound)
        b = jax.random.uniform(kb, (1, fan_out), jnp.float32, -bound, bound)
        return w, b

    layers = []
    for _ in range(depth):
        key, k1, k2, k3, k4 = jax.random.split(key, 5)
        wqkv, bqkv = linear(k1, emb, 3 * emb)
        wproj, bproj = linear(k2, emb, emb)
        w1, b1 = linear(k3, emb, expansion * emb)
        w2, b2 = linear(k4, expansion * emb, emb)
        layers.append({
            "attn": dict(ln_g=jnp.ones((1, emb), jnp.float32),
                         ln_b=jnp.zeros((1, emb), jnp.float32),
                         wqkv=wqkv, bqkv=bqkv, wproj=wproj, bproj=bproj),
            "ff": dict(ln_g=jnp.ones((1, emb), jnp.float32),
                       ln_b=jnp.zeros((1, emb), jnp.float32),
                       w1=w1, b1=b1, w2=w2, b2=b2),
        })
    return layers


def transformer_block_forward(x, params, num_heads, extract_layers):
    """x: (B, N, E) float32. Returns list of extracted layer outputs."""
    # TODO(synk): attention mask path omitted — TransformerBlock.forward never
    # passes a mask; Dropout(p=0.0) is an identity and is omitted.
    outs = []
    for cnt, lp in enumerate(params):
        x = mha_prenorm_residual(x, lp["attn"], num_heads)
        x = ff_prenorm_residual(x, lp["ff"])
        if cnt + 1 in extract_layers:
            outs.append(x)
    return outs


if __name__ == "__main__":
    # Small config consistent with the module: embed_dim=128 (lane-dense),
    # num_heads=8 (head_dim=16), depth=4, extract_layers=[2, 4], B=2, seq=16.
    EMB, HEADS, DEPTH = 128, 8, 4
    EXTRACT = (2, 4)
    B, N = 2, 16

    key = jax.random.PRNGKey(0)
    key, kx = jax.random.split(key)
    x = jax.random.normal(kx, (B, N, EMB), jnp.float32)
    params = init_transformer_params(key, DEPTH, EMB)

    fwd = jax.jit(functools.partial(transformer_block_forward,
                                    num_heads=HEADS, extract_layers=EXTRACT))
    outs = fwd(x, params)
    outs = jax.block_until_ready(outs)

    assert len(outs) == len(EXTRACT), len(outs)
    for o in outs:
        assert o.shape == (B, N, EMB), o.shape
        assert bool(jnp.all(jnp.isfinite(o)))
    print("KERNEL_OK")
</pallas_src>

<mosaic_0001>
module attributes {stable_mosaic.version = 11 : i64} {
  func.func @_ff_block_kernel(%arg0: i32, %arg1: memref<1x16x128xf32, #tpu.memory_space<vmem>>, %arg2: memref<1x128xf32, #tpu.memory_space<vmem>>, %arg3: memref<1x128xf32, #tpu.memory_space<vmem>>, %arg4: memref<128x512xf32, #tpu.memory_space<vmem>>, %arg5: memref<1x512xf32, #tpu.memory_space<vmem>>, %arg6: memref<512x128xf32, #tpu.memory_space<vmem>>, %arg7: memref<1x128xf32, #tpu.memory_space<vmem>>, %arg8: memref<1x16x128xf32, #tpu.memory_space<vmem>>) attributes {dimension_semantics = [#tpu.dimension_semantics<parallel>], iteration_bounds = array<i64: 2>, scalar_prefetch = 0 : i64, scratch_operands = 0 : i64, tpu.core_type = #tpu.core_type<tc>, window_params = [{transform_indices = @transform_0, window_bounds = array<i64: 1, 16, 128>}, {pipeline_mode = #tpu.pipeline_mode<synchronous>, transform_indices = @transform_1, window_bounds = array<i64: 1, 128>}, {pipeline_mode = #tpu.pipeline_mode<synchronous>, transform_indices = @transform_2, window_bounds = array<i64: 1, 128>}, {pipeline_mode = #tpu.pipeline_mode<synchronous>, transform_indices = @transform_3, window_bounds = array<i64: 128, 512>}, {pipeline_mode = #tpu.pipeline_mode<synchronous>, transform_indices = @transform_4, window_bounds = array<i64: 1, 512>}, {pipeline_mode = #tpu.pipeline_mode<synchronous>, transform_indices = @transform_5, window_bounds = array<i64: 512, 128>}, {pipeline_mode = #tpu.pipeline_mode<synchronous>, transform_indices = @transform_6, window_bounds = array<i64: 1, 128>}, {transform_indices = @transform_7, window_bounds = array<i64: 1, 16, 128>}]} {
    %c0 = arith.constant 0 : index
    %c0_0 = arith.constant 0 : index
    %c0_1 = arith.constant 0 : index
    %0 = vector.load %arg1[%c0, %c0_0, %c0_1] : memref<1x16x128xf32, #tpu.memory_space<vmem>>, vector<1x16x128xf32>
    %1 = vector.shape_cast %0 : vector<1x16x128xf32> to vector<16x128xf32>
    %c0_2 = arith.constant 0 : index
    %c0_3 = arith.constant 0 : index
    %2 = vector.load %arg2[%c0_2, %c0_3] : memref<1x128xf32, #tpu.memory_space<vmem>>, vector<1x128xf32>
    %c0_4 = arith.constant 0 : index
    %c0_5 = arith.constant 0 : index
    %3 = vector.load %arg3[%c0_4, %c0_5] : memref<1x128xf32, #tpu.memory_space<vmem>>, vector<1x128xf32>
    %cst = arith.constant dense<0.000000e+00> : vector<16xf32>
    %4 = vector.multi_reduction <add>, %1, %cst [1] : vector<16x128xf32> to vector<16xf32>
    %5 = vector.shape_cast %4 : vector<16xf32> to vector<16x1xf32>
    %cst_6 = arith.constant 1.280000e+02 : f32
    %6 = vector.broadcast %cst_6 : f32 to vector<16x1xf32>
    %7 = arith.divf %5, %6 : vector<16x1xf32>
    %8 = vector.broadcast %7 : vector<16x1xf32> to vector<16x128xf32>
    %9 = arith.subf %1, %8 : vector<16x128xf32>
    %10 = arith.mulf %9, %9 : vector<16x128xf32>
    %cst_7 = arith.constant dense<0.000000e+00> : vector<16xf32>
    %11 = vector.multi_reduction <add>, %10, %cst_7 [1] : vector<16x128xf32> to vector<16xf32>
    %12 = vector.shape_cast %11 : vector<16xf32> to vector<16x1xf32>
    %cst_8 = arith.constant 1.280000e+02 : f32
    %13 = vector.broadcast %cst_8 : f32 to vector<16x1xf32>
    %14 = arith.divf %12, %13 : vector<16x1xf32>
    %cst_9 = arith.constant 9.99999974E-6 : f32
    %15 = vector.broadcast %cst_9 : f32 to vector<16x1xf32>
    %16 = arith.addf %14, %15 : vector<16x1xf32>
    %17 = math.rsqrt %16 : vector<16x1xf32>
    %18 = vector.broadcast %17 : vector<16x1xf32> to vector<16x128xf32>
    %19 = arith.mulf %9, %18 : vector<16x128xf32>
    %20 = vector.broadcast %2 : vector<1x128xf32> to vector<16x128xf32>
    %21 = arith.mulf %19, %20 : vector<16x128xf32>
    %22 = vector.broadcast %3 : vector<1x128xf32> to vector<16x128xf32>
    %23 = arith.addf %21, %22 : vector<16x128xf32>
    %c0_10 = arith.constant 0 : index
    %c0_11 = arith.constant 0 : index
    %24 = vector.load %arg4[%c0_10, %c0_11] : memref<128x512xf32, #tpu.memory_space<vmem>>, vector<128x512xf32>
    %cst_12 = arith.constant dense<0.000000e+00> : vector<16x512xf32>
    %25 = tpu.matmul %23, %24, %cst_12 {dimension_numbers = #tpu.dot_dimension_numbers<[1], [0], [0], [1], [0, 0, 1, 1], [], []>} : vector<16x128xf32>, vector<128x512xf32>, vector<16x512xf32> -> vector<16x512xf32>
    %c0_13 = arith.constant 0 : index
    %c0_14 = arith.constant 0 : index
    %26 = vector.load %arg5[%c0_13, %c0_14] : memref<1x512xf32, #tpu.memory_space<vmem>>, vector<1x512xf32>
    %27 = vector.broadcast %26 : vector<1x512xf32> to vector<16x512xf32>
    %28 = arith.addf %25, %27 : vector<16x512xf32>
    %cst_15 = arith.constant 5.000000e-01 : f32
    %29 = vector.broadcast %cst_15 : f32 to vector<16x512xf32>
    %30 = arith.mulf %29, %28 : vector<16x512xf32>
    %cst_16 = arith.constant 0.707106769 : f32
    %31 = vector.broadcast %cst_16 : f32 to vector<16x512xf32>
    %32 = arith.mulf %28, %31 : vector<16x512xf32>
    %cst_17 = arith.constant 0.000000e+00 : f32
    %33 = vector.broadcast %cst_17 : f32 to vector<16x512xf32>
    %34 = arith.cmpf oge, %32, %33 : vector<16x512xf32>
    %cst_18 = arith.constant 1.000000e+00 : f32
    %cst_19 = arith.constant -1.000000e+00 : f32
    %35 = vector.broadcast %cst_18 : f32 to vector<16x512xf32>
    %36 = vector.broadcast %cst_19 : f32 to vector<16x512xf32>
    %37 = arith.select %34, %35, %36 : vector<16x512xi1>, vector<16x512xf32>
    %38 = math.absf %32 : vector<16x512xf32>
    %cst_20 = arith.constant 0.327591091 : f32
    %39 = vector.broadcast %cst_20 : f32 to vector<16x512xf32>
    %40 = arith.mulf %39, %38 : vector<16x512xf32>
    %cst_21 = arith.constant 1.000000e+00 : f32
    %41 = vector.broadcast %cst_21 : f32 to vector<16x512xf32>
    %42 = arith.addf %41, %40 : vector<16x512xf32>
    %cst_22 = arith.constant 1.000000e+00 : f32
    %43 = vector.broadcast %cst_22 : f32 to vector<16x512xf32>
    %44 = arith.divf %43, %42 : vector<16x512xf32>
    %cst_23 = arith.constant 1.06140542 : f32
    %45 = vector.broadcast %cst_23 : f32 to vector<16x512xf32>
    %46 = arith.mulf %45, %44 : vector<16x512xf32>
    %cst_24 = arith.constant -1.45315206 : f32
    %47 = vector.broadcast %cst_24 : f32 to vector<16x512xf32>
    %48 = arith.addf %46, %47 : vector<16x512xf32>
    %49 = arith.mulf %48, %44 : vector<16x512xf32>
    %cst_25 = arith.constant 1.42141378 : f32
    %50 = vector.broadcast %cst_25 : f32 to vector<16x512xf32>
    %51 = arith.addf %49, %50 : vector<16x512xf32>
    %52 = arith.mulf %51, %44 : vector<16x512xf32>
    %cst_26 = arith.constant -0.284496725 : f32
    %53 = vector.broadcast %cst_26 : f32 to vector<16x512xf32>
    %54 = arith.addf %52, %53 : vector<16x512xf32>
    %55 = arith.mulf %54, %44 : vector<16x512xf32>
    %cst_27 = arith.constant 0.254829586 : f32
    %56 = vector.broadcast %cst_27 : f32 to vector<16x512xf32>
    %57 = arith.addf %55, %56 : vector<16x512xf32>
    %58 = arith.mulf %57, %44 : vector<16x512xf32>
    %cst_28 = arith.constant 0.000000e+00 : f32
    %59 = vector.broadcast %cst_28 : f32 to vector<16x512xf32>
    %60 = arith.subf %59, %38 : vector<16x512xf32>
    %61 = arith.mulf %60, %38 : vector<16x512xf32>
    %62 = math.exp %61 : vector<16x512xf32>
    %63 = arith.mulf %58, %62 : vector<16x512xf32>
    %cst_29 = arith.constant 1.000000e+00 : f32
    %64 = vector.broadcast %cst_29 : f32 to vector<16x512xf32>
    %65 = arith.subf %64, %63 : vector<16x512xf32>
    %66 = arith.mulf %37, %65 : vector<16x512xf32>
    %cst_30 = arith.constant 1.000000e+00 : f32
    %67 = vector.broadcast %cst_30 : f32 to vector<16x512xf32>
    %68 = arith.addf %67, %66 : vector<16x512xf32>
    %69 = arith.mulf %30, %68 : vector<16x512xf32>
    %c0_31 = arith.constant 0 : index
    %c0_32 = arith.constant 0 : index
    %70 = vector.load %arg6[%c0_31, %c0_32] : memref<512x128xf32, #tpu.memory_space<vmem>>, vector<512x128xf32>
    %cst_33 = arith.constant dense<0.000000e+00> : vector<16x128xf32>
    %71 = tpu.matmul %69, %70, %cst_33 {dimension_numbers = #tpu.dot_dimension_numbers<[1], [0], [0], [1], [0, 0, 1, 1], [], []>} : vector<16x512xf32>, vector<512x128xf32>, vector<16x128xf32> -> vector<16x128xf32>
    %c0_34 = arith.constant 0 : index
    %c0_35 = arith.constant 0 : index
    %72 = vector.load %arg7[%c0_34, %c0_35] : memref<1x128xf32, #tpu.memory_space<vmem>>, vector<1x128xf32>
    %73 = vector.broadcast %72 : vector<1x128xf32> to vector<16x128xf32>
    %74 = arith.addf %71, %73 : vector<16x128xf32>
    %75 = arith.addf %1, %74 : vector<16x128xf32>
    %c0_36 = arith.constant 0 : index
    %c0_37 = arith.constant 0 : index
    %c0_38 = arith.constant 0 : index
    %76 = vector.load %arg8[%c0_36, %c0_37, %c0_38] : memref<1x16x128xf32, #tpu.memory_space<vmem>>, vector<1x16x128xf32>
    %77 = vector.shape_cast %76 : vector<1x16x128xf32> to vector<16x128xf32>
    %78 = vector.shape_cast %75 : vector<16x128xf32> to vector<1x16x128xf32>
    tpu.vector_store %arg8[%c0_36, %c0_37, %c0_38], %78 {strides = array<i32>} : memref<1x16x128xf32, #tpu.memory_space<vmem>>, vector<1x16x128xf32>,
    return
  }
  func.func @transform_0(%arg0: i32) -> (i32, i32, i32) {
    %c0_i32 = arith.constant 0 : i32
    %c0_i32_0 = arith.constant 0 : i32
    %c0_i32_1 = arith.constant 0 : i32
    return %arg0, %c0_i32, %c0_i32_0 : i32, i32, i32
  }
  func.func @transform_1(%arg0: i32) -> (i32, i32) {
    %c0_i32 = arith.constant 0 : i32
    %c0_i32_0 = arith.constant 0 : i32
    %c0_i32_1 = arith.constant 0 : i32
    return %c0_i32, %c0_i32_0 : i32, i32
  }
  func.func @transform_2(%arg0: i32) -> (i32, i32) {
    %c0_i32 = arith.constant 0 : i32
    %c0_i32_0 = arith.constant 0 : i32
    %c0_i32_1 = arith.constant 0 : i32
    return %c0_i32, %c0_i32_0 : i32, i32
  }
  func.func @transform_3(%arg0: i32) -> (i32, i32) {
    %c0_i32 = arith.constant 0 : i32
    %c0_i32_0 = arith.constant 0 : i32
    %c0_i32_1 = arith.constant 0 : i32
    return %c0_i32, %c0_i32_0 : i32, i32
  }
  func.func @transform_4(%arg0: i32) -> (i32, i32) {
    %c0_i32 = arith.constant 0 : i32
    %c0_i32_0 = arith.constant 0 : i32
    %c0_i32_1 = arith.constant 0 : i32
    return %c0_i32, %c0_i32_0 : i32, i32
  }
  func.func @transform_5(%arg0: i32) -> (i32, i32) {
    %c0_i32 = arith.constant 0 : i32
    %c0_i32_0 = arith.constant 0 : i32
    %c0_i32_1 = arith.constant 0 : i32
    return %c0_i32, %c0_i32_0 : i32, i32
  }
  func.func @transform_6(%arg0: i32) -> (i32, i32) {
    %c0_i32 = arith.constant 0 : i32
    %c0_i32_0 = arith.constant 0 : i32
    %c0_i32_1 = arith.constant 0 : i32
    return %c0_i32, %c0_i32_0 : i32, i32
  }
  func.func @transform_7(%arg0: i32) -> (i32, i32, i32) {
    %c0_i32 = arith.constant 0 : i32
    %c0_i32_0 = arith.constant 0 : i32
    %c0_i32_1 = arith.constant 0 : i32
    return %arg0, %c0_i32, %c0_i32_0 : i32, i32, i32
  }
}

module attributes {stable_mosaic.version = 11 : i64} {
  func.func @_mha_block_kernel(%arg0: i32, %arg1: memref<1x16x128xf32, #tpu.memory_space<vmem>>, %arg2: memref<1x128xf32, #tpu.memory_space<vmem>>, %arg3: memref<1x128xf32, #tpu.memory_space<vmem>>, %arg4: memref<128x384xf32, #tpu.memory_space<vmem>>, %arg5: memref<1x384xf32, #tpu.memory_space<vmem>>, %arg6: memref<128x128xf32, #tpu.memory_space<vmem>>, %arg7: memref<1x128xf32, #tpu.memory_space<vmem>>, %arg8: memref<1x16x128xf32, #tpu.memory_space<vmem>>, %arg9: memref<16x128xf32, #tpu.memory_space<vmem>>) attributes {dimension_semantics = [#tpu.dimension_semantics<parallel>], iteration_bounds = array<i64: 2>, scalar_prefetch = 0 : i64, scratch_operands = 1 : i64, tpu.core_type = #tpu.core_type<tc>, window_params = [{transform_indices = @transform_0, window_bounds = array<i64: 1, 16, 128>}, {pipeline_mode = #tpu.pipeline_mode<synchronous>, transform_indices = @transform_1, window_bounds = array<i64: 1, 128>}, {pipeline_mode = #tpu.pipeline_mode<synchronous>, transform_indices = @transform_2, window_bounds = array<i64: 1, 128>}, {pipeline_mode = #tpu.pipeline_mode<synchronous>, transform_indices = @transform_3, window_bounds = array<i64: 128, 384>}, {pipeline_mode = #tpu.pipeline_mode<synchronous>, transform_indices = @transform_4, window_bounds = array<i64: 1, 384>}, {pipeline_mode = #tpu.pipeline_mode<synchronous>, transform_indices = @transform_5, window_bounds = array<i64: 128, 128>}, {pipeline_mode = #tpu.pipeline_mode<synchronous>, transform_indices = @transform_6, window_bounds = array<i64: 1, 128>}, {transform_indices = @transform_7, window_bounds = array<i64: 1, 16, 128>}]} {
    %c0 = arith.constant 0 : index
    %c0_0 = arith.constant 0 : index
    %c0_1 = arith.constant 0 : index
    %0 = vector.load %arg1[%c0, %c0_0, %c0_1] : memref<1x16x128xf32, #tpu.memory_space<vmem>>, vector<1x16x128xf32>
    %1 = vector.shape_cast %0 : vector<1x16x128xf32> to vector<16x128xf32>
    %c0_2 = arith.constant 0 : index
    %c0_3 = arith.constant 0 : index
    %2 = vector.load %arg2[%c0_2, %c0_3] : memref<1x128xf32, #tpu.memory_space<vmem>>, vector<1x128xf32>
    %c0_4 = arith.constant 0 : index
    %c0_5 = arith.constant 0 : index
    %3 = vector.load %arg3[%c0_4, %c0_5] : memref<1x128xf32, #tpu.memory_space<vmem>>, vector<1x128xf32>
    %cst = arith.constant dense<0.000000e+00> : vector<16xf32>
    %4 = vector.multi_reduction <add>, %1, %cst [1] : vector<16x128xf32> to vector<16xf32>
    %5 = vector.shape_cast %4 : vector<16xf32> to vector<16x1xf32>
    %cst_6 = arith.constant 1.280000e+02 : f32
    %6 = vector.broadcast %cst_6 : f32 to vector<16x1xf32>
    %7 = arith.divf %5, %6 : vector<16x1xf32>
    %8 = vector.broadcast %7 : vector<16x1xf32> to vector<16x128xf32>
    %9 = arith.subf %1, %8 : vector<16x128xf32>
    %10 = arith.mulf %9, %9 : vector<16x128xf32>
    %cst_7 = arith.constant dense<0.000000e+00> : vector<16xf32>
    %11 = vector.multi_reduction <add>, %10, %cst_7 [1] : vector<16x128xf32> to vector<16xf32>
    %12 = vector.shape_cast %11 : vector<16xf32> to vector<16x1xf32>
    %cst_8 = arith.constant 1.280000e+02 : f32
    %13 = vector.broadcast %cst_8 : f32 to vector<16x1xf32>
    %14 = arith.divf %12, %13 : vector<16x1xf32>
    %cst_9 = arith.constant 9.99999974E-6 : f32
    %15 = vector.broadcast %cst_9 : f32 to vector<16x1xf32>
    %16 = arith.addf %14, %15 : vector<16x1xf32>
    %17 = math.rsqrt %16 : vector<16x1xf32>
    %18 = vector.broadcast %17 : vector<16x1xf32> to vector<16x128xf32>
    %19 = arith.mulf %9, %18 : vector<16x128xf32>
    %20 = vector.broadcast %2 : vector<1x128xf32> to vector<16x128xf32>
    %21 = arith.mulf %19, %20 : vector<16x128xf32>
    %22 = vector.broadcast %3 : vector<1x128xf32> to vector<16x128xf32>
    %23 = arith.addf %21, %22 : vector<16x128xf32>
    %c0_10 = arith.constant 0 : index
    %c0_11 = arith.constant 0 : index
    %24 = vector.load %arg4[%c0_10, %c0_11] : memref<128x384xf32, #tpu.memory_space<vmem>>, vector<128x384xf32>
    %cst_12 = arith.constant dense<0.000000e+00> : vector<16x384xf32>
    %25 = tpu.matmul %23, %24, %cst_12 {dimension_numbers = #tpu.dot_dimension_numbers<[1], [0], [0], [1], [0, 0, 1, 1], [], []>} : vector<16x128xf32>, vector<128x384xf32>, vector<16x384xf32> -> vector<16x384xf32>
    %c0_13 = arith.constant 0 : index
    %c0_14 = arith.constant 0 : index
    %26 = vector.load %arg5[%c0_13, %c0_14] : memref<1x384xf32, #tpu.memory_space<vmem>>, vector<1x384xf32>
    %27 = vector.broadcast %26 : vector<1x384xf32> to vector<16x384xf32>
    %28 = arith.addf %25, %27 : vector<16x384xf32>
    %29 = vector.extract_strided_slice %28 {offsets = [0, 0], sizes = [16, 16], strides = [1, 1]} : vector<16x384xf32> to vector<16x16xf32>
    %30 = vector.extract_strided_slice %28 {offsets = [0, 128], sizes = [16, 16], strides = [1, 1]} : vector<16x384xf32> to vector<16x16xf32>
    %31 = vector.extract_strided_slice %28 {offsets = [0, 256], sizes = [16, 16], strides = [1, 1]} : vector<16x384xf32> to vector<16x16xf32>
    %cst_15 = arith.constant dense<0.000000e+00> : vector<16x16xf32>
    %32 = tpu.matmul %29, %30, %cst_15 {dimension_numbers = #tpu.dot_dimension_numbers<[1], [1], [0], [0], [0, 0, 1, 0], [], []>} : vector<16x16xf32>, vector<16x16xf32>, vector<16x16xf32> -> vector<16x16xf32>
    %cst_16 = arith.constant 0.0883883461 : f32
    %33 = vector.broadcast %cst_16 : f32 to vector<16x16xf32>
    %34 = arith.mulf %32, %33 : vector<16x16xf32>
    %cst_17 = arith.constant dense<0xFF800000> : vector<16xf32>
    %35 = vector.multi_reduction <maximumf>, %34, %cst_17 [1] : vector<16x16xf32> to vector<16xf32>
    %36 = vector.shape_cast %35 : vector<16xf32> to vector<16x1xf32>
    %37 = vector.broadcast %36 : vector<16x1xf32> to vector<16x16xf32>
    %38 = arith.subf %34, %37 : vector<16x16xf32>
    %39 = math.exp %38 : vector<16x16xf32>
    %cst_18 = arith.constant dense<0.000000e+00> : vector<16xf32>
    %40 = vector.multi_reduction <add>, %39, %cst_18 [1] : vector<16x16xf32> to vector<16xf32>
    %41 = vector.shape_cast %40 : vector<16xf32> to vector<16x1xf32>
    %42 = vector.broadcast %41 : vector<16x1xf32> to vector<16x16xf32>
    %43 = arith.divf %39, %42 : vector<16x16xf32>
    %cst_19 = arith.constant dense<0.000000e+00> : vector<16x16xf32>
    %44 = tpu.matmul %43, %31, %cst_19 {dimension_numbers = #tpu.dot_dimension_numbers<[1], [0], [0], [1], [0, 0, 1, 1], [], []>} : vector<16x16xf32>, vector<16x16xf32>, vector<16x16xf32> -> vector<16x16xf32>
    %c0_20 = arith.constant 0 : index
    %c0_21 = arith.constant 0 : index
    %45 = vector.load %arg9[%c0_20, %c0_21] : memref<16x128xf32, #tpu.memory_space<vmem>>, vector<16x16xf32>
    tpu.vector_store %arg9[%c0_20, %c0_21], %44 {strides = array<i32>} : memref<16x128xf32, #tpu.memory_space<vmem>>, vector<16x16xf32>,
    %46 = vector.extract_strided_slice %28 {offsets = [0, 16], sizes = [16, 16], strides = [1, 1]} : vector<16x384xf32> to vector<16x16xf32>
    %47 = vector.extract_strided_slice %28 {offsets = [0, 144], sizes = [16, 16], strides = [1, 1]} : vector<16x384xf32> to vector<16x16xf32>
    %48 = vector.extract_strided_slice %28 {offsets = [0, 272], sizes = [16, 16], strides = [1, 1]} : vector<16x384xf32> to vector<16x16xf32>
    %cst_22 = arith.constant dense<0.000000e+00> : vector<16x16xf32>
    %49 = tpu.matmul %46, %47, %cst_22 {dimension_numbers = #tpu.dot_dimension_numbers<[1], [1], [0], [0], [0, 0, 1, 0], [], []>} : vector<16x16xf32>, vector<16x16xf32>, vector<16x16xf32> -> vector<16x16xf32>
    %cst_23 = arith.constant 0.0883883461 : f32
    %50 = vector.broadcast %cst_23 : f32 to vector<16x16xf32>
    %51 = arith.mulf %49, %50 : vector<16x16xf32>
    %cst_24 = arith.constant dense<0xFF800000> : vector<16xf32>
    %52 = vector.multi_reduction <maximumf>, %51, %cst_24 [1] : vector<16x16xf32> to vector<16xf32>
    %53 = vector.shape_cast %52 : vector<16xf32> to vector<16x1xf32>
    %54 = vector.broadcast %53 : vector<16x1xf32> to vector<16x16xf32>
    %55 = arith.subf %51, %54 : vector<16x16xf32>
    %56 = math.exp %55 : vector<16x16xf32>
    %cst_25 = arith.constant dense<0.000000e+00> : vector<16xf32>
    %57 = vector.multi_reduction <add>, %56, %cst_25 [1] : vector<16x16xf32> to vector<16xf32>
    %58 = vector.shape_cast %57 : vector<16xf32> to vector<16x1xf32>
    %59 = vector.broadcast %58 : vector<16x1xf32> to vector<16x16xf32>
    %60 = arith.divf %56, %59 : vector<16x16xf32>
    %cst_26 = arith.constant dense<0.000000e+00> : vector<16x16xf32>
    %61 = tpu.matmul %60, %48, %cst_26 {dimension_numbers = #tpu.dot_dimension_numbers<[1], [0], [0], [1], [0, 0, 1, 1], [], []>} : vector<16x16xf32>, vector<16x16xf32>, vector<16x16xf32> -> vector<16x16xf32>
    %c0_27 = arith.constant 0 : index
    %c16 = arith.constant 16 : index
    %62 = vector.load %arg9[%c0_27, %c16] : memref<16x128xf32, #tpu.memory_space<vmem>>, vector<16x16xf32>
    tpu.vector_store %arg9[%c0_27, %c16], %61 {strides = array<i32>} : memref<16x128xf32, #tpu.memory_space<vmem>>, vector<16x16xf32>,
    %63 = vector.extract_strided_slice %28 {offsets = [0, 32], sizes = [16, 16], strides = [1, 1]} : vector<16x384xf32> to vector<16x16xf32>
    %64 = vector.extract_strided_slice %28 {offsets = [0, 160], sizes = [16, 16], strides = [1, 1]} : vector<16x384xf32> to vector<16x16xf32>
    %65 = vector.extract_strided_slice %28 {offsets = [0, 288], sizes = [16, 16], strides = [1, 1]} : vector<16x384xf32> to vector<16x16xf32>
    %cst_28 = arith.constant dense<0.000000e+00> : vector<16x16xf32>
    %66 = tpu.matmul %63, %64, %cst_28 {dimension_numbers = #tpu.dot_dimension_numbers<[1], [1], [0], [0], [0, 0, 1, 0], [], []>} : vector<16x16xf32>, vector<16x16xf32>, vector<16x16xf32> -> vector<16x16xf32>
    %cst_29 = arith.constant 0.0883883461 : f32
    %67 = vector.broadcast %cst_29 : f32 to vector<16x16xf32>
    %68 = arith.mulf %66, %67 : vector<16x16xf32>
    %cst_30 = arith.constant dense<0xFF800000> : vector<16xf32>
    %69 = vector.multi_reduction <maximumf>, %68, %cst_30 [1] : vector<16x16xf32> to vector<16xf32>
    %70 = vector.shape_cast %69 : vector<16xf32> to vector<16x1xf32>
    %71 = vector.broadcast %70 : vector<16x1xf32> to vector<16x16xf32>
    %72 = arith.subf %68, %71 : vector<16x16xf32>
    %73 = math.exp %72 : vector<16x16xf32>
    %cst_31 = arith.constant dense<0.000000e+00> : vector<16xf32>
    %74 = vector.multi_reduction <add>, %73, %cst_31 [1] : vector<16x16xf32> to vector<16xf32>
    %75 = vector.shape_cast %74 : vector<16xf32> to vector<16x1xf32>
    %76 = vector.broadcast %75 : vector<16x1xf32> to vector<16x16xf32>
    %77 = arith.divf %73, %76 : vector<16x16xf32>
    %cst_32 = arith.constant dense<0.000000e+00> : vector<16x16xf32>
    %78 = tpu.matmul %77, %65, %cst_32 {dimension_numbers = #tpu.dot_dimension_numbers<[1], [0], [0], [1], [0, 0, 1, 1], [], []>} : vector<16x16xf32>, vector<16x16xf32>, vector<16x16xf32> -> vector<16x16xf32>
    %c0_33 = arith.constant 0 : index
    %c32 = arith.constant 32 : index
    %79 = vector.load %arg9[%c0_33, %c32] : memref<16x128xf32, #tpu.memory_space<vmem>>, vector<16x16xf32>
    tpu.vector_store %arg9[%c0_33, %c32], %78 {strides = array<i32>} : memref<16x128xf32, #tpu.memory_space<vmem>>, vector<16x16xf32>,
    %80 = vector.extract_strided_slice %28 {offsets = [0, 48], sizes = [16, 16], strides = [1, 1]} : vector<16x384xf32> to vector<16x16xf32>
    %81 = vector.extract_strided_slice %28 {offsets = [0, 176], sizes = [16, 16], strides = [1, 1]} : vector<16x384xf32> to vector<16x16xf32>
    %82 = vector.extract_strided_slice %28 {offsets = [0, 304], sizes = [16, 16], strides = [1, 1]} : vector<16x384xf32> to vector<16x16xf32>
    %cst_34 = arith.constant dense<0.000000e+00> : vector<16x16xf32>
    %83 = tpu.matmul %80, %81, %cst_34 {dimension_numbers = #tpu.dot_dimension_numbers<[1], [1], [0], [0], [0, 0, 1, 0], [], []>} : vector<16x16xf32>, vector<16x16xf32>, vector<16x16xf32> -> vector<16x16xf32>
    %cst_35 = arith.constant 0.0883883461 : f32
    %84 = vector.broadcast %cst_35 : f32 to vector<16x16xf32>
    %85 = arith.mulf %83, %84 : vector<16x16xf32>
    %cst_36 = arith.constant dense<0xFF800000> : vector<16xf32>
    %86 = vector.multi_reduction <maximumf>, %85, %cst_36 [1] : vector<16x16xf32> to vector<16xf32>
    %87 = vector.shape_cast %86 : vector<16xf32> to vector<16x1xf32>
    %88 = vector.broadcast %87 : vector<16x1xf32> to vector<16x16xf32>
    %89 = arith.subf %85, %88 : vector<16x16xf32>
    %90 = math.exp %89 : vector<16x16xf32>
    %cst_37 = arith.constant dense<0.000000e+00> : vector<16xf32>
    %91 = vector.multi_reduction <add>, %90, %cst_37 [1] : vector<16x16xf32> to vector<16xf32>
    %92 = vector.shape_cast %91 : vector<16xf32> to vector<16x1xf32>
    %93 = vector.broadcast %92 : vector<16x1xf32> to vector<16x16xf32>
    %94 = arith.divf %90, %93 : vector<16x16xf32>
    %cst_38 = arith.constant dense<0.000000e+00> : vector<16x16xf32>
    %95 = tpu.matmul %94, %82, %cst_38 {dimension_numbers = #tpu.dot_dimension_numbers<[1], [0], [0], [1], [0, 0, 1, 1], [], []>} : vector<16x16xf32>, vector<16x16xf32>, vector<16x16xf32> -> vector<16x16xf32>
    %c0_39 = arith.constant 0 : index
    %c48 = arith.constant 48 : index
    %96 = vector.load %arg9[%c0_39, %c48] : memref<16x128xf32, #tpu.memory_space<vmem>>, vector<16x16xf32>
    tpu.vector_store %arg9[%c0_39, %c48], %95 {strides = array<i32>} : memref<16x128xf32, #tpu.memory_space<vmem>>, vector<16x16xf32>,
    %97 = vector.extract_strided_slice %28 {offsets = [0, 64], sizes = [16, 16], strides = [1, 1]} : vector<16x384xf32> to vector<16x16xf32>
    %98 = vector.extract_strided_slice %28 {offsets = [0, 192], sizes = [16, 16], strides = [1, 1]} : vector<16x384xf32> to vector<16x16xf32>
    %99 = vector.extract_strided_slice %28 {offsets = [0, 320], sizes = [16, 16], strides = [1, 1]} : vector<16x384xf32> to vector<16x16xf32>
    %cst_40 = arith.constant dense<0.000000e+00> : vector<16x16xf32>
    %100 = tpu.matmul %97, %98, %cst_40 {dimension_numbers = #tpu.dot_dimension_numbers<[1], [1], [0], [0], [0, 0, 1, 0], [], []>} : vector<16x16xf32>, vector<16x16xf32>, vector<16x16xf32> -> vector<16x16xf32>
    %cst_41 = arith.constant 0.0883883461 : f32
    %101 = vector.broadcast %cst_41 : f32 to vector<16x16xf32>
    %102 = arith.mulf %100, %101 : vector<16x16xf32>
    %cst_42 = arith.constant dense<0xFF800000> : vector<16xf32>
    %103 = vector.multi_reduction <maximumf>, %102, %cst_42 [1] : vector<16x16xf32> to vector<16xf32>
    %104 = vector.shape_cast %103 : vector<16xf32> to vector<16x1xf32>
    %105 = vector.broadcast %104 : vector<16x1xf32> to vector<16x16xf32>
    %106 = arith.subf %102, %105 : vector<16x16xf32>
    %107 = math.exp %106 : vector<16x16xf32>
    %cst_43 = arith.constant dense<0.000000e+00> : vector<16xf32>
    %108 = vector.multi_reduction <add>, %107, %cst_43 [1] : vector<16x16xf32> to vector<16xf32>
    %109 = vector.shape_cast %108 : vector<16xf32> to vector<16x1xf32>
    %110 = vector.broadcast %109 : vector<16x1xf32> to vector<16x16xf32>
    %111 = arith.divf %107, %110 : vector<16x16xf32>
    %cst_44 = arith.constant dense<0.000000e+00> : vector<16x16xf32>
    %112 = tpu.matmul %111, %99, %cst_44 {dimension_numbers = #tpu.dot_dimension_numbers<[1], [0], [0], [1], [0, 0, 1, 1], [], []>} : vector<16x16xf32>, vector<16x16xf32>, vector<16x16xf32> -> vector<16x16xf32>
    %c0_45 = arith.constant 0 : index
    %c64 = arith.constant 64 : index
    %113 = vector.load %arg9[%c0_45, %c64] : memref<16x128xf32, #tpu.memory_space<vmem>>, vector<16x16xf32>
    tpu.vector_store %arg9[%c0_45, %c64], %112 {strides = array<i32>} : memref<16x128xf32, #tpu.memory_space<vmem>>, vector<16x16xf32>,
    %114 = vector.extract_strided_slice %28 {offsets = [0, 80], sizes = [16, 16], strides = [1, 1]} : vector<16x384xf32> to vector<16x16xf32>
    %115 = vector.extract_strided_slice %28 {offsets = [0, 208], sizes = [16, 16], strides = [1, 1]} : vector<16x384xf32> to vector<16x16xf32>
    %116 = vector.extract_strided_slice %28 {offsets = [0, 336], sizes = [16, 16], strides = [1, 1]} : vector<16x384xf32> to vector<16x16xf32>
    %cst_46 = arith.constant dense<0.000000e+00> : vector<16x16xf32>
    %117 = tpu.matmul %114, %115, %cst_46 {dimension_numbers = #tpu.dot_dimension_numbers<[1], [1], [0], [0], [0, 0, 1, 0], [], []>} : vector<16x16xf32>, vector<16x16xf32>, vector<16x16xf32> -> vector<16x16xf32>
    %cst_47 = arith.constant 0.0883883461 : f32
    %118 = vector.broadcast %cst_47 : f32 to vector<16x16xf32>
    %119 = arith.mulf %117, %118 : vector<16x16xf32>
    %cst_48 = arith.constant dense<0xFF800000> : vector<16xf32>
    %120 = vector.multi_reduction <maximumf>, %119, %cst_48 [1] : vector<16x16xf32> to vector<16xf32>
    %121 = vector.shape_cast %120 : vector<16xf32> to vector<16x1xf32>
    %122 = vector.broadcast %121 : vector<16x1xf32> to vector<16x16xf32>
    %123 = arith.subf %119, %122 : vector<16x16xf32>
    %124 = math.exp %123 : vector<16x16xf32>
    %cst_49 = arith.constant dense<0.000000e+00> : vector<16xf32>
    %125 = vector.multi_reduction <add>, %124, %cst_49 [1] : vector<16x16xf32> to vector<16xf32>
    %126 = vector.shape_cast %125 : vector<16xf32> to vector<16x1xf32>
    %127 = vector.broadcast %126 : vector<16x1xf32> to vector<16x16xf32>
    %128 = arith.divf %124, %127 : vector<16x16xf32>
    %cst_50 = arith.constant dense<0.000000e+00> : vector<16x16xf32>
    %129 = tpu.matmul %128, %116, %cst_50 {dimension_numbers = #tpu.dot_dimension_numbers<[1], [0], [0], [1], [0, 0, 1, 1], [], []>} : vector<16x16xf32>, vector<16x16xf32>, vector<16x16xf32> -> vector<16x16xf32>
    %c0_51 = arith.constant 0 : index
    %c80 = arith.constant 80 : index
    %130 = vector.load %arg9[%c0_51, %c80] : memref<16x128xf32, #tpu.memory_space<vmem>>, vector<16x16xf32>
    tpu.vector_store %arg9[%c0_51, %c80], %129 {strides = array<i32>} : memref<16x128xf32, #tpu.memory_space<vmem>>, vector<16x16xf32>,
    %131 = vector.extract_strided_slice %28 {offsets = [0, 96], sizes = [16, 16], strides = [1, 1]} : vector<16x384xf32> to vector<16x16xf32>
    %132 = vector.extract_strided_slice %28 {offsets = [0, 224], sizes = [16, 16], strides = [1, 1]} : vector<16x384xf32> to vector<16x16xf32>
    %133 = vector.extract_strided_slice %28 {offsets = [0, 352], sizes = [16, 16], strides = [1, 1]} : vector<16x384xf32> to vector<16x16xf32>
    %cst_52 = arith.constant dense<0.000000e+00> : vector<16x16xf32>
    %134 = tpu.matmul %131, %132, %cst_52 {dimension_numbers = #tpu.dot_dimension_numbers<[1], [1], [0], [0], [0, 0, 1, 0], [], []>} : vector<16x16xf32>, vector<16x16xf32>, vector<16x16xf32> -> vector<16x16xf32>
    %cst_53 = arith.constant 0.0883883461 : f32
    %135 = vector.broadcast %cst_53 : f32 to vector<16x16xf32>
    %136 = arith.mulf %134, %135 : vector<16x16xf32>
    %cst_54 = arith.constant dense<0xFF800000> : vector<16xf32>
    %137 = vector.multi_reduction <maximumf>, %136, %cst_54 [1] : vector<16x16xf32> to vector<16xf32>
    %138 = vector.shape_cast %137 : vector<16xf32> to vector<16x1xf32>
    %139 = vector.broadcast %138 : vector<16x1xf32> to vector<16x16xf32>
    %140 = arith.subf %136, %139 : vector<16x16xf32>
    %141 = math.exp %140 : vector<16x16xf32>
    %cst_55 = arith.constant dense<0.000000e+00> : vector<16xf32>
    %142 = vector.multi_reduction <add>, %141, %cst_55 [1] : vector<16x16xf32> to vector<16xf32>
    %143 = vector.shape_cast %142 : vector<16xf32> to vector<16x1xf32>
    %144 = vector.broadcast %143 : vector<16x1xf32> to vector<16x16xf32>
    %145 = arith.divf %141, %144 : vector<16x16xf32>
    %cst_56 = arith.constant dense<0.000000e+00> : vector<16x16xf32>
    %146 = tpu.matmul %145, %133, %cst_56 {dimension_numbers = #tpu.dot_dimension_numbers<[1], [0], [0], [1], [0, 0, 1, 1], [], []>} : vector<16x16xf32>, vector<16x16xf32>, vector<16x16xf32> -> vector<16x16xf32>
    %c0_57 = arith.constant 0 : index
    %c96 = arith.constant 96 : index
    %147 = vector.load %arg9[%c0_57, %c96] : memref<16x128xf32, #tpu.memory_space<vmem>>, vector<16x16xf32>
    tpu.vector_store %arg9[%c0_57, %c96], %146 {strides = array<i32>} : memref<16x128xf32, #tpu.memory_space<vmem>>, vector<16x16xf32>,
    %148 = vector.extract_strided_slice %28 {offsets = [0, 112], sizes = [16, 16], strides = [1, 1]} : vector<16x384xf32> to vector<16x16xf32>
    %149 = vector.extract_strided_slice %28 {offsets = [0, 240], sizes = [16, 16], strides = [1, 1]} : vector<16x384xf32> to vector<16x16xf32>
    %150 = vector.extract_strided_slice %28 {offsets = [0, 368], sizes = [16, 16], strides = [1, 1]} : vector<16x384xf32> to vector<16x16xf32>
    %cst_58 = arith.constant dense<0.000000e+00> : vector<16x16xf32>
    %151 = tpu.matmul %148, %149, %cst_58 {dimension_numbers = #tpu.dot_dimension_numbers<[1], [1], [0], [0], [0, 0, 1, 0], [], []>} : vector<16x16xf32>, vector<16x16xf32>, vector<16x16xf32> -> vector<16x16xf32>
    %cst_59 = arith.constant 0.0883883461 : f32
    %152 = vector.broadcast %cst_59 : f32 to vector<16x16xf32>
    %153 = arith.mulf %151, %152 : vector<16x16xf32>
    %cst_60 = arith.constant dense<0xFF800000> : vector<16xf32>
    %154 = vector.multi_reduction <maximumf>, %153, %cst_60 [1] : vector<16x16xf32> to vector<16xf32>
    %155 = vector.shape_cast %154 : vector<16xf32> to vector<16x1xf32>
    %156 = vector.broadcast %155 : vector<16x1xf32> to vector<16x16xf32>
    %157 = arith.subf %153, %156 : vector<16x16xf32>
    %158 = math.exp %157 : vector<16x16xf32>
    %cst_61 = arith.constant dense<0.000000e+00> : vector<16xf32>
    %159 = vector.multi_reduction <add>, %158, %cst_61 [1] : vector<16x16xf32> to vector<16xf32>
    %160 = vector.shape_cast %159 : vector<16xf32> to vector<16x1xf32>
    %161 = vector.broadcast %160 : vector<16x1xf32> to vector<16x16xf32>
    %162 = arith.divf %158, %161 : vector<16x16xf32>
    %cst_62 = arith.constant dense<0.000000e+00> : vector<16x16xf32>
    %163 = tpu.matmul %162, %150, %cst_62 {dimension_numbers = #tpu.dot_dimension_numbers<[1], [0], [0], [1], [0, 0, 1, 1], [], []>} : vector<16x16xf32>, vector<16x16xf32>, vector<16x16xf32> -> vector<16x16xf32>
    %c0_63 = arith.constant 0 : index
    %c112 = arith.constant 112 : index
    %164 = vector.load %arg9[%c0_63, %c112] : memref<16x128xf32, #tpu.memory_space<vmem>>, vector<16x16xf32>
    tpu.vector_store %arg9[%c0_63, %c112], %163 {strides = array<i32>} : memref<16x128xf32, #tpu.memory_space<vmem>>, vector<16x16xf32>,
    %c0_64 = arith.constant 0 : index
    %c0_65 = arith.constant 0 : index
    %165 = vector.load %arg9[%c0_64, %c0_65] : memref<16x128xf32, #tpu.memory_space<vmem>>, vector<16x128xf32>
    %c0_66 = arith.constant 0 : index
    %c0_67 = arith.constant 0 : index
    %166 = vector.load %arg6[%c0_66, %c0_67] : memref<128x128xf32, #tpu.memory_space<vmem>>, vector<128x128xf32>
    %cst_68 = arith.constant dense<0.000000e+00> : vector<16x128xf32>
    %167 = tpu.matmul %165, %166, %cst_68 {dimension_numbers = #tpu.dot_dimension_numbers<[1], [0], [0], [1], [0, 0, 1, 1], [], []>} : vector<16x128xf32>, vector<128x128xf32>, vector<16x128xf32> -> vector<16x128xf32>
    %c0_69 = arith.constant 0 : index
    %c0_70 = arith.constant 0 : index
    %168 = vector.load %arg7[%c0_69, %c0_70] : memref<1x128xf32, #tpu.memory_space<vmem>>, vector<1x128xf32>
    %169 = vector.broadcast %168 : vector<1x128xf32> to vector<16x128xf32>
    %170 = arith.addf %167, %169 : vector<16x128xf32>
    %171 = arith.addf %1, %170 : vector<16x128xf32>
    %c0_71 = arith.constant 0 : index
    %c0_72 = arith.constant 0 : index
    %c0_73 = arith.constant 0 : index
    %172 = vector.load %arg8[%c0_71, %c0_72, %c0_73] : memref<1x16x128xf32, #tpu.memory_space<vmem>>, vector<1x16x128xf32>
    %173 = vector.shape_cast %172 : vector<1x16x128xf32> to vector<16x128xf32>
    %174 = vector.shape_cast %171 : vector<16x128xf32> to vector<1x16x128xf32>
    tpu.vector_store %arg8[%c0_71, %c0_72, %c0_73], %174 {strides = array<i32>} : memref<1x16x128xf32, #tpu.memory_space<vmem>>, vector<1x16x128xf32>,
    return
  }
  func.func @transform_0(%arg0: i32) -> (i32, i32, i32) {
    %c0_i32 = arith.constant 0 : i32
    %c0_i32_0 = arith.constant 0 : i32
    %c0_i32_1 = arith.constant 0 : i32
    return %arg0, %c0_i32, %c0_i32_0 : i32, i32, i32
  }
  func.func @transform_1(%arg0: i32) -> (i32, i32) {
    %c0_i32 = arith.constant 0 : i32
    %c0_i32_0 = arith.constant 0 : i32
    %c0_i32_1 = arith.constant 0 : i32
    return %c0_i32, %c0_i32_0 : i32, i32
  }
  func.func @transform_2(%arg0: i32) -> (i32, i32) {
    %c0_i32 = arith.constant 0 : i32
    %c0_i32_0 = arith.constant 0 : i32
    %c0_i32_1 = arith.constant 0 : i32
    return %c0_i32, %c0_i32_0 : i32, i32
  }
  func.func @transform_3(%arg0: i32) -> (i32, i32) {
    %c0_i32 = arith.constant 0 : i32
    %c0_i32_0 = arith.constant 0 : i32
    %c0_i32_1 = arith.constant 0 : i32
    return %c0_i32, %c0_i32_0 : i32, i32
  }
  func.func @transform_4(%arg0: i32) -> (i32, i32) {
    %c0_i32 = arith.constant 0 : i32
    %c0_i32_0 = arith.constant 0 : i32
    %c0_i32_1 = arith.constant 0 : i32
    return %c0_i32, %c0_i32_0 : i32, i32
  }
  func.func @transform_5(%arg0: i32) -> (i32, i32) {
    %c0_i32 = arith.constant 0 : i32
    %c0_i32_0 = arith.constant 0 : i32
    %c0_i32_1 = arith.constant 0 : i32
    return %c0_i32, %c0_i32_0 : i32, i32
  }
  func.func @transform_6(%arg0: i32) -> (i32, i32) {
    %c0_i32 = arith.constant 0 : i32
    %c0_i32_0 = arith.constant 0 : i32
    %c0_i32_1 = arith.constant 0 : i32
    return %c0_i32, %c0_i32_0 : i32, i32
  }
  func.func @transform_7(%arg0: i32) -> (i32, i32, i32) {
    %c0_i32 = arith.constant 0 : i32
    %c0_i32_0 = arith.constant 0 : i32
    %c0_i32_1 = arith.constant 0 : i32
    return %arg0, %c0_i32, %c0_i32_0 : i32, i32, i32
  }
}

module attributes {stable_mosaic.version = 11 : i64} {
  func.func @_ff_block_kernel(%arg0: i32, %arg1: memref<1x16x128xf32, #tpu.memory_space<vmem>>, %arg2: memref<1x128xf32, #tpu.memory_space<vmem>>, %arg3: memref<1x128xf32, #tpu.memory_space<vmem>>, %arg4: memref<128x512xf32, #tpu.memory_space<vmem>>, %arg5: memref<1x512xf32, #tpu.memory_space<vmem>>, %arg6: memref<512x128xf32, #tpu.memory_space<vmem>>, %arg7: memref<1x128xf32, #tpu.memory_space<vmem>>, %arg8: memref<1x16x128xf32, #tpu.memory_space<vmem>>) attributes {dimension_semantics = [#tpu.dimension_semantics<parallel>], iteration_bounds = array<i64: 2>, scalar_prefetch = 0 : i64, scratch_operands = 0 : i64, tpu.core_type = #tpu.core_type<tc>, window_params = [{transform_indices = @transform_0, window_bounds = array<i64: 1, 16, 128>}, {pipeline_mode = #tpu.pipeline_mode<synchronous>, transform_indices = @transform_1, window_bounds = array<i64: 1, 128>}, {pipeline_mode = #tpu.pipeline_mode<synchronous>, transform_indices = @transform_2, window_bounds = array<i64: 1, 128>}, {pipeline_mode = #tpu.pipeline_mode<synchronous>, transform_indices = @transform_3, window_bounds = array<i64: 128, 512>}, {pipeline_mode = #tpu.pipeline_mode<synchronous>, transform_indices = @transform_4, window_bounds = array<i64: 1, 512>}, {pipeline_mode = #tpu.pipeline_mode<synchronous>, transform_indices = @transform_5, window_bounds = array<i64: 512, 128>}, {pipeline_mode = #tpu.pipeline_mode<synchronous>, transform_indices = @transform_6, window_bounds = array<i64: 1, 128>}, {transform_indices = @transform_7, window_bounds = array<i64: 1, 16, 128>}]} {
    %c0 = arith.constant 0 : index
    %c0_0 = arith.constant 0 : index
    %c0_1 = arith.constant 0 : index
    %0 = vector.load %arg1[%c0, %c0_0, %c0_1] : memref<1x16x128xf32, #tpu.memory_space<vmem>>, vector<1x16x128xf32>
    %1 = vector.shape_cast %0 : vector<1x16x128xf32> to vector<16x128xf32>
    %c0_2 = arith.constant 0 : index
    %c0_3 = arith.constant 0 : index
    %2 = vector.load %arg2[%c0_2, %c0_3] : memref<1x128xf32, #tpu.memory_space<vmem>>, vector<1x128xf32>
    %c0_4 = arith.constant 0 : index
    %c0_5 = arith.constant 0 : index
    %3 = vector.load %arg3[%c0_4, %c0_5] : memref<1x128xf32, #tpu.memory_space<vmem>>, vector<1x128xf32>
    %cst = arith.constant dense<0.000000e+00> : vector<16xf32>
    %4 = vector.multi_reduction <add>, %1, %cst [1] : vector<16x128xf32> to vector<16xf32>
    %5 = vector.shape_cast %4 : vector<16xf32> to vector<16x1xf32>
    %cst_6 = arith.constant 1.280000e+02 : f32
    %6 = vector.broadcast %cst_6 : f32 to vector<16x1xf32>
    %7 = arith.divf %5, %6 : vector<16x1xf32>
    %8 = vector.broadcast %7 : vector<16x1xf32> to vector<16x128xf32>
    %9 = arith.subf %1, %8 : vector<16x128xf32>
    %10 = arith.mulf %9, %9 : vector<16x128xf32>
    %cst_7 = arith.constant dense<0.000000e+00> : vector<16xf32>
    %11 = vector.multi_reduction <add>, %10, %cst_7 [1] : vector<16x128xf32> to vector<16xf32>
    %12 = vector.shape_cast %11 : vector<16xf32> to vector<16x1xf32>
    %cst_8 = arith.constant 1.280000e+02 : f32
    %13 = vector.broadcast %cst_8 : f32 to vector<16x1xf32>
    %14 = arith.divf %12, %13 : vector<16x1xf32>
    %cst_9 = arith.constant 9.99999974E-6 : f32
    %15 = vector.broadcast %cst_9 : f32 to vector<16x1xf32>
    %16 = arith.addf %14, %15 : vector<16x1xf32>
    %17 = math.rsqrt %16 : vector<16x1xf32>
    %18 = vector.broadcast %17 : vector<16x1xf32> to vector<16x128xf32>
    %19 = arith.mulf %9, %18 : vector<16x128xf32>
    %20 = vector.broadcast %2 : vector<1x128xf32> to vector<16x128xf32>
    %21 = arith.mulf %19, %20 : vector<16x128xf32>
    %22 = vector.broadcast %3 : vector<1x128xf32> to vector<16x128xf32>
    %23 = arith.addf %21, %22 : vector<16x128xf32>
    %c0_10 = arith.constant 0 : index
    %c0_11 = arith.constant 0 : index
    %24 = vector.load %arg4[%c0_10, %c0_11] : memref<128x512xf32, #tpu.memory_space<vmem>>, vector<128x512xf32>
    %cst_12 = arith.constant dense<0.000000e+00> : vector<16x512xf32>
    %25 = tpu.matmul %23, %24, %cst_12 {dimension_numbers = #tpu.dot_dimension_numbers<[1], [0], [0], [1], [0, 0, 1, 1], [], []>} : vector<16x128xf32>, vector<128x512xf32>, vector<16x512xf32> -> vector<16x512xf32>
    %c0_13 = arith.constant 0 : index
    %c0_14 = arith.constant 0 : index
    %26 = vector.load %arg5[%c0_13, %c0_14] : memref<1x512xf32, #tpu.memory_space<vmem>>, vector<1x512xf32>
    %27 = vector.broadcast %26 : vector<1x512xf32> to vector<16x512xf32>
    %28 = arith.addf %25, %27 : vector<16x512xf32>
    %cst_15 = arith.constant 5.000000e-01 : f32
    %29 = vector.broadcast %cst_15 : f32 to vector<16x512xf32>
    %30 = arith.mulf %29, %28 : vector<16x512xf32>
    %cst_16 = arith.constant 0.707106769 : f32
    %31 = vector.broadcast %cst_16 : f32 to vector<16x512xf32>
    %32 = arith.mulf %28, %31 : vector<16x512xf32>
    %cst_17 = arith.constant 0.000000e+00 : f32
    %33 = vector.broadcast %cst_17 : f32 to vector<16x512xf32>
    %34 = arith.cmpf oge, %32, %33 : vector<16x512xf32>
    %cst_18 = arith.constant 1.000000e+00 : f32
    %cst_19 = arith.constant -1.000000e+00 : f32
    %35 = vector.broadcast %cst_18 : f32 to vector<16x512xf32>
    %36 = vector.broadcast %cst_19 : f32 to vector<16x512xf32>
    %37 = arith.select %34, %35, %36 : vector<16x512xi1>, vector<16x512xf32>
    %38 = math.absf %32 : vector<16x512xf32>
    %cst_20 = arith.constant 0.327591091 : f32
    %39 = vector.broadcast %cst_20 : f32 to vector<16x512xf32>
    %40 = arith.mulf %39, %38 : vector<16x512xf32>
    %cst_21 = arith.constant 1.000000e+00 : f32
    %41 = vector.broadcast %cst_21 : f32 to vector<16x512xf32>
    %42 = arith.addf %41, %40 : vector<16x512xf32>
    %cst_22 = arith.constant 1.000000e+00 : f32
    %43 = vector.broadcast %cst_22 : f32 to vector<16x512xf32>
    %44 = arith.divf %43, %42 : vector<16x512xf32>
    %cst_23 = arith.constant 1.06140542 : f32
    %45 = vector.broadcast %cst_23 : f32 to vector<16x512xf32>
    %46 = arith.mulf %45, %44 : vector<16x512xf32>
    %cst_24 = arith.constant -1.45315206 : f32
    %47 = vector.broadcast %cst_24 : f32 to vector<16x512xf32>
    %48 = arith.addf %46, %47 : vector<16x512xf32>
    %49 = arith.mulf %48, %44 : vector<16x512xf32>
    %cst_25 = arith.constant 1.42141378 : f32
    %50 = vector.broadcast %cst_25 : f32 to vector<16x512xf32>
    %51 = arith.addf %49, %50 : vector<16x512xf32>
    %52 = arith.mulf %51, %44 : vector<16x512xf32>
    %cst_26 = arith.constant -0.284496725 : f32
    %53 = vector.broadcast %cst_26 : f32 to vector<16x512xf32>
    %54 = arith.addf %52, %53 : vector<16x512xf32>
    %55 = arith.mulf %54, %44 : vector<16x512xf32>
    %cst_27 = arith.constant 0.254829586 : f32
    %56 = vector.broadcast %cst_27 : f32 to vector<16x512xf32>
    %57 = arith.addf %55, %56 : vector<16x512xf32>
    %58 = arith.mulf %57, %44 : vector<16x512xf32>
    %cst_28 = arith.constant 0.000000e+00 : f32
    %59 = vector.broadcast %cst_28 : f32 to vector<16x512xf32>
    %60 = arith.subf %59, %38 : vector<16x512xf32>
    %61 = arith.mulf %60, %38 : vector<16x512xf32>
    %62 = math.exp %61 : vector<16x512xf32>
    %63 = arith.mulf %58, %62 : vector<16x512xf32>
    %cst_29 = arith.constant 1.000000e+00 : f32
    %64 = vector.broadcast %cst_29 : f32 to vector<16x512xf32>
    %65 = arith.subf %64, %63 : vector<16x512xf32>
    %66 = arith.mulf %37, %65 : vector<16x512xf32>
    %cst_30 = arith.constant 1.000000e+00 : f32
    %67 = vector.broadcast %cst_30 : f32 to vector<16x512xf32>
    %68 = arith.addf %67, %66 : vector<16x512xf32>
    %69 = arith.mulf %30, %68 : vector<16x512xf32>
    %c0_31 = arith.constant 0 : index
    %c0_32 = arith.constant 0 : index
    %70 = vector.load %arg6[%c0_31, %c0_32] : memref<512x128xf32, #tpu.memory_space<vmem>>, vector<512x128xf32>
    %cst_33 = arith.constant dense<0.000000e+00> : vector<16x128xf32>
    %71 = tpu.matmul %69, %70, %cst_33 {dimension_numbers = #tpu.dot_dimension_numbers<[1], [0], [0], [1], [0, 0, 1, 1], [], []>} : vector<16x512xf32>, vector<512x128xf32>, vector<16x128xf32> -> vector<16x128xf32>
    %c0_34 = arith.constant 0 : index
    %c0_35 = arith.constant 0 : index
    %72 = vector.load %arg7[%c0_34, %c0_35] : memref<1x128xf32, #tpu.memory_space<vmem>>, vector<1x128xf32>
    %73 = vector.broadcast %72 : vector<1x128xf32> to vector<16x128xf32>
    %74 = arith.addf %71, %73 : vector<16x128xf32>
    %75 = arith.addf %1, %74 : vector<16x128xf32>
    %c0_36 = arith.constant 0 : index
    %c0_37 = arith.constant 0 : index
    %c0_38 = arith.constant 0 : index
    %76 = vector.load %arg8[%c0_36, %c0_37, %c0_38] : memref<1x16x128xf32, #tpu.memory_space<vmem>>, vector<1x16x128xf32>
    %77 = vector.shape_cast %76 : vector<1x16x128xf32> to vector<16x128xf32>
    %78 = vector.shape_cast %75 : vector<16x128xf32> to vector<1x16x128xf32>
    tpu.vector_store %arg8[%c0_36, %c0_37, %c0_38], %78 {strides = array<i32>} : memref<1x16x128xf32, #tpu.memory_space<vmem>>, vector<1x16x128xf32>,
    return
  }
  func.func @transform_0(%arg0: i32) -> (i32, i32, i32) {
    %c0_i32 = arith.constant 0 : i32
    %c0_i32_0 = arith.constant 0 : i32
    %c0_i32_1 = arith.constant 0 : i32
    return %arg0, %c0_i32, %c0_i32_0 : i32, i32, i32
  }
  func.func @transform_1(%arg0: i32) -> (i32, i32) {
    %c0_i32 = arith.constant 0 : i32
    %c0_i32_0 = arith.constant 0 : i32
    %c0_i32_1 = arith.constant 0 : i32
    return %c0_i32, %c0_i32_0 : i32, i32
  }
  func.func @transform_2(%arg0: i32) -> (i32, i32) {
    %c0_i32 = arith.constant 0 : i32
    %c0_i32_0 = arith.constant 0 : i32
    %c0_i32_1 = arith.constant 0 : i32
    return %c0_i32, %c0_i32_0 : i32, i32
  }
  func.func @transform_3(%arg0: i32) -> (i32, i32) {
    %c0_i32 = arith.constant 0 : i32
    %c0_i32_0 = arith.constant 0 : i32
    %c0_i32_1 = arith.constant 0 : i32
    return %c0_i32, %c0_i32_0 : i32, i32
  }
  func.func @transform_4(%arg0: i32) -> (i32, i32) {
    %c0_i32 = arith.constant 0 : i32
    %c0_i32_0 = arith.constant 0 : i32
    %c0_i32_1 = arith.constant 0 : i32
    return %c0_i32, %c0_i32_0 : i32, i32
  }
  func.func @transform_5(%arg0: i32) -> (i32, i32) {
    %c0_i32 = arith.constant 0 : i32
    %c0_i32_0 = arith.constant 0 : i32
    %c0_i32_1 = arith.constant 0 : i32
    return %c0_i32, %c0_i32_0 : i32, i32
  }
  func.func @transform_6(%arg0: i32) -> (i32, i32) {
    %c0_i32 = arith.constant 0 : i32
    %c0_i32_0 = arith.constant 0 : i32
    %c0_i32_1 = arith.constant 0 : i32
    return %c0_i32, %c0_i32_0 : i32, i32
  }
  func.func @transform_7(%arg0: i32) -> (i32, i32, i32) {
    %c0_i32 = arith.constant 0 : i32
    %c0_i32_0 = arith.constant 0 : i32
    %c0_i32_1 = arith.constant 0 : i32
    return %arg0, %c0_i32, %c0_i32_0 : i32, i32, i32
  }
}

module attributes {stable_mosaic.version = 11 : i64} {
  func.func @_mha_block_kernel(%arg0: i32, %arg1: memref<1x16x128xf32, #tpu.memory_space<vmem>>, %arg2: memref<1x128xf32, #tpu.memory_space<vmem>>, %arg3: memref<1x128xf32, #tpu.memory_space<vmem>>, %arg4: memref<128x384xf32, #tpu.memory_space<vmem>>, %arg5: memref<1x384xf32, #tpu.memory_space<vmem>>, %arg6: memref<128x128xf32, #tpu.memory_space<vmem>>, %arg7: memref<1x128xf32, #tpu.memory_space<vmem>>, %arg8: memref<1x16x128xf32, #tpu.memory_space<vmem>>, %arg9: memref<16x128xf32, #tpu.memory_space<vmem>>) attributes {dimension_semantics = [#tpu.dimension_semantics<parallel>], iteration_bounds = array<i64: 2>, scalar_prefetch = 0 : i64, scratch_operands = 1 : i64, tpu.core_type = #tpu.core_type<tc>, window_params = [{transform_indices = @transform_0, window_bounds = array<i64: 1, 16, 128>}, {pipeline_mode = #tpu.pipeline_mode<synchronous>, transform_indices = @transform_1, window_bounds = array<i64: 1, 128>}, {pipeline_mode = #tpu.pipeline_mode<synchronous>, transform_indices = @transform_2, window_bounds = array<i64: 1, 128>}, {pipeline_mode = #tpu.pipeline_mode<synchronous>, transform_indices = @transform_3, window_bounds = array<i64: 128, 384>}, {pipeline_mode = #tpu.pipeline_mode<synchronous>, transform_indices = @transform_4, window_bounds = array<i64: 1, 384>}, {pipeline_mode = #tpu.pipeline_mode<synchronous>, transform_indices = @transform_5, window_bounds = array<i64: 128, 128>}, {pipeline_mode = #tpu.pipeline_mode<synchronous>, transform_indices = @transform_6, window_bounds = array<i64: 1, 128>}, {transform_indices = @transform_7, window_bounds = array<i64: 1, 16, 128>}]} {
    %c0 = arith.constant 0 : index
    %c0_0 = arith.constant 0 : index
    %c0_1 = arith.constant 0 : index
    %0 = vector.load %arg1[%c0, %c0_0, %c0_1] : memref<1x16x128xf32, #tpu.memory_space<vmem>>, vector<1x16x128xf32>
    %1 = vector.shape_cast %0 : vector<1x16x128xf32> to vector<16x128xf32>
    %c0_2 = arith.constant 0 : index
    %c0_3 = arith.constant 0 : index
    %2 = vector.load %arg2[%c0_2, %c0_3] : memref<1x128xf32, #tpu.memory_space<vmem>>, vector<1x128xf32>
    %c0_4 = arith.constant 0 : index
    %c0_5 = arith.constant 0 : index
    %3 = vector.load %arg3[%c0_4, %c0_5] : memref<1x128xf32, #tpu.memory_space<vmem>>, vector<1x128xf32>
    %cst = arith.constant dense<0.000000e+00> : vector<16xf32>
    %4 = vector.multi_reduction <add>, %1, %cst [1] : vector<16x128xf32> to vector<16xf32>
    %5 = vector.shape_cast %4 : vector<16xf32> to vector<16x1xf32>
    %cst_6 = arith.constant 1.280000e+02 : f32
    %6 = vector.broadcast %cst_6 : f32 to vector<16x1xf32>
    %7 = arith.divf %5, %6 : vector<16x1xf32>
    %8 = vector.broadcast %7 : vector<16x1xf32> to vector<16x128xf32>
    %9 = arith.subf %1, %8 : vector<16x128xf32>
    %10 = arith.mulf %9, %9 : vector<16x128xf32>
    %cst_7 = arith.constant dense<0.000000e+00> : vector<16xf32>
    %11 = vector.multi_reduction <add>, %10, %cst_7 [1] : vector<16x128xf32> to vector<16xf32>
    %12 = vector.shape_cast %11 : vector<16xf32> to vector<16x1xf32>
    %cst_8 = arith.constant 1.280000e+02 : f32
    %13 = vector.broadcast %cst_8 : f32 to vector<16x1xf32>
    %14 = arith.divf %12, %13 : vector<16x1xf32>
    %cst_9 = arith.constant 9.99999974E-6 : f32
    %15 = vector.broadcast %cst_9 : f32 to vector<16x1xf32>
    %16 = arith.addf %14, %15 : vector<16x1xf32>
    %17 = math.rsqrt %16 : vector<16x1xf32>
    %18 = vector.broadcast %17 : vector<16x1xf32> to vector<16x128xf32>
    %19 = arith.mulf %9, %18 : vector<16x128xf32>
    %20 = vector.broadcast %2 : vector<1x128xf32> to vector<16x128xf32>
    %21 = arith.mulf %19, %20 : vector<16x128xf32>
    %22 = vector.broadcast %3 : vector<1x128xf32> to vector<16x128xf32>
    %23 = arith.addf %21, %22 : vector<16x128xf32>
    %c0_10 = arith.constant 0 : index
    %c0_11 = arith.constant 0 : index
    %24 = vector.load %arg4[%c0_10, %c0_11] : memref<128x384xf32, #tpu.memory_space<vmem>>, vector<128x384xf32>
    %cst_12 = arith.constant dense<0.000000e+00> : vector<16x384xf32>
    %25 = tpu.matmul %23, %24, %cst_12 {dimension_numbers = #tpu.dot_dimension_numbers<[1], [0], [0], [1], [0, 0, 1, 1], [], []>} : vector<16x128xf32>, vector<128x384xf32>, vector<16x384xf32> -> vector<16x384xf32>
    %c0_13 = arith.constant 0 : index
    %c0_14 = arith.constant 0 : index
    %26 = vector.load %arg5[%c0_13, %c0_14] : memref<1x384xf32, #tpu.memory_space<vmem>>, vector<1x384xf32>
    %27 = vector.broadcast %26 : vector<1x384xf32> to vector<16x384xf32>
    %28 = arith.addf %25, %27 : vector<16x384xf32>
    %29 = vector.extract_strided_slice %28 {offsets = [0, 0], sizes = [16, 16], strides = [1, 1]} : vector<16x384xf32> to vector<16x16xf32>
    %30 = vector.extract_strided_slice %28 {offsets = [0, 128], sizes = [16, 16], strides = [1, 1]} : vector<16x384xf32> to vector<16x16xf32>
    %31 = vector.extract_strided_slice %28 {offsets = [0, 256], sizes = [16, 16], strides = [1, 1]} : vector<16x384xf32> to vector<16x16xf32>
    %cst_15 = arith.constant dense<0.000000e+00> : vector<16x16xf32>
    %32 = tpu.matmul %29, %30, %cst_15 {dimension_numbers = #tpu.dot_dimension_numbers<[1], [1], [0], [0], [0, 0, 1, 0], [], []>} : vector<16x16xf32>, vector<16x16xf32>, vector<16x16xf32> -> vector<16x16xf32>
    %cst_16 = arith.constant 0.0883883461 : f32
    %33 = vector.broadcast %cst_16 : f32 to vector<16x16xf32>
    %34 = arith.mulf %32, %33 : vector<16x16xf32>
    %cst_17 = arith.constant dense<0xFF800000> : vector<16xf32>
    %35 = vector.multi_reduction <maximumf>, %34, %cst_17 [1] : vector<16x16xf32> to vector<16xf32>
    %36 = vector.shape_cast %35 : vector<16xf32> to vector<16x1xf32>
    %37 = vector.broadcast %36 : vector<16x1xf32> to vector<16x16xf32>
    %38 = arith.subf %34, %37 : vector<16x16xf32>
    %39 = math.exp %38 : vector<16x16xf32>
    %cst_18 = arith.constant dense<0.000000e+00> : vector<16xf32>
    %40 = vector.multi_reduction <add>, %39, %cst_18 [1] : vector<16x16xf32> to vector<16xf32>
    %41 = vector.shape_cast %40 : vector<16xf32> to vector<16x1xf32>
    %42 = vector.broadcast %41 : vector<16x1xf32> to vector<16x16xf32>
    %43 = arith.divf %39, %42 : vector<16x16xf32>
    %cst_19 = arith.constant dense<0.000000e+00> : vector<16x16xf32>
    %44 = tpu.matmul %43, %31, %cst_19 {dimension_numbers = #tpu.dot_dimension_numbers<[1], [0], [0], [1], [0, 0, 1, 1], [], []>} : vector<16x16xf32>, vector<16x16xf32>, vector<16x16xf32> -> vector<16x16xf32>
    %c0_20 = arith.constant 0 : index
    %c0_21 = arith.constant 0 : index
    %45 = vector.load %arg9[%c0_20, %c0_21] : memref<16x128xf32, #tpu.memory_space<vmem>>, vector<16x16xf32>
    tpu.vector_store %arg9[%c0_20, %c0_21], %44 {strides = array<i32>} : memref<16x128xf32, #tpu.memory_space<vmem>>, vector<16x16xf32>,
    %46 = vector.extract_strided_slice %28 {offsets = [0, 16], sizes = [16, 16], strides = [1, 1]} : vector<16x384xf32> to vector<16x16xf32>
    %47 = vector.extract_strided_slice %28 {offsets = [0, 144], sizes = [16, 16], strides = [1, 1]} : vector<16x384xf32> to vector<16x16xf32>
    %48 = vector.extract_strided_slice %28 {offsets = [0, 272], sizes = [16, 16], strides = [1, 1]} : vector<16x384xf32> to vector<16x16xf32>
    %cst_22 = arith.constant dense<0.000000e+00> : vector<16x16xf32>
    %49 = tpu.matmul %46, %47, %cst_22 {dimension_numbers = #tpu.dot_dimension_numbers<[1], [1], [0], [0], [0, 0, 1, 0], [], []>} : vector<16x16xf32>, vector<16x16xf32>, vector<16x16xf32> -> vector<16x16xf32>
    %cst_23 = arith.constant 0.0883883461 : f32
    %50 = vector.broadcast %cst_23 : f32 to vector<16x16xf32>
    %51 = arith.mulf %49, %50 : vector<16x16xf32>
    %cst_24 = arith.constant dense<0xFF800000> : vector<16xf32>
    %52 = vector.multi_reduction <maximumf>, %51, %cst_24 [1] : vector<16x16xf32> to vector<16xf32>
    %53 = vector.shape_cast %52 : vector<16xf32> to vector<16x1xf32>
    %54 = vector.broadcast %53 : vector<16x1xf32> to vector<16x16xf32>
    %55 = arith.subf %51, %54 : vector<16x16xf32>
    %56 = math.exp %55 : vector<16x16xf32>
    %cst_25 = arith.constant dense<0.000000e+00> : vector<16xf32>
    %57 = vector.multi_reduction <add>, %56, %cst_25 [1] : vector<16x16xf32> to vector<16xf32>
    %58 = vector.shape_cast %57 : vector<16xf32> to vector<16x1xf32>
    %59 = vector.broadcast %58 : vector<16x1xf32> to vector<16x16xf32>
    %60 = arith.divf %56, %59 : vector<16x16xf32>
    %cst_26 = arith.constant dense<0.000000e+00> : vector<16x16xf32>
    %61 = tpu.matmul %60, %48, %cst_26 {dimension_numbers = #tpu.dot_dimension_numbers<[1], [0], [0], [1], [0, 0, 1, 1], [], []>} : vector<16x16xf32>, vector<16x16xf32>, vector<16x16xf32> -> vector<16x16xf32>
    %c0_27 = arith.constant 0 : index
    %c16 = arith.constant 16 : index
    %62 = vector.load %arg9[%c0_27, %c16] : memref<16x128xf32, #tpu.memory_space<vmem>>, vector<16x16xf32>
    tpu.vector_store %arg9[%c0_27, %c16], %61 {strides = array<i32>} : memref<16x128xf32, #tpu.memory_space<vmem>>, vector<16x16xf32>,
    %63 = vector.extract_strided_slice %28 {offsets = [0, 32], sizes = [16, 16], strides = [1, 1]} : vector<16x384xf32> to vector<16x16xf32>
    %64 = vector.extract_strided_slice %28 {offsets = [0, 160], sizes = [16, 16], strides = [1, 1]} : vector<16x384xf32> to vector<16x16xf32>
    %65 = vector.extract_strided_slice %28 {offsets = [0, 288], sizes = [16, 16], strides = [1, 1]} : vector<16x384xf32> to vector<16x16xf32>
    %cst_28 = arith.constant dense<0.000000e+00> : vector<16x16xf32>
    %66 = tpu.matmul %63, %64, %cst_28 {dimension_numbers = #tpu.dot_dimension_numbers<[1], [1], [0], [0], [0, 0, 1, 0], [], []>} : vector<16x16xf32>, vector<16x16xf32>, vector<16x16xf32> -> vector<16x16xf32>
    %cst_29 = arith.constant 0.0883883461 : f32
    %67 = vector.broadcast %cst_29 : f32 to vector<16x16xf32>
    %68 = arith.mulf %66, %67 : vector<16x16xf32>
    %cst_30 = arith.constant dense<0xFF800000> : vector<16xf32>
    %69 = vector.multi_reduction <maximumf>, %68, %cst_30 [1] : vector<16x16xf32> to vector<16xf32>
    %70 = vector.shape_cast %69 : vector<16xf32> to vector<16x1xf32>
    %71 = vector.broadcast %70 : vector<16x1xf32> to vector<16x16xf32>
    %72 = arith.subf %68, %71 : vector<16x16xf32>
    %73 = math.exp %72 : vector<16x16xf32>
    %cst_31 = arith.constant dense<0.000000e+00> : vector<16xf32>
    %74 = vector.multi_reduction <add>, %73, %cst_31 [1] : vector<16x16xf32> to vector<16xf32>
    %75 = vector.shape_cast %74 : vector<16xf32> to vector<16x1xf32>
    %76 = vector.broadcast %75 : vector<16x1xf32> to vector<16x16xf32>
    %77 = arith.divf %73, %76 : vector<16x16xf32>
    %cst_32 = arith.constant dense<0.000000e+00> : vector<16x16xf32>
    %78 = tpu.matmul %77, %65, %cst_32 {dimension_numbers = #tpu.dot_dimension_numbers<[1], [0], [0], [1], [0, 0, 1, 1], [], []>} : vector<16x16xf32>, vector<16x16xf32>, vector<16x16xf32> -> vector<16x16xf32>
    %c0_33 = arith.constant 0 : index
    %c32 = arith.constant 32 : index
    %79 = vector.load %arg9[%c0_33, %c32] : memref<16x128xf32, #tpu.memory_space<vmem>>, vector<16x16xf32>
    tpu.vector_store %arg9[%c0_33, %c32], %78 {strides = array<i32>} : memref<16x128xf32, #tpu.memory_space<vmem>>, vector<16x16xf32>,
    %80 = vector.extract_strided_slice %28 {offsets = [0, 48], sizes = [16, 16], strides = [1, 1]} : vector<16x384xf32> to vector<16x16xf32>
    %81 = vector.extract_strided_slice %28 {offsets = [0, 176], sizes = [16, 16], strides = [1, 1]} : vector<16x384xf32> to vector<16x16xf32>
    %82 = vector.extract_strided_slice %28 {offsets = [0, 304], sizes = [16, 16], strides = [1, 1]} : vector<16x384xf32> to vector<16x16xf32>
    %cst_34 = arith.constant dense<0.000000e+00> : vector<16x16xf32>
    %83 = tpu.matmul %80, %81, %cst_34 {dimension_numbers = #tpu.dot_dimension_numbers<[1], [1], [0], [0], [0, 0, 1, 0], [], []>} : vector<16x16xf32>, vector<16x16xf32>, vector<16x16xf32> -> vector<16x16xf32>
    %cst_35 = arith.constant 0.0883883461 : f32
    %84 = vector.broadcast %cst_35 : f32 to vector<16x16xf32>
    %85 = arith.mulf %83, %84 : vector<16x16xf32>
    %cst_36 = arith.constant dense<0xFF800000> : vector<16xf32>
    %86 = vector.multi_reduction <maximumf>, %85, %cst_36 [1] : vector<16x16xf32> to vector<16xf32>
    %87 = vector.shape_cast %86 : vector<16xf32> to vector<16x1xf32>
    %88 = vector.broadcast %87 : vector<16x1xf32> to vector<16x16xf32>
    %89 = arith.subf %85, %88 : vector<16x16xf32>
    %90 = math.exp %89 : vector<16x16xf32>
    %cst_37 = arith.constant dense<0.000000e+00> : vector<16xf32>
    %91 = vector.multi_reduction <add>, %90, %cst_37 [1] : vector<16x16xf32> to vector<16xf32>
    %92 = vector.shape_cast %91 : vector<16xf32> to vector<16x1xf32>
    %93 = vector.broadcast %92 : vector<16x1xf32> to vector<16x16xf32>
    %94 = arith.divf %90, %93 : vector<16x16xf32>
    %cst_38 = arith.constant dense<0.000000e+00> : vector<16x16xf32>
    %95 = tpu.matmul %94, %82, %cst_38 {dimension_numbers = #tpu.dot_dimension_numbers<[1], [0], [0], [1], [0, 0, 1, 1], [], []>} : vector<16x16xf32>, vector<16x16xf32>, vector<16x16xf32> -> vector<16x16xf32>
    %c0_39 = arith.constant 0 : index
    %c48 = arith.constant 48 : index
    %96 = vector.load %arg9[%c0_39, %c48] : memref<16x128xf32, #tpu.memory_space<vmem>>, vector<16x16xf32>
    tpu.vector_store %arg9[%c0_39, %c48], %95 {strides = array<i32>} : memref<16x128xf32, #tpu.memory_space<vmem>>, vector<16x16xf32>,
    %97 = vector.extract_strided_slice %28 {offsets = [0, 64], sizes = [16, 16], strides = [1, 1]} : vector<16x384xf32> to vector<16x16xf32>
    %98 = vector.extract_strided_slice %28 {offsets = [0, 192], sizes = [16, 16], strides = [1, 1]} : vector<16x384xf32> to vector<16x16xf32>
    %99 = vector.extract_strided_slice %28 {offsets = [0, 320], sizes = [16, 16], strides = [1, 1]} : vector<16x384xf32> to vector<16x16xf32>
    %cst_40 = arith.constant dense<0.000000e+00> : vector<16x16xf32>
    %100 = tpu.matmul %97, %98, %cst_40 {dimension_numbers = #tpu.dot_dimension_numbers<[1], [1], [0], [0], [0, 0, 1, 0], [], []>} : vector<16x16xf32>, vector<16x16xf32>, vector<16x16xf32> -> vector<16x16xf32>
    %cst_41 = arith.constant 0.0883883461 : f32
    %101 = vector.broadcast %cst_41 : f32 to vector<16x16xf32>
    %102 = arith.mulf %100, %101 : vector<16x16xf32>
    %cst_42 = arith.constant dense<0xFF800000> : vector<16xf32>
    %103 = vector.multi_reduction <maximumf>, %102, %cst_42 [1] : vector<16x16xf32> to vector<16xf32>
    %104 = vector.shape_cast %103 : vector<16xf32> to vector<16x1xf32>
    %105 = vector.broadcast %104 : vector<16x1xf32> to vector<16x16xf32>
    %106 = arith.subf %102, %105 : vector<16x16xf32>
    %107 = math.exp %106 : vector<16x16xf32>
    %cst_43 = arith.constant dense<0.000000e+00> : vector<16xf32>
    %108 = vector.multi_reduction <add>, %107, %cst_43 [1] : vector<16x16xf32> to vector<16xf32>
    %109 = vector.shape_cast %108 : vector<16xf32> to vector<16x1xf32>
    %110 = vector.broadcast %109 : vector<16x1xf32> to vector<16x16xf32>
    %111 = arith.divf %107, %110 : vector<16x16xf32>
    %cst_44 = arith.constant dense<0.000000e+00> : vector<16x16xf32>
    %112 = tpu.matmul %111, %99, %cst_44 {dimension_numbers = #tpu.dot_dimension_numbers<[1], [0], [0], [1], [0, 0, 1, 1], [], []>} : vector<16x16xf32>, vector<16x16xf32>, vector<16x16xf32> -> vector<16x16xf32>
    %c0_45 = arith.constant 0 : index
    %c64 = arith.constant 64 : index
    %113 = vector.load %arg9[%c0_45, %c64] : memref<16x128xf32, #tpu.memory_space<vmem>>, vector<16x16xf32>
    tpu.vector_store %arg9[%c0_45, %c64], %112 {strides = array<i32>} : memref<16x128xf32, #tpu.memory_space<vmem>>, vector<16x16xf32>,
    %114 = vector.extract_strided_slice %28 {offsets = [0, 80], sizes = [16, 16], strides = [1, 1]} : vector<16x384xf32> to vector<16x16xf32>
    %115 = vector.extract_strided_slice %28 {offsets = [0, 208], sizes = [16, 16], strides = [1, 1]} : vector<16x384xf32> to vector<16x16xf32>
    %116 = vector.extract_strided_slice %28 {offsets = [0, 336], sizes = [16, 16], strides = [1, 1]} : vector<16x384xf32> to vector<16x16xf32>
    %cst_46 = arith.constant dense<0.000000e+00> : vector<16x16xf32>
    %117 = tpu.matmul %114, %115, %cst_46 {dimension_numbers = #tpu.dot_dimension_numbers<[1], [1], [0], [0], [0, 0, 1, 0], [], []>} : vector<16x16xf32>, vector<16x16xf32>, vector<16x16xf32> -> vector<16x16xf32>
    %cst_47 = arith.constant 0.0883883461 : f32
    %118 = vector.broadcast %cst_47 : f32 to vector<16x16xf32>
    %119 = arith.mulf %117, %118 : vector<16x16xf32>
    %cst_48 = arith.constant dense<0xFF800000> : vector<16xf32>
    %120 = vector.multi_reduction <maximumf>, %119, %cst_48 [1] : vector<16x16xf32> to vector<16xf32>
    %121 = vector.shape_cast %120 : vector<16xf32> to vector<16x1xf32>
    %122 = vector.broadcast %121 : vector<16x1xf32> to vector<16x16xf32>
    %123 = arith.subf %119, %122 : vector<16x16xf32>
    %124 = math.exp %123 : vector<16x16xf32>
    %cst_49 = arith.constant dense<0.000000e+00> : vector<16xf32>
    %125 = vector.multi_reduction <add>, %124, %cst_49 [1] : vector<16x16xf32> to vector<16xf32>
    %126 = vector.shape_cast %125 : vector<16xf32> to vector<16x1xf32>
    %127 = vector.broadcast %126 : vector<16x1xf32> to vector<16x16xf32>
    %128 = arith.divf %124, %127 : vector<16x16xf32>
    %cst_50 = arith.constant dense<0.000000e+00> : vector<16x16xf32>
    %129 = tpu.matmul %128, %116, %cst_50 {dimension_numbers = #tpu.dot_dimension_numbers<[1], [0], [0], [1], [0, 0, 1, 1], [], []>} : vector<16x16xf32>, vector<16x16xf32>, vector<16x16xf32> -> vector<16x16xf32>
    %c0_51 = arith.constant 0 : index
    %c80 = arith.constant 80 : index
    %130 = vector.load %arg9[%c0_51, %c80] : memref<16x128xf32, #tpu.memory_space<vmem>>, vector<16x16xf32>
    tpu.vector_store %arg9[%c0_51, %c80], %129 {strides = array<i32>} : memref<16x128xf32, #tpu.memory_space<vmem>>, vector<16x16xf32>,
    %131 = vector.extract_strided_slice %28 {offsets = [0, 96], sizes = [16, 16], strides = [1, 1]} : vector<16x384xf32> to vector<16x16xf32>
    %132 = vector.extract_strided_slice %28 {offsets = [0, 224], sizes = [16, 16], strides = [1, 1]} : vector<16x384xf32> to vector<16x16xf32>
    %133 = vector.extract_strided_slice %28 {offsets = [0, 352], sizes = [16, 16], strides = [1, 1]} : vector<16x384xf32> to vector<16x16xf32>
    %cst_52 = arith.constant dense<0.000000e+00> : vector<16x16xf32>
    %134 = tpu.matmul %131, %132, %cst_52 {dimension_numbers = #tpu.dot_dimension_numbers<[1], [1], [0], [0], [0, 0, 1, 0], [], []>} : vector<16x16xf32>, vector<16x16xf32>, vector<16x16xf32> -> vector<16x16xf32>
    %cst_53 = arith.constant 0.0883883461 : f32
    %135 = vector.broadcast %cst_53 : f32 to vector<16x16xf32>
    %136 = arith.mulf %134, %135 : vector<16x16xf32>
    %cst_54 = arith.constant dense<0xFF800000> : vector<16xf32>
    %137 = vector.multi_reduction <maximumf>, %136, %cst_54 [1] : vector<16x16xf32> to vector<16xf32>
    %138 = vector.shape_cast %137 : vector<16xf32> to vector<16x1xf32>
    %139 = vector.broadcast %138 : vector<16x1xf32> to vector<16x16xf32>
    %140 = arith.subf %136, %139 : vector<16x16xf32>
    %141 = math.exp %140 : vector<16x16xf32>
    %cst_55 = arith.constant dense<0.000000e+00> : vector<16xf32>
    %142 = vector.multi_reduction <add>, %141, %cst_55 [1] : vector<16x16xf32> to vector<16xf32>
    %143 = vector.shape_cast %142 : vector<16xf32> to vector<16x1xf32>
    %144 = vector.broadcast %143 : vector<16x1xf32> to vector<16x16xf32>
    %145 = arith.divf %141, %144 : vector<16x16xf32>
    %cst_56 = arith.constant dense<0.000000e+00> : vector<16x16xf32>
    %146 = tpu.matmul %145, %133, %cst_56 {dimension_numbers = #tpu.dot_dimension_numbers<[1], [0], [0], [1], [0, 0, 1, 1], [], []>} : vector<16x16xf32>, vector<16x16xf32>, vector<16x16xf32> -> vector<16x16xf32>
    %c0_57 = arith.constant 0 : index
    %c96 = arith.constant 96 : index
    %147 = vector.load %arg9[%c0_57, %c96] : memref<16x128xf32, #tpu.memory_space<vmem>>, vector<16x16xf32>
    tpu.vector_store %arg9[%c0_57, %c96], %146 {strides = array<i32>} : memref<16x128xf32, #tpu.memory_space<vmem>>, vector<16x16xf32>,
    %148 = vector.extract_strided_slice %28 {offsets = [0, 112], sizes = [16, 16], strides = [1, 1]} : vector<16x384xf32> to vector<16x16xf32>
    %149 = vector.extract_strided_slice %28 {offsets = [0, 240], sizes = [16, 16], strides = [1, 1]} : vector<16x384xf32> to vector<16x16xf32>
    %150 = vector.extract_strided_slice %28 {offsets = [0, 368], sizes = [16, 16], strides = [1, 1]} : vector<16x384xf32> to vector<16x16xf32>
    %cst_58 = arith.constant dense<0.000000e+00> : vector<16x16xf32>
    %151 = tpu.matmul %148, %149, %cst_58 {dimension_numbers = #tpu.dot_dimension_numbers<[1], [1], [0], [0], [0, 0, 1, 0], [], []>} : vector<16x16xf32>, vector<16x16xf32>, vector<16x16xf32> -> vector<16x16xf32>
    %cst_59 = arith.constant 0.0883883461 : f32
    %152 = vector.broadcast %cst_59 : f32 to vector<16x16xf32>
    %153 = arith.mulf %151, %152 : vector<16x16xf32>
    %cst_60 = arith.constant dense<0xFF800000> : vector<16xf32>
    %154 = vector.multi_reduction <maximumf>, %153, %cst_60 [1] : vector<16x16xf32> to vector<16xf32>
    %155 = vector.shape_cast %154 : vector<16xf32> to vector<16x1xf32>
    %156 = vector.broadcast %155 : vector<16x1xf32> to vector<16x16xf32>
    %157 = arith.subf %153, %156 : vector<16x16xf32>
    %158 = math.exp %157 : vector<16x16xf32>
    %cst_61 = arith.constant dense<0.000000e+00> : vector<16xf32>
    %159 = vector.multi_reduction <add>, %158, %cst_61 [1] : vector<16x16xf32> to vector<16xf32>
    %160 = vector.shape_cast %159 : vector<16xf32> to vector<16x1xf32>
    %161 = vector.broadcast %160 : vector<16x1xf32> to vector<16x16xf32>
    %162 = arith.divf %158, %161 : vector<16x16xf32>
    %cst_62 = arith.constant dense<0.000000e+00> : vector<16x16xf32>
    %163 = tpu.matmul %162, %150, %cst_62 {dimension_numbers = #tpu.dot_dimension_numbers<[1], [0], [0], [1], [0, 0, 1, 1], [], []>} : vector<16x16xf32>, vector<16x16xf32>, vector<16x16xf32> -> vector<16x16xf32>
    %c0_63 = arith.constant 0 : index
    %c112 = arith.constant 112 : index
    %164 = vector.load %arg9[%c0_63, %c112] : memref<16x128xf32, #tpu.memory_space<vmem>>, vector<16x16xf32>
    tpu.vector_store %arg9[%c0_63, %c112], %163 {strides = array<i32>} : memref<16x128xf32, #tpu.memory_space<vmem>>, vector<16x16xf32>,
    %c0_64 = arith.constant 0 : index
    %c0_65 = arith.constant 0 : index
    %165 = vector.load %arg9[%c0_64, %c0_65] : memref<16x128xf32, #tpu.memory_space<vmem>>, vector<16x128xf32>
    %c0_66 = arith.constant 0 : index
    %c0_67 = arith.constant 0 : index
    %166 = vector.load %arg6[%c0_66, %c0_67] : memref<128x128xf32, #tpu.memory_space<vmem>>, vector<128x128xf32>
    %cst_68 = arith.constant dense<0.000000e+00> : vector<16x128xf32>
    %167 = tpu.matmul %165, %166, %cst_68 {dimension_numbers = #tpu.dot_dimension_numbers<[1], [0], [0], [1], [0, 0, 1, 1], [], []>} : vector<16x128xf32>, vector<128x128xf32>, vector<16x128xf32> -> vector<16x128xf32>
    %c0_69 = arith.constant 0 : index
    %c0_70 = arith.constant 0 : index
    %168 = vector.load %arg7[%c0_69, %c0_70] : memref<1x128xf32, #tpu.memory_space<vmem>>, vector<1x128xf32>
    %169 = vector.broadcast %168 : vector<1x128xf32> to vector<16x128xf32>
    %170 = arith.addf %167, %169 : vector<16x128xf32>
    %171 = arith.addf %1, %170 : vector<16x128xf32>
    %c0_71 = arith.constant 0 : index
    %c0_72 = arith.constant 0 : index
    %c0_73 = arith.constant 0 : index
    %172 = vector.load %arg8[%c0_71, %c0_72, %c0_73] : memref<1x16x128xf32, #tpu.memory_space<vmem>>, vector<1x16x128xf32>
    %173 = vector.shape_cast %172 : vector<1x16x128xf32> to vector<16x128xf32>
    %174 = vector.shape_cast %171 : vector<16x128xf32> to vector<1x16x128xf32>
    tpu.vector_store %arg8[%c0_71, %c0_72, %c0_73], %174 {strides = array<i32>} : memref<1x16x128xf32, #tpu.memory_space<vmem>>, vector<1x16x128xf32>,
    return
  }
  func.func @transform_0(%arg0: i32) -> (i32, i32, i32) {
    %c0_i32 = arith.constant 0 : i32
    %c0_i32_0 = arith.constant 0 : i32
    %c0_i32_1 = arith.constant 0 : i32
    return %arg0, %c0_i32, %c0_i32_0 : i32, i32, i32
  }
  func.func @transform_1(%arg0: i32) -> (i32, i32) {
    %c0_i32 = arith.constant 0 : i32
    %c0_i32_0 = arith.constant 0 : i32
    %c0_i32_1 = arith.constant 0 : i32
    return %c0_i32, %c0_i32_0 : i32, i32
  }
  func.func @transform_2(%arg0: i32) -> (i32, i32) {
    %c0_i32 = arith.constant 0 : i32
    %c0_i32_0 = arith.constant 0 : i32
    %c0_i32_1 = arith.constant 0 : i32
    return %c0_i32, %c0_i32_0 : i32, i32
  }
  func.func @transform_3(%arg0: i32) -> (i32, i32) {
    %c0_i32 = arith.constant 0 : i32
    %c0_i32_0 = arith.constant 0 : i32
    %c0_i32_1 = arith.constant 0 : i32
    return %c0_i32, %c0_i32_0 : i32, i32
  }
  func.func @transform_4(%arg0: i32) -> (i32, i32) {
    %c0_i32 = arith.constant 0 : i32
    %c0_i32_0 = arith.constant 0 : i32
    %c0_i32_1 = arith.constant 0 : i32
    return %c0_i32, %c0_i32_0 : i32, i32
  }
  func.func @transform_5(%arg0: i32) -> (i32, i32) {
    %c0_i32 = arith.constant 0 : i32
    %c0_i32_0 = arith.constant 0 : i32
    %c0_i32_1 = arith.constant 0 : i32
    return %c0_i32, %c0_i32_0 : i32, i32
  }
  func.func @transform_6(%arg0: i32) -> (i32, i32) {
    %c0_i32 = arith.constant 0 : i32
    %c0_i32_0 = arith.constant 0 : i32
    %c0_i32_1 = arith.constant 0 : i32
    return %c0_i32, %c0_i32_0 : i32, i32
  }
  func.func @transform_7(%arg0: i32) -> (i32, i32, i32) {
    %c0_i32 = arith.constant 0 : i32
    %c0_i32_0 = arith.constant 0 : i32
    %c0_i32_1 = arith.constant 0 : i32
    return %arg0, %c0_i32, %c0_i32_0 : i32, i32, i32
  }
}

module attributes {stable_mosaic.version = 11 : i64} {
  func.func @_ff_block_kernel(%arg0: i32, %arg1: memref<1x16x128xf32, #tpu.memory_space<vmem>>, %arg2: memref<1x128xf32, #tpu.memory_space<vmem>>, %arg3: memref<1x128xf32, #tpu.memory_space<vmem>>, %arg4: memref<128x512xf32, #tpu.memory_space<vmem>>, %arg5: memref<1x512xf32, #tpu.memory_space<vmem>>, %arg6: memref<512x128xf32, #tpu.memory_space<vmem>>, %arg7: memref<1x128xf32, #tpu.memory_space<vmem>>, %arg8: memref<1x16x128xf32, #tpu.memory_space<vmem>>) attributes {dimension_semantics = [#tpu.dimension_semantics<parallel>], iteration_bounds = array<i64: 2>, scalar_prefetch = 0 : i64, scratch_operands = 0 : i64, tpu.core_type = #tpu.core_type<tc>, window_params = [{transform_indices = @transform_0, window_bounds = array<i64: 1, 16, 128>}, {pipeline_mode = #tpu.pipeline_mode<synchronous>, transform_indices = @transform_1, window_bounds = array<i64: 1, 128>}, {pipeline_mode = #tpu.pipeline_mode<synchronous>, transform_indices = @transform_2, window_bounds = array<i64: 1, 128>}, {pipeline_mode = #tpu.pipeline_mode<synchronous>, transform_indices = @transform_3, window_bounds = array<i64: 128, 512>}, {pipeline_mode = #tpu.pipeline_mode<synchronous>, transform_indices = @transform_4, window_bounds = array<i64: 1, 512>}, {pipeline_mode = #tpu.pipeline_mode<synchronous>, transform_indices = @transform_5, window_bounds = array<i64: 512, 128>}, {pipeline_mode = #tpu.pipeline_mode<synchronous>, transform_indices = @transform_6, window_bounds = array<i64: 1, 128>}, {transform_indices = @transform_7, window_bounds = array<i64: 1, 16, 128>}]} {
    %c0 = arith.constant 0 : index
    %c0_0 = arith.constant 0 : index
    %c0_1 = arith.constant 0 : index
    %0 = vector.load %arg1[%c0, %c0_0, %c0_1] : memref<1x16x128xf32, #tpu.memory_space<vmem>>, vector<1x16x128xf32>
    %1 = vector.shape_cast %0 : vector<1x16x128xf32> to vector<16x128xf32>
    %c0_2 = arith.constant 0 : index
    %c0_3 = arith.constant 0 : index
    %2 = vector.load %arg2[%c0_2, %c0_3] : memref<1x128xf32, #tpu.memory_space<vmem>>, vector<1x128xf32>
    %c0_4 = arith.constant 0 : index
    %c0_5 = arith.constant 0 : index
    %3 = vector.load %arg3[%c0_4, %c0_5] : memref<1x128xf32, #tpu.memory_space<vmem>>, vector<1x128xf32>
    %cst = arith.constant dense<0.000000e+00> : vector<16xf32>
    %4 = vector.multi_reduction <add>, %1, %cst [1] : vector<16x128xf32> to vector<16xf32>
    %5 = vector.shape_cast %4 : vector<16xf32> to vector<16x1xf32>
    %cst_6 = arith.constant 1.280000e+02 : f32
    %6 = vector.broadcast %cst_6 : f32 to vector<16x1xf32>
    %7 = arith.divf %5, %6 : vector<16x1xf32>
    %8 = vector.broadcast %7 : vector<16x1xf32> to vector<16x128xf32>
    %9 = arith.subf %1, %8 : vector<16x128xf32>
    %10 = arith.mulf %9, %9 : vector<16x128xf32>
    %cst_7 = arith.constant dense<0.000000e+00> : vector<16xf32>
    %11 = vector.multi_reduction <add>, %10, %cst_7 [1] : vector<16x128xf32> to vector<16xf32>
    %12 = vector.shape_cast %11 : vector<16xf32> to vector<16x1xf32>
    %cst_8 = arith.constant 1.280000e+02 : f32
    %13 = vector.broadcast %cst_8 : f32 to vector<16x1xf32>
    %14 = arith.divf %12, %13 : vector<16x1xf32>
    %cst_9 = arith.constant 9.99999974E-6 : f32
    %15 = vector.broadcast %cst_9 : f32 to vector<16x1xf32>
    %16 = arith.addf %14, %15 : vector<16x1xf32>
    %17 = math.rsqrt %16 : vector<16x1xf32>
    %18 = vector.broadcast %17 : vector<16x1xf32> to vector<16x128xf32>
    %19 = arith.mulf %9, %18 : vector<16x128xf32>
    %20 = vector.broadcast %2 : vector<1x128xf32> to vector<16x128xf32>
    %21 = arith.mulf %19, %20 : vector<16x128xf32>
    %22 = vector.broadcast %3 : vector<1x128xf32> to vector<16x128xf32>
    %23 = arith.addf %21, %22 : vector<16x128xf32>
    %c0_10 = arith.constant 0 : index
    %c0_11 = arith.constant 0 : index
    %24 = vector.load %arg4[%c0_10, %c0_11] : memref<128x512xf32, #tpu.memory_space<vmem>>, vector<128x512xf32>
    %cst_12 = arith.constant dense<0.000000e+00> : vector<16x512xf32>
    %25 = tpu.matmul %23, %24, %cst_12 {dimension_numbers = #tpu.dot_dimension_numbers<[1], [0], [0], [1], [0, 0, 1, 1], [], []>} : vector<16x128xf32>, vector<128x512xf32>, vector<16x512xf32> -> vector<16x512xf32>
    %c0_13 = arith.constant 0 : index
    %c0_14 = arith.constant 0 : index
    %26 = vector.load %arg5[%c0_13, %c0_14] : memref<1x512xf32, #tpu.memory_space<vmem>>, vector<1x512xf32>
    %27 = vector.broadcast %26 : vector<1x512xf32> to vector<16x512xf32>
    %28 = arith.addf %25, %27 : vector<16x512xf32>
    %cst_15 = arith.constant 5.000000e-01 : f32
    %29 = vector.broadcast %cst_15 : f32 to vector<16x512xf32>
    %30 = arith.mulf %29, %28 : vector<16x512xf32>
    %cst_16 = arith.constant 0.707106769 : f32
    %31 = vector.broadcast %cst_16 : f32 to vector<16x512xf32>
    %32 = arith.mulf %28, %31 : vector<16x512xf32>
    %cst_17 = arith.constant 0.000000e+00 : f32
    %33 = vector.broadcast %cst_17 : f32 to vector<16x512xf32>
    %34 = arith.cmpf oge, %32, %33 : vector<16x512xf32>
    %cst_18 = arith.constant 1.000000e+00 : f32
    %cst_19 = arith.constant -1.000000e+00 : f32
    %35 = vector.broadcast %cst_18 : f32 to vector<16x512xf32>
    %36 = vector.broadcast %cst_19 : f32 to vector<16x512xf32>
    %37 = arith.select %34, %35, %36 : vector<16x512xi1>, vector<16x512xf32>
    %38 = math.absf %32 : vector<16x512xf32>
    %cst_20 = arith.constant 0.327591091 : f32
    %39 = vector.broadcast %cst_20 : f32 to vector<16x512xf32>
    %40 = arith.mulf %39, %38 : vector<16x512xf32>
    %cst_21 = arith.constant 1.000000e+00 : f32
    %41 = vector.broadcast %cst_21 : f32 to vector<16x512xf32>
    %42 = arith.addf %41, %40 : vector<16x512xf32>
    %cst_22 = arith.constant 1.000000e+00 : f32
    %43 = vector.broadcast %cst_22 : f32 to vector<16x512xf32>
    %44 = arith.divf %43, %42 : vector<16x512xf32>
    %cst_23 = arith.constant 1.06140542 : f32
    %45 = vector.broadcast %cst_23 : f32 to vector<16x512xf32>
    %46 = arith.mulf %45, %44 : vector<16x512xf32>
    %cst_24 = arith.constant -1.45315206 : f32
    %47 = vector.broadcast %cst_24 : f32 to vector<16x512xf32>
    %48 = arith.addf %46, %47 : vector<16x512xf32>
    %49 = arith.mulf %48, %44 : vector<16x512xf32>
    %cst_25 = arith.constant 1.42141378 : f32
    %50 = vector.broadcast %cst_25 : f32 to vector<16x512xf32>
    %51 = arith.addf %49, %50 : vector<16x512xf32>
    %52 = arith.mulf %51, %44 : vector<16x512xf32>
    %cst_26 = arith.constant -0.284496725 : f32
    %53 = vector.broadcast %cst_26 : f32 to vector<16x512xf32>
    %54 = arith.addf %52, %53 : vector<16x512xf32>
    %55 = arith.mulf %54, %44 : vector<16x512xf32>
    %cst_27 = arith.constant 0.254829586 : f32
    %56 = vector.broadcast %cst_27 : f32 to vector<16x512xf32>
    %57 = arith.addf %55, %56 : vector<16x512xf32>
    %58 = arith.mulf %57, %44 : vector<16x512xf32>
    %cst_28 = arith.constant 0.000000e+00 : f32
    %59 = vector.broadcast %cst_28 : f32 to vector<16x512xf32>
    %60 = arith.subf %59, %38 : vector<16x512xf32>
    %61 = arith.mulf %60, %38 : vector<16x512xf32>
    %62 = math.exp %61 : vector<16x512xf32>
    %63 = arith.mulf %58, %62 : vector<16x512xf32>
    %cst_29 = arith.constant 1.000000e+00 : f32
    %64 = vector.broadcast %cst_29 : f32 to vector<16x512xf32>
    %65 = arith.subf %64, %63 : vector<16x512xf32>
    %66 = arith.mulf %37, %65 : vector<16x512xf32>
    %cst_30 = arith.constant 1.000000e+00 : f32
    %67 = vector.broadcast %cst_30 : f32 to vector<16x512xf32>
    %68 = arith.addf %67, %66 : vector<16x512xf32>
    %69 = arith.mulf %30, %68 : vector<16x512xf32>
    %c0_31 = arith.constant 0 : index
    %c0_32 = arith.constant 0 : index
    %70 = vector.load %arg6[%c0_31, %c0_32] : memref<512x128xf32, #tpu.memory_space<vmem>>, vector<512x128xf32>
    %cst_33 = arith.constant dense<0.000000e+00> : vector<16x128xf32>
    %71 = tpu.matmul %69, %70, %cst_33 {dimension_numbers = #tpu.dot_dimension_numbers<[1], [0], [0], [1], [0, 0, 1, 1], [], []>} : vector<16x512xf32>, vector<512x128xf32>, vector<16x128xf32> -> vector<16x128xf32>
    %c0_34 = arith.constant 0 : index
    %c0_35 = arith.constant 0 : index
    %72 = vector.load %arg7[%c0_34, %c0_35] : memref<1x128xf32, #tpu.memory_space<vmem>>, vector<1x128xf32>
    %73 = vector.broadcast %72 : vector<1x128xf32> to vector<16x128xf32>
    %74 = arith.addf %71, %73 : vector<16x128xf32>
    %75 = arith.addf %1, %74 : vector<16x128xf32>
    %c0_36 = arith.constant 0 : index
    %c0_37 = arith.constant 0 : index
    %c0_38 = arith.constant 0 : index
    %76 = vector.load %arg8[%c0_36, %c0_37, %c0_38] : memref<1x16x128xf32, #tpu.memory_space<vmem>>, vector<1x16x128xf32>
    %77 = vector.shape_cast %76 : vector<1x16x128xf32> to vector<16x128xf32>
    %78 = vector.shape_cast %75 : vector<16x128xf32> to vector<1x16x128xf32>
    tpu.vector_store %arg8[%c0_36, %c0_37, %c0_38], %78 {strides = array<i32>} : memref<1x16x128xf32, #tpu.memory_space<vmem>>, vector<1x16x128xf32>,
    return
  }
  func.func @transform_0(%arg0: i32) -> (i32, i32, i32) {
    %c0_i32 = arith.constant 0 : i32
    %c0_i32_0 = arith.constant 0 : i32
    %c0_i32_1 = arith.constant 0 : i32
    return %arg0, %c0_i32, %c0_i32_0 : i32, i32, i32
  }
  func.func @transform_1(%arg0: i32) -> (i32, i32) {
    %c0_i32 = arith.constant 0 : i32
    %c0_i32_0 = arith.constant 0 : i32
    %c0_i32_1 = arith.constant 0 : i32
    return %c0_i32, %c0_i32_0 : i32, i32
  }
  func.func @transform_2(%arg0: i32) -> (i32, i32) {
    %c0_i32 = arith.constant 0 : i32
    %c0_i32_0 = arith.constant 0 : i32
    %c0_i32_1 = arith.constant 0 : i32
    return %c0_i32, %c0_i32_0 : i32, i32
  }
  func.func @transform_3(%arg0: i32) -> (i32, i32) {
    %c0_i32 = arith.constant 0 : i32
    %c0_i32_0 = arith.constant 0 : i32
    %c0_i32_1 = arith.constant 0 : i32
    return %c0_i32, %c0_i32_0 : i32, i32
  }
  func.func @transform_4(%arg0: i32) -> (i32, i32) {
    %c0_i32 = arith.constant 0 : i32
    %c0_i32_0 = arith.constant 0 : i32
    %c0_i32_1 = arith.constant 0 : i32
    return %c0_i32, %c0_i32_0 : i32, i32
  }
  func.func @transform_5(%arg0: i32) -> (i32, i32) {
    %c0_i32 = arith.constant 0 : i32
    %c0_i32_0 = arith.constant 0 : i32
    %c0_i32_1 = arith.constant 0 : i32
    return %c0_i32, %c0_i32_0 : i32, i32
  }
  func.func @transform_6(%arg0: i32) -> (i32, i32) {
    %c0_i32 = arith.constant 0 : i32
    %c0_i32_0 = arith.constant 0 : i32
    %c0_i32_1 = arith.constant 0 : i32
    return %c0_i32, %c0_i32_0 : i32, i32
  }
  func.func @transform_7(%arg0: i32) -> (i32, i32, i32) {
    %c0_i32 = arith.constant 0 : i32
    %c0_i32_0 = arith.constant 0 : i32
    %c0_i32_1 = arith.constant 0 : i32
    return %arg0, %c0_i32, %c0_i32_0 : i32, i32, i32
  }
}

</mosaic_0001>

<bundles_post_ra>
// kernel: transformer_block_forward.9
= control target key start
LH: loop header
LB: loop body
LE: loop exit
PB: predicated region body
PF: predicated region fallthrough
CT: control target
= control target key end

     0   :  { %12 = vsyncpa [#allocation3], 0  ;;  %s1453_s24 = smov 0   ;;  %s1870_s0 = inlined_call_operand.vmem [shape: f32[2,16,128], index: 0, kind: input, shape index: {}]   ;;  %s1871_s1 = inlined_call_operand.vmem [shape: f32[1,128], index: 1, kind: input, shape index: {}]   ;;  %s1872_s2 = inlined_call_operand.vmem [shape: f32[1,128], index: 2, kind: input, shape index: {}]   ;;  %s1873_s3 = inlined_call_operand.vmem [shape: f32[128,512], index: 3, kind: input, shape index: {}]   ;;  %s1874_s4 = inlined_call_operand.vmem [shape: f32[1,512], index: 4, kind: input, shape index: {}]   ;;  %s1875_s5 = inlined_call_operand.hbm [shape: f32[512,128], index: 5, kind: input, shape index: {}]   ;;  %s1876_s6 = inlined_call_operand.vmem [shape: f32[1,128], index: 6, kind: input, shape index: {}]   ;;  %s1877_s7 = inlined_call_operand.vmem [shape: f32[2,16,128], index: 7, kind: output, shape index: {}]  }
   0x1 LB: > { %s1459_s25 = sadd.s32 4294967295, %s1406_s24   ;;  %p1087_p0 = scmp.ge.s32.totalorder %s1406_s24, 1  ;;  %s1406_s24 = sphi %s1453_s24, %s18_s24  }
   0x2   : > { %p201_p1 = scmp.lt.s32.totalorder %s1406_s24, 3  ;;  %s1408_s26 = smov [#allocation2]  }
   0x3   : > { %s225_s27 = sshll.u32 %s1408_s26, 4  ;;  %p1878_p3 = scmp.eq.s32.totalorder %s1459_s25, 0  ;;  %s226_s27 = int_to_ptr.vmem [resolvable:$true] %s225_s27 }
   0x4   : > { %p1463_p2 = pnand %p1087_p0, %p201_p1  ;;  %s1368_s9 = scalar_lea.hbm %s1875_s5, 8192 }
   0x5   : > { %p1369_p6 = scmp.ne.s32.totalorder %s1875_s5, %s1368_s9  ;;  %p1375_p10 = scmp.lt.u32.totalorder %s1368_s9, %s1875_s5 }
   0x6   : > { %s1880_s28 = scalar_select %p1463_p2, 1, 0 }
   0x7   : > { %p1311_p4 = pneg %p1463_p2 }
   0x9   : > { %p1472_p5 = pnand %p1878_p3, %p1311_p4 }
   0xb   : > { %p1370_p7 = pneg %p1472_p5 }
   0xd   : > { %p1371_p8 = pnand %p1370_p7, %p1369_p6 }
   0xf   : > { %p1372_p9 = pneg %p1371_p8 }
  0x11   : > { %p1377_p11 = pnand %p1375_p10, %p1372_p9 }
  0x13   : > { %1380 = shalt.err (!%p1377_p11)
}
  0x14   : > { %s1381_s14 = scalar_lea.vmem %s226_s27, 8192  ;;  %p1389_p1 = scmp.lt.s32.totalorder %s226_s27, %s226_s27 }
  0x15   : > { %p1382_p12 = scmp.ne.s32.totalorder %s226_s27, %s1381_s14  ;;  %p1390_p4 = scmp.lt.s32.totalorder %s1381_s14, %s1381_s14 }
  0x17   : > { %p1384_p13 = pnand %p1382_p12, %p1370_p7  ;;  %p1391_p3 = por %p1390_p4, %p1389_p1 }
  0x19   : > { %p1385_p0 = pneg %p1384_p13 }
  0x1b   : > { %p1392_p2 = pnand %p1391_p3, %p1385_p0 }
  0x1d   : > { %1395 = shalt.err (!%p1392_p2)
}
  0x1e   : > { %s1409_s15 = smov 128   ;;  %s1410_s16 = smov 8  }
  0x1f   : > { %1314 = dma.hbm_to_vmem [thread:$0]  (!%p1472_p5), %s1875_s5, 8192, %s226_s27, [#allocation3], %s1409_s15, %s1409_s15, %s1410_s16  }
  0x20   : > { %p1882_p6 = scmp.ne.s32.totalorder %s1880_s28, 0 }
  0x21   : > { %p1883_p8 = scmp.eq.s32.totalorder (!%p1882_p6), %s1459_s25, 0 }
  0x22   : > { %252 = sbr.rel (%p1882_p6) target bundleno = 856 (0x358), region = 48 }
  0x29   : > { %1401 = dma.done.wait (%p1883_p8), [#allocation3], 8192   ;;  %p1884_p7 = pmov %p1883_p8 }
  0x2a   : > { %p284_p2 = scmp.lt.s32.totalorder %s1459_s25, 1  ;;  %v338_v2 = vld [vmem:[%s1873_s3 + $0x8] sm:$0xff]  ;;  %v340_v4 = vld [vmem:[%s1873_s3 + $0x18] sm:$0xff]  ;;  %v337_v7 = vld [vmem:[%s1873_s3] sm:$0xff] }
  0x2b   : > { %1403 = vsyncadd (%p1884_p7), [#allocation3], 4294959104  ;;  %v342_v3 = vld [vmem:[%s1873_s3 + $0x28] sm:$0xff]  ;;  %v344_v6 = vld [vmem:[%s1873_s3 + $0x38] sm:$0xff] }
  0x2c   : > { %s1886_s25 = smov (!%p284_p2, %s1459_s25), 1  ;;  %v1179_v5 = vpack.c.bf16 %v342_v3, %v338_v2  ;;  %v341_v8 = vld [vmem:[%s1873_s3 + $0x20] sm:$0xff]  ;;  %v1211_v9 = vpack.c.bf16 %v344_v6, %v340_v4  ;;  %v339_v11 = vld [vmem:[%s1873_s3 + $0x10] sm:$0xff]  ;;  %v346_v13 = vld [vmem:[%s1873_s3 + $0x48] sm:$0xff] }
  0x2d   : > { %s1101_s19 = sshll.u32 %s1886_s25, 4  ;;  %v1181_v10 = vpack.c.bf16 %v341_v8, %v337_v7  ;;  %v343_v12 = vld [vmem:[%s1873_s3 + $0x30] sm:$0xff]  ;;  %v350_v15 = vld [vmem:[%s1873_s3 + $0x68] sm:$0xff]  ;;  %v348_v16 = vld [vmem:[%s1873_s3 + $0x58] sm:$0xff] }
  0x2e   : > { %s1508_s22 = scalar_lea.vmem %s1870_s0, %s1101_s19  ;;  %1180 = vmatprep.subr.bf16.mxu0 %v1179_v5  ;;  %v1213_v14 = vpack.c.bf16 %v343_v12, %v339_v11  ;;  %v352_v17 = vld [vmem:[%s1873_s3 + $0x78] sm:$0xff]  ;;  %1212 = vmatprep.subr.bf16.mxu1 %v1211_v9  ;;  %v1183_v18 = vpack.c.bf16 %v350_v15, %v346_v13  ;;  %v345_v20 = vld [vmem:[%s1873_s3 + $0x40] sm:$0xff]  ;;  %v347_v22 = vld [vmem:[%s1873_s3 + $0x50] sm:$0xff]  ;;  %s293_s30 = scalar_lea.vmem %s1877_s7, %s1101_s19 }
  0x2f   : > { %v294_v0 = vld [vmem:[%s1508_s22] sm:$0xff]  ;;  %v295_v1 = vld [vmem:[%s1508_s22 + $0x8] sm:$0xff]  ;;  %1182 = vmatpush1.bf16.msra.mxu0 %v1181_v10  ;;  %v1215_v19 = vpack.c.bf16 %v352_v17, %v348_v16  ;;  %v351_v24 = vld [vmem:[%s1873_s3 + $0x70] sm:$0xff] }
  0x30   : > { %298 = vadd.xlane.f32.xlu0 %v294_v0  ;;  %v349_v21 = vld [vmem:[%s1873_s3 + $0x60] sm:$0xff]  ;;  %1214 = vmatpush1.bf16.msra.mxu1 %v1213_v14  ;;  %v354_v25 = vld [vmem:[%s1873_s3 + $0x88] sm:$0xff]  ;;  %v1217_v27 = vpack.c.bf16 %v351_v24, %v347_v22  ;;  %v356_v29 = vld [vmem:[%s1873_s3 + $0x98] sm:$0xff]  ;;  %v1411_v22 = vmov 0.0  }
  0x31   : > { %v1185_v23 = vpack.c.bf16 %v349_v21, %v345_v20  ;;  %v358_v26 = vld [vmem:[%s1873_s3 + $0xa8] sm:$0xff]  ;;  %1184 = vmatprep.subr.bf16.mxu0 %v1183_v18  ;;  %1216 = vmatprep.subr.bf16.mxu1 %v1215_v19  ;;  %v360_v30 = vld [vmem:[%s1873_s3 + $0xb8] sm:$0xff]  ;;  %v353_v31 = vld [vmem:[%s1873_s3 + $0x80] sm:$0xff] }
  0x32   : > { %v1187_v28 = vpack.c.bf16 %v358_v26, %v354_v25  ;;  %v1219_v32 = vpack.c.bf16 %v360_v30, %v356_v29  ;;  %v357_v33 = vld [vmem:[%s1873_s3 + $0xa0] sm:$0xff]  ;;  %v355_v34 = vld [vmem:[%s1873_s3 + $0x90] sm:$0xff]  ;;  %v362_v46 = vld [vmem:[%s1873_s3 + $0xc8] sm:$0xff]  ;;  %487 = vmatprep.mubr.f32.mxu0 %v1411_v22  ;;  %564 = vmatprep.mubr.f32.mxu1 %v1411_v22 }
  0x33   : > { %v359_v35 = vld [vmem:[%s1873_s3 + $0xb0] sm:$0xff]  ;;  %1186 = vmatpush1.bf16.msra.mxu0 %v1185_v23  ;;  %v1189_v36 = vpack.c.bf16 %v357_v33, %v353_v31  ;;  %v366_v47 = vld [vmem:[%s1873_s3 + $0xe8] sm:$0xff]  ;;  %v364_v48 = vld [vmem:[%s1873_s3 + $0xd8] sm:$0xff] }
  0x34   : > { %300 = vadd.xlane.f32.xlu0 %v295_v1  ;;  %1218 = vmatpush1.bf16.msra.mxu1 %v1217_v27  ;;  %v1221_v37 = vpack.c.bf16 %v359_v35, %v355_v34  ;;  %v1191_v49 = vpack.c.bf16 %v366_v47, %v362_v46  ;;  %v368_v50 = vld [vmem:[%s1873_s3 + $0xf8] sm:$0xff]  ;;  %v361_v51 = vld [vmem:[%s1873_s3 + $0xc0] sm:$0xff]  ;;  %v363_v55 = vld [vmem:[%s1873_s3 + $0xd0] sm:$0xff] }
  0x35   : > { %1188 = vmatprep.subr.bf16.mxu0 %v1187_v28  ;;  %1220 = vmatprep.subr.bf16.mxu1 %v1219_v32  ;;  %v365_v52 = vld [vmem:[%s1873_s3 + $0xe0] sm:$0xff]  ;;  %v1223_v53 = vpack.c.bf16 %v368_v50, %v364_v48  ;;  %v367_v56 = vld [vmem:[%s1873_s3 + $0xf0] sm:$0xff]  ;;  %v370_v58 = vld [vmem:[%s1873_s3 + $0x108] sm:$0xff] }
  0x36   : > { %v1193_v54 = vpack.c.bf16 %v365_v52, %v361_v51  ;;  %v1225_v57 = vpack.c.bf16 %v367_v56, %v363_v55  ;;  %v374_v59 = vld [vmem:[%s1873_s3 + $0x128] sm:$0xff]  ;;  %v372_v60 = vld [vmem:[%s1873_s3 + $0x118] sm:$0xff]  ;;  %v369_v63 = vld [vmem:[%s1873_s3 + $0x100] sm:$0xff] }
  0x37   : > { %1190 = vmatpush1.bf16.msra.mxu0 %v1189_v36  ;;  %v1195_v61 = vpack.c.bf16 %v374_v59, %v370_v58  ;;  %v376_v62 = vld [vmem:[%s1873_s3 + $0x138] sm:$0xff]  ;;  %v371_v3 = vld [vmem:[%s1873_s3 + $0x110] sm:$0xff]  ;;  %v378_v6 = vld [vmem:[%s1873_s3 + $0x148] sm:$0xff] }
  0x38   : > { %1222 = vmatpush1.bf16.msra.mxu1 %v1221_v37  ;;  %1192 = vmatprep.subr.bf16.mxu0 %v1191_v49  ;;  %v375_v4 = vld [vmem:[%s1873_s3 + $0x130] sm:$0xff]  ;;  %v382_v7 = vld [vmem:[%s1873_s3 + $0x168] sm:$0xff]  ;;  %v380_v8 = vld [vmem:[%s1873_s3 + $0x158] sm:$0xff] }
  0x39   : > { %1224 = vmatprep.subr.bf16.mxu1 %v1223_v53  ;;  %v1229_v5 = vpack.c.bf16 %v375_v4, %v371_v3  ;;  %v1199_v9 = vpack.c.bf16 %v382_v7, %v378_v6  ;;  %v384_v10 = vld [vmem:[%s1873_s3 + $0x178] sm:$0xff]  ;;  %v377_v11 = vld [vmem:[%s1873_s3 + $0x140] sm:$0xff]  ;;  %v379_v15 = vld [vmem:[%s1873_s3 + $0x150] sm:$0xff] }
  0x3a   : > { %v381_v12 = vld [vmem:[%s1873_s3 + $0x160] sm:$0xff]  ;;  %v1231_v13 = vpack.c.bf16 %v384_v10, %v380_v8  ;;  %v383_v16 = vld [vmem:[%s1873_s3 + $0x170] sm:$0xff]  ;;  %v386_v17 = vld [vmem:[%s1873_s3 + $0x188] sm:$0xff] }
  0x3b   : > { %1194 = vmatpush1.bf16.msra.mxu0 %v1193_v54  ;;  %v1201_v14 = vpack.c.bf16 %v381_v12, %v377_v11  ;;  %v1233_v18 = vpack.c.bf16 %v383_v16, %v379_v15  ;;  %v390_v19 = vld [vmem:[%s1873_s3 + $0x1a8] sm:$0xff]  ;;  %v388_v20 = vld [vmem:[%s1873_s3 + $0x198] sm:$0xff]  ;;  %v385_v25 = vld [vmem:[%s1873_s3 + $0x180] sm:$0xff] }
  0x3c   : > { %1226 = vmatpush1.bf16.msra.mxu1 %v1225_v57  ;;  %1196 = vmatprep.subr.bf16.mxu0 %v1195_v61  ;;  %v392_v21 = vld [vmem:[%s1873_s3 + $0x1b8] sm:$0xff]  ;;  %v1203_v23 = vpack.c.bf16 %v390_v19, %v386_v17  ;;  %v389_v26 = vld [vmem:[%s1873_s3 + $0x1a0] sm:$0xff]  ;;  %v387_v27 = vld [vmem:[%s1873_s3 + $0x190] sm:$0xff] }
  0x3d   : > { %v1235_v24 = vpack.c.bf16 %v392_v21, %v388_v20  ;;  %v1205_v28 = vpack.c.bf16 %v389_v26, %v385_v25  ;;  %v391_v29 = vld [vmem:[%s1873_s3 + $0x1b0] sm:$0xff]  ;;  %v394_v30 = vld [vmem:[%s1873_s3 + $0x1c8] sm:$0xff]  ;;  %v396_v34 = vld [vmem:[%s1873_s3 + $0x1d8] sm:$0xff] }
  0x3e   : > { %v398_v31 = vld [vmem:[%s1873_s3 + $0x1e8] sm:$0xff]  ;;  %v1237_v32 = vpack.c.bf16 %v391_v29, %v387_v27  ;;  %v400_v35 = vld [vmem:[%s1873_s3 + $0x1f8] sm:$0xff]  ;;  %v393_v36 = vld [vmem:[%s1873_s3 + $0x1c0] sm:$0xff] }
  0x3f   : > { %v1207_v33 = vpack.c.bf16 %v398_v31, %v394_v30  ;;  %v1239_v37 = vpack.c.bf16 %v400_v35, %v396_v34  ;;  %v1096_v52 = vld [vmem:[%s1871_s1] ss:$0 sm:$0xff]  ;;  %v826_v6 = vld [vmem:[#allocation2 + $0x108] sm:$0xff]  ;;  %v811_v7 = vld [vmem:[#allocation2 + $0x90] sm:$0xff] }
  0x40   : > { %v1097_v54 = vld [vmem:[%s1872_s2] ss:$0 sm:$0xff]  ;;  %v812_v8 = vld [vmem:[#allocation2 + $0x98] sm:$0xff]  ;;  %v795_v12 = vld [vmem:[#allocation2 + $0x10] sm:$0xff] }
  0x41   : > { %v809_v61 = vld [vmem:[#allocation2 + $0x80] sm:$0xff]  ;;  %v1247_v10 = vpack.c.bf16 %v812_v8, %v811_v7  ;;  %v844_v11 = vld [vmem:[#allocation2 + $0x198] sm:$0xff]  ;;  %v827_v16 = vld [vmem:[#allocation2 + $0x110] sm:$0xff] }
  0x42   : > { %v828_v17 = vld [vmem:[#allocation2 + $0x118] sm:$0xff]  ;;  %v813_v19 = vld [vmem:[#allocation2 + $0xa0] sm:$0xff]  ;;  %v814_v20 = vld [vmem:[#allocation2 + $0xa8] sm:$0xff] }
  0x43   : > { %v845_v21 = vld [vmem:[#allocation2 + $0x1a0] sm:$0xff]  ;;  %v798_v25 = vld [vmem:[#allocation2 + $0x28] sm:$0xff]  ;;  %v815_v31 = vld [vmem:[#allocation2 + $0xb0] sm:$0xff] }
  0x44   : > { %v830_v29 = vld [vmem:[#allocation2 + $0x128] sm:$0xff]  ;;  %v848_v35 = vld [vmem:[#allocation2 + $0x1b8] sm:$0xff]  ;;  %v805_v8 = vld [vmem:[#allocation2 + $0x60] sm:$0xff] }
  0x45   : > { %v854_v7 = vld [vmem:[#allocation2 + $0x1e8] sm:$0xff] }
  0xbd   : > { %v299_v38 = vpop.xlane.xlu0 %298 }
  0xbe   : > { %v303_v39 = vmul.f32 0.0078125, %v299_v38  ;;  %v397_v38 = vld [vmem:[%s1873_s3 + $0x1e0] sm:$0xff] }
  0xc0   : > { %v1584_v40 = vsub.f32 %v294_v0, %v303_v39  ;;  %v373_v0 = vld [vmem:[%s1873_s3 + $0x120] sm:$0xff]  ;;  %v395_v39 = vld [vmem:[%s1873_s3 + $0x1d0] sm:$0xff] }
  0xc1   : > { %v301_v41 = vpop.xlane.xlu0 %300  ;;  %v1197_v2 = vpack.c.bf16 %v373_v0, %v369_v63  ;;  %v842_v0 = vld [vmem:[#allocation2 + $0x188] sm:$0xff] }
  0xc2   : > { %v304_v42 = vmul.f32 0.0078125, %v301_v41  ;;  %v307_v43 = vmul.f32 %v1584_v40, %v1584_v40  ;;  %v399_v41 = vld [vmem:[%s1873_s3 + $0x1f0] sm:$0xff] }
  0xc3   : > { %1198 = vmatpush1.bf16.msra.mxu0 %v1197_v2  ;;  %v794_v2 = vld [vmem:[#allocation2 + $0x8] sm:$0xff] }
  0xc4   : > { %v1588_v44 = vsub.f32 %v295_v1, %v304_v42  ;;  %309 = vadd.xlane.f32.xlu1 %v307_v43  ;;  %v1227_v1 = vpack.c.bf16 %v376_v62, %v372_v60  ;;  %1200 = vmatprep.subr.bf16.mxu0 %v1199_v9  ;;  %v1209_v42 = vpack.c.bf16 %v397_v38, %v393_v36  ;;  %v810_v62 = vld [vmem:[#allocation2 + $0x88] sm:$0xff]  ;;  %v843_v9 = vld [vmem:[#allocation2 + $0x190] sm:$0xff] }
  0xc5   : > { %v1241_v43 = vpack.c.bf16 %v399_v41, %v395_v39  ;;  %v1243_v63 = vpack.c.bf16 %v810_v62, %v809_v61  ;;  %v799_v36 = vld [vmem:[#allocation2 + $0x30] sm:$0xff] }
  0xc6   : > { %v308_v45 = vmul.f32 %v1588_v44, %v1588_v44  ;;  %1228 = vmatprep.subr.bf16.mxu1 %v1227_v1  ;;  %v793_v1 = vld [vmem:[#allocation2] sm:$0xff]  ;;  %v831_v41 = vld [vmem:[#allocation2 + $0x130] sm:$0xff] }
  0xc7   : > { %1230 = vmatpush1.bf16.msra.mxu1 %v1229_v5  ;;  %1202 = vmatpush1.bf16.msra.mxu0 %v1201_v14  ;;  %v1245_v4 = vpack.c.bf16 %v794_v2, %v793_v1  ;;  %v825_v5 = vld [vmem:[#allocation2 + $0x100] sm:$0xff]  ;;  %v1279_v14 = vpack.c.bf16 %v844_v11, %v843_v9  ;;  %v836_v2 = vld [vmem:[#allocation2 + $0x158] sm:$0xff] }
  0xc8   : > { %311 = vadd.xlane.f32.xlu1 %v308_v45  ;;  %1232 = vmatprep.subr.bf16.mxu1 %v1231_v13  ;;  %v796_v13 = vld [vmem:[#allocation2 + $0x18] sm:$0xff]  ;;  %v837_v11 = vld [vmem:[#allocation2 + $0x160] sm:$0xff] }
  0xc9   : > { %1204 = vmatprep.subr.bf16.mxu0 %v1203_v23  ;;  %v1249_v15 = vpack.c.bf16 %v796_v13, %v795_v12  ;;  %v846_v23 = vld [vmem:[#allocation2 + $0x1a8] sm:$0xff] }
  0xca   : > { %v1283_v26 = vpack.c.bf16 %v846_v23, %v845_v21  ;;  %v838_v12 = vld [vmem:[#allocation2 + $0x168] sm:$0xff]  ;;  %v808_v21 = vld [vmem:[#allocation2 + $0x78] sm:$0xff]  ;;  %v839_v23 = vld [vmem:[#allocation2 + $0x170] sm:$0xff] }
  0xcb   : > { %1234 = vmatpush1.bf16.msra.mxu1 %v1233_v18  ;;  %1206 = vmatpush1.bf16.msra.mxu0 %v1205_v28  ;;  %v1281_v18 = vpack.c.bf16 %v828_v17, %v827_v16  ;;  %v829_v28 = vld [vmem:[#allocation2 + $0x120] sm:$0xff]  ;;  %v855_v16 = vld [vmem:[#allocation2 + $0x1f0] sm:$0xff]  ;;  %v1301_v17 = vpack.c.bf16 %v838_v12, %v837_v11 }
  0xcc   : > { %1236 = vmatprep.subr.bf16.mxu1 %v1235_v24  ;;  %1208 = vmatprep.subr.bf16.mxu0 %v1207_v33  ;;  %v797_v24 = vld [vmem:[#allocation2 + $0x20] sm:$0xff]  ;;  %v1285_v30 = vpack.c.bf16 %v830_v29, %v829_v28  ;;  %v847_v33 = vld [vmem:[#allocation2 + $0x1b0] sm:$0xff] }
  0xcd   : > { %v1253_v27 = vpack.c.bf16 %v798_v25, %v797_v24  ;;  %v1287_v38 = vpack.c.bf16 %v848_v35, %v847_v33  ;;  %v840_v24 = vld [vmem:[#allocation2 + $0x178] sm:$0xff] }
  0xcf   : > { %1238 = vmatpush1.bf16.msra.mxu1 %v1237_v32  ;;  %1210 = vmatpush1.bf16.msra.mxu0 %v1209_v42  ;;  %v816_v32 = vld [vmem:[#allocation2 + $0xb8] sm:$0xff] }
  0xd0   : > { %1240 = vmatprep.subr.bf16.mxu1 %v1239_v37  ;;  %1244 = vmatprep.subr.bf16.mxu0 %v1243_v63  ;;  %v1255_v34 = vpack.c.bf16 %v816_v32, %v815_v31  ;;  %v800_v37 = vld [vmem:[#allocation2 + $0x38] sm:$0xff]  ;;  %v401_v31 = vld [vmem:[%s1874_s4] sm:$0xf] }
  0xd1   : > { %v1257_v39 = vpack.c.bf16 %v800_v37, %v799_v36  ;;  %v832_v42 = vld [vmem:[#allocation2 + $0x138] sm:$0xff] }
  0xd2   : > { %v804_v63 = vld [vmem:[#allocation2 + $0x58] sm:$0xff] }
  0xd3   : > { %1242 = vmatpush1.bf16.msra.mxu1 %v1241_v43  ;;  %v1289_v43 = vpack.c.bf16 %v832_v42, %v831_v41 }
 0x151   : > { %v310_v45 = vpop.xlane.xlu1 %309 }
 0x152   : > { %v313_v46 = vmul.f32 0.0078125, %v310_v45  ;;  %v817_v45 = vld [vmem:[#allocation2 + $0xc0] sm:$0xff] }
 0x154   : > { %v315_v47 = vadd.f32 1e-05, %v313_v46  ;;  %v818_v46 = vld [vmem:[#allocation2 + $0xc8] sm:$0xff] }
 0x155   : > { %v312_v48 = vpop.xlane.xlu1 %311 }
 0x156   : > { %1330 = vrsqrt.f32 %v315_v47  ;;  %v314_v49 = vmul.f32 0.0078125, %v312_v48  ;;  %v849_v47 = vld [vmem:[#allocation2 + $0x1c0] sm:$0xff]  ;;  %v1259_v48 = vpack.c.bf16 %v818_v46, %v817_v45 }
 0x158   : > { %v316_v50 = vadd.f32 1e-05, %v314_v49  ;;  %v850_v49 = vld [vmem:[#allocation2 + $0x1c8] sm:$0xff] }
 0x15a   : > { %1332 = vrsqrt.f32 %v316_v50  ;;  %v801_v50 = vld [vmem:[#allocation2 + $0x40] sm:$0xff] }
 0x160   : > { %v1331_v51 = vpop.eup %1330 }
 0x161   : > { %v319_v53 = vmul.f32 %v1331_v51, %v1584_v40  ;;  %v841_v40 = vld [vmem:[#allocation2 + $0x180] sm:$0xff]  ;;  %v802_v51 = vld [vmem:[#allocation2 + $0x48] sm:$0xff] }
 0x162   : > { %v1275_v3 = vpack.c.bf16 %v842_v0, %v841_v40  ;;  %v803_v40 = vld [vmem:[#allocation2 + $0x50] sm:$0xff] }
 0x163   : > { %v327_v55 = vmul.f32 %v1096_v52, %v319_v53  ;;  %v1261_v53 = vpack.c.bf16 %v802_v51, %v801_v50  ;;  %v835_v0 = vld [vmem:[#allocation2 + $0x150] sm:$0xff]  ;;  %v1265_v1 = vpack.c.bf16 %v804_v63, %v803_v40 }
 0x164   : > { %v1333_v56 = vpop.eup %1332  ;;  %1276 = vmatprep.subr.bf16.mxu1 %v1275_v3  ;;  %v821_v3 = vld [vmem:[#allocation2 + $0xe0] sm:$0xff] }
 0x165   : > { %v335_v57 = vadd.f32 %v1097_v54, %v327_v55  ;;  %v320_v58 = vmul.f32 %v1333_v56, %v1588_v44  ;;  %v1277_v44 = vpack.c.bf16 %v826_v6, %v825_v5  ;;  %v834_v55 = vld [vmem:[#allocation2 + $0x148] sm:$0xff]  ;;  %v819_v56 = vld [vmem:[#allocation2 + $0xd0] sm:$0xff]  ;;  %v1297_v5 = vpack.c.bf16 %v836_v2, %v835_v0 }
 0x167   : > { %488 = vmatmul.mubr.f32.vlgmr.msra.gmra.mrb[0].mxu0 %v335_v57  ;;  %565 = vmatmul.mubr.f32.vlgmr.msra.gmra.mrb[0].mxu1 %v335_v57  ;;  %v328_v59 = vmul.f32 %v1096_v52, %v320_v58  ;;  %v1291_v52 = vpack.c.bf16 %v850_v49, %v849_v47  ;;  %v820_v58 = vld [vmem:[#allocation2 + $0xd8] sm:$0xff] }
 0x168   : > { %493 = vmatprep.mubr.f32.mxu0 %v1411_v22  ;;  %570 = vmatprep.mubr.f32.mxu1 %v1411_v22  ;;  %v1251_v22 = vpack.c.bf16 %v814_v20, %v813_v19  ;;  %v1263_v61 = vpack.c.bf16 %v820_v58, %v819_v56  ;;  %v856_v19 = vld [vmem:[#allocation2 + $0x1f8] sm:$0xff]  ;;  %v807_v20 = vld [vmem:[#allocation2 + $0x70] sm:$0xff] }
 0x169   : > { %v336_v60 = vadd.f32 %v1097_v54, %v328_v59  ;;  %1246 = vmatpush3.bf16.msra.mxu0 %v1245_v4  ;;  %1278 = vmatpush3.bf16.msra.mxu1 %v1277_v44  ;;  %v833_v54 = vld [vmem:[#allocation2 + $0x140] sm:$0xff]  ;;  %v851_v59 = vld [vmem:[#allocation2 + $0x1d0] sm:$0xff]  ;;  %v822_v4 = vld [vmem:[#allocation2 + $0xe8] sm:$0xff]  ;;  %v1273_v25 = vpack.c.bf16 %v808_v21, %v807_v20 }
 0x16a   : > { %1248 = vmatprep.subr.bf16.mxu0 %v1247_v10  ;;  %1280 = vmatprep.subr.bf16.mxu1 %v1279_v14  ;;  %v1293_v57 = vpack.c.bf16 %v834_v55, %v833_v54  ;;  %v1267_v6 = vpack.c.bf16 %v822_v4, %v821_v3  ;;  %v853_v44 = vld [vmem:[#allocation2 + $0x1e0] sm:$0xff]  ;;  %v806_v10 = vld [vmem:[#allocation2 + $0x68] sm:$0xff]  ;;  %v823_v14 = vld [vmem:[#allocation2 + $0xf0] sm:$0xff] }
 0x16b   : > { %494 = vmatmul.mubr.f32.gmra.mrb[2].mxu0 %v336_v60  ;;  %571 = vmatmul.mubr.f32.gmra.mrb[2].mxu1 %v336_v60  ;;  %v852_v60 = vld [vmem:[#allocation2 + $0x1d8] sm:$0xff]  ;;  %v1299_v9 = vpack.c.bf16 %v854_v7, %v853_v44  ;;  %v1269_v13 = vpack.c.bf16 %v806_v10, %v805_v8 }
 0x16c   : > { %v1295_v62 = vpack.c.bf16 %v852_v60, %v851_v59 }
 0x16d   : > { %1250 = vmatpush3.bf16.msra.mxu0 %v1249_v15  ;;  %1282 = vmatpush3.bf16.msra.mxu1 %v1281_v18  ;;  %v824_v15 = vld [vmem:[#allocation2 + $0xf8] sm:$0xff] }
 0x16e   : > { %1252 = vmatprep.subr.bf16.mxu0 %v1251_v22  ;;  %1284 = vmatprep.subr.bf16.mxu1 %v1283_v26  ;;  %v1271_v18 = vpack.c.bf16 %v824_v15, %v823_v14  ;;  %v1303_v22 = vpack.c.bf16 %v856_v19, %v855_v16  ;;  %v1305_v26 = vpack.c.bf16 %v840_v24, %v839_v23 }
 0x171   : > { %1254 = vmatpush3.bf16.msra.mxu0 %v1253_v27  ;;  %1286 = vmatpush3.bf16.msra.mxu1 %v1285_v30  ;;  %v403_v27 = vlaneseq }
 0x172   : > { %1256 = vmatprep.subr.bf16.mxu0 %v1255_v34  ;;  %1288 = vmatprep.subr.bf16.mxu1 %v1287_v38 }
 0x173   : > { %v404_v28 = vshrl.u32 %v403_v27, 7 }
 0x175   : > { %1258 = vmatpush3.bf16.msra.mxu0 %v1257_v39  ;;  %1290 = vmatpush3.bf16.msra.mxu1 %v1289_v43  ;;  %v405_v29 = vsub.s32 0, %v404_v28  ;;  %v413_v30 = vsub.s32 2, %v404_v28  ;;  %v409_v32 = vsub.s32 1, %v404_v28  ;;  %v417_v33 = vsub.s32 3, %v404_v28 }
 0x176   : > { %1260 = vmatprep.subr.bf16.mxu0 %v1259_v48  ;;  %1292 = vmatprep.subr.bf16.mxu1 %v1291_v52 }
 0x177   : > { %v406_v34 = vrot.slane %v401_v31, %v405_v29  ;;  %v414_v35 = vrot.slane %v401_v31, %v413_v30  ;;  %v410_v36 = vrot.slane %v401_v31, %v409_v32  ;;  %v418_v37 = vrot.slane %v401_v31, %v417_v33 }
 0x179   : > { %1262 = vmatpush3.bf16.msra.mxu0 %v1261_v53  ;;  %1294 = vmatpush3.bf16.msra.mxu1 %v1293_v57 }
 0x17a   : > { %1264 = vmatprep.subr.bf16.mxu0 %v1263_v61  ;;  %1296 = vmatprep.subr.bf16.mxu1 %v1295_v62 }
 0x17d   : > { %1266 = vmatpush3.bf16.msra.mxu0 %v1265_v1  ;;  %1298 = vmatpush3.bf16.msra.mxu1 %v1297_v5 }
 0x17e   : > { %1268 = vmatprep.subr.bf16.mxu0 %v1267_v6  ;;  %1300 = vmatprep.subr.bf16.mxu1 %v1299_v9 }
 0x181   : > { %1270 = vmatpush3.bf16.msra.mxu0 %v1269_v13  ;;  %1302 = vmatpush3.bf16.msra.mxu1 %v1301_v17 }
 0x182   : > { %1272 = vmatprep.subr.bf16.mxu0 %v1271_v18  ;;  %1304 = vmatprep.subr.bf16.mxu1 %v1303_v22  ;;  %v1412_v22 = vmov -1.0  }
 0x185   : > { %1274 = vmatpush3.bf16.msra.mxu0 %v1273_v25  ;;  %1306 = vmatpush3.bf16.msra.mxu1 %v1305_v26 }
 0x23a   : > { %v489_v38 = vpop.f32.mrb[0].mxu0  ;;  %v566_v39 = vpop.f32.mrb[0].mxu1 }
 0x23b   : > { %v490_v41 = vadd.f32 %v489_v38, %v406_v34  ;;  %v1723_v42 = vadd.f32 %v566_v39, %v414_v35  ;;  %v491_v43 = vpop.f32.mrb[1].mxu0  ;;  %v568_v45 = vpop.f32.mrb[1].mxu1 }
 0x23c   : > { %v492_v46 = vadd.f32 %v491_v43, %v410_v36  ;;  %v569_v47 = vadd.f32 %v568_v45, %v418_v37 }
 0x23d   : > { %v585_v48 = vmul.f32 0.70710677, %v490_v41  ;;  %v587_v49 = vmul.f32 0.70710677, %v1723_v42  ;;  %v1742_v9 = vmul.f32 0.5, %v490_v41 }
 0x23e   : > { %v1726_v50 = vmul.f32 0.70710677, %v492_v46  ;;  %v1729_v54 = vmul.f32 0.70710677, %v569_v47  ;;  %v495_v55 = vpop.f32.mrb[2].mxu0  ;;  %v572_v59 = vpop.f32.mrb[2].mxu1 }
 0x23f   : > { %v609_v51 = vand.u32 2147483647, %v585_v48  ;;  %v611_v52 = vand.u32 2147483647, %v587_v49  ;;  %v497_v62 = vpop.f32.mrb[3].mxu0  ;;  %v574_v40 = vpop.f32.mrb[3].mxu1  ;;  %v1732_v1 = vadd.f32 %v495_v55, %v406_v34  ;;  %v1737_v5 = vadd.f32 %v572_v59, %v414_v35 }
 0x240   : > { %v610_v53 = vand.u32 2147483647, %v1726_v50  ;;  %v612_v63 = vand.u32 2147483647, %v1729_v54  ;;  %v1739_v44 = vadd.f32 %v497_v62, %v410_v36  ;;  %vm593_vm0 = vcmp.ge.f32.partialorder %v585_v48, 0.0 }
 0x241   : > { %v617_v56 = vmul.f32 0.3275911, %v609_v51  ;;  %v619_v57 = vmul.f32 0.3275911, %v611_v52  ;;  %v721_v3 = vsub.f32 0.0, %v609_v51  ;;  %v723_v7 = vsub.f32 0.0, %v611_v52 }
 0x242   : > { %v618_v58 = vmul.f32 0.3275911, %v610_v53  ;;  %v620_v2 = vmul.f32 0.3275911, %v612_v63  ;;  %v1735_v4 = vmul.f32 0.70710677, %v1732_v1  ;;  %v1755_v21 = vadd.f32 %v574_v40, %v418_v37 }
 0x243   : > { %v625_v60 = vadd.f32 1.0, %v617_v56  ;;  %v627_v61 = vadd.f32 1.0, %v619_v57  ;;  %vm595_vm1 = vcmp.ge.f32.partialorder %v587_v49, 0.0  ;;  %v1745_v10 = vmul.f32 0.70710677, %v1737_v5 }
 0x244   : > { %v626_v0 = vadd.f32 1.0, %v618_v58  ;;  %v628_v6 = vadd.f32 1.0, %v620_v2  ;;  %v613_v8 = vand.u32 2147483647, %v1735_v4  ;;  %v729_v11 = vmul.f32 %v721_v3, %v609_v51 }
 0x245   : > { %1334 = vrcp.f32 %v625_v60  ;;  %v722_v12 = vsub.f32 0.0, %v610_v53  ;;  %v1747_v14 = vmul.f32 0.5, %v492_v46  ;;  %v1749_v15 = vmul.f32 0.5, %v569_v47 }
 0x246   : > { %1336 = vrcp.f32 %v627_v61  ;;  %v621_v13 = vmul.f32 0.3275911, %v613_v8  ;;  %v615_v16 = vand.u32 2147483647, %v1745_v10  ;;  %v1753_v17 = vmul.f32 0.70710677, %v1739_v44 }
 0x247   : > { %1338 = vrcp.f32 %v626_v0  ;;  %v731_v18 = vmul.f32 %v723_v7, %v611_v52  ;;  %v724_v19 = vsub.f32 0.0, %v612_v63  ;;  %v1759_v23 = vsel %vm593_vm0, 1.0, %v1412_v22 }
 0x248   : > { %1340 = vrcp.f32 %v628_v6  ;;  %v629_v20 = vadd.f32 1.0, %v621_v13  ;;  %v1763_v24 = vsel %vm595_vm1, 1.0, %v1412_v22  ;;  %v623_v25 = vmul.f32 0.3275911, %v615_v16 }
 0x249   : > { %v614_v26 = vand.u32 2147483647, %v1753_v17  ;;  %v737_v28 = vmul.f32 1.442695, %v729_v11  ;;  %vm594_vm2 = vcmp.ge.f32.partialorder %v1726_v50, 0.0  ;;  %v730_v29 = vmul.f32 %v722_v12, %v610_v53 }
 0x24a   : > { %1342 = vrcp.f32 %v629_v20  ;;  %v725_v32 = vsub.f32 0.0, %v613_v8  ;;  %v631_v33 = vadd.f32 1.0, %v623_v25  ;;  %v741_v36 = vmul.f32 1.442695, %v731_v18 }
 0x24b   : > { %v622_v34 = vmul.f32 0.3275911, %v614_v26  ;;  %v732_v37 = vmul.f32 %v724_v19, %v612_v63  ;;  %v1774_v38 = vmul.f32 0.70710677, %v1755_v21  ;;  %v727_v41 = vsub.f32 0.0, %v615_v16 }
 0x24c   : > { %1344 = vrcp.f32 %v631_v33  ;;  %v739_v47 = vmul.f32 1.442695, %v730_v29  ;;  %v733_v51 = vmul.f32 %v725_v32, %v613_v8  ;;  %v726_v60 = vsub.f32 0.0, %v614_v26 }
 0x24d   : > { %v630_v43 = vadd.f32 1.0, %v622_v34  ;;  %v616_v48 = vand.u32 2147483647, %v1774_v38  ;;  %1346 = vpow2.f32 %v737_v28  ;;  %v743_v56 = vmul.f32 1.442695, %v732_v37 }
 0x24e   : > { %v735_v59 = vmul.f32 %v727_v41, %v615_v16  ;;  %v745_v2 = vmul.f32 1.442695, %v733_v51  ;;  %v1793_v8 = vsel %vm594_vm2, 1.0, %v1412_v22  ;;  %v734_v16 = vmul.f32 %v726_v60, %v614_v26 }
 0x24f   : > { %v1766_v27 = vpop.eup %1334  ;;  %1348 = vrcp.f32 %v630_v43  ;;  %v624_v57 = vmul.f32 0.3275911, %v616_v48  ;;  %v728_v50 = vsub.f32 0.0, %v616_v48  ;;  %vm596_vm3 = vcmp.ge.f32.partialorder %v1729_v54, 0.0 }
 0x250   : > { %v1769_v30 = vpop.eup %1336  ;;  %v649_v31 = vmul.f32 1.0614054, %v1766_v27  ;;  %1350 = vpow2.f32 %v741_v36  ;;  %v749_v13 = vmul.f32 1.442695, %v735_v59  ;;  %v747_v37 = vmul.f32 1.442695, %v734_v16 }
 0x251   : > { %v651_v35 = vmul.f32 1.0614054, %v1769_v30  ;;  %v1776_v45 = vpop.eup %1338  ;;  %v632_v40 = vadd.f32 1.0, %v624_v57  ;;  %1352 = vpow2.f32 %v739_v47  ;;  %vm597_vm4 = vcmp.ge.f32.partialorder %v1735_v4, 0.0 }
 0x252   : > { %v657_v39 = vadd.f32 -1.4531521, %v649_v31  ;;  %v650_v52 = vmul.f32 1.0614054, %v1776_v45  ;;  %v1781_v53 = vpop.eup %1340  ;;  %vm598_vm5 = vcmp.ge.f32.partialorder %v1753_v17, 0.0  ;;  %vm599_vm6 = vcmp.ge.f32.partialorder %v1745_v10, 0.0 }
 0x253   : > { %v659_v46 = vadd.f32 -1.4531521, %v651_v35  ;;  %v652_v63 = vmul.f32 1.0614054, %v1781_v53  ;;  %1354 = vrcp.f32 %v632_v40  ;;  %v606_v4 = vsel %vm598_vm5, 1.0, %v1412_v22 }
 0x254   : > { %v665_v49 = vmul.f32 %v1766_v27, %v657_v39  ;;  %v658_v61 = vadd.f32 -1.4531521, %v650_v52  ;;  %v1787_v6 = vpop.eup %1342  ;;  %1356 = vpow2.f32 %v743_v56  ;;  %v736_v52 = vmul.f32 %v728_v50, %v616_v48 }
 0x255   : > { %v667_v55 = vmul.f32 %v1769_v30, %v659_v46  ;;  %v660_v11 = vadd.f32 -1.4531521, %v652_v63  ;;  %v653_v25 = vmul.f32 1.0614054, %v1787_v6  ;;  %1358 = vpow2.f32 %v745_v2 }
 0x256   : > { %v673_v58 = vadd.f32 1.4214138, %v665_v49  ;;  %v666_v3 = vmul.f32 %v1776_v45, %v658_v61  ;;  %v1797_v28 = vpop.eup %1344  ;;  %1360 = vpow2.f32 %v749_v13  ;;  %vm600_vm7 = vcmp.ge.f32.partialorder %v1774_v38, 0.0 }
 0x257   : > { %v675_v62 = vadd.f32 1.4214138, %v667_v55  ;;  %v668_v20 = vmul.f32 %v1781_v53, %v660_v11  ;;  %v661_v34 = vadd.f32 -1.4531521, %v653_v25  ;;  %v655_v26 = vmul.f32 1.0614054, %v1797_v28  ;;  %v1347_v35 = vpop.eup %1346 }
 0x258   : > { %v681_v0 = vmul.f32 %v1766_v27, %v673_v58  ;;  %v674_v18 = vadd.f32 1.4214138, %v666_v3  ;;  %1362 = vpow2.f32 %v747_v37 }
 0x259   : > { %v683_v7 = vmul.f32 %v1769_v30, %v675_v62  ;;  %v676_v33 = vadd.f32 1.4214138, %v668_v20  ;;  %v1803_v41 = vpop.eup %1348  ;;  %v669_v47 = vmul.f32 %v1787_v6, %v661_v34  ;;  %v663_v49 = vadd.f32 -1.4531521, %v655_v26 }
 0x25a   : > { %v689_v12 = vadd.f32 -0.28449672, %v681_v0  ;;  %v682_v31 = vmul.f32 %v1776_v45, %v674_v18  ;;  %v654_v56 = vmul.f32 1.0614054, %v1803_v41  ;;  %v1351_v57 = vpop.eup %1350  ;;  %v751_v18 = vmul.f32 1.442695, %v736_v52 }
 0x25b   : > { %v691_v19 = vadd.f32 -0.28449672, %v683_v7  ;;  %v684_v46 = vmul.f32 %v1781_v53, %v676_v33  ;;  %v677_v60 = vadd.f32 1.4214138, %v669_v47  ;;  %v671_v61 = vmul.f32 %v1797_v28, %v663_v49  ;;  %v1353_v62 = vpop.eup %1352 }
 0x25c   : > { %v697_v29 = vmul.f32 %v1766_v27, %v689_v12  ;;  %v690_v39 = vadd.f32 -0.28449672, %v682_v31  ;;  %v662_v0 = vadd.f32 -1.4531521, %v654_v56  ;;  %1364 = vpow2.f32 %v751_v18 }
 0x25d   : > { %v699_v32 = vmul.f32 %v1769_v30, %v691_v19  ;;  %v692_v59 = vadd.f32 -0.28449672, %v684_v46  ;;  %v1812_v2 = vpop.eup %1354  ;;  %v685_v3 = vmul.f32 %v1787_v6, %v677_v60  ;;  %v679_v7 = vadd.f32 1.4214138, %v671_v61 }
 0x25e   : > { %v705_v36 = vadd.f32 0.2548296, %v697_v29  ;;  %v698_v55 = vmul.f32 %v1776_v45, %v690_v39  ;;  %v670_v12 = vmul.f32 %v1803_v41, %v662_v0  ;;  %v656_v13 = vmul.f32 1.0614054, %v1812_v2  ;;  %v1357_v16 = vpop.eup %1356 }
 0x25f   : > { %v707_v43 = vadd.f32 0.2548296, %v699_v32  ;;  %v700_v48 = vmul.f32 %v1781_v53, %v692_v59  ;;  %v693_v20 = vadd.f32 -0.28449672, %v685_v3  ;;  %v687_v25 = vmul.f32 %v1797_v28, %v679_v7  ;;  %v1359_v29 = vpop.eup %1358 }
 0x260   : > { %v713_v51 = vmul.f32 %v1766_v27, %v705_v36  ;;  %v706_v63 = vadd.f32 0.2548296, %v698_v55  ;;  %v678_v32 = vadd.f32 1.4214138, %v670_v12  ;;  %v664_v33 = vadd.f32 -1.4531521, %v656_v13  ;;  %v1361_v36 = vpop.eup %1360 }
 0x261   : > { %v715_v58 = vmul.f32 %v1769_v30, %v707_v43  ;;  %v708_v19 = vadd.f32 0.2548296, %v700_v48  ;;  %v604_v60 = vsel %vm596_vm3, 1.0, %v1412_v22 }
 0x262   : > { %v753_v40 = vmul.f32 %v1347_v35, %v713_v51  ;;  %v714_v30 = vmul.f32 %v1776_v45, %v706_v63  ;;  %v701_v45 = vmul.f32 %v1787_v6, %v693_v20  ;;  %v695_v35 = vadd.f32 -0.28449672, %v687_v25  ;;  %v1363_v59 = vpop.eup %1362 }
 0x263   : > { %v755_v27 = vmul.f32 %v1351_v57, %v715_v58  ;;  %v716_v26 = vmul.f32 %v1781_v53, %v708_v19  ;;  %v686_v39 = vmul.f32 %v1803_v41, %v678_v32  ;;  %v672_v43 = vmul.f32 %v1812_v2, %v664_v33 }
 0x264   : > { %v761_v11 = vsub.f32 1.0, %v753_v40  ;;  %v754_v31 = vmul.f32 %v1353_v62, %v714_v30  ;;  %v709_v47 = vadd.f32 0.2548296, %v701_v45  ;;  %v703_v49 = vmul.f32 %v1797_v28, %v695_v35 }
 0x265   : > { %v763_v50 = vsub.f32 1.0, %v755_v27  ;;  %v756_v46 = vmul.f32 %v1357_v16, %v716_v26  ;;  %v694_v51 = vadd.f32 -0.28449672, %v686_v39  ;;  %v680_v52 = vadd.f32 1.4214138, %v672_v43 }
 0x266   : > { %v769_v34 = vmul.f32 %v761_v11, %v1759_v23  ;;  %v762_v37 = vsub.f32 1.0, %v754_v31  ;;  %v717_v57 = vmul.f32 %v1787_v6, %v709_v47  ;;  %v711_v58 = vadd.f32 0.2548296, %v703_v49  ;;  %v1365_v19 = vpop.eup %1364 }
 0x267   : > { %v771_v23 = vmul.f32 %v763_v50, %v1763_v24  ;;  %v764_v56 = vsub.f32 1.0, %v756_v46  ;;  %v702_v62 = vmul.f32 %v1803_v41, %v694_v51  ;;  %v688_v40 = vmul.f32 %v1812_v2, %v680_v52 }
 0x268   : > { %v770_v53 = vmul.f32 %v762_v37, %v1793_v8  ;;  %v777_v55 = vadd.f32 1.0, %v769_v34  ;;  %v757_v8 = vmul.f32 %v1359_v29, %v717_v57  ;;  %v719_v63 = vmul.f32 %v1797_v28, %v711_v58 }
 0x269   : > { %v772_v24 = vmul.f32 %v764_v56, %v604_v60  ;;  %v779_v0 = vadd.f32 1.0, %v771_v23  ;;  %v710_v27 = vadd.f32 0.2548296, %v702_v62  ;;  %v696_v48 = vadd.f32 -0.28449672, %v688_v40  ;;  %v1367_v40 = vld [vmem:[%s1508_s22 + $0x8] sm:$0xff] }
 0x26a   : > { %v778_v61 = vadd.f32 1.0, %v770_v53  ;;  %v785_v3 = vmul.f32 %v777_v55, %v1742_v9  ;;  %v765_v7 = vsub.f32 1.0, %v757_v8  ;;  %v759_v11 = vmul.f32 %v1361_v36, %v719_v63 }
 0x26b   : > { %v780_v54 = vadd.f32 1.0, %v772_v24  ;;  %v579_v30 = vmul.f32 0.5, %v1723_v42  ;;  %v718_v12 = vmul.f32 %v1803_v41, %v710_v27  ;;  %v704_v13 = vmul.f32 %v1812_v2, %v696_v48 }
 0x26c   : > { %v786_v6 = vmul.f32 %v778_v61, %v1747_v14  ;;  %v605_v28 = vsel %vm597_vm4, 1.0, %v1412_v22  ;;  %v767_v41 = vsub.f32 1.0, %v759_v11  ;;  %v582_v32 = vmul.f32 0.5, %v1739_v44 }
 0x26d   : > { %v788_v14 = vmul.f32 %v780_v54, %v1749_v15  ;;  %v787_v16 = vmul.f32 %v779_v0, %v579_v30  ;;  %v758_v9 = vmul.f32 %v1363_v59, %v718_v12  ;;  %v712_v18 = vadd.f32 0.2548296, %v704_v13 }
 0x26e   : > { %928 = vmatprep.mubr.f32.mxu0 %v786_v6  ;;  %v773_v42 = vmul.f32 %v765_v7, %v605_v28  ;;  %v607_v15 = vsel %vm599_vm6, 1.0, %v1412_v22  ;;  %v581_v34 = vmul.f32 0.5, %v1732_v1  ;;  %v608_v26 = vsel %vm600_vm7, 1.0, %v1412_v22  ;;  %v1098_v22 = vld [vmem:[%s1876_s6] ss:$0 sm:$0xff] }
 0x26f   : > { %929 = vmatmul.mubr.f32.vlgmr.msra.gmra.mrb[4].mxu0 %v785_v3  ;;  %1003 = vmatprep.mubr.f32.mxu1 %v788_v14  ;;  %v766_v20 = vsub.f32 1.0, %v758_v9  ;;  %v720_v25 = vmul.f32 %v1812_v2, %v712_v18  ;;  %v775_v31 = vmul.f32 %v767_v41, %v607_v15  ;;  %v584_v37 = vmul.f32 0.5, %v1755_v21 }
 0x270   : > { %1004 = vmatmul.mubr.f32.vlgmr.msra.gmra.mrb[4].mxu1 %v787_v16  ;;  %v781_v50 = vadd.f32 1.0, %v773_v42  ;;  %v583_v39 = vmul.f32 0.5, %v1737_v5  ;;  %v1366_v5 = vld [vmem:[%s1508_s22] sm:$0xff] }
 0x271   : > { %v774_v29 = vmul.f32 %v766_v20, %v606_v4  ;;  %v760_v17 = vmul.f32 %v1365_v19, %v720_v25  ;;  %v783_v36 = vadd.f32 1.0, %v775_v31 }
 0x272   : > { %v789_v35 = vmul.f32 %v781_v50, %v581_v34 }
 0x273   : > { %v782_v10 = vadd.f32 1.0, %v774_v29  ;;  %v768_v33 = vsub.f32 1.0, %v760_v17  ;;  %v791_v43 = vmul.f32 %v783_v36, %v583_v39 }
 0x275   : > { %v790_v45 = vmul.f32 %v782_v10, %v582_v32  ;;  %v776_v2 = vmul.f32 %v768_v33, %v608_v26 }
 0x277   : > { %933 = vmatprep.mubr.f32.mxu0 %v790_v45  ;;  %v784_v38 = vadd.f32 1.0, %v776_v2 }
 0x278   : > { %934 = vmatmul.mubr.f32.gmra.mrb[6].mxu0 %v789_v35 }
 0x279   : > { %v792_v44 = vmul.f32 %v784_v38, %v584_v37 }
 0x27b   : > { %1008 = vmatprep.mubr.f32.mxu1 %v792_v44 }
 0x27c   : > { %1009 = vmatmul.mubr.f32.gmra.mrb[6].mxu1 %v791_v43 }
 0x342   : > { %v1135_v1 = vpop.f32.mrb[4].mxu0 }
 0x343   : > { %v1136_v46 = vpop.f32.mrb[5].mxu0  ;;  %v1173_v49 = vpop.f32.mrb[4].mxu1 }
 0x344   : > { %v1137_v47 = vadd.f32 %v1136_v46, %v1135_v1  ;;  %v1174_v23 = vpop.f32.mrb[5].mxu1 }
 0x345   : > { %v1175_v53 = vadd.f32 %v1174_v23, %v1173_v49 }
 0x346   : > { %v931_v21 = vadd.f32 %v1137_v47, %v1098_v22 }
 0x348   : > { %v1006_v51 = vadd.f32 %v1175_v53, %v931_v21 }
 0x34a   : > { %v1014_v52 = vadd.f32 %v1366_v5, %v1006_v51 }
 0x34b   : > { %v1138_v55 = vpop.f32.mrb[6].mxu0 }
 0x34c   : > { %1016 = vst [vmem:[%s293_s30] sm:$0xff] %v1014_v52  ;;  %v1139_v56 = vpop.f32.mrb[7].mxu0 }
 0x34d   : > { %v1140_v57 = vadd.f32 %v1139_v56, %v1138_v55 }
 0x34f   : > { %v1176_v58 = vpop.f32.mrb[6].mxu1  ;;  %v936_v59 = vadd.f32 %v1140_v57, %v1098_v22 }
 0x350   : > { %v1177_v60 = vpop.f32.mrb[7].mxu1 }
 0x351   : > { %v1178_v61 = vadd.f32 %v1177_v60, %v1176_v58 }
 0x353   : > { %v1011_v62 = vadd.f32 %v1178_v61, %v936_v59 }
 0x355   : > { %v1015_v24 = vadd.f32 %v1367_v40, %v1011_v62 }
 0x357   : > { %1017 = vst [vmem:[%s293_s30 + $0x8] sm:$0xff] %v1015_v24 }
 0x358 PF: > { %s18_s24 = sadd.s32 1, %s1406_s24  }
 0x359   : > { %p15_p3 = scmp.ge.s32.totalorder %s18_s24, 4  }
 0x35b   :  { %17 = sbr.rel (!%p15_p3) target bundleno = 1 (0x1), region = 83 }
 0x362   :  { %1039 = vsyncpa [#allocation3], 1 }
 0x363   :  { %1041 = vsyncpa [#allocation3 + $0x1], 1 }

// kernel: transformer_block_forward.11
= control target key start
LH: loop header
LB: loop body
LE: loop exit
PB: predicated region body
PF: predicated region fallthrough
CT: control target
= control target key end

     0   :  { %s1376_s24 = smov 0   ;;  %s1946_s0 = inlined_call_operand.vmem [shape: f32[2,16,128], index: 0, kind: input, shape index: {}]   ;;  %s1947_s1 = inlined_call_operand.vmem [shape: f32[1,128], index: 1, kind: input, shape index: {}]   ;;  %s1948_s2 = inlined_call_operand.vmem [shape: f32[1,128], index: 2, kind: input, shape index: {}]   ;;  %s1949_s3 = inlined_call_operand.vmem [shape: f32[128,512], index: 3, kind: input, shape index: {}]   ;;  %s1950_s4 = inlined_call_operand.vmem [shape: f32[1,512], index: 4, kind: input, shape index: {}]   ;;  %s1951_s5 = inlined_call_operand.vmem [shape: f32[512,128], index: 5, kind: input, shape index: {}]   ;;  %s1952_s6 = inlined_call_operand.vmem [shape: f32[1,128], index: 6, kind: input, shape index: {}]   ;;  %s1953_s7 = inlined_call_operand.vmem [shape: f32[2,16,128], index: 7, kind: output, shape index: {}]  }
   0x1 LB: > { %s1058_s25 = sadd.s32 4294967295, %s1332_s24   ;;  %p1062_p0 = scmp.ge.s32.totalorder %s1332_s24, 1  ;;  %s1332_s24 = sphi %s1376_s24, %s17_s24  }
   0x2   : > { %p237_p1 = scmp.lt.s32.totalorder %s1332_s24, 3 }
   0x4   : > { %p238_p2 = pnand %p1062_p0, %p237_p1 }
   0x5   : > { %p269_p3 = scmp.lt.s32.totalorder (!%p238_p2), %s1058_s25, 1  ;;  %v323_v2 = vld [vmem:[%s1949_s3 + $0x8] sm:$0xff] (!%p238_p2)  ;;  %v325_v4 = vld [vmem:[%s1949_s3 + $0x18] sm:$0xff] (!%p238_p2)  ;;  %v322_v7 = vld [vmem:[%s1949_s3] sm:$0xff] (!%p238_p2) }
   0x6   : > { %241 = sbr.rel (%p238_p2) target bundleno = 825 (0x339), region = 48  ;;  %v327_v3 = vld [vmem:[%s1949_s3 + $0x28] sm:$0xff] (!%p238_p2)  ;;  %v329_v6 = vld [vmem:[%s1949_s3 + $0x38] sm:$0xff] (!%p238_p2)  ;;  %v326_v8 = vld [vmem:[%s1949_s3 + $0x20] sm:$0xff] (!%p238_p2) }
   0x7   : > { %v1150_v5 = vpack.c.bf16 (!%p238_p2), %v327_v3, %v323_v2  ;;  %v1182_v9 = vpack.c.bf16 (!%p238_p2), %v329_v6, %v325_v4  ;;  %v1152_v10 = vpack.c.bf16 (!%p238_p2), %v326_v8, %v322_v7  ;;  %v324_v11 = vld [vmem:[%s1949_s3 + $0x10] sm:$0xff] (!%p238_p2)  ;;  %v331_v13 = vld [vmem:[%s1949_s3 + $0x48] sm:$0xff] (!%p238_p2)  ;;  %v333_v16 = vld [vmem:[%s1949_s3 + $0x58] sm:$0xff] (!%p238_p2) }
   0x8   : > { %v328_v12 = vld [vmem:[%s1949_s3 + $0x30] sm:$0xff] (!%p238_p2)  ;;  %v335_v15 = vld [vmem:[%s1949_s3 + $0x68] sm:$0xff] (!%p238_p2)  ;;  %v337_v17 = vld [vmem:[%s1949_s3 + $0x78] sm:$0xff] (!%p238_p2) }
   0x9   : > { %1151 = vmatprep.subr.bf16.mxu0 (!%p238_p2), %v1150_v5  ;;  %v1184_v14 = vpack.c.bf16 (!%p238_p2), %v328_v12, %v324_v11  ;;  %1183 = vmatprep.subr.bf16.mxu1 (!%p238_p2), %v1182_v9  ;;  %v1154_v18 = vpack.c.bf16 (!%p238_p2), %v335_v15, %v331_v13  ;;  %v1186_v19 = vpack.c.bf16 (!%p238_p2), %v337_v17, %v333_v16  ;;  %v330_v20 = vld [vmem:[%s1949_s3 + $0x40] sm:$0xff] (!%p238_p2)  ;;  %v332_v22 = vld [vmem:[%s1949_s3 + $0x50] sm:$0xff] (!%p238_p2)  ;;  %v339_v25 = vld [vmem:[%s1949_s3 + $0x88] sm:$0xff] (!%p238_p2) }
   0xa   : > { %1153 = vmatpush1.bf16.msra.mxu0 (!%p238_p2), %v1152_v10  ;;  %v334_v21 = vld [vmem:[%s1949_s3 + $0x60] sm:$0xff] (!%p238_p2)  ;;  %v336_v24 = vld [vmem:[%s1949_s3 + $0x70] sm:$0xff] (!%p238_p2)  ;;  %v343_v26 = vld [vmem:[%s1949_s3 + $0xa8] sm:$0xff] (!%p238_p2) }
   0xb   : > { %1185 = vmatpush1.bf16.msra.mxu1 (!%p238_p2), %v1184_v14  ;;  %v1156_v23 = vpack.c.bf16 (!%p238_p2), %v334_v21, %v330_v20  ;;  %1155 = vmatprep.subr.bf16.mxu0 (!%p238_p2), %v1154_v18  ;;  %v1188_v27 = vpack.c.bf16 (!%p238_p2), %v336_v24, %v332_v22  ;;  %v1158_v28 = vpack.c.bf16 (!%p238_p2), %v343_v26, %v339_v25  ;;  %v341_v29 = vld [vmem:[%s1949_s3 + $0x98] sm:$0xff] (!%p238_p2)  ;;  %v338_v31 = vld [vmem:[%s1949_s3 + $0x80] sm:$0xff] (!%p238_p2)  ;;  %v340_v34 = vld [vmem:[%s1949_s3 + $0x90] sm:$0xff] (!%p238_p2)  ;;  %v1334_v22 = vmov (!%p238_p2), 0.0  }
   0xc   : > { %1187 = vmatprep.subr.bf16.mxu1 (!%p238_p2), %v1186_v19  ;;  %v345_v30 = vld [vmem:[%s1949_s3 + $0xb8] sm:$0xff] (!%p238_p2)  ;;  %v342_v33 = vld [vmem:[%s1949_s3 + $0xa0] sm:$0xff] (!%p238_p2)  ;;  %v344_v35 = vld [vmem:[%s1949_s3 + $0xb0] sm:$0xff] (!%p238_p2)  ;;  %472 = vmatprep.mubr.f32.mxu0 (!%p238_p2), %v1334_v22 }
   0xd   : > { %s1955_s25 = smov (!%p269_p3, %s1058_s25), 1  ;;  %v1190_v32 = vpack.c.bf16 %v345_v30, %v341_v29  ;;  %v1160_v36 = vpack.c.bf16 %v342_v33, %v338_v31  ;;  %v1192_v37 = vpack.c.bf16 %v344_v35, %v340_v34  ;;  %v347_v46 = vld [vmem:[%s1949_s3 + $0xc8] sm:$0xff]  ;;  %v349_v48 = vld [vmem:[%s1949_s3 + $0xd8] sm:$0xff]  ;;  %v346_v51 = vld [vmem:[%s1949_s3 + $0xc0] sm:$0xff]  ;;  %549 = vmatprep.mubr.f32.mxu1 %v1334_v22 }
   0xe   : > { %s1072_s26 = sshll.u32 %s1955_s25, 4  ;;  %1157 = vmatpush1.bf16.msra.mxu0 %v1156_v23  ;;  %v351_v47 = vld [vmem:[%s1949_s3 + $0xe8] sm:$0xff]  ;;  %v353_v50 = vld [vmem:[%s1949_s3 + $0xf8] sm:$0xff]  ;;  %v350_v52 = vld [vmem:[%s1949_s3 + $0xe0] sm:$0xff] }
   0xf   : > { %s1392_s29 = scalar_lea.vmem %s1946_s0, %s1072_s26  ;;  %1189 = vmatpush1.bf16.msra.mxu1 %v1188_v27  ;;  %1159 = vmatprep.subr.bf16.mxu0 %v1158_v28  ;;  %v1162_v49 = vpack.c.bf16 %v351_v47, %v347_v46  ;;  %v1194_v53 = vpack.c.bf16 %v353_v50, %v349_v48  ;;  %v1164_v54 = vpack.c.bf16 %v350_v52, %v346_v51  ;;  %v348_v55 = vld [vmem:[%s1949_s3 + $0xd0] sm:$0xff]  ;;  %v355_v58 = vld [vmem:[%s1949_s3 + $0x108] sm:$0xff]  ;;  %v357_v60 = vld [vmem:[%s1949_s3 + $0x118] sm:$0xff]  ;;  %s278_s30 = scalar_lea.vmem %s1953_s7, %s1072_s26 }
  0x10   : > { %v279_v0 = vld [vmem:[%s1392_s29] sm:$0xff]  ;;  %v280_v1 = vld [vmem:[%s1392_s29 + $0x8] sm:$0xff]  ;;  %1191 = vmatprep.subr.bf16.mxu1 %v1190_v32  ;;  %v352_v56 = vld [vmem:[%s1949_s3 + $0xf0] sm:$0xff] }
  0x11   : > { %283 = vadd.xlane.f32.xlu0 %v279_v0  ;;  %v1196_v57 = vpack.c.bf16 %v352_v56, %v348_v55  ;;  %v359_v59 = vld [vmem:[%s1949_s3 + $0x128] sm:$0xff]  ;;  %v361_v62 = vld [vmem:[%s1949_s3 + $0x138] sm:$0xff]  ;;  %v354_v63 = vld [vmem:[%s1949_s3 + $0x100] sm:$0xff] }
  0x12   : > { %1161 = vmatpush1.bf16.msra.mxu0 %v1160_v36  ;;  %v1166_v61 = vpack.c.bf16 %v359_v59, %v355_v58  ;;  %v356_v3 = vld [vmem:[%s1949_s3 + $0x110] sm:$0xff]  ;;  %v363_v6 = vld [vmem:[%s1949_s3 + $0x148] sm:$0xff]  ;;  %v365_v8 = vld [vmem:[%s1949_s3 + $0x158] sm:$0xff] }
  0x13   : > { %1193 = vmatpush1.bf16.msra.mxu1 %v1192_v37  ;;  %1163 = vmatprep.subr.bf16.mxu0 %v1162_v49  ;;  %v360_v4 = vld [vmem:[%s1949_s3 + $0x130] sm:$0xff]  ;;  %v367_v7 = vld [vmem:[%s1949_s3 + $0x168] sm:$0xff]  ;;  %v369_v10 = vld [vmem:[%s1949_s3 + $0x178] sm:$0xff] }
  0x14   : > { %1195 = vmatprep.subr.bf16.mxu1 %v1194_v53  ;;  %v1200_v5 = vpack.c.bf16 %v360_v4, %v356_v3  ;;  %v1170_v9 = vpack.c.bf16 %v367_v7, %v363_v6  ;;  %v362_v11 = vld [vmem:[%s1949_s3 + $0x140] sm:$0xff]  ;;  %v1202_v13 = vpack.c.bf16 %v369_v10, %v365_v8  ;;  %v364_v15 = vld [vmem:[%s1949_s3 + $0x150] sm:$0xff]  ;;  %v371_v17 = vld [vmem:[%s1949_s3 + $0x188] sm:$0xff] }
  0x15   : > { %285 = vadd.xlane.f32.xlu0 %v280_v1  ;;  %v366_v12 = vld [vmem:[%s1949_s3 + $0x160] sm:$0xff]  ;;  %v368_v16 = vld [vmem:[%s1949_s3 + $0x170] sm:$0xff]  ;;  %v375_v19 = vld [vmem:[%s1949_s3 + $0x1a8] sm:$0xff] }
  0x16   : > { %1165 = vmatpush1.bf16.msra.mxu0 %v1164_v54  ;;  %v1172_v14 = vpack.c.bf16 %v366_v12, %v362_v11  ;;  %v1204_v18 = vpack.c.bf16 %v368_v16, %v364_v15  ;;  %v373_v20 = vld [vmem:[%s1949_s3 + $0x198] sm:$0xff]  ;;  %v1174_v23 = vpack.c.bf16 %v375_v19, %v371_v17  ;;  %v370_v25 = vld [vmem:[%s1949_s3 + $0x180] sm:$0xff]  ;;  %v372_v27 = vld [vmem:[%s1949_s3 + $0x190] sm:$0xff] }
  0x17   : > { %1197 = vmatpush1.bf16.msra.mxu1 %v1196_v57  ;;  %1167 = vmatprep.subr.bf16.mxu0 %v1166_v61  ;;  %v377_v21 = vld [vmem:[%s1949_s3 + $0x1b8] sm:$0xff]  ;;  %v374_v26 = vld [vmem:[%s1949_s3 + $0x1a0] sm:$0xff]  ;;  %v376_v29 = vld [vmem:[%s1949_s3 + $0x1b0] sm:$0xff] }
  0x18   : > { %v1206_v24 = vpack.c.bf16 %v377_v21, %v373_v20  ;;  %v1176_v28 = vpack.c.bf16 %v374_v26, %v370_v25  ;;  %v379_v30 = vld [vmem:[%s1949_s3 + $0x1c8] sm:$0xff]  ;;  %v1208_v32 = vpack.c.bf16 %v376_v29, %v372_v27  ;;  %v381_v34 = vld [vmem:[%s1949_s3 + $0x1d8] sm:$0xff]  ;;  %v378_v36 = vld [vmem:[%s1949_s3 + $0x1c0] sm:$0xff] }
  0x19   : > { %v383_v31 = vld [vmem:[%s1949_s3 + $0x1e8] sm:$0xff]  ;;  %v385_v35 = vld [vmem:[%s1949_s3 + $0x1f8] sm:$0xff]  ;;  %v1067_v52 = vld [vmem:[%s1947_s1] ss:$0 sm:$0xff] }
  0x1a   : > { %v1178_v33 = vpack.c.bf16 %v383_v31, %v379_v30  ;;  %v1210_v37 = vpack.c.bf16 %v385_v35, %v381_v34  ;;  %v1068_v54 = vld [vmem:[%s1948_s2] ss:$0 sm:$0xff]  ;;  %v795_v61 = vld [vmem:[%s1951_s5 + $0x88] sm:$0xff]  ;;  %v796_v7 = vld [vmem:[%s1951_s5 + $0x90] sm:$0xff] }
  0x1b   : > { %v810_v4 = vld [vmem:[%s1951_s5 + $0x100] sm:$0xff]  ;;  %v797_v8 = vld [vmem:[%s1951_s5 + $0x98] sm:$0xff]  ;;  %v780_v12 = vld [vmem:[%s1951_s5 + $0x10] sm:$0xff] }
  0x1c   : > { %v1218_v10 = vpack.c.bf16 %v797_v8, %v796_v7  ;;  %v829_v11 = vld [vmem:[%s1951_s5 + $0x198] sm:$0xff]  ;;  %v812_v16 = vld [vmem:[%s1951_s5 + $0x110] sm:$0xff]  ;;  %v798_v19 = vld [vmem:[%s1951_s5 + $0xa0] sm:$0xff] }
  0x1d   : > { %v813_v17 = vld [vmem:[%s1951_s5 + $0x118] sm:$0xff]  ;;  %v799_v20 = vld [vmem:[%s1951_s5 + $0xa8] sm:$0xff]  ;;  %v830_v21 = vld [vmem:[%s1951_s5 + $0x1a0] sm:$0xff] }
  0x1e   : > { %v783_v25 = vld [vmem:[%s1951_s5 + $0x28] sm:$0xff]  ;;  %v800_v31 = vld [vmem:[%s1951_s5 + $0xb0] sm:$0xff]  ;;  %v833_v35 = vld [vmem:[%s1951_s5 + $0x1b8] sm:$0xff] }
  0x1f   : > { %v815_v29 = vld [vmem:[%s1951_s5 + $0x128] sm:$0xff]  ;;  %v790_v8 = vld [vmem:[%s1951_s5 + $0x60] sm:$0xff] }
  0x20   : > { %v839_v7 = vld [vmem:[%s1951_s5 + $0x1e8] sm:$0xff] }
  0x9e   : > { %v284_v38 = vpop.xlane.xlu0 %283 }
  0x9f   : > { %v288_v39 = vmul.f32 0.0078125, %v284_v38  ;;  %v382_v38 = vld [vmem:[%s1949_s3 + $0x1e0] sm:$0xff] }
  0xa1   : > { %v1468_v40 = vsub.f32 %v279_v0, %v288_v39  ;;  %v358_v0 = vld [vmem:[%s1949_s3 + $0x120] sm:$0xff]  ;;  %v380_v39 = vld [vmem:[%s1949_s3 + $0x1d0] sm:$0xff] }
  0xa2   : > { %v286_v41 = vpop.xlane.xlu0 %285  ;;  %v1168_v2 = vpack.c.bf16 %v358_v0, %v354_v63  ;;  %v827_v63 = vld [vmem:[%s1951_s5 + $0x188] sm:$0xff]  ;;  %v778_v0 = vld [vmem:[%s1951_s5] sm:$0xff] }
  0xa3   : > { %v289_v42 = vmul.f32 0.0078125, %v286_v41  ;;  %v292_v43 = vmul.f32 %v1468_v40, %v1468_v40  ;;  %v384_v41 = vld [vmem:[%s1949_s3 + $0x1f0] sm:$0xff] }
  0xa4   : > { %1169 = vmatpush1.bf16.msra.mxu0 %v1168_v2 }
  0xa5   : > { %v1472_v44 = vsub.f32 %v280_v1, %v289_v42  ;;  %294 = vadd.xlane.f32.xlu1 %v292_v43  ;;  %v1198_v1 = vpack.c.bf16 %v361_v62, %v357_v60  ;;  %1171 = vmatprep.subr.bf16.mxu0 %v1170_v9  ;;  %v1180_v42 = vpack.c.bf16 %v382_v38, %v378_v36  ;;  %v828_v9 = vld [vmem:[%s1951_s5 + $0x190] sm:$0xff] }
  0xa6   : > { %v1212_v43 = vpack.c.bf16 %v384_v41, %v380_v39  ;;  %v784_v36 = vld [vmem:[%s1951_s5 + $0x30] sm:$0xff] }
  0xa7   : > { %v293_v45 = vmul.f32 %v1472_v44, %v1472_v44  ;;  %1199 = vmatprep.subr.bf16.mxu1 %v1198_v1  ;;  %v779_v1 = vld [vmem:[%s1951_s5 + $0x8] sm:$0xff]  ;;  %v816_v41 = vld [vmem:[%s1951_s5 + $0x130] sm:$0xff] }
  0xa8   : > { %1201 = vmatpush1.bf16.msra.mxu1 %v1200_v5  ;;  %1173 = vmatpush1.bf16.msra.mxu0 %v1172_v14  ;;  %v1216_v3 = vpack.c.bf16 %v779_v1, %v778_v0  ;;  %v811_v5 = vld [vmem:[%s1951_s5 + $0x108] sm:$0xff]  ;;  %v1250_v14 = vpack.c.bf16 %v829_v11, %v828_v9  ;;  %v821_v1 = vld [vmem:[%s1951_s5 + $0x158] sm:$0xff]  ;;  %v822_v11 = vld [vmem:[%s1951_s5 + $0x160] sm:$0xff] }
  0xa9   : > { %296 = vadd.xlane.f32.xlu1 %v293_v45  ;;  %1203 = vmatprep.subr.bf16.mxu1 %v1202_v13  ;;  %v1248_v6 = vpack.c.bf16 %v811_v5, %v810_v4  ;;  %v781_v13 = vld [vmem:[%s1951_s5 + $0x18] sm:$0xff] }
  0xaa   : > { %1175 = vmatprep.subr.bf16.mxu0 %v1174_v23  ;;  %v1220_v15 = vpack.c.bf16 %v781_v13, %v780_v12  ;;  %v831_v23 = vld [vmem:[%s1951_s5 + $0x1a8] sm:$0xff] }
  0xab   : > { %v1254_v26 = vpack.c.bf16 %v831_v23, %v830_v21  ;;  %v823_v12 = vld [vmem:[%s1951_s5 + $0x168] sm:$0xff]  ;;  %v793_v21 = vld [vmem:[%s1951_s5 + $0x78] sm:$0xff]  ;;  %v824_v23 = vld [vmem:[%s1951_s5 + $0x170] sm:$0xff] }
  0xac   : > { %1205 = vmatpush1.bf16.msra.mxu1 %v1204_v18  ;;  %1177 = vmatpush1.bf16.msra.mxu0 %v1176_v28  ;;  %v1252_v18 = vpack.c.bf16 %v813_v17, %v812_v16  ;;  %v814_v28 = vld [vmem:[%s1951_s5 + $0x120] sm:$0xff]  ;;  %v840_v16 = vld [vmem:[%s1951_s5 + $0x1f0] sm:$0xff]  ;;  %v1272_v17 = vpack.c.bf16 %v823_v12, %v822_v11 }
  0xad   : > { %1207 = vmatprep.subr.bf16.mxu1 %v1206_v24  ;;  %1179 = vmatprep.subr.bf16.mxu0 %v1178_v33  ;;  %v782_v24 = vld [vmem:[%s1951_s5 + $0x20] sm:$0xff]  ;;  %v1256_v30 = vpack.c.bf16 %v815_v29, %v814_v28  ;;  %v832_v33 = vld [vmem:[%s1951_s5 + $0x1b0] sm:$0xff] }
  0xae   : > { %v1224_v27 = vpack.c.bf16 %v783_v25, %v782_v24  ;;  %v1258_v38 = vpack.c.bf16 %v833_v35, %v832_v33  ;;  %v825_v24 = vld [vmem:[%s1951_s5 + $0x178] sm:$0xff] }
  0xb0   : > { %1209 = vmatpush1.bf16.msra.mxu1 %v1208_v32  ;;  %1181 = vmatpush1.bf16.msra.mxu0 %v1180_v42  ;;  %v801_v32 = vld [vmem:[%s1951_s5 + $0xb8] sm:$0xff] }
  0xb1   : > { %1211 = vmatprep.subr.bf16.mxu1 %v1210_v37  ;;  %v1226_v34 = vpack.c.bf16 %v801_v32, %v800_v31  ;;  %v785_v37 = vld [vmem:[%s1951_s5 + $0x38] sm:$0xff]  ;;  %v386_v31 = vld [vmem:[%s1950_s4] sm:$0xf] }
  0xb2   : > { %v1228_v39 = vpack.c.bf16 %v785_v37, %v784_v36  ;;  %v817_v42 = vld [vmem:[%s1951_s5 + $0x138] sm:$0xff] }
  0xb4   : > { %1213 = vmatpush1.bf16.msra.mxu1 %v1212_v43  ;;  %v1260_v43 = vpack.c.bf16 %v817_v42, %v816_v41 }
 0x132   : > { %v295_v45 = vpop.xlane.xlu1 %294 }
 0x133   : > { %v298_v46 = vmul.f32 0.0078125, %v295_v45  ;;  %v802_v45 = vld [vmem:[%s1951_s5 + $0xc0] sm:$0xff] }
 0x135   : > { %v300_v47 = vadd.f32 1e-05, %v298_v46  ;;  %v803_v46 = vld [vmem:[%s1951_s5 + $0xc8] sm:$0xff] }
 0x136   : > { %v297_v48 = vpop.xlane.xlu1 %296 }
 0x137   : > { %1288 = vrsqrt.f32 %v300_v47  ;;  %v299_v49 = vmul.f32 0.0078125, %v297_v48  ;;  %v834_v47 = vld [vmem:[%s1951_s5 + $0x1c0] sm:$0xff]  ;;  %v1230_v48 = vpack.c.bf16 %v803_v46, %v802_v45 }
 0x139   : > { %v301_v50 = vadd.f32 1e-05, %v299_v49  ;;  %v835_v49 = vld [vmem:[%s1951_s5 + $0x1c8] sm:$0xff] }
 0x13b   : > { %1290 = vrsqrt.f32 %v301_v50  ;;  %v786_v50 = vld [vmem:[%s1951_s5 + $0x40] sm:$0xff] }
 0x141   : > { %v1289_v51 = vpop.eup %1288 }
 0x142   : > { %v304_v53 = vmul.f32 %v1289_v51, %v1468_v40  ;;  %v794_v40 = vld [vmem:[%s1951_s5 + $0x80] sm:$0xff]  ;;  %v787_v51 = vld [vmem:[%s1951_s5 + $0x48] sm:$0xff] }
 0x143   : > { %v1214_v62 = vpack.c.bf16 %v795_v61, %v794_v40 }
 0x144   : > { %v312_v55 = vmul.f32 %v1067_v52, %v304_v53  ;;  %v1232_v53 = vpack.c.bf16 %v787_v51, %v786_v50 }
 0x145   : > { %v1291_v56 = vpop.eup %1290  ;;  %1215 = vmatprep.subr.bf16.mxu0 %v1214_v62  ;;  %v789_v62 = vld [vmem:[%s1951_s5 + $0x58] sm:$0xff] }
 0x146   : > { %v320_v57 = vadd.f32 %v1068_v54, %v312_v55  ;;  %v305_v58 = vmul.f32 %v1291_v56, %v1472_v44  ;;  %v826_v44 = vld [vmem:[%s1951_s5 + $0x180] sm:$0xff]  ;;  %v819_v55 = vld [vmem:[%s1951_s5 + $0x148] sm:$0xff]  ;;  %v804_v56 = vld [vmem:[%s1951_s5 + $0xd0] sm:$0xff] }
 0x147   : > { %v1246_v2 = vpack.c.bf16 %v827_v63, %v826_v44  ;;  %v788_v44 = vld [vmem:[%s1951_s5 + $0x50] sm:$0xff] }
 0x148   : > { %473 = vmatmul.mubr.f32.vlgmr.msra.gmra.mrb[0].mxu0 %v320_v57  ;;  %550 = vmatmul.mubr.f32.vlgmr.msra.gmra.mrb[0].mxu1 %v320_v57  ;;  %v313_v59 = vmul.f32 %v1067_v52, %v305_v58  ;;  %v1262_v52 = vpack.c.bf16 %v835_v49, %v834_v47  ;;  %v805_v58 = vld [vmem:[%s1951_s5 + $0xd8] sm:$0xff]  ;;  %v820_v63 = vld [vmem:[%s1951_s5 + $0x150] sm:$0xff]  ;;  %v1236_v0 = vpack.c.bf16 %v789_v62, %v788_v44 }
 0x149   : > { %478 = vmatprep.mubr.f32.mxu0 %v1334_v22  ;;  %555 = vmatprep.mubr.f32.mxu1 %v1334_v22  ;;  %v1222_v22 = vpack.c.bf16 %v799_v20, %v798_v19  ;;  %v1234_v40 = vpack.c.bf16 %v805_v58, %v804_v56  ;;  %v1268_v4 = vpack.c.bf16 %v821_v1, %v820_v63  ;;  %v841_v19 = vld [vmem:[%s1951_s5 + $0x1f8] sm:$0xff]  ;;  %v792_v20 = vld [vmem:[%s1951_s5 + $0x70] sm:$0xff] }
 0x14a   : > { %v321_v60 = vadd.f32 %v1068_v54, %v313_v59  ;;  %1247 = vmatprep.subr.bf16.mxu1 %v1246_v2  ;;  %1217 = vmatpush3.bf16.msra.mxu0 %v1216_v3  ;;  %v818_v54 = vld [vmem:[%s1951_s5 + $0x140] sm:$0xff]  ;;  %v836_v59 = vld [vmem:[%s1951_s5 + $0x1d0] sm:$0xff]  ;;  %v807_v3 = vld [vmem:[%s1951_s5 + $0xe8] sm:$0xff]  ;;  %v1244_v25 = vpack.c.bf16 %v793_v21, %v792_v20 }
 0x14b   : > { %1249 = vmatpush3.bf16.msra.mxu1 %v1248_v6  ;;  %1219 = vmatprep.subr.bf16.mxu0 %v1218_v10  ;;  %v1264_v57 = vpack.c.bf16 %v819_v55, %v818_v54  ;;  %v806_v2 = vld [vmem:[%s1951_s5 + $0xe0] sm:$0xff]  ;;  %v791_v10 = vld [vmem:[%s1951_s5 + $0x68] sm:$0xff] }
 0x14c   : > { %479 = vmatmul.mubr.f32.gmra.mrb[2].mxu0 %v321_v60  ;;  %556 = vmatmul.mubr.f32.gmra.mrb[2].mxu1 %v321_v60  ;;  %v837_v60 = vld [vmem:[%s1951_s5 + $0x1d8] sm:$0xff]  ;;  %v1238_v5 = vpack.c.bf16 %v807_v3, %v806_v2  ;;  %v838_v6 = vld [vmem:[%s1951_s5 + $0x1e0] sm:$0xff]  ;;  %v1240_v13 = vpack.c.bf16 %v791_v10, %v790_v8 }
 0x14d   : > { %1251 = vmatprep.subr.bf16.mxu1 %v1250_v14  ;;  %v1266_v61 = vpack.c.bf16 %v837_v60, %v836_v59  ;;  %v1270_v9 = vpack.c.bf16 %v839_v7, %v838_v6  ;;  %v808_v14 = vld [vmem:[%s1951_s5 + $0xf0] sm:$0xff] }
 0x14e   : > { %1221 = vmatpush3.bf16.msra.mxu0 %v1220_v15  ;;  %v809_v15 = vld [vmem:[%s1951_s5 + $0xf8] sm:$0xff] }
 0x14f   : > { %1253 = vmatpush3.bf16.msra.mxu1 %v1252_v18  ;;  %1223 = vmatprep.subr.bf16.mxu0 %v1222_v22  ;;  %v1242_v18 = vpack.c.bf16 %v809_v15, %v808_v14  ;;  %v1274_v22 = vpack.c.bf16 %v841_v19, %v840_v16 }
 0x150   : > { %1255 = vmatprep.subr.bf16.mxu1 %v1254_v26  ;;  %v1276_v26 = vpack.c.bf16 %v825_v24, %v824_v23 }
 0x152   : > { %1225 = vmatpush3.bf16.msra.mxu0 %v1224_v27  ;;  %v388_v27 = vlaneseq }
 0x153   : > { %1257 = vmatpush3.bf16.msra.mxu1 %v1256_v30  ;;  %1227 = vmatprep.subr.bf16.mxu0 %v1226_v34 }
 0x154   : > { %1259 = vmatprep.subr.bf16.mxu1 %v1258_v38  ;;  %v389_v28 = vshrl.u32 %v388_v27, 7 }
 0x156   : > { %1229 = vmatpush3.bf16.msra.mxu0 %v1228_v39  ;;  %v390_v29 = vsub.s32 0, %v389_v28  ;;  %v398_v30 = vsub.s32 2, %v389_v28  ;;  %v394_v32 = vsub.s32 1, %v389_v28  ;;  %v402_v33 = vsub.s32 3, %v389_v28 }
 0x157   : > { %1261 = vmatpush3.bf16.msra.mxu1 %v1260_v43  ;;  %1231 = vmatprep.subr.bf16.mxu0 %v1230_v48 }
 0x158   : > { %1263 = vmatprep.subr.bf16.mxu1 %v1262_v52  ;;  %v391_v34 = vrot.slane %v386_v31, %v390_v29  ;;  %v399_v35 = vrot.slane %v386_v31, %v398_v30  ;;  %v395_v36 = vrot.slane %v386_v31, %v394_v32  ;;  %v403_v37 = vrot.slane %v386_v31, %v402_v33 }
 0x15a   : > { %1233 = vmatpush3.bf16.msra.mxu0 %v1232_v53 }
 0x15b   : > { %1265 = vmatpush3.bf16.msra.mxu1 %v1264_v57  ;;  %1235 = vmatprep.subr.bf16.mxu0 %v1234_v40 }
 0x15c   : > { %1267 = vmatprep.subr.bf16.mxu1 %v1266_v61 }
 0x15e   : > { %1237 = vmatpush3.bf16.msra.mxu0 %v1236_v0 }
 0x15f   : > { %1269 = vmatpush3.bf16.msra.mxu1 %v1268_v4  ;;  %1239 = vmatprep.subr.bf16.mxu0 %v1238_v5 }
 0x160   : > { %1271 = vmatprep.subr.bf16.mxu1 %v1270_v9 }
 0x162   : > { %1241 = vmatpush3.bf16.msra.mxu0 %v1240_v13 }
 0x163   : > { %1273 = vmatpush3.bf16.msra.mxu1 %v1272_v17  ;;  %1243 = vmatprep.subr.bf16.mxu0 %v1242_v18 }
 0x164   : > { %1275 = vmatprep.subr.bf16.mxu1 %v1274_v22  ;;  %v1335_v22 = vmov -1.0  }
 0x166   : > { %1245 = vmatpush3.bf16.msra.mxu0 %v1244_v25 }
 0x167   : > { %1277 = vmatpush3.bf16.msra.mxu1 %v1276_v26 }
 0x21b   : > { %v474_v38 = vpop.f32.mrb[0].mxu0  ;;  %v551_v39 = vpop.f32.mrb[0].mxu1 }
 0x21c   : > { %v475_v41 = vadd.f32 %v474_v38, %v391_v34  ;;  %v1799_v42 = vadd.f32 %v551_v39, %v399_v35  ;;  %v476_v43 = vpop.f32.mrb[1].mxu0  ;;  %v553_v45 = vpop.f32.mrb[1].mxu1 }
 0x21d   : > { %v477_v46 = vadd.f32 %v476_v43, %v395_v36  ;;  %v554_v47 = vadd.f32 %v553_v45, %v403_v37 }
 0x21e   : > { %v570_v48 = vmul.f32 0.70710677, %v475_v41  ;;  %v572_v49 = vmul.f32 0.70710677, %v1799_v42  ;;  %v1818_v9 = vmul.f32 0.5, %v475_v41 }
 0x21f   : > { %v1802_v50 = vmul.f32 0.70710677, %v477_v46  ;;  %v1805_v54 = vmul.f32 0.70710677, %v554_v47  ;;  %v480_v55 = vpop.f32.mrb[2].mxu0  ;;  %v557_v59 = vpop.f32.mrb[2].mxu1 }
 0x220   : > { %v594_v51 = vand.u32 2147483647, %v570_v48  ;;  %v596_v52 = vand.u32 2147483647, %v572_v49  ;;  %v482_v61 = vpop.f32.mrb[3].mxu0  ;;  %v559_v44 = vpop.f32.mrb[3].mxu1  ;;  %v1808_v0 = vadd.f32 %v480_v55, %v391_v34  ;;  %v1813_v4 = vadd.f32 %v557_v59, %v399_v35 }
 0x221   : > { %v595_v53 = vand.u32 2147483647, %v1802_v50  ;;  %v597_v62 = vand.u32 2147483647, %v1805_v54  ;;  %v1815_v6 = vadd.f32 %v482_v61, %v395_v36  ;;  %vm578_vm0 = vcmp.ge.f32.partialorder %v570_v48, 0.0 }
 0x222   : > { %v602_v56 = vmul.f32 0.3275911, %v594_v51  ;;  %v604_v57 = vmul.f32 0.3275911, %v596_v52  ;;  %v706_v2 = vsub.f32 0.0, %v594_v51  ;;  %v708_v7 = vsub.f32 0.0, %v596_v52 }
 0x223   : > { %v603_v58 = vmul.f32 0.3275911, %v595_v53  ;;  %v605_v1 = vmul.f32 0.3275911, %v597_v62  ;;  %v1811_v3 = vmul.f32 0.70710677, %v1808_v0  ;;  %v1831_v21 = vadd.f32 %v559_v44, %v403_v37 }
 0x224   : > { %v610_v60 = vadd.f32 1.0, %v602_v56  ;;  %v612_v40 = vadd.f32 1.0, %v604_v57  ;;  %vm580_vm1 = vcmp.ge.f32.partialorder %v572_v49, 0.0  ;;  %v1821_v10 = vmul.f32 0.70710677, %v1813_v4 }
 0x225   : > { %v611_v63 = vadd.f32 1.0, %v603_v58  ;;  %v613_v5 = vadd.f32 1.0, %v605_v1  ;;  %v598_v8 = vand.u32 2147483647, %v1811_v3  ;;  %v714_v11 = vmul.f32 %v706_v2, %v594_v51 }
 0x226   : > { %1292 = vrcp.f32 %v610_v60  ;;  %v707_v12 = vsub.f32 0.0, %v595_v53  ;;  %v1823_v14 = vmul.f32 0.5, %v477_v46  ;;  %v1825_v15 = vmul.f32 0.5, %v554_v47 }
 0x227   : > { %1294 = vrcp.f32 %v612_v40  ;;  %v606_v13 = vmul.f32 0.3275911, %v598_v8  ;;  %v600_v16 = vand.u32 2147483647, %v1821_v10  ;;  %v1829_v17 = vmul.f32 0.70710677, %v1815_v6 }
 0x228   : > { %1296 = vrcp.f32 %v611_v63  ;;  %v716_v18 = vmul.f32 %v708_v7, %v596_v52  ;;  %v709_v19 = vsub.f32 0.0, %v597_v62  ;;  %v1835_v23 = vsel %vm578_vm0, 1.0, %v1335_v22 }
 0x229   : > { %1298 = vrcp.f32 %v613_v5  ;;  %v614_v20 = vadd.f32 1.0, %v606_v13  ;;  %v1839_v24 = vsel %vm580_vm1, 1.0, %v1335_v22  ;;  %v608_v25 = vmul.f32 0.3275911, %v600_v16 }
 0x22a   : > { %v599_v26 = vand.u32 2147483647, %v1829_v17  ;;  %v722_v28 = vmul.f32 1.442695, %v714_v11  ;;  %vm579_vm2 = vcmp.ge.f32.partialorder %v1802_v50, 0.0  ;;  %v715_v29 = vmul.f32 %v707_v12, %v595_v53 }
 0x22b   : > { %1300 = vrcp.f32 %v614_v20  ;;  %v710_v32 = vsub.f32 0.0, %v598_v8  ;;  %v616_v33 = vadd.f32 1.0, %v608_v25  ;;  %v726_v36 = vmul.f32 1.442695, %v716_v18 }
 0x22c   : > { %v607_v34 = vmul.f32 0.3275911, %v599_v26  ;;  %v717_v37 = vmul.f32 %v709_v19, %v597_v62  ;;  %v1850_v38 = vmul.f32 0.70710677, %v1831_v21  ;;  %v712_v41 = vsub.f32 0.0, %v600_v16 }
 0x22d   : > { %1302 = vrcp.f32 %v616_v33  ;;  %v724_v47 = vmul.f32 1.442695, %v715_v29  ;;  %v718_v51 = vmul.f32 %v710_v32, %v598_v8  ;;  %v711_v60 = vsub.f32 0.0, %v599_v26 }
 0x22e   : > { %v615_v43 = vadd.f32 1.0, %v607_v34  ;;  %v601_v48 = vand.u32 2147483647, %v1850_v38  ;;  %1304 = vpow2.f32 %v722_v28  ;;  %v728_v56 = vmul.f32 1.442695, %v717_v37 }
 0x22f   : > { %v720_v59 = vmul.f32 %v712_v41, %v600_v16  ;;  %v730_v1 = vmul.f32 1.442695, %v718_v51  ;;  %v1869_v8 = vsel %vm579_vm2, 1.0, %v1335_v22  ;;  %v719_v16 = vmul.f32 %v711_v60, %v599_v26 }
 0x230   : > { %v1842_v27 = vpop.eup %1292  ;;  %1306 = vrcp.f32 %v615_v43  ;;  %v609_v57 = vmul.f32 0.3275911, %v601_v48  ;;  %v713_v50 = vsub.f32 0.0, %v601_v48  ;;  %vm581_vm3 = vcmp.ge.f32.partialorder %v1805_v54, 0.0 }
 0x231   : > { %v1845_v30 = vpop.eup %1294  ;;  %v634_v31 = vmul.f32 1.0614054, %v1842_v27  ;;  %1308 = vpow2.f32 %v726_v36  ;;  %v734_v13 = vmul.f32 1.442695, %v720_v59  ;;  %v732_v37 = vmul.f32 1.442695, %v719_v16 }
 0x232   : > { %v636_v35 = vmul.f32 1.0614054, %v1845_v30  ;;  %v1852_v45 = vpop.eup %1296  ;;  %v617_v44 = vadd.f32 1.0, %v609_v57  ;;  %1310 = vpow2.f32 %v724_v47  ;;  %vm582_vm4 = vcmp.ge.f32.partialorder %v1811_v3, 0.0 }
 0x233   : > { %v642_v39 = vadd.f32 -1.4531521, %v634_v31  ;;  %v635_v52 = vmul.f32 1.0614054, %v1852_v45  ;;  %v1857_v53 = vpop.eup %1298  ;;  %vm583_vm5 = vcmp.ge.f32.partialorder %v1829_v17, 0.0  ;;  %vm584_vm6 = vcmp.ge.f32.partialorder %v1821_v10, 0.0 }
 0x234   : > { %v644_v46 = vadd.f32 -1.4531521, %v636_v35  ;;  %v637_v62 = vmul.f32 1.0614054, %v1857_v53  ;;  %1312 = vrcp.f32 %v617_v44  ;;  %v591_v3 = vsel %vm583_vm5, 1.0, %v1335_v22 }
 0x235   : > { %v650_v49 = vmul.f32 %v1842_v27, %v642_v39  ;;  %v643_v40 = vadd.f32 -1.4531521, %v635_v52  ;;  %v1863_v5 = vpop.eup %1300  ;;  %1314 = vpow2.f32 %v728_v56  ;;  %v721_v52 = vmul.f32 %v713_v50, %v601_v48 }
 0x236   : > { %v652_v55 = vmul.f32 %v1845_v30, %v644_v46  ;;  %v645_v11 = vadd.f32 -1.4531521, %v637_v62  ;;  %v638_v25 = vmul.f32 1.0614054, %v1863_v5  ;;  %1316 = vpow2.f32 %v730_v1 }
 0x237   : > { %v658_v58 = vadd.f32 1.4214138, %v650_v49  ;;  %v651_v2 = vmul.f32 %v1852_v45, %v643_v40  ;;  %v1873_v28 = vpop.eup %1302  ;;  %1318 = vpow2.f32 %v734_v13  ;;  %vm585_vm7 = vcmp.ge.f32.partialorder %v1850_v38, 0.0 }
 0x238   : > { %v660_v61 = vadd.f32 1.4214138, %v652_v55  ;;  %v653_v20 = vmul.f32 %v1857_v53, %v645_v11  ;;  %v646_v34 = vadd.f32 -1.4531521, %v638_v25  ;;  %v640_v26 = vmul.f32 1.0614054, %v1873_v28  ;;  %v1305_v35 = vpop.eup %1304 }
 0x239   : > { %v666_v63 = vmul.f32 %v1842_v27, %v658_v58  ;;  %v659_v18 = vadd.f32 1.4214138, %v651_v2  ;;  %1320 = vpow2.f32 %v732_v37 }
 0x23a   : > { %v668_v7 = vmul.f32 %v1845_v30, %v660_v61  ;;  %v661_v33 = vadd.f32 1.4214138, %v653_v20  ;;  %v1879_v41 = vpop.eup %1306  ;;  %v654_v47 = vmul.f32 %v1863_v5, %v646_v34  ;;  %v648_v49 = vadd.f32 -1.4531521, %v640_v26 }
 0x23b   : > { %v674_v12 = vadd.f32 -0.28449672, %v666_v63  ;;  %v667_v31 = vmul.f32 %v1852_v45, %v659_v18  ;;  %v639_v56 = vmul.f32 1.0614054, %v1879_v41  ;;  %v1309_v57 = vpop.eup %1308  ;;  %v736_v18 = vmul.f32 1.442695, %v721_v52 }
 0x23c   : > { %v676_v19 = vadd.f32 -0.28449672, %v668_v7  ;;  %v669_v46 = vmul.f32 %v1857_v53, %v661_v33  ;;  %v662_v60 = vadd.f32 1.4214138, %v654_v47  ;;  %v656_v40 = vmul.f32 %v1873_v28, %v648_v49  ;;  %v1311_v61 = vpop.eup %1310 }
 0x23d   : > { %v682_v29 = vmul.f32 %v1842_v27, %v674_v12  ;;  %v675_v39 = vadd.f32 -0.28449672, %v667_v31  ;;  %v647_v63 = vadd.f32 -1.4531521, %v639_v56  ;;  %1322 = vpow2.f32 %v736_v18 }
 0x23e   : > { %v684_v32 = vmul.f32 %v1845_v30, %v676_v19  ;;  %v677_v59 = vadd.f32 -0.28449672, %v669_v46  ;;  %v1888_v1 = vpop.eup %1312  ;;  %v670_v2 = vmul.f32 %v1863_v5, %v662_v60  ;;  %v664_v7 = vadd.f32 1.4214138, %v656_v40 }
 0x23f   : > { %v690_v36 = vadd.f32 0.2548296, %v682_v29  ;;  %v683_v55 = vmul.f32 %v1852_v45, %v675_v39  ;;  %v655_v12 = vmul.f32 %v1879_v41, %v647_v63  ;;  %v641_v13 = vmul.f32 1.0614054, %v1888_v1  ;;  %v1315_v16 = vpop.eup %1314 }
 0x240   : > { %v692_v43 = vadd.f32 0.2548296, %v684_v32  ;;  %v685_v48 = vmul.f32 %v1857_v53, %v677_v59  ;;  %v678_v20 = vadd.f32 -0.28449672, %v670_v2  ;;  %v672_v25 = vmul.f32 %v1873_v28, %v664_v7  ;;  %v1317_v29 = vpop.eup %1316 }
 0x241   : > { %v698_v51 = vmul.f32 %v1842_v27, %v690_v36  ;;  %v691_v62 = vadd.f32 0.2548296, %v683_v55  ;;  %v663_v32 = vadd.f32 1.4214138, %v655_v12  ;;  %v649_v33 = vadd.f32 -1.4531521, %v641_v13  ;;  %v1319_v36 = vpop.eup %1318 }
 0x242   : > { %v700_v58 = vmul.f32 %v1845_v30, %v692_v43  ;;  %v693_v19 = vadd.f32 0.2548296, %v685_v48  ;;  %v589_v60 = vsel %vm581_vm3, 1.0, %v1335_v22 }
 0x243   : > { %v738_v44 = vmul.f32 %v1305_v35, %v698_v51  ;;  %v699_v30 = vmul.f32 %v1852_v45, %v691_v62  ;;  %v686_v45 = vmul.f32 %v1863_v5, %v678_v20  ;;  %v680_v35 = vadd.f32 -0.28449672, %v672_v25  ;;  %v1321_v59 = vpop.eup %1320 }
 0x244   : > { %v740_v27 = vmul.f32 %v1309_v57, %v700_v58  ;;  %v701_v26 = vmul.f32 %v1857_v53, %v693_v19  ;;  %v671_v39 = vmul.f32 %v1879_v41, %v663_v32  ;;  %v657_v43 = vmul.f32 %v1888_v1, %v649_v33 }
 0x245   : > { %v746_v11 = vsub.f32 1.0, %v738_v44  ;;  %v739_v31 = vmul.f32 %v1311_v61, %v699_v30  ;;  %v694_v47 = vadd.f32 0.2548296, %v686_v45  ;;  %v688_v49 = vmul.f32 %v1873_v28, %v680_v35 }
 0x246   : > { %v748_v50 = vsub.f32 1.0, %v740_v27  ;;  %v741_v46 = vmul.f32 %v1315_v16, %v701_v26  ;;  %v679_v51 = vadd.f32 -0.28449672, %v671_v39  ;;  %v665_v52 = vadd.f32 1.4214138, %v657_v43 }
 0x247   : > { %v754_v34 = vmul.f32 %v746_v11, %v1835_v23  ;;  %v747_v37 = vsub.f32 1.0, %v739_v31  ;;  %v702_v57 = vmul.f32 %v1863_v5, %v694_v47  ;;  %v696_v58 = vadd.f32 0.2548296, %v688_v49  ;;  %v1323_v19 = vpop.eup %1322 }
 0x248   : > { %v756_v23 = vmul.f32 %v748_v50, %v1839_v24  ;;  %v749_v56 = vsub.f32 1.0, %v741_v46  ;;  %v687_v61 = vmul.f32 %v1879_v41, %v679_v51  ;;  %v673_v44 = vmul.f32 %v1888_v1, %v665_v52 }
 0x249   : > { %v755_v53 = vmul.f32 %v747_v37, %v1869_v8  ;;  %v762_v55 = vadd.f32 1.0, %v754_v34  ;;  %v742_v8 = vmul.f32 %v1317_v29, %v702_v57  ;;  %v704_v62 = vmul.f32 %v1873_v28, %v696_v58 }
 0x24a   : > { %v757_v24 = vmul.f32 %v749_v56, %v589_v60  ;;  %v764_v63 = vadd.f32 1.0, %v756_v23  ;;  %v695_v27 = vadd.f32 0.2548296, %v687_v61  ;;  %v681_v48 = vadd.f32 -0.28449672, %v673_v44  ;;  %v1325_v44 = vld [vmem:[%s1392_s29 + $0x8] sm:$0xff] }
 0x24b   : > { %v763_v40 = vadd.f32 1.0, %v755_v53  ;;  %v770_v2 = vmul.f32 %v762_v55, %v1818_v9  ;;  %v750_v7 = vsub.f32 1.0, %v742_v8  ;;  %v744_v11 = vmul.f32 %v1319_v36, %v704_v62 }
 0x24c   : > { %v765_v54 = vadd.f32 1.0, %v757_v24  ;;  %v564_v30 = vmul.f32 0.5, %v1799_v42  ;;  %v703_v12 = vmul.f32 %v1879_v41, %v695_v27  ;;  %v689_v13 = vmul.f32 %v1888_v1, %v681_v48 }
 0x24d   : > { %v771_v5 = vmul.f32 %v763_v40, %v1823_v14  ;;  %v590_v28 = vsel %vm582_vm4, 1.0, %v1335_v22  ;;  %v752_v41 = vsub.f32 1.0, %v744_v11  ;;  %v567_v32 = vmul.f32 0.5, %v1815_v6 }
 0x24e   : > { %v773_v14 = vmul.f32 %v765_v54, %v1825_v15  ;;  %v772_v16 = vmul.f32 %v764_v63, %v564_v30  ;;  %v743_v9 = vmul.f32 %v1321_v59, %v703_v12  ;;  %v697_v18 = vadd.f32 0.2548296, %v689_v13 }
 0x24f   : > { %913 = vmatprep.mubr.f32.mxu0 %v771_v5  ;;  %v758_v42 = vmul.f32 %v750_v7, %v590_v28  ;;  %v592_v15 = vsel %vm584_vm6, 1.0, %v1335_v22  ;;  %v566_v34 = vmul.f32 0.5, %v1808_v0  ;;  %v593_v26 = vsel %vm585_vm7, 1.0, %v1335_v22  ;;  %v1069_v22 = vld [vmem:[%s1952_s6] ss:$0 sm:$0xff] }
 0x250   : > { %914 = vmatmul.mubr.f32.vlgmr.msra.gmra.mrb[4].mxu0 %v770_v2  ;;  %988 = vmatprep.mubr.f32.mxu1 %v773_v14  ;;  %v751_v20 = vsub.f32 1.0, %v743_v9  ;;  %v705_v25 = vmul.f32 %v1888_v1, %v697_v18  ;;  %v760_v31 = vmul.f32 %v752_v41, %v592_v15  ;;  %v569_v37 = vmul.f32 0.5, %v1831_v21 }
 0x251   : > { %989 = vmatmul.mubr.f32.vlgmr.msra.gmra.mrb[4].mxu1 %v772_v16  ;;  %v766_v50 = vadd.f32 1.0, %v758_v42  ;;  %v568_v39 = vmul.f32 0.5, %v1813_v4  ;;  %v1324_v4 = vld [vmem:[%s1392_s29] sm:$0xff] }
 0x252   : > { %v759_v29 = vmul.f32 %v751_v20, %v591_v3  ;;  %v745_v17 = vmul.f32 %v1323_v19, %v705_v25  ;;  %v768_v36 = vadd.f32 1.0, %v760_v31 }
 0x253   : > { %v774_v35 = vmul.f32 %v766_v50, %v566_v34 }
 0x254   : > { %v767_v10 = vadd.f32 1.0, %v759_v29  ;;  %v753_v33 = vsub.f32 1.0, %v745_v17  ;;  %v776_v43 = vmul.f32 %v768_v36, %v568_v39 }
 0x256   : > { %v775_v45 = vmul.f32 %v767_v10, %v567_v32  ;;  %v761_v1 = vmul.f32 %v753_v33, %v593_v26 }
 0x258   : > { %918 = vmatprep.mubr.f32.mxu0 %v775_v45  ;;  %v769_v38 = vadd.f32 1.0, %v761_v1 }
 0x259   : > { %919 = vmatmul.mubr.f32.gmra.mrb[6].mxu0 %v774_v35 }
 0x25a   : > { %v777_v6 = vmul.f32 %v769_v38, %v569_v37 }
 0x25c   : > { %993 = vmatprep.mubr.f32.mxu1 %v777_v6 }
 0x25d   : > { %994 = vmatmul.mubr.f32.gmra.mrb[6].mxu1 %v776_v43 }
 0x323   : > { %v1106_v0 = vpop.f32.mrb[4].mxu0 }
 0x324   : > { %v1107_v46 = vpop.f32.mrb[5].mxu0  ;;  %v1144_v49 = vpop.f32.mrb[4].mxu1 }
 0x325   : > { %v1108_v47 = vadd.f32 %v1107_v46, %v1106_v0  ;;  %v1145_v23 = vpop.f32.mrb[5].mxu1 }
 0x326   : > { %v1146_v53 = vadd.f32 %v1145_v23, %v1144_v49 }
 0x327   : > { %v916_v21 = vadd.f32 %v1108_v47, %v1069_v22 }
 0x329   : > { %v991_v51 = vadd.f32 %v1146_v53, %v916_v21 }
 0x32b   : > { %v999_v52 = vadd.f32 %v1324_v4, %v991_v51 }
 0x32c   : > { %v1109_v55 = vpop.f32.mrb[6].mxu0 }
 0x32d   : > { %1001 = vst [vmem:[%s278_s30] sm:$0xff] %v999_v52  ;;  %v1110_v56 = vpop.f32.mrb[7].mxu0 }
 0x32e   : > { %v1111_v57 = vadd.f32 %v1110_v56, %v1109_v55 }
 0x330   : > { %v1147_v58 = vpop.f32.mrb[6].mxu1  ;;  %v921_v59 = vadd.f32 %v1111_v57, %v1069_v22 }
 0x331   : > { %v1148_v60 = vpop.f32.mrb[7].mxu1 }
 0x332   : > { %v1149_v40 = vadd.f32 %v1148_v60, %v1147_v58 }
 0x334   : > { %v996_v61 = vadd.f32 %v1149_v40, %v921_v59 }
 0x336   : > { %v1000_v24 = vadd.f32 %v1325_v44, %v996_v61 }
 0x338   : > { %1002 = vst [vmem:[%s278_s30 + $0x8] sm:$0xff] %v1000_v24 }
 0x339 PF: > { %s17_s24 = sadd.s32 1, %s1332_s24  }
 0x33a   : > { %p14_p4 = scmp.ge.s32.totalorder %s17_s24, 4  }
 0x33c   :  { %16 = sbr.rel (!%p14_p4) target bundleno = 1 (0x1), region = 78 }

// kernel: transformer_block_forward.10
= control target key start
LH: loop header
LB: loop body
LE: loop exit
PB: predicated region body
PF: predicated region fallthrough
CT: control target
= control target key end

     0   :  { %s3120_s24 = smov 0   ;;  %s3600_s0 = inlined_call_operand.vmem [shape: f32[2,16,128], index: 0, kind: input, shape index: {}]   ;;  %s3601_s1 = inlined_call_operand.vmem [shape: f32[1,128], index: 1, kind: input, shape index: {}]   ;;  %s3602_s2 = inlined_call_operand.vmem [shape: f32[1,128], index: 2, kind: input, shape index: {}]   ;;  %s3603_s3 = inlined_call_operand.vmem [shape: f32[128,384], index: 3, kind: input, shape index: {}]   ;;  %s3604_s4 = inlined_call_operand.vmem [shape: f32[1,384], index: 4, kind: input, shape index: {}]   ;;  %s3605_s5 = inlined_call_operand.vmem [shape: f32[128,128], index: 5, kind: input, shape index: {}]   ;;  %s3606_s6 = inlined_call_operand.vmem [shape: f32[1,128], index: 6, kind: input, shape index: {}]   ;;  %s3607_s7 = inlined_call_operand.vmem [shape: f32[2,16,128], index: 7, kind: output, shape index: {}]  }
   0x1 LB: > { %s2386_s25 = sadd.s32 4294967295, %s3070_s24   ;;  %p2390_p0 = scmp.ge.s32.totalorder %s3070_s24, 1  ;;  %s3070_s24 = sphi %s3120_s24, %s17_s24  }
   0x2   : > { %p237_p1 = scmp.lt.s32.totalorder %s3070_s24, 3 }
   0x4   : > { %p238_p2 = pnand %p2390_p0, %p237_p1 }
   0x5   : > { %p269_p3 = scmp.lt.s32.totalorder (!%p238_p2), %s2386_s25, 1  ;;  %v323_v2 = vld [vmem:[%s3603_s3 + $0x8] sm:$0xff] (!%p238_p2)  ;;  %v326_v3 = vld [vmem:[%s3603_s3 + $0x20] sm:$0xff] (!%p238_p2)  ;;  %v325_v6 = vld [vmem:[%s3603_s3 + $0x18] sm:$0xff] (!%p238_p2)  ;;  %vm539_vm0 = vcmask (!%p238_p2), 130048   ;;  %s3073_s14 = smov (!%p238_p2), 96  }
   0x6   : > { %241 = sbr.rel (%p238_p2) target bundleno = 4369 (0x1111), region = 48  ;;  %v322_v4 = vld [vmem:[%s3603_s3] sm:$0xff] (!%p238_p2)  ;;  %v2732_v5 = vpack.c.bf16 (!%p238_p2), %v326_v3, %v323_v2  ;;  %v329_v7 = vld [vmem:[%s3603_s3 + $0x38] sm:$0xff] (!%p238_p2)  ;;  %v332_v8 = vld [vmem:[%s3603_s3 + $0x50] sm:$0xff] (!%p238_p2)  ;;  %s3074_s15 = smov (!%p238_p2), 112   ;;  %vm946_vm2 = vcmask (!%p238_p2), 261248  }
   0x7   : > { %v2734_v9 = vpack.c.bf16 (!%p238_p2), %v325_v6, %v322_v4  ;;  %v2736_v10 = vpack.c.bf16 (!%p238_p2), %v332_v8, %v329_v7  ;;  %v324_v11 = vld [vmem:[%s3603_s3 + $0x10] sm:$0xff] (!%p238_p2)  ;;  %v327_v12 = vld [vmem:[%s3603_s3 + $0x28] sm:$0xff] (!%p238_p2)  ;;  %v338_v17 = vld [vmem:[%s3603_s3 + $0x80] sm:$0xff] (!%p238_p2)  ;;  %v3072_v4 = vmov (!%p238_p2), 0.0   ;;  %s3075_s16 = smov (!%p238_p2), 80   ;;  %s3076_s17 = smov (!%p238_p2), 64  }
   0x8   : > { %v328_v13 = vld [vmem:[%s3603_s3 + $0x30] sm:$0xff] (!%p238_p2)  ;;  %2733 = vmatprep.subr.bf16.mxu0 (!%p238_p2), %v2732_v5  ;;  %v2764_v14 = vpack.c.bf16 (!%p238_p2), %v327_v12, %v324_v11  ;;  %v331_v15 = vld [vmem:[%s3603_s3 + $0x48] sm:$0xff] (!%p238_p2)  ;;  %v330_v19 = vld [vmem:[%s3603_s3 + $0x40] sm:$0xff] (!%p238_p2)  ;;  %451 = vmatprep.mubr.f32.mxu0 (!%p238_p2), %v3072_v4  ;;  %s3077_s18 = smov (!%p238_p2), 48   ;;  %s3078_s19 = smov (!%p238_p2), 32   ;;  %vm1159_vm3 = vcmask (!%p238_p2), 392448  }
   0x9   : > { %v335_v16 = vld [vmem:[%s3603_s3 + $0x68] sm:$0xff] (!%p238_p2)  ;;  %2735 = vmatpush1.bf16.msra.mxu0 (!%p238_p2), %v2734_v9  ;;  %v2738_v18 = vpack.c.bf16 (!%p238_p2), %v331_v15, %v328_v13  ;;  %v333_v20 = vld [vmem:[%s3603_s3 + $0x58] sm:$0xff] (!%p238_p2)  ;;  %v334_v23 = vld [vmem:[%s3603_s3 + $0x60] sm:$0xff] (!%p238_p2)  ;;  %s3079_s20 = smov (!%p238_p2), 16   ;;  %vm1372_vm4 = vcmask (!%p238_p2), 523648   ;;  %vm1585_vm5 = vcmask (!%p238_p2), 654848  }
   0xa   : > { %2737 = vmatprep.subr.bf16.mxu0 (!%p238_p2), %v2736_v10  ;;  %2765 = vmatprep.subr.bf16.mxu1 (!%p238_p2), %v2764_v14  ;;  %v2740_v21 = vpack.c.bf16 (!%p238_p2), %v338_v17, %v335_v16  ;;  %v2768_v22 = vpack.c.bf16 (!%p238_p2), %v333_v20, %v330_v19  ;;  %v337_v24 = vld [vmem:[%s3603_s3 + $0x78] sm:$0xff] (!%p238_p2)  ;;  %v344_v35 = vld [vmem:[%s3603_s3 + $0xb0] sm:$0xff] (!%p238_p2)  ;;  %v339_v38 = vld [vmem:[%s3603_s3 + $0x88] sm:$0xff] (!%p238_p2)  ;;  %vm1798_vm6 = vcmask (!%p238_p2), 786048   ;;  %vm2011_vm7 = vcmask (!%p238_p2), 917248  }
   0xb   : > { %2767 = vmatpush3.bf16.msra.mxu1 (!%p238_p2), %v2764_v14  ;;  %v2742_v25 = vpack.c.bf16 (!%p238_p2), %v337_v24, %v334_v23  ;;  %v341_v34 = vld [vmem:[%s3603_s3 + $0x98] sm:$0xff] (!%p238_p2)  ;;  %v336_v36 = vld [vmem:[%s3603_s3 + $0x70] sm:$0xff] (!%p238_p2)  ;;  %v343_v40 = vld [vmem:[%s3603_s3 + $0xa8] sm:$0xff] (!%p238_p2)  ;;  %vm2224_vm8 = vcmask (!%p238_p2), 1048448  }
   0xc   : > { %2769 = vmatprep.subr.bf16.mxu1 (!%p238_p2), %v2768_v22  ;;  %v2744_v37 = vpack.c.bf16 (!%p238_p2), %v344_v35, %v341_v34  ;;  %v340_v39 = vld [vmem:[%s3603_s3 + $0x90] sm:$0xff] (!%p238_p2)  ;;  %v2772_v41 = vpack.c.bf16 (!%p238_p2), %v339_v38, %v336_v36  ;;  %v347_v43 = vld [vmem:[%s3603_s3 + $0xc8] sm:$0xff] (!%p238_p2)  ;;  %v350_v44 = vld [vmem:[%s3603_s3 + $0xe0] sm:$0xff] (!%p238_p2) }
   0xd   : > { %s3611_s25 = smov (!%p269_p3, %s2386_s25), 1  ;;  %2739 = vmatpush1.bf16.msra.mxu0 %v2738_v18  ;;  %v2746_v42 = vpack.c.bf16 %v343_v40, %v340_v39  ;;  %v342_v45 = vld [vmem:[%s3603_s3 + $0xa0] sm:$0xff]  ;;  %v2748_v46 = vpack.c.bf16 %v350_v44, %v347_v43  ;;  %v345_v47 = vld [vmem:[%s3603_s3 + $0xb8] sm:$0xff]  ;;  %v356_v53 = vld [vmem:[%s3603_s3 + $0x110] sm:$0xff] }
   0xe   : > { %s2448_s26 = sshll.u32 %s3611_s25, 4  ;;  %2741 = vmatprep.subr.bf16.mxu0 %v2740_v21  ;;  %v346_v48 = vld [vmem:[%s3603_s3 + $0xc0] sm:$0xff]  ;;  %v349_v49 = vld [vmem:[%s3603_s3 + $0xd8] sm:$0xff]  ;;  %v2776_v50 = vpack.c.bf16 %v345_v47, %v342_v45  ;;  %v348_v54 = vld [vmem:[%s3603_s3 + $0xd0] sm:$0xff] }
   0xf   : > { %s3136_s29 = scalar_lea.vmem %s3600_s0, %s2448_s26  ;;  %2771 = vmatpush3.bf16.msra.mxu1 %v2768_v22  ;;  %v2750_v51 = vpack.c.bf16 %v349_v49, %v346_v48  ;;  %v353_v52 = vld [vmem:[%s3603_s3 + $0xf8] sm:$0xff]  ;;  %v351_v56 = vld [vmem:[%s3603_s3 + $0xe8] sm:$0xff]  ;;  %v352_v57 = vld [vmem:[%s3603_s3 + $0xf0] sm:$0xff] }
  0x10   : > { %v279_v0 = vld [vmem:[%s3136_s29] sm:$0xff]  ;;  %v280_v1 = vld [vmem:[%s3136_s29 + $0x8] sm:$0xff]  ;;  %2773 = vmatprep.subr.bf16.mxu1 %v2772_v41  ;;  %v2752_v55 = vpack.c.bf16 %v356_v53, %v353_v52  ;;  %v2780_v59 = vpack.c.bf16 %v351_v56, %v348_v54  ;;  %v361_v3 = vld [vmem:[%s3603_s3 + $0x138] sm:$0xff] }
  0x11   : > { %283 = vadd.xlane.f32.xlu0 %v279_v0  ;;  %2743 = vmatpush1.bf16.msra.mxu0 %v2742_v25  ;;  %v355_v58 = vld [vmem:[%s3603_s3 + $0x108] sm:$0xff]  ;;  %v362_v62 = vld [vmem:[%s3603_s3 + $0x140] sm:$0xff]  ;;  %v365_v7 = vld [vmem:[%s3603_s3 + $0x158] sm:$0xff] }
  0x12   : > { %2745 = vmatprep.subr.bf16.mxu0 %v2744_v37  ;;  %v2754_v60 = vpack.c.bf16 %v355_v58, %v352_v57  ;;  %v359_v61 = vld [vmem:[%s3603_s3 + $0x128] sm:$0xff]  ;;  %v354_v63 = vld [vmem:[%s3603_s3 + $0x100] sm:$0xff]  ;;  %v368_v8 = vld [vmem:[%s3603_s3 + $0x170] sm:$0xff]  ;;  %v372_v37 = vlaneseq }
  0x13   : > { %2775 = vmatpush3.bf16.msra.mxu1 %v2772_v41  ;;  %v358_v2 = vld [vmem:[%s3603_s3 + $0x120] sm:$0xff]  ;;  %v360_v9 = vld [vmem:[%s3603_s3 + $0x130] sm:$0xff]  ;;  %v2760_v10 = vpack.c.bf16 %v368_v8, %v365_v7  ;;  %v363_v11 = vld [vmem:[%s3603_s3 + $0x148] sm:$0xff] }
  0x14   : > { %2777 = vmatprep.subr.bf16.mxu1 %v2776_v50  ;;  %v2758_v6 = vpack.c.bf16 %v361_v3, %v358_v2  ;;  %v364_v12 = vld [vmem:[%s3603_s3 + $0x150] sm:$0xff]  ;;  %v367_v13 = vld [vmem:[%s3603_s3 + $0x168] sm:$0xff]  ;;  %v2788_v14 = vpack.c.bf16 %v363_v11, %v360_v9  ;;  %v366_v16 = vld [vmem:[%s3603_s3 + $0x160] sm:$0xff]  ;;  %v373_v38 = vshrl.u32 %v372_v37, 7 }
  0x15   : > { %285 = vadd.xlane.f32.xlu0 %v280_v1  ;;  %2747 = vmatpush1.bf16.msra.mxu0 %v2746_v42  ;;  %v2762_v15 = vpack.c.bf16 %v367_v13, %v364_v12  ;;  %v369_v17 = vld [vmem:[%s3603_s3 + $0x178] sm:$0xff]  ;;  %vm3309_vm1 = vmpackc.low %vm539_vm0, %vm539_vm0 }
  0x16   : > { %2749 = vmatprep.subr.bf16.mxu0 %v2748_v46  ;;  %v2792_v18 = vpack.c.bf16 %v369_v17, %v366_v16  ;;  %v374_v39 = vsub.s32 0, %v373_v38  ;;  %v382_v41 = vsub.s32 2, %v373_v38  ;;  %v378_v42 = vsub.s32 1, %v373_v38 }
  0x17   : > { %2779 = vmatpush3.bf16.msra.mxu1 %v2776_v50 }
  0x18   : > { %2781 = vmatprep.subr.bf16.mxu1 %v2780_v59 }
  0x19   : > { %2751 = vmatpush1.bf16.msra.mxu0 %v2750_v51 }
  0x1a   : > { %2753 = vmatprep.subr.bf16.mxu0 %v2752_v55 }
  0x1b   : > { %2783 = vmatpush3.bf16.msra.mxu1 %v2780_v59 }
  0x1d   : > { %2755 = vmatpush1.bf16.msra.mxu0 %v2754_v60 }
  0x9e   : > { %v284_v26 = vpop.xlane.xlu0 %283 }
  0x9f   : > { %v288_v27 = vmul.f32 0.0078125, %v284_v26  ;;  %v2395_v26 = vld [vmem:[%s3601_s1] ss:$0 sm:$0xff] }
  0xa1   : > { %v3188_v28 = vsub.f32 %v279_v0, %v288_v27  ;;  %v2756_v0 = vpack.c.bf16 %v362_v62, %v359_v61 }
  0xa2   : > { %v286_v29 = vpop.xlane.xlu0 %285 }
  0xa3   : > { %v289_v30 = vmul.f32 0.0078125, %v286_v29  ;;  %v292_v31 = vmul.f32 %v3188_v28, %v3188_v28  ;;  %2757 = vmatprep.subr.bf16.mxu0 %v2756_v0  ;;  %v2396_v29 = vld [vmem:[%s3602_s2] ss:$0 sm:$0xff] }
  0xa4   : > { %2759 = vmatpush1.bf16.msra.mxu0 %v2758_v6 }
  0xa5   : > { %v3192_v32 = vsub.f32 %v280_v1, %v289_v30  ;;  %294 = vadd.xlane.f32.xlu1 %v292_v31  ;;  %v357_v1 = vld [vmem:[%s3603_s3 + $0x118] sm:$0xff]  ;;  %2761 = vmatprep.subr.bf16.mxu0 %v2760_v10 }
  0xa6   : > { %v2784_v5 = vpack.c.bf16 %v357_v1, %v354_v63 }
  0xa7   : > { %v293_v33 = vmul.f32 %v3192_v32, %v3192_v32 }
  0xa8   : > { %2785 = vmatprep.subr.bf16.mxu1 %v2784_v5  ;;  %2763 = vmatpush1.bf16.msra.mxu0 %v2762_v15 }
  0xa9   : > { %296 = vadd.xlane.f32.xlu1 %v293_v33  ;;  %2787 = vmatpush3.bf16.msra.mxu1 %v2784_v5 }
  0xaa   : > { %2789 = vmatprep.subr.bf16.mxu1 %v2788_v14 }
  0xad   : > { %2791 = vmatpush3.bf16.msra.mxu1 %v2788_v14 }
  0xae   : > { %2793 = vmatprep.subr.bf16.mxu1 %v2792_v18 }
  0xb1   : > { %2795 = vmatpush3.bf16.msra.mxu1 %v2792_v18 }
 0x132   : > { %v295_v19 = vpop.xlane.xlu1 %294 }
 0x133   : > { %v298_v20 = vmul.f32 0.0078125, %v295_v19 }
 0x135   : > { %v300_v21 = vadd.f32 1e-05, %v298_v20 }
 0x136   : > { %v297_v22 = vpop.xlane.xlu1 %296 }
 0x137   : > { %2994 = vrsqrt.f32 %v300_v21  ;;  %v299_v23 = vmul.f32 0.0078125, %v297_v22 }
 0x139   : > { %v301_v24 = vadd.f32 1e-05, %v299_v23 }
 0x13b   : > { %2996 = vrsqrt.f32 %v301_v24 }
 0x141   : > { %v2995_v25 = vpop.eup %2994 }
 0x142   : > { %v304_v27 = vmul.f32 %v2995_v25, %v3188_v28  ;;  %v370_v28 = vld [vmem:[%s3604_s4] sm:$0x7] }
 0x143   : > { %v375_v40 = vrot.slane %v370_v28, %v374_v39  ;;  %v383_v45 = vrot.slane %v370_v28, %v382_v41  ;;  %v379_v46 = vrot.slane %v370_v28, %v378_v42 }
 0x144   : > { %v312_v30 = vmul.f32 %v2395_v26, %v304_v27 }
 0x145   : > { %v2997_v31 = vpop.eup %2996 }
 0x146   : > { %v320_v33 = vadd.f32 %v2396_v29, %v312_v30  ;;  %v305_v34 = vmul.f32 %v2997_v31, %v3192_v32 }
 0x148   : > { %452 = vmatmul.mubr.f32.vlgmr.msra.gmra.mrb[0].mxu0 %v320_v33  ;;  %2582 = vmatprep.mubr.f32.mxu1 %v320_v33  ;;  %v313_v35 = vmul.f32 %v2395_v26, %v305_v34 }
 0x149   : > { %457 = vmatprep.mubr.f32.mxu0 %v3072_v4 }
 0x14a   : > { %v321_v36 = vadd.f32 %v2396_v29, %v313_v35 }
 0x14c   : > { %458 = vmatmul.mubr.f32.gmra.mrb[2].mxu0 %v321_v36  ;;  %2583 = vmatmul.mubr.f32.vlgmr.msra.gmra.mrb[0].mxu1 %v321_v36 }
 0x21b   : > { %v453_v43 = vpop.f32.mrb[0].mxu0 }
 0x21c   : > { %v3303_v32 = vadd.f32 %v453_v43, %v375_v40  ;;  %v455_v44 = vpop.f32.mrb[1].mxu0 }
 0x21d   : > { %v456_v52 = vadd.f32 %v455_v44, %v379_v46 }
 0x21e   : > { %2589 = vmatprep.mubr.msk.f32.mxu0 %vm539_vm0, %v3303_v32 }
 0x21f   : > { %v459_v47 = vpop.f32.mrb[2].mxu0  ;;  %v2584_v48 = vpop.f32.mrb[0].mxu1 }
 0x220   : > { %v536_v49 = vadd.f32 %v2584_v48, %v383_v45  ;;  %v461_v50 = vpop.f32.mrb[3].mxu0  ;;  %v530_v51 = vpop.f32.mrb[1].mxu1  ;;  %v3321_v60 = vadd.f32 %v459_v47, %v375_v40 }
 0x221   : > { %v462_v53 = vadd.f32 %v461_v50, %v379_v46  ;;  %v531_v54 = vadd.f32 %v530_v51, %v383_v45 }
 0x223   : > { %v2796_v56 = vpack.c.bf16 %v462_v53, %v456_v52  ;;  %v2802_v57 = vpack.c.bf16 %v536_v49, %v531_v54  ;;  %v3313_v58 = vpack.i.bf16 %v462_v53, %v456_v52  ;;  %v3315_v59 = vpack.i.bf16 %v536_v49, %v531_v54 }
 0x225   : > { %2798 = vmatprep.subr.msk.bf16.mxu0 %vm3309_vm1, %v2796_v56  ;;  %2803 = vmatprep.subr.bf16.mxu1 %v2802_v57 }
 0x226   : > { %2801 = vmatpush3.bf16.xpose.msk.msra.mxu0 %vm3309_vm1, %v2796_v56  ;;  %2805 = vmatpush3.bf16.msra.mxu1 %v2802_v57 }
 0x22d   : > { %2590 = vmatmul.mubr.msk.f32.vlgmr.msra.gmra.mrb[4].mxu0 %vm539_vm0, %v3321_v60 }
 0x300   : > { %v2591_v61 = vpop.f32.mrb[4].mxu0 }
 0x301   : > { %v628_v62 = vmul.f32 0.088388346, %v2591_v61  ;;  %v618_v63 = vpop.f32.mrb[5].mxu0 }
 0x302   : > { %v627_v0 = vmul.f32 0.088388346, %v618_v63 }
 0x303   : > { %v632_v1 = vsel %vm539_vm0, %v628_v62, -inf }
 0x304   : > { %633 = vmax.xlane.f32.xlu1 %v632_v1  ;;  %v629_v2 = vsel %vm539_vm0, %v627_v0, -inf }
 0x305   : > { %630 = vmax.xlane.f32.xlu0 %v629_v2 }
 0x391   : > { %v634_v3 = vpop.xlane.xlu1 %633 }
 0x392   : > { %v636_v4 = vsub.f32 %v628_v62, %v634_v3  ;;  %v631_v5 = vpop.xlane.xlu0 %630 }
 0x393   : > { %v635_v6 = vsub.f32 %v627_v0, %v631_v5 }
 0x394   : > { %v639_v7 = vmul.f32 1.442695, %v636_v4 }
 0x395   : > { %v637_v8 = vmul.f32 1.442695, %v635_v6 }
 0x396   : > { %2998 = vpow2.f32 %v639_v7 }
 0x397   : > { %3000 = vpow2.f32 %v637_v8 }
 0x3a0   : > { %v2999_v9 = vpop.eup %2998 }
 0x3a1   : > { %v3001_v10 = vpop.eup %3000  ;;  %v644_v11 = vsel %vm539_vm0, %v2999_v9, 0.0 }
 0x3a2   : > { %645 = vadd.xlane.f32.xlu1 %v644_v11  ;;  %v641_v12 = vsel %vm539_vm0, %v3001_v10, 0.0 }
 0x3a3   : > { %642 = vadd.xlane.f32.xlu0 %v641_v12 }
 0x3b3   : > { %2930 = vrot.lane.b32.xlu1 %v3313_v58, %s3073_s14 }
 0x3b7   : > { %734 = vrot.lane.b32.xlu1 %v3303_v32, %s3074_s15 }
 0x3b9   : > { %2925 = vrot.lane.b32.xlu0 %v3313_v58, %s3074_s15 }
 0x3bb   : > { %736 = vrot.lane.b32.xlu1 %v3321_v60, %s3074_s15 }
 0x3bd   : > { %949 = vrot.lane.b32.xlu0 %v3303_v32, %s3073_s14 }
 0x3bf   : > { %951 = vrot.lane.b32.xlu1 %v3321_v60, %s3073_s14 }
 0x42f   : > { %v646_v13 = vpop.xlane.xlu1 %645 }
 0x430   : > { %3002 = vrcp.f32 %v646_v13  ;;  %v643_v14 = vpop.xlane.xlu0 %642 }
 0x431   : > { %3004 = vrcp.f32 %v643_v14 }
 0x433   : > { %v2931_v19 = vpop.permute.xlu1 %2930 }
 0x434   : > { %v2926_v15 = vpop.permute.xlu0 %2925  ;;  %v2933_v22 = vunpack.i.h.bf16 %v2931_v19  ;;  %v2932_v23 = vunpack.i.l.bf16 %v2931_v19 }
 0x435   : > { %v2928_v16 = vunpack.i.h.bf16 %v2926_v15  ;;  %v2927_v17 = vunpack.i.l.bf16 %v2926_v15 }
 0x436   : > { %v2816_v26 = vpack.c.bf16 %v2933_v22, %v2932_v23 }
 0x437   : > { %v2806_v18 = vpack.c.bf16 %v2928_v16, %v2927_v17  ;;  %v735_v27 = vpop.permute.xlu1 %734 }
 0x438   : > { %v950_v30 = vpop.permute.xlu0 %949 }
 0x439   : > { %2808 = vmatprep.subr.msk.bf16.mxu1 %vm3309_vm1, %v2806_v18 }
 0x43a   : > { %v3003_v20 = vpop.eup %3002 }
 0x43b   : > { %v3005_v21 = vpop.eup %3004  ;;  %v650_v25 = vmul.f32 %v3003_v20, %v2999_v9  ;;  %v737_v29 = vpop.permute.xlu1 %736 }
 0x43c   : > { %v648_v24 = vmul.f32 %v3005_v21, %v3001_v10 }
 0x43e   : > { %2596 = vmatprep.mubr.msk.f32.mxu1 %vm539_vm0, %v648_v24 }
 0x43f   : > { %2597 = vmatmul.mubr.msk.f32.vlgmr.msra.gmra.mrb[2].mxu1 %vm539_vm0, %v650_v25  ;;  %v952_v31 = vpop.permute.xlu1 %951 }
 0x440   : > { %2811 = vmatpush3.bf16.xpose.msk.msra.mxu1 %vm3309_vm1, %v2806_v18  ;;  %2603 = vmatprep.mubr.msk.f32.mxu1 %vm539_vm0, %v735_v27 }
 0x441   : > { %2818 = vmatprep.subr.msk.bf16.mxu1 %vm3309_vm1, %v2816_v26 }
 0x447   : > { %2604 = vmatmul.mubr.msk.f32.vlgmr.msra.gmra.mrb[4].mxu1 %vm539_vm0, %v737_v29 }
 0x448   : > { %2821 = vmatpush3.bf16.xpose.msk.msra.mxu1 %vm3309_vm1, %v2816_v26  ;;  %2617 = vmatprep.mubr.msk.f32.mxu1 %vm539_vm0, %v950_v30 }
 0x44f   : > { %2618 = vmatmul.mubr.msk.f32.vlgmr.msra.gmra.mrb[6].mxu1 %vm539_vm0, %v952_v31 }
 0x512   : > { %v2598_v33 = vpop.f32.mrb[2].mxu1 }
 0x513   : > { %733 = vst.msk [vmem:[#allocation2 + $0x8] sm:$0xff] %vm539_vm0, %v2598_v33  ;;  %v723_v34 = vpop.f32.mrb[3].mxu1 }
 0x514   : > { %732 = vst.msk [vmem:[#allocation2] sm:$0xff] %vm539_vm0, %v723_v34 }
 0x51a   : > { %v3357_v35 = vpop.f32.mrb[4].mxu1 }
 0x51b   : > { %v3359_v36 = vpop.f32.mrb[5].mxu1 }
 0x51c   : > { %v825_v24 = vmul.f32 0.088388346, %v3359_v36 }
 0x51e   : > { %v827_v25 = vsel %vm539_vm0, %v825_v24, -inf }
 0x522   : > { %v2619_v37 = vpop.f32.mrb[6].mxu1 }
 0x523   : > { %v1041_v38 = vmul.f32 0.088388346, %v2619_v37  ;;  %v1031_v39 = vpop.f32.mrb[7].mxu1 }
 0x524   : > { %v1040_v28 = vmul.f32 0.088388346, %v1031_v39 }
 0x525   : > { %v1045_v40 = vsel %vm539_vm0, %v1041_v38, -inf }
 0x526   : > { %1046 = vmax.xlane.f32.xlu1 %v1045_v40  ;;  %v1042_v41 = vsel %vm539_vm0, %v1040_v28, -inf }
 0x527   : > { %1043 = vmax.xlane.f32.xlu0 %v1042_v41 }
 0x537   : > { %2940 = vrot.lane.b32.xlu1 %v3313_v58, %s3075_s16 }
 0x53b   : > { %2945 = vrot.lane.b32.xlu1 %v3313_v58, %s3076_s17 }
 0x53f   : > { %1162 = vrot.lane.b32.xlu1 %v3303_v32, %s3075_s16 }
 0x543   : > { %1375 = vrot.lane.b32.xlu1 %v3303_v32, %s3076_s17 }
 0x5b3   : > { %v1047_v42 = vpop.xlane.xlu1 %1046 }
 0x5b4   : > { %v1049_v43 = vsub.f32 %v1041_v38, %v1047_v42  ;;  %v1044_v44 = vpop.xlane.xlu0 %1043  ;;  %v826_v42 = vmul.f32 0.088388346, %v3357_v35 }
 0x5b5   : > { %v1048_v45 = vsub.f32 %v1040_v28, %v1044_v44 }
 0x5b6   : > { %v1052_v46 = vmul.f32 1.442695, %v1049_v43  ;;  %v830_v44 = vsel %vm539_vm0, %v826_v42, -inf }
 0x5b7   : > { %v1050_v47 = vmul.f32 1.442695, %v1048_v45  ;;  %v2941_v54 = vpop.permute.xlu1 %2940 }
 0x5b8   : > { %3006 = vpow2.f32 %v1052_v46  ;;  %v2943_v57 = vunpack.i.h.bf16 %v2941_v54  ;;  %v2942_v61 = vunpack.i.l.bf16 %v2941_v54 }
 0x5b9   : > { %3008 = vpow2.f32 %v1050_v47 }
 0x5ba   : > { %v2826_v1 = vpack.c.bf16 %v2943_v57, %v2942_v61 }
 0x5bb   : > { %v2946_v2 = vpop.permute.xlu1 %2945 }
 0x5bc   : > { %v2948_v7 = vunpack.i.h.bf16 %v2946_v2  ;;  %v2947_v8 = vunpack.i.l.bf16 %v2946_v2 }
 0x5be   : > { %v2836_v10 = vpack.c.bf16 %v2948_v7, %v2947_v8 }
 0x5bf   : > { %v1163_v9 = vpop.permute.xlu1 %1162 }
 0x5c2   : > { %v3007_v48 = vpop.eup %3006 }
 0x5c3   : > { %v1057_v49 = vsel %vm539_vm0, %v3007_v48, 0.0  ;;  %v3009_v50 = vpop.eup %3008  ;;  %v1376_v12 = vpop.permute.xlu1 %1375 }
 0x5c4   : > { %1058 = vadd.xlane.f32.xlu0 %v1057_v49  ;;  %v1054_v51 = vsel %vm539_vm0, %v3009_v50, 0.0 }
 0x5c8   : > { %1055 = vadd.xlane.f32.xlu0 %v1054_v51 }
 0x5de   : > { %2935 = vrot.lane.b32.xlu0 %v3315_v59, %s3073_s14 }
 0x5e2   : > { %1164 = vrot.lane.b32.xlu0 %v3321_v60, %s3075_s16 }
 0x5e6   : > { %1377 = vrot.lane.b32.xlu0 %v3321_v60, %s3076_s17 }
 0x651   : > { %v1059_v52 = vpop.xlane.xlu0 %1058 }
 0x652   : > { %3010 = vrcp.f32 %v1059_v52 }
 0x655   : > { %v1056_v53 = vpop.xlane.xlu0 %1055 }
 0x656   : > { %3012 = vrcp.f32 %v1056_v53 }
 0x659   : > { %v2936_v56 = vpop.permute.xlu0 %2935 }
 0x65a   : > { %v2938_v62 = vunpack.i.h.bf16 %v2936_v56  ;;  %v2937_v63 = vunpack.i.l.bf16 %v2936_v56 }
 0x65c   : > { %v2822_v0 = vpack.c.bf16 %v2938_v62, %v2937_v63  ;;  %v3011_v3 = vpop.eup %3010 }
 0x65d   : > { %v1063_v6 = vmul.f32 %v3011_v3, %v3007_v48  ;;  %v1165_v11 = vpop.permute.xlu0 %1164 }
 0x65e   : > { %2823 = vmatprep.subr.bf16.mxu1 %v2822_v0 }
 0x65f   : > { %2825 = vmatpush3.bf16.msra.mxu1 %v2822_v0 }
 0x660   : > { %v3013_v4 = vpop.eup %3012  ;;  %2828 = vmatprep.subr.msk.bf16.mxu1 %vm3309_vm1, %v2826_v1 }
 0x661   : > { %v1061_v5 = vmul.f32 %v3013_v4, %v3009_v50  ;;  %v1378_v13 = vpop.permute.xlu0 %1377 }
 0x663   : > { %2624 = vmatprep.mubr.msk.f32.mxu1 %vm539_vm0, %v1061_v5 }
 0x664   : > { %2625 = vmatmul.mubr.msk.f32.vlgmr.msra.gmra.mrb[8].mxu1 %vm539_vm0, %v1063_v6 }
 0x665   : > { %2631 = vmatprep.mubr.msk.f32.mxu1 %vm539_vm0, %v1163_v9 }
 0x668   : > { %2831 = vmatpush3.bf16.xpose.msk.msra.mxu1 %vm3309_vm1, %v2826_v1 }
 0x669   : > { %2838 = vmatprep.subr.msk.bf16.mxu1 %vm3309_vm1, %v2836_v10 }
 0x66f   : > { %2632 = vmatmul.mubr.msk.f32.vlgmr.msra.gmra.mrb[10].mxu1 %vm539_vm0, %v1165_v11 }
 0x670   : > { %2841 = vmatpush3.bf16.xpose.msk.msra.mxu1 %vm3309_vm1, %v2836_v10  ;;  %2645 = vmatprep.mubr.msk.f32.mxu1 %vm539_vm0, %v1376_v12 }
 0x677   : > { %2646 = vmatmul.mubr.msk.f32.vlgmr.msra.gmra.mrb[12].mxu1 %vm539_vm0, %v1378_v13 }
 0x737   : > { %v3393_v14 = vpop.f32.mrb[8].mxu1 }
 0x738   : > { %v3395_v15 = vpop.f32.mrb[9].mxu1 }
 0x742   : > { %v2633_v16 = vpop.f32.mrb[10].mxu1 }
 0x743   : > { %v1244_v17 = vpop.f32.mrb[11].mxu1  ;;  %v1254_v45 = vmul.f32 0.088388346, %v2633_v16 }
 0x744   : > { %v1253_v43 = vmul.f32 0.088388346, %v1244_v17 }
 0x745   : > { %v1258_v47 = vsel %vm539_vm0, %v1254_v45, -inf }
 0x746   : > { %v1255_v46 = vsel %vm539_vm0, %v1253_v43, -inf }
 0x74a   : > { %v2647_v18 = vpop.f32.mrb[12].mxu1 }
 0x74b   : > { %v1467_v19 = vmul.f32 0.088388346, %v2647_v18  ;;  %v1457_v20 = vpop.f32.mrb[13].mxu1 }
 0x74c   : > { %v1466_v21 = vmul.f32 0.088388346, %v1457_v20 }
 0x74d   : > { %v1471_v22 = vsel %vm539_vm0, %v1467_v19, -inf }
 0x74e   : > { %1472 = vmax.xlane.f32.xlu0 %v1471_v22  ;;  %v1468_v23 = vsel %vm539_vm0, %v1466_v21, -inf }
 0x74f   : > { %1469 = vmax.xlane.f32.xlu1 %v1468_v23 }
 0x760   : > { %2950 = vrot.lane.b32.xlu1 %v3315_v59, %s3076_s17 }
 0x764   : > { %1588 = vrot.lane.b32.xlu1 %v3303_v32, %s3077_s18 }
 0x768   : > { %1590 = vrot.lane.b32.xlu1 %v3321_v60, %s3077_s18 }
 0x78c   : > { %828 = vmax.xlane.f32.xlu1 %v827_v25 }
 0x7db   : > { %v1473_v26 = vpop.xlane.xlu0 %1472 }
 0x7dc   : > { %v1475_v27 = vsub.f32 %v1467_v19, %v1473_v26  ;;  %v1470_v29 = vpop.xlane.xlu1 %1469 }
 0x7dd   : > { %v1474_v30 = vsub.f32 %v1466_v21, %v1470_v29 }
 0x7de   : > { %v1478_v31 = vmul.f32 1.442695, %v1475_v27 }
 0x7df   : > { %v1476_v33 = vmul.f32 1.442695, %v1474_v30 }
 0x7e0   : > { %3014 = vpow2.f32 %v1478_v31  ;;  %v2951_v34 = vpop.permute.xlu1 %2950 }
 0x7e1   : > { %v2953_v37 = vunpack.i.h.bf16 %v2951_v34  ;;  %v2952_v38 = vunpack.i.l.bf16 %v2951_v34  ;;  %3016 = vpow2.f32 %v1476_v33 }
 0x7e3   : > { %v2842_v39 = vpack.c.bf16 %v2953_v37, %v2952_v38 }
 0x7e4   : > { %v1589_v61 = vpop.permute.xlu1 %1588 }
 0x7e5   : > { %2843 = vmatprep.subr.bf16.mxu1 %v2842_v39 }
 0x7e6   : > { %2845 = vmatpush3.bf16.msra.mxu1 %v2842_v39 }
 0x7e8   : > { %v1591_v62 = vpop.permute.xlu1 %1590 }
 0x7ea   : > { %v3015_v28 = vpop.eup %3014 }
 0x7eb   : > { %v1483_v36 = vsel %vm539_vm0, %v3015_v28, 0.0  ;;  %v3017_v40 = vpop.eup %3016 }
 0x7ec   : > { %1484 = vadd.xlane.f32.xlu0 %v1483_v36  ;;  %v1480_v41 = vsel %vm539_vm0, %v3017_v40, 0.0 }
 0x7f0   : > { %1481 = vadd.xlane.f32.xlu0 %v1480_v41 }
 0x806   : > { %2955 = vrot.lane.b32.xlu0 %v3313_v58, %s3077_s18 }
 0x819   : > { %v829_v1 = vpop.xlane.xlu1 %828 }
 0x81a   : > { %v833_v3 = vsub.f32 %v825_v24, %v829_v1 }
 0x81c   : > { %v835_v7 = vmul.f32 1.442695, %v833_v3 }
 0x825   : > { %831 = vmax.xlane.f32.xlu0 %v830_v44 }
 0x829   : > { %1256 = vmax.xlane.f32.xlu0 %v1255_v46 }
 0x82d   : > { %1259 = vmax.xlane.f32.xlu0 %v1258_v47 }
 0x879   : > { %v1485_v48 = vpop.xlane.xlu0 %1484 }
 0x87a   : > { %3018 = vrcp.f32 %v1485_v48 }
 0x87d   : > { %v1482_v49 = vpop.xlane.xlu0 %1481 }
 0x87e   : > { %3020 = vrcp.f32 %v1482_v49 }
 0x881   : > { %v2956_v50 = vpop.permute.xlu0 %2955 }
 0x882   : > { %v2958_v51 = vunpack.i.h.bf16 %v2956_v50  ;;  %v2957_v52 = vunpack.i.l.bf16 %v2956_v50 }
 0x884   : > { %v2846_v53 = vpack.c.bf16 %v2958_v51, %v2957_v52  ;;  %v3019_v35 = vpop.eup %3018 }
 0x885   : > { %v1489_v57 = vmul.f32 %v3019_v35, %v3015_v28 }
 0x886   : > { %2848 = vmatprep.subr.msk.bf16.mxu1 %vm3309_vm1, %v2846_v53 }
 0x888   : > { %v3021_v54 = vpop.eup %3020 }
 0x889   : > { %v1487_v56 = vmul.f32 %v3021_v54, %v3017_v40 }
 0x88b   : > { %2652 = vmatprep.mubr.msk.f32.mxu1 %vm539_vm0, %v1487_v56 }
 0x88c   : > { %2653 = vmatmul.mubr.msk.f32.vlgmr.msra.gmra.mrb[14].mxu1 %vm539_vm0, %v1489_v57 }
 0x88d   : > { %2851 = vmatpush3.bf16.xpose.msk.msra.mxu1 %vm3309_vm1, %v2846_v53  ;;  %2659 = vmatprep.mubr.msk.f32.mxu1 %vm539_vm0, %v1589_v61 }
 0x894   : > { %2660 = vmatmul.mubr.msk.f32.vlgmr.msra.gmra.mrb[16].mxu1 %vm539_vm0, %v1591_v62 }
 0x8b2   : > { %v832_v63 = vpop.xlane.xlu0 %831 }
 0x8b3   : > { %v834_v2 = vsub.f32 %v826_v42, %v832_v63 }
 0x8b5   : > { %v837_v5 = vmul.f32 1.442695, %v834_v2 }
 0x8b6   : > { %v1257_v0 = vpop.xlane.xlu0 %1256 }
 0x8b7   : > { %v1261_v8 = vsub.f32 %v1253_v43, %v1257_v0  ;;  %3022 = vpow2.f32 %v837_v5 }
 0x8b8   : > { %3024 = vpow2.f32 %v835_v7 }
 0x8b9   : > { %v1263_v12 = vmul.f32 1.442695, %v1261_v8 }
 0x8ba   : > { %v1260_v4 = vpop.xlane.xlu0 %1259 }
 0x8bb   : > { %v1262_v6 = vsub.f32 %v1254_v45, %v1260_v4 }
 0x8bd   : > { %v1265_v11 = vmul.f32 1.442695, %v1262_v6 }
 0x8bf   : > { %3026 = vpow2.f32 %v1265_v11 }
 0x8c0   : > { %3028 = vpow2.f32 %v1263_v12 }
 0x8c1   : > { %v3023_v20 = vpop.eup %3022 }
 0x8c2   : > { %v3025_v22 = vpop.eup %3024  ;;  %v842_v23 = vsel %vm539_vm0, %v3023_v20, 0.0 }
 0x8c3   : > { %v839_v25 = vsel %vm539_vm0, %v3025_v22, 0.0 }
 0x8c9   : > { %v3430_v24 = vpop.eup %3026 }
 0x8ca   : > { %v3029_v26 = vpop.eup %3028  ;;  %v1270_v27 = vsel %vm539_vm0, %v3430_v24, 0.0 }
 0x8cb   : > { %v1267_v29 = vsel %vm539_vm0, %v3029_v26, 0.0 }
 0x95f   : > { %v3423_v9 = vpop.f32.mrb[14].mxu1 }
 0x960   : > { %v3425_v10 = vpop.f32.mrb[15].mxu1 }
 0x967   : > { %v2661_v13 = vpop.f32.mrb[16].mxu1 }
 0x968   : > { %v1680_v16 = vmul.f32 0.088388346, %v2661_v13  ;;  %v1670_v17 = vpop.f32.mrb[17].mxu1 }
 0x969   : > { %v1679_v18 = vmul.f32 0.088388346, %v1670_v17 }
 0x96a   : > { %v1684_v19 = vsel %vm539_vm0, %v1680_v16, -inf }
 0x96b   : > { %1685 = vmax.xlane.f32.xlu0 %v1684_v19  ;;  %v1681_v21 = vsel %vm539_vm0, %v1679_v18, -inf }
 0x96c   : > { %1682 = vmax.xlane.f32.xlu1 %v1681_v21 }
 0x96f   : > { %843 = vadd.xlane.f32.xlu0 %v842_v23 }
 0x970   : > { %840 = vadd.xlane.f32.xlu1 %v839_v25 }
 0x973   : > { %1271 = vadd.xlane.f32.xlu0 %v1270_v27 }
 0x974   : > { %1268 = vadd.xlane.f32.xlu1 %v1267_v29 }
 0x985   : > { %2960 = vrot.lane.b32.xlu1 %v3315_v59, %s3074_s15 }
 0x989   : > { %2970 = vrot.lane.b32.xlu1 %v3315_v59, %s3077_s18 }
 0x98d   : > { %2975 = vrot.lane.b32.xlu1 %v3313_v58, %s3078_s19 }
 0x9f8   : > { %v1686_v30 = vpop.xlane.xlu0 %1685 }
 0x9f9   : > { %v1688_v31 = vsub.f32 %v1680_v16, %v1686_v30  ;;  %v1683_v33 = vpop.xlane.xlu1 %1682 }
 0x9fa   : > { %v1687_v34 = vsub.f32 %v1679_v18, %v1683_v33 }
 0x9fb   : > { %v1691_v37 = vmul.f32 1.442695, %v1688_v31 }
 0x9fc   : > { %v1689_v38 = vmul.f32 1.442695, %v1687_v34  ;;  %v844_v39 = vpop.xlane.xlu0 %843 }
 0x9fd   : > { %3030 = vpow2.f32 %v1691_v37  ;;  %v841_v28 = vpop.xlane.xlu1 %840 }
 0x9fe   : > { %3032 = vpow2.f32 %v1689_v38 }
 0x9ff   : > { %3034 = vrcp.f32 %v844_v39 }
 0xa00   : > { %3036 = vrcp.f32 %v841_v28  ;;  %v1272_v54 = vpop.xlane.xlu0 %1271 }
 0xa01   : > { %v1269_v36 = vpop.xlane.xlu1 %1268 }
 0xa02   : > { %3038 = vrcp.f32 %v1269_v36 }
 0xa03   : > { %3040 = vrcp.f32 %v1272_v54 }
 0xa05   : > { %v2961_v40 = vpop.permute.xlu1 %2960 }
 0xa06   : > { %v2963_v41 = vunpack.i.h.bf16 %v2961_v40  ;;  %v2962_v42 = vunpack.i.l.bf16 %v2961_v40 }
 0xa07   : > { %v3031_v43 = vpop.eup %3030 }
 0xa08   : > { %v3033_v44 = vpop.eup %3032  ;;  %v2812_v45 = vpack.c.bf16 %v2963_v41, %v2962_v42  ;;  %v1696_v46 = vsel %vm539_vm0, %v3031_v43, 0.0 }
 0xa09   : > { %v3035_v47 = vpop.eup %3034  ;;  %1697 = vadd.xlane.f32.xlu0 %v1696_v46  ;;  %v1693_v48 = vsel %vm539_vm0, %v3033_v44, 0.0  ;;  %v2971_v35 = vpop.permute.xlu1 %2970 }
 0xa0a   : > { %v3037_v49 = vpop.eup %3036  ;;  %1694 = vadd.xlane.f32.xlu1 %v1693_v48  ;;  %2813 = vmatprep.subr.bf16.mxu0 %v2812_v45  ;;  %v848_v52 = vmul.f32 %v3035_v47, %v3023_v20  ;;  %v2973_v63 = vunpack.i.h.bf16 %v2971_v35  ;;  %v2972_v0 = vunpack.i.l.bf16 %v2971_v35 }
 0xa0b   : > { %2815 = vmatpush3.bf16.msra.mxu0 %v2812_v45  ;;  %v846_v50 = vmul.f32 %v3037_v49, %v3025_v22 }
 0xa0c   : > { %v3039_v51 = vpop.eup %3038  ;;  %v2852_v5 = vpack.c.bf16 %v2973_v63, %v2972_v0 }
 0xa0d   : > { %2610 = vmatprep.mubr.msk.f32.mxu0 %vm539_vm0, %v846_v50  ;;  %v1274_v53 = vmul.f32 %v3039_v51, %v3029_v26  ;;  %v2976_v56 = vpop.permute.xlu1 %2975  ;;  %v3041_v4 = vpop.eup %3040 }
 0xa0e   : > { %2611 = vmatmul.mubr.msk.f32.vlgmr.msra.gmra.mrb[6].mxu0 %vm539_vm0, %v848_v52  ;;  %v2978_v6 = vunpack.i.h.bf16 %v2976_v56  ;;  %v2977_v7 = vunpack.i.l.bf16 %v2976_v56  ;;  %v1276_v11 = vmul.f32 %v3041_v4, %v3430_v24 }
 0xa0f   : > { %2638 = vmatprep.mubr.msk.f32.mxu0 %vm539_vm0, %v1274_v53 }
 0xa10   : > { %v2856_v13 = vpack.c.bf16 %v2978_v6, %v2977_v7 }
 0xa1b   : > { %1801 = vrot.lane.b32.xlu1 %v3303_v32, %s3078_s19 }
 0xa1f   : > { %2965 = vrot.lane.b32.xlu0 %v3315_v59, %s3075_s16 }
 0xa23   : > { %1803 = vrot.lane.b32.xlu0 %v3321_v60, %s3078_s19 }
 0xa96   : > { %v1698_v57 = vpop.xlane.xlu0 %1697 }
 0xa97   : > { %3042 = vrcp.f32 %v1698_v57  ;;  %v1695_v61 = vpop.xlane.xlu1 %1694 }
 0xa98   : > { %3044 = vrcp.f32 %v1695_v61 }
 0xa9a   : > { %v2966_v62 = vpop.permute.xlu0 %2965 }
 0xa9b   : > { %v2968_v1 = vunpack.i.h.bf16 %v2966_v62  ;;  %v2967_v2 = vunpack.i.l.bf16 %v2966_v62  ;;  %v1802_v18 = vpop.permute.xlu1 %1801 }
 0xa9d   : > { %v2832_v3 = vpack.c.bf16 %v2968_v1, %v2967_v2 }
 0xa9e   : > { %v1804_v19 = vpop.permute.xlu0 %1803 }
 0xa9f   : > { %2833 = vmatprep.subr.bf16.mxu0 %v2832_v3 }
 0xaa0   : > { %2835 = vmatpush3.bf16.msra.mxu0 %v2832_v3 }
 0xaa1   : > { %v3043_v8 = vpop.eup %3042  ;;  %2853 = vmatprep.subr.bf16.mxu0 %v2852_v5 }
 0xaa2   : > { %v3045_v12 = vpop.eup %3044  ;;  %v1702_v17 = vmul.f32 %v3043_v8, %v3031_v43 }
 0xaa3   : > { %2639 = vmatmul.mubr.msk.f32.vlgmr.msra.gmra.mrb[8].mxu0 %vm539_vm0, %v1276_v11  ;;  %v1700_v16 = vmul.f32 %v3045_v12, %v3033_v44 }
 0xaa4   : > { %2855 = vmatpush3.bf16.msra.mxu0 %v2852_v5 }
 0xaa5   : > { %2666 = vmatprep.mubr.msk.f32.mxu0 %vm539_vm0, %v1700_v16  ;;  %2858 = vmatprep.subr.msk.bf16.mxu0 %vm3309_vm1, %v2856_v13 }
 0xaa7   : > { %2667 = vmatmul.mubr.msk.f32.vlgmr.msra.gmra.mrb[10].mxu0 %vm539_vm0, %v1702_v17 }
 0xaa8   : > { %2673 = vmatprep.mubr.msk.f32.mxu0 %vm539_vm0, %v1802_v18 }
 0xaad   : > { %2861 = vmatpush3.bf16.xpose.msk.msra.mxu0 %vm3309_vm1, %v2856_v13 }
 0xab4   : > { %2674 = vmatmul.mubr.msk.f32.vlgmr.msra.gmra.mrb[12].mxu0 %vm539_vm0, %v1804_v19 }
 0xae1   : > { %v3463_v20 = vpop.f32.mrb[6].mxu0 }
 0xae2   : > { %v3465_v21 = vpop.f32.mrb[7].mxu0 }
 0xb76   : > { %v3467_v22 = vpop.f32.mrb[8].mxu0 }
 0xb77   : > { %v3469_v23 = vpop.f32.mrb[9].mxu0 }
 0xb7a   : > { %v3471_v24 = vpop.f32.mrb[10].mxu0 }
 0xb7b   : > { %v3473_v25 = vpop.f32.mrb[11].mxu0 }
 0xb87   : > { %v2675_v26 = vpop.f32.mrb[12].mxu0 }
 0xb88   : > { %v1893_v27 = vmul.f32 0.088388346, %v2675_v26  ;;  %v1883_v29 = vpop.f32.mrb[13].mxu0 }
 0xb89   : > { %v1892_v30 = vmul.f32 0.088388346, %v1883_v29 }
 0xb8a   : > { %v1897_v31 = vsel %vm539_vm0, %v1893_v27, -inf }
 0xb8b   : > { %1898 = vmax.xlane.f32.xlu0 %v1897_v31  ;;  %v1894_v33 = vsel %vm539_vm0, %v1892_v30, -inf }
 0xb8c   : > { %1895 = vmax.xlane.f32.xlu1 %v1894_v33 }
 0xb9d   : > { %2980 = vrot.lane.b32.xlu1 %v3315_v59, %s3078_s19 }
 0xba1   : > { %2014 = vrot.lane.b32.xlu1 %v3303_v32, %s3079_s20 }
 0xba5   : > { %2016 = vrot.lane.b32.xlu1 %v3321_v60, %s3079_s20 }
 0xc18   : > { %v1899_v34 = vpop.xlane.xlu0 %1898 }
 0xc19   : > { %v1901_v37 = vsub.f32 %v1893_v27, %v1899_v34  ;;  %v1896_v38 = vpop.xlane.xlu1 %1895 }
 0xc1a   : > { %v1900_v39 = vsub.f32 %v1892_v30, %v1896_v38  ;;  %v2229_v38 = vld [vmem:[%s3605_s5] sm:$0xff] }
 0xc1b   : > { %v1904_v28 = vmul.f32 1.442695, %v1901_v37 }
 0xc1c   : > { %v1902_v36 = vmul.f32 1.442695, %v1900_v39  ;;  %v2230_v39 = vld [vmem:[%s3605_s5 + $0x8] sm:$0xff] }
 0xc1d   : > { %3046 = vpow2.f32 %v1904_v28  ;;  %v2981_v40 = vpop.permute.xlu1 %2980  ;;  %v2231_v28 = vld [vmem:[%s3605_s5 + $0x10] sm:$0xff] }
 0xc1e   : > { %v2983_v41 = vunpack.i.h.bf16 %v2981_v40  ;;  %v2982_v42 = vunpack.i.l.bf16 %v2981_v40  ;;  %3048 = vpow2.f32 %v1902_v36  ;;  %v2876_v36 = vpack.c.bf16 %v2230_v39, %v2229_v38  ;;  %v2232_v40 = vld [vmem:[%s3605_s5 + $0x18] sm:$0xff] }
 0xc20   : > { %v2862_v43 = vpack.c.bf16 %v2983_v41, %v2982_v42  ;;  %v2880_v41 = vpack.c.bf16 %v2232_v40, %v2231_v28  ;;  %v2233_v42 = vld [vmem:[%s3605_s5 + $0x20] sm:$0xff] }
 0xc21   : > { %v2015_v56 = vpop.permute.xlu1 %2014 }
 0xc22   : > { %2863 = vmatprep.subr.bf16.mxu1 %v2862_v43 }
 0xc23   : > { %2865 = vmatpush3.bf16.msra.mxu1 %v2862_v43  ;;  %v2234_v43 = vld [vmem:[%s3605_s5 + $0x28] sm:$0xff] }
 0xc27   : > { %v3047_v44 = vpop.eup %3046 }
 0xc28   : > { %v1909_v32 = vsel %vm539_vm0, %v3047_v44, 0.0  ;;  %v3049_v45 = vpop.eup %3048 }
 0xc29   : > { %1910 = vadd.xlane.f32.xlu0 %v1909_v32  ;;  %v1906_v60 = vsel %vm539_vm0, %v3049_v45, 0.0  ;;  %v2235_v32 = vld [vmem:[%s3605_s5 + $0x30] sm:$0xff] }
 0xc2d   : > { %1907 = vadd.xlane.f32.xlu0 %v1906_v60 }
 0xc43   : > { %2985 = vrot.lane.b32.xlu0 %v3313_v58, %s3079_s20  ;;  %v2017_v58 = vpop.permute.xlu1 %2016 }
 0xcb6   : > { %v1911_v46 = vpop.xlane.xlu0 %1910 }
 0xcb7   : > { %3050 = vrcp.f32 %v1911_v46  ;;  %v2237_v46 = vld [vmem:[%s3605_s5 + $0x40] sm:$0xff] }
 0xcba   : > { %v1908_v47 = vpop.xlane.xlu0 %1907 }
 0xcbb   : > { %3052 = vrcp.f32 %v1908_v47  ;;  %v2238_v47 = vld [vmem:[%s3605_s5 + $0x48] sm:$0xff] }
 0xcbe   : > { %v2986_v48 = vpop.permute.xlu0 %2985 }
 0xcbf   : > { %v2988_v49 = vunpack.i.h.bf16 %v2986_v48  ;;  %v2987_v50 = vunpack.i.l.bf16 %v2986_v48  ;;  %v2892_v48 = vpack.c.bf16 %v2238_v47, %v2237_v46 }
 0xcc1   : > { %v2866_v51 = vpack.c.bf16 %v2988_v49, %v2987_v50  ;;  %v3051_v52 = vpop.eup %3050  ;;  %v2239_v49 = vld [vmem:[%s3605_s5 + $0x50] sm:$0xff]  ;;  %v2240_v50 = vld [vmem:[%s3605_s5 + $0x58] sm:$0xff] }
 0xcc2   : > { %v1915_v54 = vmul.f32 %v3051_v52, %v3047_v44  ;;  %v2884_v44 = vpack.c.bf16 %v2234_v43, %v2233_v42  ;;  %v2241_v52 = vld [vmem:[%s3605_s5 + $0x60] sm:$0xff] }
 0xcc3   : > { %2868 = vmatprep.subr.msk.bf16.mxu1 %vm3309_vm1, %v2866_v51 }
 0xcc5   : > { %v3053_v53 = vpop.eup %3052 }
 0xcc6   : > { %v1913_v35 = vmul.f32 %v3053_v53, %v3049_v45  ;;  %v2236_v45 = vld [vmem:[%s3605_s5 + $0x38] sm:$0xff]  ;;  %v2242_v53 = vld [vmem:[%s3605_s5 + $0x68] sm:$0xff] }
 0xcc7   : > { %v2888_v60 = vpack.c.bf16 %v2236_v45, %v2235_v32 }
 0xcc8   : > { %2680 = vmatprep.mubr.msk.f32.mxu1 %vm539_vm0, %v1913_v35  ;;  %v2900_v35 = vpack.c.bf16 %v2242_v53, %v2241_v52 }
 0xcc9   : > { %2681 = vmatmul.mubr.msk.f32.vlgmr.msra.gmra.mrb[18].mxu1 %vm539_vm0, %v1915_v54  ;;  %v2243_v54 = vld [vmem:[%s3605_s5 + $0x70] sm:$0xff] }
 0xcca   : > { %2871 = vmatpush3.bf16.xpose.msk.msra.mxu1 %vm3309_vm1, %v2866_v51  ;;  %2687 = vmatprep.mubr.msk.f32.mxu1 %vm539_vm0, %v2015_v56  ;;  %v2896_v51 = vpack.c.bf16 %v2240_v50, %v2239_v49  ;;  %v2244_v56 = vld [vmem:[%s3605_s5 + $0x78] sm:$0xff] }
 0xcd1   : > { %2688 = vmatmul.mubr.msk.f32.vlgmr.msra.gmra.mrb[20].mxu1 %vm539_vm0, %v2017_v58  ;;  %v2904_v58 = vpack.c.bf16 %v2244_v56, %v2243_v54 }
 0xd9c   : > { %v2682_v57 = vpop.f32.mrb[18].mxu1 }
 0xd9d   : > { %v1994_v61 = vpop.f32.mrb[19].mxu1 }
 0xda4   : > { %v2689_v62 = vpop.f32.mrb[20].mxu1 }
 0xda5   : > { %v2106_v63 = vmul.f32 0.088388346, %v2689_v62  ;;  %v2096_v0 = vpop.f32.mrb[21].mxu1 }
 0xda6   : > { %v2105_v1 = vmul.f32 0.088388346, %v2096_v0 }
 0xda7   : > { %v2110_v2 = vsel %vm539_vm0, %v2106_v63, -inf }
 0xda8   : > { %2111 = vmax.xlane.f32.xlu0 %v2110_v2  ;;  %v2107_v3 = vsel %vm539_vm0, %v2105_v1, -inf  ;;  %v2445_v2 = vld [vmem:[%s3606_s6] ss:$0 sm:$0xff] }
 0xda9   : > { %2108 = vmax.xlane.f32.xlu1 %v2107_v3 }
 0xdba   : > { %2990 = vrot.lane.b32.xlu1 %v3315_v59, %s3079_s20 }
 0xdbe   : > { %942 = vrot.lane.b32.xlu1 %v3463_v20, %s3079_s20 }
 0xdc2   : > { %1153 = vrot.lane.b32.xlu1 %v3395_v15, %s3078_s19 }
 0xdc6   : > { %1155 = vrot.lane.b32.xlu1 %v3393_v14, %s3078_s19 }
 0xdca   : > { %1368 = vrot.lane.b32.xlu1 %v3467_v22, %s3077_s18 }
 0xdce   : > { %1581 = vrot.lane.b32.xlu1 %v3423_v9, %s3076_s17 }
 0xdd2   : > { %1794 = vrot.lane.b32.xlu1 %v3471_v24, %s3075_s16 }
 0xdd6   : > { %2007 = vrot.lane.b32.xlu1 %v2682_v57, %s3073_s14 }
 0xe35   : > { %v2112_v55 = vpop.xlane.xlu0 %2111 }
 0xe36   : > { %v2114_v59 = vsub.f32 %v2106_v63, %v2112_v55  ;;  %v2109_v4 = vpop.xlane.xlu1 %2108 }
 0xe37   : > { %v2113_v5 = vsub.f32 %v2105_v1, %v2109_v4 }
 0xe38   : > { %v2117_v6 = vmul.f32 1.442695, %v2114_v59 }
 0xe39   : > { %v2115_v15 = vmul.f32 1.442695, %v2113_v5  ;;  %v3062_v5 = vld [vmem:[%s3136_s29 + $0x8] sm:$0xff] }
 0xe3a   : > { %v2991_v7 = vpop.permute.xlu1 %2990 }
 0xe3b   : > { %3054 = vpow2.f32 %v2115_v15  ;;  %v2993_v14 = vunpack.i.h.bf16 %v2991_v7  ;;  %v2992_v8 = vunpack.i.l.bf16 %v2991_v7  ;;  %v3063_v15 = vld [vmem:[%s3136_s29] sm:$0xff] }
 0xe3c   : > { %3056 = vpow2.f32 %v2117_v6 }
 0xe3d   : > { %v2872_v11 = vpack.c.bf16 %v2993_v14, %v2992_v8 }
 0xe3e   : > { %v943_v12 = vpop.permute.xlu1 %942 }
 0xe3f   : > { %948 = vst.msk [vmem:[#allocation2 + $0x8] sm:$0xff] %vm946_vm2, %v943_v12  ;;  %2873 = vmatprep.subr.bf16.mxu0 %v2872_v11 }
 0xe40   : > { %2875 = vmatpush3.bf16.msra.mxu0 %v2872_v11 }
 0xe41   : > { %2877 = vmatprep.subr.bf16.mxu0 %v2876_v36 }
 0xe42   : > { %v1154_v9 = vpop.permute.xlu1 %1153 }
 0xe45   : > { %v3055_v13 = vpop.eup %3054 }
 0xe46   : > { %v1156_v16 = vpop.permute.xlu1 %1155  ;;  %v2119_v17 = vsel %vm539_vm0, %v3055_v13, 0.0  ;;  %v3057_v18 = vpop.eup %3056 }
 0xe47   : > { %1161 = vst.msk [vmem:[#allocation2 + $0x8] sm:$0xff] %vm1159_vm3, %v1156_v16  ;;  %2120 = vadd.xlane.f32.xlu0 %v2119_v17  ;;  %v2122_v20 = vsel %vm539_vm0, %v3057_v18, 0.0 }
 0xe4a   : > { %v1369_v19 = vpop.permute.xlu1 %1368 }
 0xe4b   : > { %1374 = vst.msk [vmem:[#allocation2 + $0x8] sm:$0xff] %vm1372_vm4, %v1369_v19  ;;  %2123 = vadd.xlane.f32.xlu0 %v2122_v20 }
 0xe4e   : > { %v1582_v22 = vpop.permute.xlu1 %1581 }
 0xe4f   : > { %1587 = vst.msk [vmem:[#allocation2 + $0x8] sm:$0xff] %vm1585_vm5, %v1582_v22 }
 0xe52   : > { %v1795_v24 = vpop.permute.xlu1 %1794 }
 0xe53   : > { %1800 = vst.msk [vmem:[#allocation2 + $0x8] sm:$0xff] %vm1798_vm6, %v1795_v24 }
 0xe56   : > { %v2008_v26 = vpop.permute.xlu1 %2007 }
 0xe57   : > { %2013 = vst.msk [vmem:[#allocation2 + $0x8] sm:$0xff] %vm2011_vm7, %v2008_v26 }
 0xe61   : > { %940 = vrot.lane.b32.xlu0 %v3465_v21, %s3079_s20  ;;  %s278_s20 = scalar_lea.vmem %s3607_s7, %s2448_s26 }
 0xe65   : > { %1366 = vrot.lane.b32.xlu0 %v3469_v23, %s3077_s18 }
 0xe69   : > { %1579 = vrot.lane.b32.xlu0 %v3425_v10, %s3076_s17 }
 0xe6d   : > { %1792 = vrot.lane.b32.xlu0 %v3473_v25, %s3075_s16 }
 0xe71   : > { %2005 = vrot.lane.b32.xlu0 %v1994_v61, %s3073_s14 }
 0xed4   : > { %v2121_v27 = vpop.xlane.xlu0 %2120 }
 0xed5   : > { %3058 = vrcp.f32 %v2121_v27 }
 0xed8   : > { %v2124_v29 = vpop.xlane.xlu0 %2123 }
 0xed9   : > { %3060 = vrcp.f32 %v2124_v29 }
 0xedc   : > { %v941_v30 = vpop.permute.xlu0 %940 }
 0xedd   : > { %947 = vst.msk [vmem:[#allocation2] sm:$0xff] %vm946_vm2, %v941_v30 }
 0xede   : > { %1160 = vst.msk [vmem:[#allocation2] sm:$0xff] %vm1159_vm3, %v1154_v9 }
 0xedf   : > { %v3059_v21 = vpop.eup %3058 }
 0xee0   : > { %v1367_v31 = vpop.permute.xlu0 %1366  ;;  %v2126_v23 = vmul.f32 %v3059_v21, %v3055_v13 }
 0xee1   : > { %1373 = vst.msk [vmem:[#allocation2] sm:$0xff] %vm1372_vm4, %v1367_v31 }
 0xee2   : > { %2694 = vmatprep.mubr.msk.f32.mxu0 %vm539_vm0, %v2126_v23 }
 0xee3   : > { %v3061_v10 = vpop.eup %3060 }
 0xee4   : > { %v2128_v25 = vmul.f32 %v3061_v10, %v3057_v18  ;;  %v1580_v33 = vpop.permute.xlu0 %1579 }
 0xee5   : > { %1586 = vst.msk [vmem:[#allocation2] sm:$0xff] %vm1585_vm5, %v1580_v33 }
 0xee6   : > { %2695 = vmatmul.mubr.msk.f32.vlgmr.msra.gmra.mrb[14].mxu0 %vm539_vm0, %v2128_v25 }
 0xee7   : > { %2879 = vmatpush3.bf16.msra.mxu0 %v2876_v36 }
 0xee8   : > { %v1793_v34 = vpop.permute.xlu0 %1792  ;;  %2881 = vmatprep.subr.bf16.mxu0 %v2880_v41 }
 0xee9   : > { %1799 = vst.msk [vmem:[#allocation2] sm:$0xff] %vm1798_vm6, %v1793_v34 }
 0xeeb   : > { %2883 = vmatpush3.bf16.msra.mxu0 %v2880_v41 }
 0xeec   : > { %v2006_v37 = vpop.permute.xlu0 %2005  ;;  %2885 = vmatprep.subr.bf16.mxu0 %v2884_v44 }
 0xeed   : > { %2012 = vst.msk [vmem:[#allocation2] sm:$0xff] %vm2011_vm7, %v2006_v37 }
 0xeef   : > { %2887 = vmatpush3.bf16.msra.mxu0 %v2884_v44 }
 0xef0   : > { %2889 = vmatprep.subr.bf16.mxu0 %v2888_v60 }
 0xef3   : > { %2891 = vmatpush3.bf16.msra.mxu0 %v2888_v60 }
 0xef4   : > { %2893 = vmatprep.subr.bf16.mxu0 %v2892_v48 }
 0xef7   : > { %2895 = vmatpush3.bf16.msra.mxu0 %v2892_v48 }
 0xef8   : > { %2897 = vmatprep.subr.bf16.mxu0 %v2896_v51 }
 0xefb   : > { %2899 = vmatpush3.bf16.msra.mxu0 %v2896_v51 }
 0xefc   : > { %2901 = vmatprep.subr.bf16.mxu0 %v2900_v35 }
 0xeff   : > { %2903 = vmatpush3.bf16.msra.mxu0 %v2900_v35 }
 0xf00   : > { %2905 = vmatprep.subr.bf16.mxu0 %v2904_v58 }
 0xf03   : > { %2907 = vmatpush3.bf16.msra.mxu0 %v2904_v58 }
 0xfb9   : > { %v2696_v57 = vpop.f32.mrb[14].mxu0 }
 0xfba   : > { %2220 = vrot.lane.b32.xlu1 %v2696_v57, %s3074_s15  ;;  %v2207_v61 = vpop.f32.mrb[15].mxu0 }
 0xfbb   : > { %2218 = vrot.lane.b32.xlu0 %v2207_v61, %s3074_s15 }
0x102c   : > { %v2221_v62 = vpop.permute.xlu1 %2220 }
0x102d   : > { %2226 = vst.msk [vmem:[#allocation2 + $0x8] sm:$0xff] %vm2224_vm8, %v2221_v62  ;;  %v2219_v63 = vpop.permute.xlu0 %2218 }
0x102e   : > { %2225 = vst.msk [vmem:[#allocation2] sm:$0xff] %vm2224_vm8, %v2219_v63 }
0x1034   : > { %v2228_v1 = vld [vmem:[#allocation2 + $0x8] sm:$0xff] }
0x1035   : > { %v2227_v0 = vld [vmem:[#allocation2] sm:$0xff] }
0x1036   : > { %2729 = vmatprep.mubr.f32.mxu0 %v2227_v0 }
0x1037   : > { %2730 = vmatmul.mubr.f32.vlgmr.msra.gmra.mrb[16].mxu0 %v2228_v1 }
0x110a   : > { %v2731_v3 = vpop.f32.mrb[16].mxu0 }
0x110b   : > { %v2324_v55 = vadd.f32 %v2731_v3, %v2445_v2  ;;  %v2318_v59 = vpop.f32.mrb[17].mxu0 }
0x110c   : > { %v2319_v4 = vadd.f32 %v2445_v2, %v2318_v59 }
0x110d   : > { %v2328_v6 = vadd.f32 %v3062_v5, %v2324_v55 }
0x110e   : > { %v2327_v7 = vadd.f32 %v3063_v15, %v2319_v4 }
0x110f   : > { %2330 = vst [vmem:[%s278_s20 + $0x8] sm:$0xff] %v2328_v6 }
0x1110   : > { %2329 = vst [vmem:[%s278_s20] sm:$0xff] %v2327_v7 }
0x1111 PF: > { %s17_s24 = sadd.s32 1, %s3070_s24  }
0x1112   : > { %p14_p4 = scmp.ge.s32.totalorder %s17_s24, 4  }
0x1114   :  { %16 = sbr.rel (!%p14_p4) target bundleno = 1 (0x1), region = 78 }

// kernel: transformer_block_forward.8
= control target key start
LH: loop header
LB: loop body
LE: loop exit
PB: predicated region body
PF: predicated region fallthrough
CT: control target
= control target key end

     0   :  { %s4169_s0 = inlined_call_operand.hbm [shape: f32[2,16,128], index: 0, kind: input, shape index: {}]   ;;  %s4170_s1 = inlined_call_operand.hbm [shape: f32[1,128], index: 1, kind: input, shape index: {}]   ;;  %s4171_s2 = inlined_call_operand.hbm [shape: f32[1,128], index: 2, kind: input, shape index: {}]   ;;  %s4172_s3 = inlined_call_operand.hbm [shape: f32[128,384], index: 3, kind: input, shape index: {}]   ;;  %s4173_s4 = inlined_call_operand.hbm [shape: f32[1,384], index: 4, kind: input, shape index: {}]   ;;  %s4174_s5 = inlined_call_operand.hbm [shape: f32[128,128], index: 5, kind: input, shape index: {}]   ;;  %s4175_s6 = inlined_call_operand.hbm [shape: f32[1,128], index: 6, kind: input, shape index: {}]   ;;  %s4176_s7 = inlined_call_operand.vmem [shape: f32[2,16,128], index: 7, kind: output, shape index: {}]  }
   0x1   :  { %4179 = sst [smem:[#allocation18_spill]] %s4170_s1 }
   0x2   :  { %12 = vsyncpa [#allocation4], 0 }
   0x3   :  { %14 = vsyncpa [#allocation4 + $0x1], 0 }
   0x4   :  { %15 = vsyncpa [#allocation6], 0 }
   0x5   :  { %16 = vsyncpa [#allocation9], 0 }
   0x6   :  { %17 = vsyncpa [#allocation12], 0  ;;  %s3646_s24 = smov 0   ;;  %s3648_s25 = smov 0  }
   0x7   :  { %s3650_s26 = smov 0   ;;  %s3652_s27 = smov 0  }
   0x8 LB: > { %s3587_s28 = smov [#allocation5]   ;;  %s3667_s30 = sadd.s32 4294967295, %s3585_s27   ;;  %s3585_s27 = sphi %s3652_s27, %s4199_s27   ;;  %s3581_s26 = sphi %s3650_s26, %s4198_s26   ;;  %s3577_s25 = sphi %s3648_s25, %s4197_s25   ;;  %s3573_s24 = sphi %s3646_s24, %s4196_s24  }
   0x9   : > { %s219_s29 = sshll.u32 %s3587_s28, 4  ;;  %p2555_p0 = scmp.ge.s32.totalorder %s3585_s27, 1  ;;  %s220_s29 = int_to_ptr.vmem [resolvable:$true] %s219_s29 }
   0xa   : > { %p4177_p1 = scmp.eq.s32.totalorder %s3667_s30, 0  ;;  %p206_p2 = scmp.lt.s32.totalorder %s3585_s27, 3 }
   0xb   : > { %s3588_s9 = smov [#allocation8]   ;;  %s3589_s12 = smov [#allocation11]  }
   0xc   : > { %p3672_p3 = pnand %p2555_p0, %p206_p2  ;;  %s240_s10 = sshll.u32 %s3588_s9, 4  ;;  %s3678_s10 = int_to_ptr.vmem [resolvable:$true] %s240_s10 }
   0xd   : > { %s264_s13 = sshll.u32 %s3589_s12, 4  ;;  %s4182_s1 = sld [smem:[#allocation18_spill]]  ;;  %s3686_s13 = int_to_ptr.vmem [resolvable:$true] %s264_s13 }
   0xe   : > { %s4180_s8 = scalar_select %p3672_p3, 1, 0 }
   0xf   : > { %p3115_p4 = pneg %p3672_p3 }
  0x11   : > { %p3682_p5 = pnand %p3115_p4, %p4177_p1 }
  0x13   : > { %s3341_s16 = scalar_lea.hbm %s4182_s1, 16  ;;  %p3696_p7 = pneg %p3682_p5 }
  0x14   : > { %p3342_p6 = scmp.ne.s32.totalorder %s4182_s1, %s3341_s16  ;;  %p3348_p10 = scmp.lt.u32.totalorder %s3341_s16, %s4182_s1 }
  0x16   : > { %p3344_p8 = pnand %p3696_p7, %p3342_p6 }
  0x18   : > { %p3345_p9 = pneg %p3344_p8 }
  0x1a   : > { %p3350_p11 = pnand %p3348_p10, %p3345_p9 }
  0x1c   : > { %3353 = shalt.err (!%p3350_p11)
}
  0x1d   : > { %s3354_s22 = scalar_lea.vmem %s220_s29, 16  ;;  %s3361_s23 = scalar_lea.vmem %s220_s29, 32 }
  0x1e   : > { %p3355_p12 = scmp.ne.s32.totalorder %s220_s29, %s3354_s22  ;;  %p3362_p2 = scmp.lt.s32.totalorder %s220_s29, %s220_s29 }
  0x1f   : > { %p3363_p4 = scmp.lt.s32.totalorder %s3361_s23, %s3354_s22 }
  0x20   : > { %p3357_p13 = pnand %p3355_p12, %p3696_p7 }
  0x21   : > { %p3364_p1 = por %p3363_p4, %p3362_p2 }
  0x22   : > { %p3358_p0 = pneg %p3357_p13 }
  0x24   : > { %p3365_p3 = pnand %p3364_p1, %p3358_p0 }
  0x26   : > { %3368 = shalt.err (!%p3365_p3)
}
  0x27   : > { %3118 = dma.hbm_to_vmem [thread:$0]  (!%p3682_p5), %s4182_s1, 16, %s220_s29, [#allocation6]  }
  0x28   : > { %s3369_s15 = scalar_lea.hbm %s4172_s3, 6144 }
  0x29   : > { %p3370_p6 = scmp.ne.s32.totalorder %s4172_s3, %s3369_s15  ;;  %p3376_p1 = scmp.lt.u32.totalorder %s3369_s15, %s4172_s3 }
  0x2b   : > { %p3372_p8 = pnand %p3370_p6, %p3696_p7 }
  0x2d   : > { %p3373_p9 = pneg %p3372_p8 }
  0x2f   : > { %p3378_p3 = pnand %p3376_p1, %p3373_p9 }
  0x31   : > { %3381 = shalt.err (!%p3378_p3)
}
  0x32   : > { %s3382_s29 = scalar_lea.vmem %s3678_s10, 6144  ;;  %p3390_p13 = scmp.lt.s32.totalorder %s3678_s10, %s3678_s10 }
  0x33   : > { %p3383_p10 = scmp.ne.s32.totalorder %s3678_s10, %s3382_s29  ;;  %p3391_p0 = scmp.lt.s32.totalorder %s3382_s29, %s3382_s29 }
  0x35   : > { %p3385_p11 = pnand %p3383_p10, %p3696_p7  ;;  %p3392_p2 = por %p3391_p0, %p3390_p13 }
  0x37   : > { %p3386_p12 = pneg %p3385_p11 }
  0x39   : > { %p3393_p4 = pnand %p3392_p2, %p3386_p12 }
  0x3b   : > { %3396 = shalt.err (!%p3393_p4)
}
  0x3c   : > { %s3590_s21 = smov 384   ;;  %s3591_s22 = smov 24  }
  0x3d   : > { %3124 = dma.hbm_to_vmem [thread:$0]  (!%p3682_p5), %s4172_s3, 6144, %s3678_s10, [#allocation9], %s3590_s21, %s3590_s21, %s3591_s22  }
  0x3e   : > { %s3397_s14 = scalar_lea.hbm %s4174_s5, 2048 }
  0x3f   : > { %p3398_p6 = scmp.ne.s32.totalorder %s4174_s5, %s3397_s14  ;;  %p3404_p1 = scmp.lt.u32.totalorder %s3397_s14, %s4174_s5 }
  0x41   : > { %p3400_p8 = pnand %p3398_p6, %p3696_p7 }
  0x43   : > { %p3401_p9 = pneg %p3400_p8 }
  0x45   : > { %p3406_p3 = pnand %p3404_p1, %p3401_p9 }
  0x47   : > { %3409 = shalt.err (!%p3406_p3)
}
  0x48   : > { %s3410_s10 = scalar_lea.vmem %s3686_s13, 2048  ;;  %p3418_p13 = scmp.lt.s32.totalorder %s3686_s13, %s3686_s13 }
  0x49   : > { %p3411_p10 = scmp.ne.s32.totalorder %s3686_s13, %s3410_s10  ;;  %p3419_p0 = scmp.lt.s32.totalorder %s3410_s10, %s3410_s10 }
  0x4b   : > { %p3413_p11 = pnand %p3411_p10, %p3696_p7  ;;  %p3420_p2 = por %p3419_p0, %p3418_p13 }
  0x4d   : > { %p3414_p12 = pneg %p3413_p11 }
  0x4f   : > { %p3421_p4 = pnand %p3420_p2, %p3414_p12 }
  0x51   : > { %3424 = shalt.err (!%p3421_p4)
}
  0x52   : > { %s3592_s20 = smov 128   ;;  %s3593_s29 = smov 8  }
  0x53   : > { %3130 = dma.hbm_to_vmem [thread:$0]  (!%p3682_p5), %s4174_s5, 2048, %s3686_s13, [#allocation12], %s3592_s20, %s3592_s20, %s3593_s29  }
  0x54   : > { %s3594_s23 = smov [#allocation7]   ;;  %s3595_s9 = smov [#allocation10]  }
  0x55   : > { %s230_s28 = sshll.u32 %s3594_s23, 4  ;;  %s254_s12 = sshll.u32 %s3595_s9, 4  ;;  %s231_s28 = int_to_ptr.vmem [resolvable:$true] %s230_s28  ;;  %s255_s12 = int_to_ptr.vmem [resolvable:$true] %s254_s12 }
  0x56   : > { %s3425_s16 = scalar_lea.hbm %s4171_s2, 16 }
  0x57   : > { %p3426_p6 = scmp.ne.s32.totalorder %s4171_s2, %s3425_s16  ;;  %p3432_p1 = scmp.lt.u32.totalorder %s3425_s16, %s4171_s2 }
  0x59   : > { %p3428_p8 = pnand %p3426_p6, %p3696_p7 }
  0x5b   : > { %p3429_p9 = pneg %p3428_p8 }
  0x5d   : > { %p3434_p3 = pnand %p3432_p1, %p3429_p9 }
  0x5f   : > { %3437 = shalt.err (!%p3434_p3)
}
  0x60   : > { %s3438_s13 = scalar_lea.vmem %s231_s28, 16  ;;  %s3445_s21 = scalar_lea.vmem %s231_s28, 32 }
  0x61   : > { %p3439_p10 = scmp.ne.s32.totalorder %s231_s28, %s3438_s13  ;;  %p3446_p13 = scmp.lt.s32.totalorder %s231_s28, %s231_s28 }
  0x62   : > { %p3447_p0 = scmp.lt.s32.totalorder %s3445_s21, %s3438_s13 }
  0x63   : > { %p3441_p11 = pnand %p3439_p10, %p3696_p7 }
  0x64   : > { %p3448_p2 = por %p3447_p0, %p3446_p13 }
  0x65   : > { %p3442_p12 = pneg %p3441_p11 }
  0x67   : > { %p3449_p4 = pnand %p3448_p2, %p3442_p12 }
  0x69   : > { %3452 = shalt.err (!%p3449_p4)
}
  0x6a   : > { %3121 = dma.hbm_to_vmem [thread:$0]  (!%p3682_p5), %s4171_s2, 16, %s231_s28, [#allocation6]  }
  0x6b   : > { %s3453_s14 = scalar_lea.hbm %s4173_s4, 48 }
  0x6c   : > { %p3454_p6 = scmp.ne.s32.totalorder %s4173_s4, %s3453_s14  ;;  %p3460_p1 = scmp.lt.u32.totalorder %s3453_s14, %s4173_s4 }
  0x6e   : > { %p3456_p8 = pnand %p3454_p6, %p3696_p7 }
  0x70   : > { %p3457_p9 = pneg %p3456_p8 }
  0x72   : > { %p3462_p3 = pnand %p3460_p1, %p3457_p9 }
  0x74   : > { %3465 = shalt.err (!%p3462_p3)
}
  0x75   : > { %s3466_s10 = scalar_lea.vmem %s255_s12, 48  ;;  %s3473_s28 = scalar_lea.vmem %s255_s12, 64 }
  0x76   : > { %p3467_p10 = scmp.ne.s32.totalorder %s255_s12, %s3466_s10  ;;  %p3474_p13 = scmp.lt.s32.totalorder %s255_s12, %s255_s12 }
  0x77   : > { %p3475_p0 = scmp.lt.s32.totalorder %s3473_s28, %s3466_s10 }
  0x78   : > { %p3469_p11 = pnand %p3467_p10, %p3696_p7 }
  0x79   : > { %p3476_p2 = por %p3475_p0, %p3474_p13 }
  0x7a   : > { %p3470_p12 = pneg %p3469_p11 }
  0x7c   : > { %p3477_p4 = pnand %p3476_p2, %p3470_p12 }
  0x7e   : > { %3480 = shalt.err (!%p3477_p4)
}
  0x7f   : > { %3127 = dma.hbm_to_vmem [thread:$0]  (!%p3682_p5), %s4173_s4, 48, %s255_s12, [#allocation9]  }
  0x80   : > { %s3596_s22 = smov [#allocation13]   ;;  %s3481_s14 = scalar_lea.hbm %s4175_s6, 16 }
  0x81   : > { %s278_s23 = sshll.u32 %s3596_s22, 4  ;;  %p3482_p6 = scmp.ne.s32.totalorder %s4175_s6, %s3481_s14  ;;  %s279_s23 = int_to_ptr.vmem [resolvable:$true] %s278_s23 }
  0x82   : > { %p3488_p1 = scmp.lt.u32.totalorder %s3481_s14, %s4175_s6 }
  0x83   : > { %p3484_p8 = pnand %p3482_p6, %p3696_p7 }
  0x85   : > { %p3485_p9 = pneg %p3484_p8 }
  0x87   : > { %p3490_p3 = pnand %p3488_p1, %p3485_p9 }
  0x89   : > { %3493 = shalt.err (!%p3490_p3)
}
  0x8a   : > { %s3494_s12 = scalar_lea.vmem %s279_s23, 16  ;;  %s3501_s10 = scalar_lea.vmem %s279_s23, 32 }
  0x8b   : > { %p3495_p10 = scmp.ne.s32.totalorder %s279_s23, %s3494_s12  ;;  %p3502_p13 = scmp.lt.s32.totalorder %s279_s23, %s279_s23 }
  0x8c   : > { %p3503_p0 = scmp.lt.s32.totalorder %s3501_s10, %s3494_s12 }
  0x8d   : > { %p3497_p11 = pnand %p3495_p10, %p3696_p7 }
  0x8e   : > { %p3504_p2 = por %p3503_p0, %p3502_p13 }
  0x8f   : > { %p3498_p12 = pneg %p3497_p11 }
  0x91   : > { %p3505_p4 = pnand %p3504_p2, %p3498_p12 }
  0x93   : > { %3508 = shalt.err (!%p3505_p4)
}
  0x94   : > { %3133 = dma.hbm_to_vmem [thread:$0]  (!%p3682_p5), %s4175_s6, 16, %s279_s23, [#allocation12]  }
  0x95   : > { %s3816_s19 = sadd.s32 1, %s3585_s27   ;;  %s30_s11 = sadd.s32 1, %s3581_s26 }
  0x96   : > { %s27_s21 = ssub.s32 %s3585_s27, %s3816_s19  ;;  %p37_p7 = scmp.ne.s32.totalorder %s3581_s26, %s3577_s25 }
  0x97   : > { %p28_p6 = scmp.eq.s32.totalorder %s27_s21, 0  ;;  %p38_p8 = scmp.eq.s32.totalorder %s3585_s27, 0 }
  0x98   : > { %p43_p9 = scmp.ne.s32.totalorder %s3577_s25, %s3573_s24  ;;  %p3144_p1 = scmp.lt.s32.totalorder %s3585_s27, 2 }
  0x99   : > { %s3828_s22 = scalar_select %p28_p6, %s3581_s26, %s30_s11  }
  0x9a   : > { %p39_p3 = por %p38_p8, %p37_p7  ;;  %p4184_p10 = scmp.eq.s32.totalorder %s3667_s30, 0 }
  0x9b   : > { %s289_s9 = sand.u32 1, %s3581_s26   ;;  %s2629_s23 = sshll.u32 %s3585_s27, 8 }
  0x9c   : > { %p3832_p11 = por %p4184_p10, %p43_p9  ;;  %s2563_s14 = sshll.u32 %s289_s9, 4 }
  0x9d   : > { %s3841_s17 = scalar_lea.hbm %s4169_s0, %s2629_s23  ;;  %s293_s24 = scalar_lea.vmem [#allocation3], %s2563_s14 }
  0x9e   : > { %s300_s18 = sshll.u32 %s293_s24, 4  ;;  %p3843_p5 = pnand %p3144_p1, %p39_p3  ;;  %s3847_s18 = int_to_ptr.vmem [resolvable:$true] %s300_s18 }
  0x9f   : > { %s3849_s27 = scalar_lea.sflag [#allocation4], %s289_s9  ;;  %s3509_s10 = scalar_lea.hbm %s3841_s17, 256 }
  0xa0   : > { %p3510_p12 = scmp.ne.s32.totalorder %s3841_s17, %s3509_s10  ;;  %p3511_p13 = pneg %p3843_p5 }
  0xa1   : > { %s3514_s11 = scalar_lea.hbm %s4169_s0, 512  ;;  %p3515_p4 = scmp.lt.u32.totalorder %s3841_s17, %s4169_s0 }
  0xa2   : > { %p3512_p0 = pnand %p3511_p13, %p3510_p12  ;;  %p3516_p7 = scmp.lt.u32.totalorder %s3514_s11, %s3509_s10 }
  0xa3   : > { %p3518_p8 = scmp.lt.u32.totalorder %s3509_s10, %s3841_s17 }
  0xa4   : > { %p3513_p2 = pneg %p3512_p0  ;;  %p3517_p6 = por %p3516_p7, %p3515_p4 }
  0xa6   : > { %p3519_p9 = por %p3518_p8, %p3517_p6 }
  0xa8   : > { %p3520_p1 = pnand %p3519_p9, %p3513_p2 }
  0xaa   : > { %3523 = shalt.err (!%p3520_p1)
}
  0xab   : > { %s3524_s9 = scalar_lea.vmem %s3847_s18, 256  ;;  %s3597_s14 = smov [#allocation3]  }
  0xac   : > { %p3525_p3 = scmp.ne.s32.totalorder %s3847_s18, %s3524_s9  ;;  %s3529_s15 = sshll.u32 %s3597_s14, 4  ;;  %s3530_s15 = int_to_ptr.vmem [resolvable:$false] %s3529_s15 }
  0xad   : > { %s3531_s16 = scalar_lea.vmem %s3530_s15, 512  ;;  %p3532_p0 = scmp.lt.s32.totalorder %s3847_s18, %s3530_s15 }
  0xae   : > { %p3527_p10 = pnand %p3525_p3, %p3511_p13  ;;  %p3533_p4 = scmp.lt.s32.totalorder %s3531_s16, %s3524_s9 }
  0xb0   : > { %p3528_p12 = pneg %p3527_p10  ;;  %p3534_p7 = por %p3533_p4, %p3532_p0 }
  0xb2   : > { %p3535_p6 = pnand %p3534_p7, %p3528_p12 }
  0xb4   : > { %3538 = shalt.err (!%p3535_p6)
}
  0xb5   : > { %3137 = dma.hbm_to_vmem [thread:$0]  (!%p3843_p5), %s3841_s17, 256, %s3847_s18, %s3849_s27, %s3592_s20, %s3592_s20, %s3593_s29  }
  0xb6   : > { %p4187_p13 = scmp.ne.s32.totalorder %s4180_s8, 0 }
  0xb7   : > { %s314_s24 = sand.u32 (!%p4187_p13), 1, %s3577_s25  }
  0xb8   : > { %312 = sbr.rel (%p4187_p13) target bundleno = 4554 (0x11ca), region = 48  ;;  %s2567_s10 = sshll.u32 (!%p4187_p13), %s314_s24, 4 }
  0xb9   : > { %s315_s28 = scalar_lea.sflag (!%p4187_p13), [#allocation4], %s314_s24  ;;  %s3883_s13 = scalar_lea.vmem (!%p4187_p13), [#allocation3], %s2567_s10 }
  0xbf   : > { %3556 = dma.done.wait (%p3832_p11), %s315_s28, 256  }
  0xc0   : > { %3558 = vsyncadd (%p3832_p11), %s315_s28, 4294967040  ;;  %p4188_p2 = scmp.eq.s32.totalorder %s3667_s30, 0 }
  0xc2   : > { %3560 = dma.done.wait (%p4188_p2), [#allocation6], 32   ;;  %p4189_p5 = pmov %p4188_p2 }
  0xc3   : > { %p4190_p8 = pmov %p4188_p2 }
  0xc4   : > { %3562 = vsyncadd (%p4189_p5), [#allocation6], 4294967264 }
  0xc5   : > { %3564 = dma.done.wait (%p4190_p8), [#allocation9], 6192   ;;  %p4191_p9 = pmov %p4188_p2 }
  0xc6   : > { %p4192_p1 = pmov %p4188_p2 }
  0xc7   : > { %3566 = vsyncadd (%p4191_p9), [#allocation9], 4294961104 }
  0xc8   : > { %3568 = dma.done.wait (%p4192_p1), [#allocation12], 2064   ;;  %p4193_p3 = pmov %p4192_p1 }
  0xc9   : > { %v378_v0 = vld [vmem:[%s3883_s13] sm:$0xff]  ;;  %v379_v1 = vld [vmem:[%s3883_s13 + $0x8] sm:$0xff]  ;;  %vm638_vm0 = vcmask 130048   ;;  %s3599_s8 = smov 96   ;;  %s3600_s20 = smov 112   ;;  %vm1045_vm2 = vcmask 261248  }
  0xca   : > { %3570 = vsyncadd (%p4193_p3), [#allocation12], 4294965232  ;;  %382 = vadd.xlane.f32.xlu0 %v378_v0  ;;  %v422_v2 = vld [vmem:[#allocation8 + $0x8] sm:$0xff]  ;;  %v425_v3 = vld [vmem:[#allocation8 + $0x20] sm:$0xff]  ;;  %s3601_s29 = smov 80   ;;  %s3602_s1 = smov 64  }
  0xcb   : > { %v421_v4 = vld [vmem:[#allocation8] sm:$0xff]  ;;  %v2913_v5 = vpack.c.bf16 %v425_v3, %v422_v2  ;;  %v424_v6 = vld [vmem:[#allocation8 + $0x18] sm:$0xff]  ;;  %v431_v8 = vld [vmem:[#allocation8 + $0x50] sm:$0xff]  ;;  %s3603_s17 = smov 48   ;;  %s3604_s18 = smov 32   ;;  %vm1258_vm3 = vcmask 392448  }
  0xcc   : > { %v428_v7 = vld [vmem:[#allocation8 + $0x38] sm:$0xff]  ;;  %v2915_v9 = vpack.c.bf16 %v424_v6, %v421_v4  ;;  %v423_v11 = vld [vmem:[#allocation8 + $0x10] sm:$0xff]  ;;  %v426_v12 = vld [vmem:[#allocation8 + $0x28] sm:$0xff]  ;;  %v3598_v4 = vmov 0.0   ;;  %s3605_s12 = smov 16   ;;  %vm1471_vm4 = vcmask 523648  }
  0xcd   : > { %v2917_v10 = vpack.c.bf16 %v431_v8, %v428_v7  ;;  %v427_v13 = vld [vmem:[#allocation8 + $0x30] sm:$0xff]  ;;  %2914 = vmatprep.subr.bf16.mxu0 %v2913_v5  ;;  %v2945_v14 = vpack.c.bf16 %v426_v12, %v423_v11  ;;  %v430_v15 = vld [vmem:[#allocation8 + $0x48] sm:$0xff]  ;;  %v437_v17 = vld [vmem:[#allocation8 + $0x80] sm:$0xff]  ;;  %550 = vmatprep.mubr.f32.mxu0 %v3598_v4  ;;  %vm1684_vm5 = vcmask 654848   ;;  %vm1897_vm6 = vcmask 786048   ;;  %p373_p11 = scmp.lt.s32.totalorder %s3667_s30, 1 }
  0xce   : > { %384 = vadd.xlane.f32.xlu0 %v379_v1  ;;  %v434_v16 = vld [vmem:[#allocation8 + $0x68] sm:$0xff]  ;;  %2916 = vmatpush1.bf16.msra.mxu0 %v2915_v9  ;;  %v2919_v18 = vpack.c.bf16 %v430_v15, %v427_v13  ;;  %v429_v19 = vld [vmem:[#allocation8 + $0x40] sm:$0xff]  ;;  %v432_v20 = vld [vmem:[#allocation8 + $0x58] sm:$0xff]  ;;  %vm2110_vm7 = vcmask 917248   ;;  %vm2323_vm8 = vcmask 1048448  }
  0xcf   : > { %2918 = vmatprep.subr.bf16.mxu0 %v2917_v10  ;;  %2946 = vmatprep.subr.bf16.mxu1 %v2945_v14  ;;  %v2921_v21 = vpack.c.bf16 %v437_v17, %v434_v16  ;;  %v2949_v22 = vpack.c.bf16 %v432_v20, %v429_v19  ;;  %v433_v23 = vld [vmem:[#allocation8 + $0x60] sm:$0xff]  ;;  %v436_v24 = vld [vmem:[#allocation8 + $0x78] sm:$0xff]  ;;  %v443_v35 = vld [vmem:[#allocation8 + $0xb0] sm:$0xff]  ;;  %s4201_s30 = smov (!%p373_p11, %s3667_s30), 1 }
  0xd0   : > { %2948 = vmatpush3.bf16.msra.mxu1 %v2945_v14  ;;  %v2923_v25 = vpack.c.bf16 %v436_v24, %v433_v23  ;;  %v440_v34 = vld [vmem:[#allocation8 + $0x98] sm:$0xff]  ;;  %v435_v36 = vld [vmem:[#allocation8 + $0x70] sm:$0xff]  ;;  %v438_v38 = vld [vmem:[#allocation8 + $0x88] sm:$0xff]  ;;  %s2630_s27 = sshll.u32 %s4201_s30, 4 }
  0xd1   : > { %2950 = vmatprep.subr.bf16.mxu1 %v2949_v22  ;;  %v2925_v37 = vpack.c.bf16 %v443_v35, %v440_v34  ;;  %v439_v39 = vld [vmem:[#allocation8 + $0x90] sm:$0xff]  ;;  %v442_v40 = vld [vmem:[#allocation8 + $0xa8] sm:$0xff]  ;;  %v2953_v41 = vpack.c.bf16 %v438_v38, %v435_v36  ;;  %v449_v44 = vld [vmem:[#allocation8 + $0xe0] sm:$0xff]  ;;  %s377_s23 = scalar_lea.vmem %s4176_s7, %s2630_s27 }
  0xd2   : > { %2920 = vmatpush1.bf16.msra.mxu0 %v2919_v18  ;;  %v2927_v42 = vpack.c.bf16 %v442_v40, %v439_v39  ;;  %v446_v43 = vld [vmem:[#allocation8 + $0xc8] sm:$0xff]  ;;  %v441_v45 = vld [vmem:[#allocation8 + $0xa0] sm:$0xff]  ;;  %v444_v47 = vld [vmem:[#allocation8 + $0xb8] sm:$0xff] }
  0xd3   : > { %2922 = vmatprep.subr.bf16.mxu0 %v2921_v21  ;;  %v2929_v46 = vpack.c.bf16 %v449_v44, %v446_v43  ;;  %v445_v48 = vld [vmem:[#allocation8 + $0xc0] sm:$0xff]  ;;  %v448_v49 = vld [vmem:[#allocation8 + $0xd8] sm:$0xff]  ;;  %v2957_v50 = vpack.c.bf16 %v444_v47, %v441_v45  ;;  %v455_v53 = vld [vmem:[#allocation8 + $0x110] sm:$0xff] }
  0xd4   : > { %2952 = vmatpush3.bf16.msra.mxu1 %v2949_v22  ;;  %v2931_v51 = vpack.c.bf16 %v448_v49, %v445_v48  ;;  %v452_v52 = vld [vmem:[#allocation8 + $0xf8] sm:$0xff]  ;;  %v447_v54 = vld [vmem:[#allocation8 + $0xd0] sm:$0xff]  ;;  %v450_v56 = vld [vmem:[#allocation8 + $0xe8] sm:$0xff] }
  0xd5   : > { %2954 = vmatprep.subr.bf16.mxu1 %v2953_v41  ;;  %v2933_v55 = vpack.c.bf16 %v455_v53, %v452_v52  ;;  %v451_v57 = vld [vmem:[#allocation8 + $0xf0] sm:$0xff]  ;;  %v454_v58 = vld [vmem:[#allocation8 + $0x108] sm:$0xff]  ;;  %v2961_v59 = vpack.c.bf16 %v450_v56, %v447_v54  ;;  %v461_v62 = vld [vmem:[#allocation8 + $0x140] sm:$0xff] }
  0xd6   : > { %2924 = vmatpush1.bf16.msra.mxu0 %v2923_v25  ;;  %v2935_v60 = vpack.c.bf16 %v454_v58, %v451_v57  ;;  %v458_v61 = vld [vmem:[#allocation8 + $0x128] sm:$0xff]  ;;  %v453_v63 = vld [vmem:[#allocation8 + $0x100] sm:$0xff]  ;;  %v460_v3 = vld [vmem:[#allocation8 + $0x138] sm:$0xff] }
  0xd7   : > { %2926 = vmatprep.subr.bf16.mxu0 %v2925_v37  ;;  %v457_v2 = vld [vmem:[#allocation8 + $0x120] sm:$0xff]  ;;  %v464_v7 = vld [vmem:[#allocation8 + $0x158] sm:$0xff]  ;;  %v467_v8 = vld [vmem:[#allocation8 + $0x170] sm:$0xff]  ;;  %v471_v37 = vlaneseq }
  0xd8   : > { %2956 = vmatpush3.bf16.msra.mxu1 %v2953_v41  ;;  %v2939_v6 = vpack.c.bf16 %v460_v3, %v457_v2  ;;  %v459_v9 = vld [vmem:[#allocation8 + $0x130] sm:$0xff]  ;;  %v2941_v10 = vpack.c.bf16 %v467_v8, %v464_v7  ;;  %v462_v11 = vld [vmem:[#allocation8 + $0x148] sm:$0xff]  ;;  %v465_v16 = vld [vmem:[#allocation8 + $0x160] sm:$0xff] }
  0xd9   : > { %2958 = vmatprep.subr.bf16.mxu1 %v2957_v50  ;;  %v463_v12 = vld [vmem:[#allocation8 + $0x150] sm:$0xff]  ;;  %v466_v13 = vld [vmem:[#allocation8 + $0x168] sm:$0xff]  ;;  %v2969_v14 = vpack.c.bf16 %v462_v11, %v459_v9  ;;  %v468_v17 = vld [vmem:[#allocation8 + $0x178] sm:$0xff]  ;;  %v472_v38 = vshrl.u32 %v471_v37, 7 }
  0xda   : > { %2928 = vmatpush1.bf16.msra.mxu0 %v2927_v42  ;;  %v2943_v15 = vpack.c.bf16 %v466_v13, %v463_v12  ;;  %v2973_v18 = vpack.c.bf16 %v468_v17, %v465_v16  ;;  %v469_v40 = vld [vmem:[#allocation10] sm:$0x7]  ;;  %vm3919_vm1 = vmpackc.low %vm638_vm0, %vm638_vm0 }
  0xdb   : > { %2930 = vmatprep.subr.bf16.mxu0 %v2929_v46  ;;  %v473_v39 = vsub.s32 0, %v472_v38  ;;  %v481_v42 = vsub.s32 2, %v472_v38 }
  0xdc   : > { %2960 = vmatpush3.bf16.msra.mxu1 %v2957_v50 }
  0xdd   : > { %2962 = vmatprep.subr.bf16.mxu1 %v2961_v59  ;;  %v474_v41 = vrot.slane %v469_v40, %v473_v39 }
  0xde   : > { %2932 = vmatpush1.bf16.msra.mxu0 %v2931_v51 }
  0xdf   : > { %2934 = vmatprep.subr.bf16.mxu0 %v2933_v55 }
  0xe0   : > { %2964 = vmatpush3.bf16.msra.mxu1 %v2961_v59 }
  0xe2   : > { %2936 = vmatpush1.bf16.msra.mxu0 %v2935_v60 }
 0x157   : > { %v383_v26 = vpop.xlane.xlu0 %382 }
 0x158   : > { %v387_v27 = vmul.f32 0.0078125, %v383_v26  ;;  %v2576_v26 = vld [vmem:[#allocation5] ss:$0 sm:$0xff] }
 0x15a   : > { %v3903_v28 = vsub.f32 %v378_v0, %v387_v27  ;;  %v2937_v0 = vpack.c.bf16 %v461_v62, %v458_v61 }
 0x15b   : > { %v385_v29 = vpop.xlane.xlu0 %384 }
 0x15c   : > { %v388_v30 = vmul.f32 0.0078125, %v385_v29  ;;  %v391_v31 = vmul.f32 %v3903_v28, %v3903_v28  ;;  %2938 = vmatprep.subr.bf16.mxu0 %v2937_v0  ;;  %v2577_v29 = vld [vmem:[#allocation7] ss:$0 sm:$0xff] }
 0x15d   : > { %2940 = vmatpush1.bf16.msra.mxu0 %v2939_v6 }
 0x15e   : > { %v3907_v32 = vsub.f32 %v379_v1, %v388_v30  ;;  %393 = vadd.xlane.f32.xlu1 %v391_v31  ;;  %v456_v1 = vld [vmem:[#allocation8 + $0x118] sm:$0xff]  ;;  %2942 = vmatprep.subr.bf16.mxu0 %v2941_v10 }
 0x15f   : > { %v2965_v5 = vpack.c.bf16 %v456_v1, %v453_v63 }
 0x160   : > { %v392_v33 = vmul.f32 %v3907_v32, %v3907_v32 }
 0x161   : > { %2966 = vmatprep.subr.bf16.mxu1 %v2965_v5  ;;  %2944 = vmatpush1.bf16.msra.mxu0 %v2943_v15 }
 0x162   : > { %395 = vadd.xlane.f32.xlu1 %v392_v33  ;;  %2968 = vmatpush3.bf16.msra.mxu1 %v2965_v5 }
 0x163   : > { %2970 = vmatprep.subr.bf16.mxu1 %v2969_v14 }
 0x166   : > { %2972 = vmatpush3.bf16.msra.mxu1 %v2969_v14 }
 0x167   : > { %2974 = vmatprep.subr.bf16.mxu1 %v2973_v18 }
 0x16a   : > { %2976 = vmatpush3.bf16.msra.mxu1 %v2973_v18 }
 0x1eb   : > { %v394_v19 = vpop.xlane.xlu1 %393 }
 0x1ec   : > { %v397_v20 = vmul.f32 0.0078125, %v394_v19 }
 0x1ee   : > { %v399_v21 = vadd.f32 1e-05, %v397_v20 }
 0x1ef   : > { %v396_v22 = vpop.xlane.xlu1 %395 }
 0x1f0   : > { %3271 = vrsqrt.f32 %v399_v21  ;;  %v398_v23 = vmul.f32 0.0078125, %v396_v22 }
 0x1f2   : > { %v400_v24 = vadd.f32 1e-05, %v398_v23 }
 0x1f4   : > { %3273 = vrsqrt.f32 %v400_v24 }
 0x1fa   : > { %v3272_v25 = vpop.eup %3271 }
 0x1fb   : > { %v403_v27 = vmul.f32 %v3272_v25, %v3903_v28  ;;  %v477_v28 = vsub.s32 1, %v472_v38 }
 0x1fd   : > { %v411_v30 = vmul.f32 %v2576_v26, %v403_v27  ;;  %v478_v46 = vrot.slane %v469_v40, %v477_v28 }
 0x1fe   : > { %v3274_v31 = vpop.eup %3273 }
 0x1ff   : > { %v419_v33 = vadd.f32 %v2577_v29, %v411_v30  ;;  %v404_v34 = vmul.f32 %v3274_v31, %v3907_v32  ;;  %v482_v32 = vrot.slane %v469_v40, %v481_v42 }
 0x201   : > { %551 = vmatmul.mubr.f32.vlgmr.msra.gmra.mrb[0].mxu0 %v419_v33  ;;  %2763 = vmatprep.mubr.f32.mxu1 %v419_v33  ;;  %v412_v35 = vmul.f32 %v2576_v26, %v404_v34 }
 0x202   : > { %556 = vmatprep.mubr.f32.mxu0 %v3598_v4 }
 0x203   : > { %v420_v36 = vadd.f32 %v2577_v29, %v412_v35 }
 0x205   : > { %557 = vmatmul.mubr.f32.gmra.mrb[2].mxu0 %v420_v36  ;;  %2764 = vmatmul.mubr.f32.vlgmr.msra.gmra.mrb[0].mxu1 %v420_v36 }
 0x2d4   : > { %v552_v43 = vpop.f32.mrb[0].mxu0 }
 0x2d5   : > { %v3913_v44 = vadd.f32 %v552_v43, %v474_v41  ;;  %v554_v45 = vpop.f32.mrb[1].mxu0 }
 0x2d6   : > { %v555_v52 = vadd.f32 %v554_v45, %v478_v46 }
 0x2d7   : > { %2770 = vmatprep.mubr.msk.f32.mxu0 %vm638_vm0, %v3913_v44 }
 0x2d8   : > { %v558_v47 = vpop.f32.mrb[2].mxu0  ;;  %v2765_v48 = vpop.f32.mrb[0].mxu1 }
 0x2d9   : > { %v635_v49 = vadd.f32 %v2765_v48, %v482_v32  ;;  %v560_v50 = vpop.f32.mrb[3].mxu0  ;;  %v629_v51 = vpop.f32.mrb[1].mxu1  ;;  %v3931_v60 = vadd.f32 %v558_v47, %v474_v41 }
 0x2da   : > { %v561_v53 = vadd.f32 %v560_v50, %v478_v46  ;;  %v630_v54 = vadd.f32 %v629_v51, %v482_v32 }
 0x2dc   : > { %v2977_v56 = vpack.c.bf16 %v561_v53, %v555_v52  ;;  %v2983_v57 = vpack.c.bf16 %v635_v49, %v630_v54  ;;  %v3923_v58 = vpack.i.bf16 %v561_v53, %v555_v52  ;;  %v3925_v59 = vpack.i.bf16 %v635_v49, %v630_v54 }
 0x2de   : > { %2979 = vmatprep.subr.msk.bf16.mxu0 %vm3919_vm1, %v2977_v56  ;;  %2984 = vmatprep.subr.bf16.mxu1 %v2983_v57 }
 0x2df   : > { %2982 = vmatpush3.bf16.xpose.msk.msra.mxu0 %vm3919_vm1, %v2977_v56  ;;  %2986 = vmatpush3.bf16.msra.mxu1 %v2983_v57 }
 0x2e6   : > { %2771 = vmatmul.mubr.msk.f32.vlgmr.msra.gmra.mrb[4].mxu0 %vm638_vm0, %v3931_v60 }
 0x3b9   : > { %v2772_v61 = vpop.f32.mrb[4].mxu0 }
 0x3ba   : > { %v727_v62 = vmul.f32 0.088388346, %v2772_v61  ;;  %v717_v63 = vpop.f32.mrb[5].mxu0 }
 0x3bb   : > { %v726_v0 = vmul.f32 0.088388346, %v717_v63 }
 0x3bc   : > { %v731_v1 = vsel %vm638_vm0, %v727_v62, -inf }
 0x3bd   : > { %732 = vmax.xlane.f32.xlu1 %v731_v1  ;;  %v728_v2 = vsel %vm638_vm0, %v726_v0, -inf }
 0x3be   : > { %729 = vmax.xlane.f32.xlu0 %v728_v2 }
 0x44a   : > { %v733_v3 = vpop.xlane.xlu1 %732 }
 0x44b   : > { %v735_v4 = vsub.f32 %v727_v62, %v733_v3  ;;  %v730_v5 = vpop.xlane.xlu0 %729 }
 0x44c   : > { %v734_v6 = vsub.f32 %v726_v0, %v730_v5 }
 0x44d   : > { %v738_v7 = vmul.f32 1.442695, %v735_v4 }
 0x44e   : > { %v736_v8 = vmul.f32 1.442695, %v734_v6 }
 0x44f   : > { %3275 = vpow2.f32 %v738_v7 }
 0x450   : > { %3277 = vpow2.f32 %v736_v8 }
 0x459   : > { %v3276_v9 = vpop.eup %3275 }
 0x45a   : > { %v3278_v10 = vpop.eup %3277  ;;  %v743_v11 = vsel %vm638_vm0, %v3276_v9, 0.0 }
 0x45b   : > { %744 = vadd.xlane.f32.xlu1 %v743_v11  ;;  %v740_v12 = vsel %vm638_vm0, %v3278_v10, 0.0 }
 0x45c   : > { %741 = vadd.xlane.f32.xlu0 %v740_v12 }
 0x46c   : > { %3207 = vrot.lane.b32.xlu1 %v3923_v58, %s3599_s8 }
 0x470   : > { %833 = vrot.lane.b32.xlu1 %v3913_v44, %s3600_s20 }
 0x472   : > { %3202 = vrot.lane.b32.xlu0 %v3923_v58, %s3600_s20 }
 0x474   : > { %835 = vrot.lane.b32.xlu1 %v3931_v60, %s3600_s20 }
 0x476   : > { %1048 = vrot.lane.b32.xlu0 %v3913_v44, %s3599_s8 }
 0x478   : > { %1050 = vrot.lane.b32.xlu1 %v3931_v60, %s3599_s8 }
 0x4e8   : > { %v745_v13 = vpop.xlane.xlu1 %744 }
 0x4e9   : > { %3279 = vrcp.f32 %v745_v13  ;;  %v742_v14 = vpop.xlane.xlu0 %741 }
 0x4ea   : > { %3281 = vrcp.f32 %v742_v14 }
 0x4ec   : > { %v3208_v19 = vpop.permute.xlu1 %3207 }
 0x4ed   : > { %v3203_v15 = vpop.permute.xlu0 %3202  ;;  %v3210_v22 = vunpack.i.h.bf16 %v3208_v19  ;;  %v3209_v23 = vunpack.i.l.bf16 %v3208_v19 }
 0x4ee   : > { %v3205_v16 = vunpack.i.h.bf16 %v3203_v15  ;;  %v3204_v17 = vunpack.i.l.bf16 %v3203_v15 }
 0x4ef   : > { %v2997_v26 = vpack.c.bf16 %v3210_v22, %v3209_v23 }
 0x4f0   : > { %v2987_v18 = vpack.c.bf16 %v3205_v16, %v3204_v17  ;;  %v834_v27 = vpop.permute.xlu1 %833 }
 0x4f1   : > { %v1049_v30 = vpop.permute.xlu0 %1048 }
 0x4f2   : > { %2989 = vmatprep.subr.msk.bf16.mxu1 %vm3919_vm1, %v2987_v18 }
 0x4f3   : > { %v3280_v20 = vpop.eup %3279 }
 0x4f4   : > { %v3282_v21 = vpop.eup %3281  ;;  %v749_v25 = vmul.f32 %v3280_v20, %v3276_v9  ;;  %v836_v29 = vpop.permute.xlu1 %835 }
 0x4f5   : > { %v747_v24 = vmul.f32 %v3282_v21, %v3278_v10 }
 0x4f7   : > { %2777 = vmatprep.mubr.msk.f32.mxu1 %vm638_vm0, %v747_v24 }
 0x4f8   : > { %2778 = vmatmul.mubr.msk.f32.vlgmr.msra.gmra.mrb[2].mxu1 %vm638_vm0, %v749_v25  ;;  %v1051_v31 = vpop.permute.xlu1 %1050 }
 0x4f9   : > { %2992 = vmatpush3.bf16.xpose.msk.msra.mxu1 %vm3919_vm1, %v2987_v18  ;;  %2784 = vmatprep.mubr.msk.f32.mxu1 %vm638_vm0, %v834_v27 }
 0x4fa   : > { %2999 = vmatprep.subr.msk.bf16.mxu1 %vm3919_vm1, %v2997_v26 }
 0x500   : > { %2785 = vmatmul.mubr.msk.f32.vlgmr.msra.gmra.mrb[4].mxu1 %vm638_vm0, %v836_v29 }
 0x501   : > { %3002 = vmatpush3.bf16.xpose.msk.msra.mxu1 %vm3919_vm1, %v2997_v26  ;;  %2798 = vmatprep.mubr.msk.f32.mxu1 %vm638_vm0, %v1049_v30 }
 0x508   : > { %2799 = vmatmul.mubr.msk.f32.vlgmr.msra.gmra.mrb[6].mxu1 %vm638_vm0, %v1051_v31 }
 0x5cb   : > { %v2779_v33 = vpop.f32.mrb[2].mxu1 }
 0x5cc   : > { %832 = vst.msk [vmem:[#allocation2 + $0x8] sm:$0xff] %vm638_vm0, %v2779_v33  ;;  %v822_v34 = vpop.f32.mrb[3].mxu1 }
 0x5cd   : > { %831 = vst.msk [vmem:[#allocation2] sm:$0xff] %vm638_vm0, %v822_v34 }
 0x5d3   : > { %v3967_v35 = vpop.f32.mrb[4].mxu1 }
 0x5d4   : > { %v3969_v36 = vpop.f32.mrb[5].mxu1 }
 0x5d5   : > { %v924_v24 = vmul.f32 0.088388346, %v3969_v36 }
 0x5d7   : > { %v926_v25 = vsel %vm638_vm0, %v924_v24, -inf }
 0x5db   : > { %v2800_v37 = vpop.f32.mrb[6].mxu1 }
 0x5dc   : > { %v1140_v38 = vmul.f32 0.088388346, %v2800_v37  ;;  %v1130_v39 = vpop.f32.mrb[7].mxu1 }
 0x5dd   : > { %v1139_v40 = vmul.f32 0.088388346, %v1130_v39 }
 0x5de   : > { %v1144_v41 = vsel %vm638_vm0, %v1140_v38, -inf }
 0x5df   : > { %1145 = vmax.xlane.f32.xlu1 %v1144_v41  ;;  %v1141_v42 = vsel %vm638_vm0, %v1139_v40, -inf }
 0x5e0   : > { %1142 = vmax.xlane.f32.xlu0 %v1141_v42 }
 0x5f0   : > { %3217 = vrot.lane.b32.xlu1 %v3923_v58, %s3601_s29 }
 0x5f4   : > { %3222 = vrot.lane.b32.xlu1 %v3923_v58, %s3602_s1 }
 0x5f8   : > { %1261 = vrot.lane.b32.xlu1 %v3913_v44, %s3601_s29 }
 0x5fc   : > { %1474 = vrot.lane.b32.xlu1 %v3913_v44, %s3602_s1 }
 0x66c   : > { %v1146_v28 = vpop.xlane.xlu1 %1145 }
 0x66d   : > { %v1148_v43 = vsub.f32 %v1140_v38, %v1146_v28  ;;  %v1143_v45 = vpop.xlane.xlu0 %1142  ;;  %v925_v28 = vmul.f32 0.088388346, %v3967_v35 }
 0x66e   : > { %v1147_v32 = vsub.f32 %v1139_v40, %v1143_v45 }
 0x66f   : > { %v1151_v46 = vmul.f32 1.442695, %v1148_v43  ;;  %v929_v45 = vsel %vm638_vm0, %v925_v28, -inf }
 0x670   : > { %v1149_v47 = vmul.f32 1.442695, %v1147_v32  ;;  %v3218_v54 = vpop.permute.xlu1 %3217 }
 0x671   : > { %3283 = vpow2.f32 %v1151_v46  ;;  %v3220_v57 = vunpack.i.h.bf16 %v3218_v54  ;;  %v3219_v61 = vunpack.i.l.bf16 %v3218_v54 }
 0x672   : > { %3285 = vpow2.f32 %v1149_v47 }
 0x673   : > { %v3007_v1 = vpack.c.bf16 %v3220_v57, %v3219_v61 }
 0x674   : > { %v3223_v2 = vpop.permute.xlu1 %3222 }
 0x675   : > { %v3225_v7 = vunpack.i.h.bf16 %v3223_v2  ;;  %v3224_v8 = vunpack.i.l.bf16 %v3223_v2 }
 0x677   : > { %v3017_v10 = vpack.c.bf16 %v3225_v7, %v3224_v8 }
 0x678   : > { %v1262_v9 = vpop.permute.xlu1 %1261 }
 0x67b   : > { %v3284_v48 = vpop.eup %3283 }
 0x67c   : > { %v1156_v49 = vsel %vm638_vm0, %v3284_v48, 0.0  ;;  %v3286_v50 = vpop.eup %3285  ;;  %v1475_v12 = vpop.permute.xlu1 %1474 }
 0x67d   : > { %1157 = vadd.xlane.f32.xlu0 %v1156_v49  ;;  %v1153_v51 = vsel %vm638_vm0, %v3286_v50, 0.0 }
 0x681   : > { %1154 = vadd.xlane.f32.xlu0 %v1153_v51 }
 0x697   : > { %3212 = vrot.lane.b32.xlu0 %v3925_v59, %s3599_s8 }
 0x69b   : > { %1263 = vrot.lane.b32.xlu0 %v3931_v60, %s3601_s29 }
 0x69f   : > { %1476 = vrot.lane.b32.xlu0 %v3931_v60, %s3602_s1 }
 0x70a   : > { %v1158_v52 = vpop.xlane.xlu0 %1157 }
 0x70b   : > { %3287 = vrcp.f32 %v1158_v52 }
 0x70e   : > { %v1155_v53 = vpop.xlane.xlu0 %1154 }
 0x70f   : > { %3289 = vrcp.f32 %v1155_v53 }
 0x712   : > { %v3213_v56 = vpop.permute.xlu0 %3212 }
 0x713   : > { %v3215_v62 = vunpack.i.h.bf16 %v3213_v56  ;;  %v3214_v63 = vunpack.i.l.bf16 %v3213_v56 }
 0x715   : > { %v3003_v0 = vpack.c.bf16 %v3215_v62, %v3214_v63  ;;  %v3288_v3 = vpop.eup %3287 }
 0x716   : > { %v1162_v6 = vmul.f32 %v3288_v3, %v3284_v48  ;;  %v1264_v11 = vpop.permute.xlu0 %1263 }
 0x717   : > { %3004 = vmatprep.subr.bf16.mxu1 %v3003_v0 }
 0x718   : > { %3006 = vmatpush3.bf16.msra.mxu1 %v3003_v0 }
 0x719   : > { %v3290_v4 = vpop.eup %3289  ;;  %3009 = vmatprep.subr.msk.bf16.mxu1 %vm3919_vm1, %v3007_v1 }
 0x71a   : > { %v1160_v5 = vmul.f32 %v3290_v4, %v3286_v50  ;;  %v1477_v13 = vpop.permute.xlu0 %1476 }
 0x71c   : > { %2805 = vmatprep.mubr.msk.f32.mxu1 %vm638_vm0, %v1160_v5 }
 0x71d   : > { %2806 = vmatmul.mubr.msk.f32.vlgmr.msra.gmra.mrb[8].mxu1 %vm638_vm0, %v1162_v6 }
 0x71e   : > { %2812 = vmatprep.mubr.msk.f32.mxu1 %vm638_vm0, %v1262_v9 }
 0x721   : > { %3012 = vmatpush3.bf16.xpose.msk.msra.mxu1 %vm3919_vm1, %v3007_v1 }
 0x722   : > { %3019 = vmatprep.subr.msk.bf16.mxu1 %vm3919_vm1, %v3017_v10 }
 0x728   : > { %2813 = vmatmul.mubr.msk.f32.vlgmr.msra.gmra.mrb[10].mxu1 %vm638_vm0, %v1264_v11 }
 0x729   : > { %3022 = vmatpush3.bf16.xpose.msk.msra.mxu1 %vm3919_vm1, %v3017_v10  ;;  %2826 = vmatprep.mubr.msk.f32.mxu1 %vm638_vm0, %v1475_v12 }
 0x730   : > { %2827 = vmatmul.mubr.msk.f32.vlgmr.msra.gmra.mrb[12].mxu1 %vm638_vm0, %v1477_v13 }
 0x7f0   : > { %v4003_v14 = vpop.f32.mrb[8].mxu1 }
 0x7f1   : > { %v4005_v15 = vpop.f32.mrb[9].mxu1 }
 0x7fb   : > { %v2814_v16 = vpop.f32.mrb[10].mxu1 }
 0x7fc   : > { %v1343_v17 = vpop.f32.mrb[11].mxu1  ;;  %v1353_v32 = vmul.f32 0.088388346, %v2814_v16 }
 0x7fd   : > { %v1352_v43 = vmul.f32 0.088388346, %v1343_v17 }
 0x7fe   : > { %v1357_v47 = vsel %vm638_vm0, %v1353_v32, -inf }
 0x7ff   : > { %v1354_v46 = vsel %vm638_vm0, %v1352_v43, -inf }
 0x803   : > { %v2828_v18 = vpop.f32.mrb[12].mxu1 }
 0x804   : > { %v1566_v19 = vmul.f32 0.088388346, %v2828_v18  ;;  %v1556_v20 = vpop.f32.mrb[13].mxu1 }
 0x805   : > { %v1565_v21 = vmul.f32 0.088388346, %v1556_v20 }
 0x806   : > { %v1570_v22 = vsel %vm638_vm0, %v1566_v19, -inf }
 0x807   : > { %1571 = vmax.xlane.f32.xlu0 %v1570_v22  ;;  %v1567_v23 = vsel %vm638_vm0, %v1565_v21, -inf }
 0x808   : > { %1568 = vmax.xlane.f32.xlu1 %v1567_v23 }
 0x819   : > { %3227 = vrot.lane.b32.xlu1 %v3925_v59, %s3602_s1 }
 0x81d   : > { %1687 = vrot.lane.b32.xlu1 %v3913_v44, %s3603_s17 }
 0x821   : > { %1689 = vrot.lane.b32.xlu1 %v3931_v60, %s3603_s17 }
 0x845   : > { %927 = vmax.xlane.f32.xlu1 %v926_v25 }
 0x894   : > { %v1572_v26 = vpop.xlane.xlu0 %1571 }
 0x895   : > { %v1574_v27 = vsub.f32 %v1566_v19, %v1572_v26  ;;  %v1569_v29 = vpop.xlane.xlu1 %1568 }
 0x896   : > { %v1573_v30 = vsub.f32 %v1565_v21, %v1569_v29 }
 0x897   : > { %v1577_v31 = vmul.f32 1.442695, %v1574_v27 }
 0x898   : > { %v1575_v33 = vmul.f32 1.442695, %v1573_v30 }
 0x899   : > { %3291 = vpow2.f32 %v1577_v31  ;;  %v3228_v34 = vpop.permute.xlu1 %3227 }
 0x89a   : > { %v3230_v37 = vunpack.i.h.bf16 %v3228_v34  ;;  %v3229_v38 = vunpack.i.l.bf16 %v3228_v34  ;;  %3293 = vpow2.f32 %v1575_v33 }
 0x89c   : > { %v3023_v39 = vpack.c.bf16 %v3230_v37, %v3229_v38 }
 0x89d   : > { %v1688_v61 = vpop.permute.xlu1 %1687 }
 0x89e   : > { %3024 = vmatprep.subr.bf16.mxu1 %v3023_v39 }
 0x89f   : > { %3026 = vmatpush3.bf16.msra.mxu1 %v3023_v39 }
 0x8a1   : > { %v1690_v62 = vpop.permute.xlu1 %1689 }
 0x8a3   : > { %v3292_v40 = vpop.eup %3291 }
 0x8a4   : > { %v1582_v36 = vsel %vm638_vm0, %v3292_v40, 0.0  ;;  %v3294_v41 = vpop.eup %3293 }
 0x8a5   : > { %1583 = vadd.xlane.f32.xlu0 %v1582_v36  ;;  %v1579_v42 = vsel %vm638_vm0, %v3294_v41, 0.0 }
 0x8a9   : > { %1580 = vadd.xlane.f32.xlu0 %v1579_v42 }
 0x8bf   : > { %3232 = vrot.lane.b32.xlu0 %v3923_v58, %s3603_s17 }
 0x8d2   : > { %v928_v1 = vpop.xlane.xlu1 %927 }
 0x8d3   : > { %v932_v3 = vsub.f32 %v924_v24, %v928_v1 }
 0x8d5   : > { %v934_v7 = vmul.f32 1.442695, %v932_v3 }
 0x8de   : > { %930 = vmax.xlane.f32.xlu0 %v929_v45 }
 0x8e2   : > { %1355 = vmax.xlane.f32.xlu0 %v1354_v46 }
 0x8e6   : > { %1358 = vmax.xlane.f32.xlu0 %v1357_v47 }
 0x932   : > { %v1584_v48 = vpop.xlane.xlu0 %1583 }
 0x933   : > { %3295 = vrcp.f32 %v1584_v48 }
 0x936   : > { %v1581_v49 = vpop.xlane.xlu0 %1580 }
 0x937   : > { %3297 = vrcp.f32 %v1581_v49 }
 0x93a   : > { %v3233_v50 = vpop.permute.xlu0 %3232 }
 0x93b   : > { %v3235_v51 = vunpack.i.h.bf16 %v3233_v50  ;;  %v3234_v52 = vunpack.i.l.bf16 %v3233_v50 }
 0x93d   : > { %v3027_v53 = vpack.c.bf16 %v3235_v51, %v3234_v52  ;;  %v3296_v35 = vpop.eup %3295 }
 0x93e   : > { %v1588_v57 = vmul.f32 %v3296_v35, %v3292_v40 }
 0x93f   : > { %3029 = vmatprep.subr.msk.bf16.mxu1 %vm3919_vm1, %v3027_v53 }
 0x941   : > { %v3298_v54 = vpop.eup %3297 }
 0x942   : > { %v1586_v56 = vmul.f32 %v3298_v54, %v3294_v41 }
 0x944   : > { %2833 = vmatprep.mubr.msk.f32.mxu1 %vm638_vm0, %v1586_v56 }
 0x945   : > { %2834 = vmatmul.mubr.msk.f32.vlgmr.msra.gmra.mrb[14].mxu1 %vm638_vm0, %v1588_v57 }
 0x946   : > { %3032 = vmatpush3.bf16.xpose.msk.msra.mxu1 %vm3919_vm1, %v3027_v53  ;;  %2840 = vmatprep.mubr.msk.f32.mxu1 %vm638_vm0, %v1688_v61 }
 0x94d   : > { %2841 = vmatmul.mubr.msk.f32.vlgmr.msra.gmra.mrb[16].mxu1 %vm638_vm0, %v1690_v62 }
 0x96b   : > { %v931_v63 = vpop.xlane.xlu0 %930 }
 0x96c   : > { %v933_v2 = vsub.f32 %v925_v28, %v931_v63 }
 0x96e   : > { %v936_v5 = vmul.f32 1.442695, %v933_v2 }
 0x96f   : > { %v1356_v0 = vpop.xlane.xlu0 %1355 }
 0x970   : > { %v1360_v8 = vsub.f32 %v1352_v43, %v1356_v0  ;;  %3299 = vpow2.f32 %v936_v5 }
 0x971   : > { %3301 = vpow2.f32 %v934_v7 }
 0x972   : > { %v1362_v12 = vmul.f32 1.442695, %v1360_v8 }
 0x973   : > { %v1359_v4 = vpop.xlane.xlu0 %1358 }
 0x974   : > { %v1361_v6 = vsub.f32 %v1353_v32, %v1359_v4 }
 0x976   : > { %v1364_v11 = vmul.f32 1.442695, %v1361_v6 }
 0x978   : > { %3303 = vpow2.f32 %v1364_v11 }
 0x979   : > { %3305 = vpow2.f32 %v1362_v12 }
 0x97a   : > { %v3300_v20 = vpop.eup %3299 }
 0x97b   : > { %v3302_v22 = vpop.eup %3301  ;;  %v941_v23 = vsel %vm638_vm0, %v3300_v20, 0.0 }
 0x97c   : > { %v938_v25 = vsel %vm638_vm0, %v3302_v22, 0.0 }
 0x982   : > { %v4040_v24 = vpop.eup %3303 }
 0x983   : > { %v3306_v26 = vpop.eup %3305  ;;  %v1369_v27 = vsel %vm638_vm0, %v4040_v24, 0.0 }
 0x984   : > { %v1366_v29 = vsel %vm638_vm0, %v3306_v26, 0.0 }
 0xa18   : > { %v4033_v9 = vpop.f32.mrb[14].mxu1 }
 0xa19   : > { %v4035_v10 = vpop.f32.mrb[15].mxu1 }
 0xa20   : > { %v2842_v13 = vpop.f32.mrb[16].mxu1 }
 0xa21   : > { %v1779_v16 = vmul.f32 0.088388346, %v2842_v13  ;;  %v1769_v17 = vpop.f32.mrb[17].mxu1 }
 0xa22   : > { %v1778_v18 = vmul.f32 0.088388346, %v1769_v17 }
 0xa23   : > { %v1783_v19 = vsel %vm638_vm0, %v1779_v16, -inf }
 0xa24   : > { %1784 = vmax.xlane.f32.xlu0 %v1783_v19  ;;  %v1780_v21 = vsel %vm638_vm0, %v1778_v18, -inf }
 0xa25   : > { %1781 = vmax.xlane.f32.xlu1 %v1780_v21 }
 0xa28   : > { %942 = vadd.xlane.f32.xlu0 %v941_v23 }
 0xa29   : > { %939 = vadd.xlane.f32.xlu1 %v938_v25 }
 0xa2c   : > { %1370 = vadd.xlane.f32.xlu0 %v1369_v27 }
 0xa2d   : > { %1367 = vadd.xlane.f32.xlu1 %v1366_v29 }
 0xa3e   : > { %3237 = vrot.lane.b32.xlu1 %v3925_v59, %s3600_s20 }
 0xa42   : > { %3247 = vrot.lane.b32.xlu1 %v3925_v59, %s3603_s17 }
 0xa46   : > { %3252 = vrot.lane.b32.xlu1 %v3923_v58, %s3604_s18 }
 0xab1   : > { %v1785_v30 = vpop.xlane.xlu0 %1784 }
 0xab2   : > { %v1787_v31 = vsub.f32 %v1779_v16, %v1785_v30  ;;  %v1782_v33 = vpop.xlane.xlu1 %1781 }
 0xab3   : > { %v1786_v34 = vsub.f32 %v1778_v18, %v1782_v33 }
 0xab4   : > { %v1790_v37 = vmul.f32 1.442695, %v1787_v31 }
 0xab5   : > { %v1788_v38 = vmul.f32 1.442695, %v1786_v34  ;;  %v943_v39 = vpop.xlane.xlu0 %942 }
 0xab6   : > { %3307 = vpow2.f32 %v1790_v37  ;;  %v940_v40 = vpop.xlane.xlu1 %939 }
 0xab7   : > { %3309 = vpow2.f32 %v1788_v38 }
 0xab8   : > { %3311 = vrcp.f32 %v943_v39 }
 0xab9   : > { %3313 = vrcp.f32 %v940_v40  ;;  %v1371_v54 = vpop.xlane.xlu0 %1370 }
 0xaba   : > { %v1368_v36 = vpop.xlane.xlu1 %1367 }
 0xabb   : > { %3315 = vrcp.f32 %v1368_v36 }
 0xabc   : > { %3317 = vrcp.f32 %v1371_v54 }
 0xabe   : > { %v3238_v41 = vpop.permute.xlu1 %3237 }
 0xabf   : > { %v3240_v42 = vunpack.i.h.bf16 %v3238_v41  ;;  %v3239_v28 = vunpack.i.l.bf16 %v3238_v41 }
 0xac0   : > { %v3308_v43 = vpop.eup %3307 }
 0xac1   : > { %v3310_v45 = vpop.eup %3309  ;;  %v2993_v32 = vpack.c.bf16 %v3240_v42, %v3239_v28  ;;  %v1795_v46 = vsel %vm638_vm0, %v3308_v43, 0.0 }
 0xac2   : > { %v3312_v47 = vpop.eup %3311  ;;  %1796 = vadd.xlane.f32.xlu0 %v1795_v46  ;;  %v1792_v48 = vsel %vm638_vm0, %v3310_v45, 0.0  ;;  %v3248_v35 = vpop.permute.xlu1 %3247 }
 0xac3   : > { %v3314_v49 = vpop.eup %3313  ;;  %1793 = vadd.xlane.f32.xlu1 %v1792_v48  ;;  %2994 = vmatprep.subr.bf16.mxu0 %v2993_v32  ;;  %v947_v52 = vmul.f32 %v3312_v47, %v3300_v20  ;;  %v3250_v63 = vunpack.i.h.bf16 %v3248_v35  ;;  %v3249_v0 = vunpack.i.l.bf16 %v3248_v35 }
 0xac4   : > { %2996 = vmatpush3.bf16.msra.mxu0 %v2993_v32  ;;  %v945_v50 = vmul.f32 %v3314_v49, %v3302_v22 }
 0xac5   : > { %v3316_v51 = vpop.eup %3315  ;;  %v3033_v5 = vpack.c.bf16 %v3250_v63, %v3249_v0 }
 0xac6   : > { %2791 = vmatprep.mubr.msk.f32.mxu0 %vm638_vm0, %v945_v50  ;;  %v1373_v53 = vmul.f32 %v3316_v51, %v3306_v26  ;;  %v3253_v56 = vpop.permute.xlu1 %3252  ;;  %v3318_v4 = vpop.eup %3317 }
 0xac7   : > { %2792 = vmatmul.mubr.msk.f32.vlgmr.msra.gmra.mrb[6].mxu0 %vm638_vm0, %v947_v52  ;;  %v3255_v6 = vunpack.i.h.bf16 %v3253_v56  ;;  %v3254_v7 = vunpack.i.l.bf16 %v3253_v56  ;;  %v1375_v11 = vmul.f32 %v3318_v4, %v4040_v24 }
 0xac8   : > { %2819 = vmatprep.mubr.msk.f32.mxu0 %vm638_vm0, %v1373_v53 }
 0xac9   : > { %v3037_v13 = vpack.c.bf16 %v3255_v6, %v3254_v7 }
 0xad4   : > { %1900 = vrot.lane.b32.xlu1 %v3913_v44, %s3604_s18 }
 0xad8   : > { %3242 = vrot.lane.b32.xlu0 %v3925_v59, %s3601_s29 }
 0xadc   : > { %1902 = vrot.lane.b32.xlu0 %v3931_v60, %s3604_s18 }
 0xb4f   : > { %v1797_v57 = vpop.xlane.xlu0 %1796 }
 0xb50   : > { %3319 = vrcp.f32 %v1797_v57  ;;  %v1794_v61 = vpop.xlane.xlu1 %1793 }
 0xb51   : > { %3321 = vrcp.f32 %v1794_v61 }
 0xb53   : > { %v3243_v62 = vpop.permute.xlu0 %3242 }
 0xb54   : > { %v3245_v1 = vunpack.i.h.bf16 %v3243_v62  ;;  %v3244_v2 = vunpack.i.l.bf16 %v3243_v62  ;;  %v1901_v18 = vpop.permute.xlu1 %1900 }
 0xb56   : > { %v3013_v3 = vpack.c.bf16 %v3245_v1, %v3244_v2 }
 0xb57   : > { %v1903_v19 = vpop.permute.xlu0 %1902 }
 0xb58   : > { %3014 = vmatprep.subr.bf16.mxu0 %v3013_v3 }
 0xb59   : > { %3016 = vmatpush3.bf16.msra.mxu0 %v3013_v3 }
 0xb5a   : > { %v3320_v8 = vpop.eup %3319  ;;  %3034 = vmatprep.subr.bf16.mxu0 %v3033_v5 }
 0xb5b   : > { %v3322_v12 = vpop.eup %3321  ;;  %v1801_v17 = vmul.f32 %v3320_v8, %v3308_v43 }
 0xb5c   : > { %2820 = vmatmul.mubr.msk.f32.vlgmr.msra.gmra.mrb[8].mxu0 %vm638_vm0, %v1375_v11  ;;  %v1799_v16 = vmul.f32 %v3322_v12, %v3310_v45 }
 0xb5d   : > { %3036 = vmatpush3.bf16.msra.mxu0 %v3033_v5 }
 0xb5e   : > { %2847 = vmatprep.mubr.msk.f32.mxu0 %vm638_vm0, %v1799_v16  ;;  %3039 = vmatprep.subr.msk.bf16.mxu0 %vm3919_vm1, %v3037_v13 }
 0xb60   : > { %2848 = vmatmul.mubr.msk.f32.vlgmr.msra.gmra.mrb[10].mxu0 %vm638_vm0, %v1801_v17 }
 0xb61   : > { %2854 = vmatprep.mubr.msk.f32.mxu0 %vm638_vm0, %v1901_v18 }
 0xb66   : > { %3042 = vmatpush3.bf16.xpose.msk.msra.mxu0 %vm3919_vm1, %v3037_v13 }
 0xb6d   : > { %2855 = vmatmul.mubr.msk.f32.vlgmr.msra.gmra.mrb[12].mxu0 %vm638_vm0, %v1903_v19 }
 0xb9a   : > { %v4073_v20 = vpop.f32.mrb[6].mxu0 }
 0xb9b   : > { %v4075_v21 = vpop.f32.mrb[7].mxu0 }
 0xc2f   : > { %v4077_v22 = vpop.f32.mrb[8].mxu0 }
 0xc30   : > { %v4079_v23 = vpop.f32.mrb[9].mxu0 }
 0xc33   : > { %v4081_v24 = vpop.f32.mrb[10].mxu0 }
 0xc34   : > { %v4083_v25 = vpop.f32.mrb[11].mxu0 }
 0xc40   : > { %v2856_v26 = vpop.f32.mrb[12].mxu0 }
 0xc41   : > { %v1992_v27 = vmul.f32 0.088388346, %v2856_v26  ;;  %v1982_v29 = vpop.f32.mrb[13].mxu0 }
 0xc42   : > { %v1991_v30 = vmul.f32 0.088388346, %v1982_v29 }
 0xc43   : > { %v1996_v31 = vsel %vm638_vm0, %v1992_v27, -inf }
 0xc44   : > { %1997 = vmax.xlane.f32.xlu0 %v1996_v31  ;;  %v1993_v33 = vsel %vm638_vm0, %v1991_v30, -inf }
 0xc45   : > { %1994 = vmax.xlane.f32.xlu1 %v1993_v33 }
 0xc56   : > { %3257 = vrot.lane.b32.xlu1 %v3925_v59, %s3604_s18 }
 0xc5a   : > { %2113 = vrot.lane.b32.xlu1 %v3913_v44, %s3605_s12 }
 0xc5e   : > { %2115 = vrot.lane.b32.xlu1 %v3931_v60, %s3605_s12 }
 0xcd1   : > { %v1998_v34 = vpop.xlane.xlu0 %1997 }
 0xcd2   : > { %v2000_v37 = vsub.f32 %v1992_v27, %v1998_v34  ;;  %v1995_v38 = vpop.xlane.xlu1 %1994 }
 0xcd3   : > { %v1999_v39 = vsub.f32 %v1991_v30, %v1995_v38  ;;  %v2328_v38 = vld [vmem:[#allocation11] sm:$0xff] }
 0xcd4   : > { %v2003_v40 = vmul.f32 1.442695, %v2000_v37 }
 0xcd5   : > { %v2001_v36 = vmul.f32 1.442695, %v1999_v39  ;;  %v2329_v39 = vld [vmem:[#allocation11 + $0x8] sm:$0xff] }
 0xcd6   : > { %3323 = vpow2.f32 %v2003_v40  ;;  %v3258_v41 = vpop.permute.xlu1 %3257  ;;  %v2330_v40 = vld [vmem:[#allocation11 + $0x10] sm:$0xff] }
 0xcd7   : > { %v3260_v42 = vunpack.i.h.bf16 %v3258_v41  ;;  %v3259_v28 = vunpack.i.l.bf16 %v3258_v41  ;;  %3325 = vpow2.f32 %v2001_v36  ;;  %v3057_v36 = vpack.c.bf16 %v2329_v39, %v2328_v38  ;;  %v2331_v41 = vld [vmem:[#allocation11 + $0x18] sm:$0xff] }
 0xcd9   : > { %v3043_v43 = vpack.c.bf16 %v3260_v42, %v3259_v28  ;;  %v3061_v42 = vpack.c.bf16 %v2331_v41, %v2330_v40  ;;  %v2332_v28 = vld [vmem:[#allocation11 + $0x20] sm:$0xff] }
 0xcda   : > { %v2114_v56 = vpop.permute.xlu1 %2113 }
 0xcdb   : > { %3044 = vmatprep.subr.bf16.mxu1 %v3043_v43 }
 0xcdc   : > { %3046 = vmatpush3.bf16.msra.mxu1 %v3043_v43  ;;  %v2333_v43 = vld [vmem:[#allocation11 + $0x28] sm:$0xff] }
 0xce0   : > { %v3324_v45 = vpop.eup %3323 }
 0xce1   : > { %v2008_v44 = vsel %vm638_vm0, %v3324_v45, 0.0  ;;  %v3326_v32 = vpop.eup %3325 }
 0xce2   : > { %2009 = vadd.xlane.f32.xlu0 %v2008_v44  ;;  %v2005_v60 = vsel %vm638_vm0, %v3326_v32, 0.0  ;;  %v2334_v44 = vld [vmem:[#allocation11 + $0x30] sm:$0xff] }
 0xce6   : > { %2006 = vadd.xlane.f32.xlu0 %v2005_v60 }
 0xcfc   : > { %3262 = vrot.lane.b32.xlu0 %v3923_v58, %s3605_s12  ;;  %v2116_v58 = vpop.permute.xlu1 %2115 }
 0xd6f   : > { %v2010_v46 = vpop.xlane.xlu0 %2009 }
 0xd70   : > { %3327 = vrcp.f32 %v2010_v46  ;;  %v2336_v46 = vld [vmem:[#allocation11 + $0x40] sm:$0xff] }
 0xd73   : > { %v2007_v47 = vpop.xlane.xlu0 %2006 }
 0xd74   : > { %3329 = vrcp.f32 %v2007_v47  ;;  %v2337_v47 = vld [vmem:[#allocation11 + $0x48] sm:$0xff] }
 0xd77   : > { %v3263_v48 = vpop.permute.xlu0 %3262 }
 0xd78   : > { %v3265_v49 = vunpack.i.h.bf16 %v3263_v48  ;;  %v3264_v50 = vunpack.i.l.bf16 %v3263_v48  ;;  %v3073_v48 = vpack.c.bf16 %v2337_v47, %v2336_v46 }
 0xd7a   : > { %v3047_v51 = vpack.c.bf16 %v3265_v49, %v3264_v50  ;;  %v3328_v52 = vpop.eup %3327  ;;  %v2338_v49 = vld [vmem:[#allocation11 + $0x50] sm:$0xff]  ;;  %v2339_v50 = vld [vmem:[#allocation11 + $0x58] sm:$0xff] }
 0xd7b   : > { %v2014_v54 = vmul.f32 %v3328_v52, %v3324_v45  ;;  %v3065_v45 = vpack.c.bf16 %v2333_v43, %v2332_v28  ;;  %v2340_v52 = vld [vmem:[#allocation11 + $0x60] sm:$0xff] }
 0xd7c   : > { %3049 = vmatprep.subr.msk.bf16.mxu1 %vm3919_vm1, %v3047_v51 }
 0xd7e   : > { %v3330_v53 = vpop.eup %3329 }
 0xd7f   : > { %v2012_v35 = vmul.f32 %v3330_v53, %v3326_v32  ;;  %v2335_v32 = vld [vmem:[#allocation11 + $0x38] sm:$0xff]  ;;  %v2341_v53 = vld [vmem:[#allocation11 + $0x68] sm:$0xff] }
 0xd80   : > { %v3069_v60 = vpack.c.bf16 %v2335_v32, %v2334_v44 }
 0xd81   : > { %2861 = vmatprep.mubr.msk.f32.mxu1 %vm638_vm0, %v2012_v35  ;;  %v3081_v35 = vpack.c.bf16 %v2341_v53, %v2340_v52 }
 0xd82   : > { %2862 = vmatmul.mubr.msk.f32.vlgmr.msra.gmra.mrb[18].mxu1 %vm638_vm0, %v2014_v54  ;;  %v2342_v54 = vld [vmem:[#allocation11 + $0x70] sm:$0xff] }
 0xd83   : > { %3052 = vmatpush3.bf16.xpose.msk.msra.mxu1 %vm3919_vm1, %v3047_v51  ;;  %2868 = vmatprep.mubr.msk.f32.mxu1 %vm638_vm0, %v2114_v56  ;;  %v3077_v51 = vpack.c.bf16 %v2339_v50, %v2338_v49  ;;  %v2343_v56 = vld [vmem:[#allocation11 + $0x78] sm:$0xff] }
 0xd8a   : > { %2869 = vmatmul.mubr.msk.f32.vlgmr.msra.gmra.mrb[20].mxu1 %vm638_vm0, %v2116_v58  ;;  %v3085_v58 = vpack.c.bf16 %v2343_v56, %v2342_v54 }
 0xe55   : > { %v2863_v57 = vpop.f32.mrb[18].mxu1 }
 0xe56   : > { %v2093_v61 = vpop.f32.mrb[19].mxu1 }
 0xe5d   : > { %v2870_v62 = vpop.f32.mrb[20].mxu1 }
 0xe5e   : > { %v2205_v63 = vmul.f32 0.088388346, %v2870_v62  ;;  %v2195_v0 = vpop.f32.mrb[21].mxu1 }
 0xe5f   : > { %v2204_v1 = vmul.f32 0.088388346, %v2195_v0 }
 0xe60   : > { %v2209_v2 = vsel %vm638_vm0, %v2205_v63, -inf }
 0xe61   : > { %2210 = vmax.xlane.f32.xlu0 %v2209_v2  ;;  %v2206_v3 = vsel %vm638_vm0, %v2204_v1, -inf  ;;  %v2626_v2 = vld [vmem:[#allocation13] ss:$0 sm:$0xff] }
 0xe62   : > { %2207 = vmax.xlane.f32.xlu1 %v2206_v3 }
 0xe73   : > { %3267 = vrot.lane.b32.xlu1 %v3925_v59, %s3605_s12 }
 0xe77   : > { %1041 = vrot.lane.b32.xlu1 %v4073_v20, %s3605_s12 }
 0xe7b   : > { %1252 = vrot.lane.b32.xlu1 %v4005_v15, %s3604_s18 }
 0xe7f   : > { %1254 = vrot.lane.b32.xlu1 %v4003_v14, %s3604_s18 }
 0xe83   : > { %1467 = vrot.lane.b32.xlu1 %v4077_v22, %s3603_s17 }
 0xe87   : > { %1680 = vrot.lane.b32.xlu1 %v4033_v9, %s3602_s1 }
 0xe8b   : > { %1893 = vrot.lane.b32.xlu1 %v4081_v24, %s3601_s29 }
 0xe8f   : > { %2106 = vrot.lane.b32.xlu1 %v2863_v57, %s3599_s8 }
 0xeee   : > { %v2211_v55 = vpop.xlane.xlu0 %2210 }
 0xeef   : > { %v2213_v59 = vsub.f32 %v2205_v63, %v2211_v55  ;;  %v2208_v4 = vpop.xlane.xlu1 %2207 }
 0xef0   : > { %v2212_v5 = vsub.f32 %v2204_v1, %v2208_v4 }
 0xef1   : > { %v2216_v6 = vmul.f32 1.442695, %v2213_v59 }
 0xef2   : > { %v2214_v15 = vmul.f32 1.442695, %v2212_v5  ;;  %v3339_v5 = vld [vmem:[%s3883_s13 + $0x8] sm:$0xff] }
 0xef3   : > { %v3268_v7 = vpop.permute.xlu1 %3267 }
 0xef4   : > { %3331 = vpow2.f32 %v2214_v15  ;;  %v3270_v14 = vunpack.i.h.bf16 %v3268_v7  ;;  %v3269_v8 = vunpack.i.l.bf16 %v3268_v7  ;;  %v3340_v15 = vld [vmem:[%s3883_s13] sm:$0xff] }
 0xef5   : > { %3333 = vpow2.f32 %v2216_v6 }
 0xef6   : > { %v3053_v11 = vpack.c.bf16 %v3270_v14, %v3269_v8 }
 0xef7   : > { %v1042_v12 = vpop.permute.xlu1 %1041 }
 0xef8   : > { %1047 = vst.msk [vmem:[#allocation2 + $0x8] sm:$0xff] %vm1045_vm2, %v1042_v12  ;;  %3054 = vmatprep.subr.bf16.mxu0 %v3053_v11 }
 0xef9   : > { %3056 = vmatpush3.bf16.msra.mxu0 %v3053_v11 }
 0xefa   : > { %3058 = vmatprep.subr.bf16.mxu0 %v3057_v36 }
 0xefb   : > { %v1253_v9 = vpop.permute.xlu1 %1252 }
 0xefe   : > { %v3332_v13 = vpop.eup %3331 }
 0xeff   : > { %v1255_v16 = vpop.permute.xlu1 %1254  ;;  %v2218_v17 = vsel %vm638_vm0, %v3332_v13, 0.0  ;;  %v3334_v18 = vpop.eup %3333 }
 0xf00   : > { %1260 = vst.msk [vmem:[#allocation2 + $0x8] sm:$0xff] %vm1258_vm3, %v1255_v16  ;;  %2219 = vadd.xlane.f32.xlu0 %v2218_v17  ;;  %v2221_v20 = vsel %vm638_vm0, %v3334_v18, 0.0 }
 0xf03   : > { %v1468_v19 = vpop.permute.xlu1 %1467 }
 0xf04   : > { %1473 = vst.msk [vmem:[#allocation2 + $0x8] sm:$0xff] %vm1471_vm4, %v1468_v19  ;;  %2222 = vadd.xlane.f32.xlu0 %v2221_v20 }
 0xf07   : > { %v1681_v22 = vpop.permute.xlu1 %1680 }
 0xf08   : > { %1686 = vst.msk [vmem:[#allocation2 + $0x8] sm:$0xff] %vm1684_vm5, %v1681_v22 }
 0xf0b   : > { %v1894_v24 = vpop.permute.xlu1 %1893 }
 0xf0c   : > { %1899 = vst.msk [vmem:[#allocation2 + $0x8] sm:$0xff] %vm1897_vm6, %v1894_v24 }
 0xf0f   : > { %v2107_v26 = vpop.permute.xlu1 %2106 }
 0xf10   : > { %2112 = vst.msk [vmem:[#allocation2 + $0x8] sm:$0xff] %vm2110_vm7, %v2107_v26 }
 0xf1a   : > { %1039 = vrot.lane.b32.xlu0 %v4075_v21, %s3605_s12 }
 0xf1e   : > { %1465 = vrot.lane.b32.xlu0 %v4079_v23, %s3603_s17 }
 0xf22   : > { %1678 = vrot.lane.b32.xlu0 %v4035_v10, %s3602_s1 }
 0xf26   : > { %1891 = vrot.lane.b32.xlu0 %v4083_v25, %s3601_s29 }
 0xf2a   : > { %2104 = vrot.lane.b32.xlu0 %v2093_v61, %s3599_s8 }
 0xf8d   : > { %v2220_v27 = vpop.xlane.xlu0 %2219 }
 0xf8e   : > { %3335 = vrcp.f32 %v2220_v27 }
 0xf91   : > { %v2223_v29 = vpop.xlane.xlu0 %2222 }
 0xf92   : > { %3337 = vrcp.f32 %v2223_v29 }
 0xf95   : > { %v1040_v30 = vpop.permute.xlu0 %1039 }
 0xf96   : > { %1046 = vst.msk [vmem:[#allocation2] sm:$0xff] %vm1045_vm2, %v1040_v30 }
 0xf97   : > { %1259 = vst.msk [vmem:[#allocation2] sm:$0xff] %vm1258_vm3, %v1253_v9 }
 0xf98   : > { %v3336_v21 = vpop.eup %3335 }
 0xf99   : > { %v1466_v31 = vpop.permute.xlu0 %1465  ;;  %v2225_v23 = vmul.f32 %v3336_v21, %v3332_v13 }
 0xf9a   : > { %1472 = vst.msk [vmem:[#allocation2] sm:$0xff] %vm1471_vm4, %v1466_v31 }
 0xf9b   : > { %2875 = vmatprep.mubr.msk.f32.mxu0 %vm638_vm0, %v2225_v23 }
 0xf9c   : > { %v3338_v10 = vpop.eup %3337 }
 0xf9d   : > { %v2227_v25 = vmul.f32 %v3338_v10, %v3334_v18  ;;  %v1679_v33 = vpop.permute.xlu0 %1678 }
 0xf9e   : > { %1685 = vst.msk [vmem:[#allocation2] sm:$0xff] %vm1684_vm5, %v1679_v33 }
 0xf9f   : > { %2876 = vmatmul.mubr.msk.f32.vlgmr.msra.gmra.mrb[14].mxu0 %vm638_vm0, %v2227_v25 }
 0xfa0   : > { %3060 = vmatpush3.bf16.msra.mxu0 %v3057_v36 }
 0xfa1   : > { %v1892_v34 = vpop.permute.xlu0 %1891  ;;  %3062 = vmatprep.subr.bf16.mxu0 %v3061_v42 }
 0xfa2   : > { %1898 = vst.msk [vmem:[#allocation2] sm:$0xff] %vm1897_vm6, %v1892_v34 }
 0xfa4   : > { %3064 = vmatpush3.bf16.msra.mxu0 %v3061_v42 }
 0xfa5   : > { %v2105_v37 = vpop.permute.xlu0 %2104  ;;  %3066 = vmatprep.subr.bf16.mxu0 %v3065_v45 }
 0xfa6   : > { %2111 = vst.msk [vmem:[#allocation2] sm:$0xff] %vm2110_vm7, %v2105_v37 }
 0xfa8   : > { %3068 = vmatpush3.bf16.msra.mxu0 %v3065_v45 }
 0xfa9   : > { %3070 = vmatprep.subr.bf16.mxu0 %v3069_v60 }
 0xfac   : > { %3072 = vmatpush3.bf16.msra.mxu0 %v3069_v60 }
 0xfad   : > { %3074 = vmatprep.subr.bf16.mxu0 %v3073_v48 }
 0xfb0   : > { %3076 = vmatpush3.bf16.msra.mxu0 %v3073_v48 }
 0xfb1   : > { %3078 = vmatprep.subr.bf16.mxu0 %v3077_v51 }
 0xfb4   : > { %3080 = vmatpush3.bf16.msra.mxu0 %v3077_v51 }
 0xfb5   : > { %3082 = vmatprep.subr.bf16.mxu0 %v3081_v35 }
 0xfb8   : > { %3084 = vmatpush3.bf16.msra.mxu0 %v3081_v35 }
 0xfb9   : > { %3086 = vmatprep.subr.bf16.mxu0 %v3085_v58 }
 0xfbc   : > { %3088 = vmatpush3.bf16.msra.mxu0 %v3085_v58 }
0x1072   : > { %v2877_v57 = vpop.f32.mrb[14].mxu0 }
0x1073   : > { %2319 = vrot.lane.b32.xlu1 %v2877_v57, %s3600_s20  ;;  %v2306_v61 = vpop.f32.mrb[15].mxu0 }
0x1074   : > { %2317 = vrot.lane.b32.xlu0 %v2306_v61, %s3600_s20 }
0x10e5   : > { %v2320_v62 = vpop.permute.xlu1 %2319 }
0x10e6   : > { %2325 = vst.msk [vmem:[#allocation2 + $0x8] sm:$0xff] %vm2323_vm8, %v2320_v62  ;;  %v2318_v63 = vpop.permute.xlu0 %2317 }
0x10e7   : > { %2324 = vst.msk [vmem:[#allocation2] sm:$0xff] %vm2323_vm8, %v2318_v63 }
0x10ed   : > { %v2327_v1 = vld [vmem:[#allocation2 + $0x8] sm:$0xff] }
0x10ee   : > { %v2326_v0 = vld [vmem:[#allocation2] sm:$0xff] }
0x10ef   : > { %2910 = vmatprep.mubr.f32.mxu0 %v2326_v0 }
0x10f0   : > { %2911 = vmatmul.mubr.f32.vlgmr.msra.gmra.mrb[16].mxu0 %v2327_v1 }
0x11c3   : > { %v2912_v3 = vpop.f32.mrb[16].mxu0 }
0x11c4   : > { %v2423_v55 = vadd.f32 %v2912_v3, %v2626_v2  ;;  %v2417_v59 = vpop.f32.mrb[17].mxu0 }
0x11c5   : > { %v2418_v4 = vadd.f32 %v2626_v2, %v2417_v59 }
0x11c6   : > { %v2427_v6 = vadd.f32 %v3339_v5, %v2423_v55 }
0x11c7   : > { %v2426_v7 = vadd.f32 %v3340_v15, %v2418_v4 }
0x11c8   : > { %2429 = vst [vmem:[%s377_s23 + $0x8] sm:$0xff] %v2427_v6 }
0x11c9   : > { %2428 = vst [vmem:[%s377_s23] sm:$0xff] %v2426_v7 }
0x11ca PF: > { %p20_p10 = scmp.ge.s32.totalorder %s3816_s19, 4   ;;  %s4196_s24 = smov %s3577_s25 }
0x11cb   : > { %s4197_s25 = smov %s3581_s26  ;;  %s4198_s26 = smov %s3828_s22 }
0x11cc   : > { %s4199_s27 = smov %s3816_s19  ;;  %22 = sbr.rel (!%p20_p10) target bundleno = 8 (0x8), region = 112 }
0x11d3   :  { %2451 = vsyncpa [#allocation4], 1 }
0x11d4   :  { %2453 = vsyncpa [#allocation4 + $0x1], 1 }
0x11d5   :  { %2454 = vsyncpa [#allocation6], 1 }
0x11d6   :  { %2455 = vsyncpa [#allocation9], 1 }
0x11d7   :  { %2456 = vsyncpa [#allocation12], 1 }

// kernel: transformer_block_forward.15
= control target key start
LH: loop header
LB: loop body
LE: loop exit
PB: predicated region body
PF: predicated region fallthrough
CT: control target
= control target key end

     0   :  { %12 = vsyncpa [#allocation3], 0  ;;  %s2137_s0 = inlined_call_operand.vmem [shape: f32[2,16,128], index: 0, kind: input, shape index: {}]   ;;  %s2138_s1 = inlined_call_operand.vmem [shape: f32[1,128], index: 1, kind: input, shape index: {}]   ;;  %s2139_s2 = inlined_call_operand.vmem [shape: f32[1,128], index: 2, kind: input, shape index: {}]   ;;  %s2140_s3 = inlined_call_operand.vmem [shape: f32[128,512], index: 3, kind: input, shape index: {}]   ;;  %s2141_s4 = inlined_call_operand.vmem [shape: f32[1,512], index: 4, kind: input, shape index: {}]   ;;  %s2142_s5 = inlined_call_operand.vmem [shape: f32[512,128], index: 5, kind: input, shape index: {}]   ;;  %s2143_s6 = inlined_call_operand.vmem [shape: f32[1,128], index: 6, kind: input, shape index: {}]   ;;  %s2144_s7 = inlined_call_operand.hbm [shape: f32[2,16,128], index: 7, kind: output, shape index: {}]  }
   0x1   :  { %14 = vsyncpa [#allocation3 + $0x1], 0  ;;  %s1488_s24 = smov 0   ;;  %s1490_s25 = smov 0  }
   0x2   :  { %s1492_s26 = smov 0   ;;  %s1494_s27 = smov 0  }
   0x3 LB: > { %s1509_s28 = sadd.s32 4294967295, %s1441_s27   ;;  %s1077_s29 = sadd.s32 4294967294, %s1441_s27   ;;  %s1441_s27 = sphi %s1494_s27, %s2150_s27   ;;  %s1437_s26 = sphi %s1492_s26, %s2149_s26   ;;  %s1433_s25 = sphi %s1490_s25, %s2148_s25   ;;  %s1429_s24 = sphi %s1488_s24, %s2147_s24  }
   0x4   : > { %s1513_s30 = sadd.s32 1, %s1441_s27   ;;  %s179_s8 = sadd.s32 1, %s1437_s26 }
   0x5   : > { %s176_s9 = ssub.s32 %s1441_s27, %s1513_s30  ;;  %p189_p0 = scmp.ne.s32.totalorder %s1437_s26, %s1433_s25 }
   0x6   : > { %p177_p1 = scmp.eq.s32.totalorder %s176_s9, 0  ;;  %p190_p2 = scmp.eq.s32.totalorder %s1509_s28, 1 }
   0x7   : > { %p195_p3 = scmp.ne.s32.totalorder %s1433_s25, %s1429_s24  ;;  %p196_p4 = scmp.eq.s32.totalorder %s1077_s29, 1 }
   0x8   : > { %s1524_s10 = scalar_select %p177_p1, %s1437_s26, %s179_s8  }
   0x9   : > { %p1526_p5 = por %p190_p2, %p189_p0  ;;  %p1530_p6 = por %p196_p4, %p195_p3 }
   0xa   : > { %p1080_p7 = scmp.ge.s32.totalorder %s1441_s27, 1  ;;  %p240_p8 = scmp.lt.s32.totalorder %s1441_s27, 3 }
   0xc   : > { %p241_p9 = pnand %p1080_p7, %p240_p8 }
   0xd   : > { %p272_p10 = scmp.lt.s32.totalorder (!%p241_p9), %s1509_s28, 1  ;;  %v321_v2 = vld [vmem:[%s2140_s3 + $0x8] sm:$0xff] (!%p241_p9)  ;;  %v323_v4 = vld [vmem:[%s2140_s3 + $0x18] sm:$0xff] (!%p241_p9)  ;;  %v320_v7 = vld [vmem:[%s2140_s3] sm:$0xff] (!%p241_p9)  ;;  %s269_s22 = sand.u32 (!%p241_p9), 1, %s1433_s25  }
   0xe   : > { %244 = sbr.rel (%p241_p9) target bundleno = 848 (0x350), region = 48  ;;  %v325_v3 = vld [vmem:[%s2140_s3 + $0x28] sm:$0xff] (!%p241_p9)  ;;  %v327_v6 = vld [vmem:[%s2140_s3 + $0x38] sm:$0xff] (!%p241_p9)  ;;  %v324_v8 = vld [vmem:[%s2140_s3 + $0x20] sm:$0xff] (!%p241_p9)  ;;  %s1081_s23 = sshll.u32 (!%p241_p9), %s269_s22, 4 }
   0xf   : > { %v1170_v5 = vpack.c.bf16 (!%p241_p9), %v325_v3, %v321_v2  ;;  %v1202_v9 = vpack.c.bf16 (!%p241_p9), %v327_v6, %v323_v4  ;;  %v1172_v10 = vpack.c.bf16 (!%p241_p9), %v324_v8, %v320_v7  ;;  %v322_v11 = vld [vmem:[%s2140_s3 + $0x10] sm:$0xff] (!%p241_p9)  ;;  %v329_v13 = vld [vmem:[%s2140_s3 + $0x48] sm:$0xff] (!%p241_p9)  ;;  %v331_v16 = vld [vmem:[%s2140_s3 + $0x58] sm:$0xff] (!%p241_p9)  ;;  %s271_s29 = scalar_lea.vmem (!%p241_p9), [#allocation2], %s1081_s23  ;;  %s1093_s9 = sshll.u32 (!%p241_p9), %s1509_s28, 8 }
  0x10   : > { %v326_v12 = vld [vmem:[%s2140_s3 + $0x30] sm:$0xff] (!%p241_p9)  ;;  %v333_v15 = vld [vmem:[%s2140_s3 + $0x68] sm:$0xff] (!%p241_p9)  ;;  %v335_v17 = vld [vmem:[%s2140_s3 + $0x78] sm:$0xff] (!%p241_p9)  ;;  %s1015_s8 = sshll.u32 (!%p241_p9), %s271_s29, 4  ;;  %s2094_s15 = scalar_lea.hbm (!%p241_p9), %s2144_s7, %s1093_s9  ;;  %s2088_s8 = int_to_ptr.vmem [resolvable:$true] %s1015_s8 }
  0x11   : > { %1171 = vmatprep.subr.bf16.mxu0 (!%p241_p9), %v1170_v5  ;;  %v1204_v14 = vpack.c.bf16 (!%p241_p9), %v326_v12, %v322_v11  ;;  %1203 = vmatprep.subr.bf16.mxu1 (!%p241_p9), %v1202_v9  ;;  %v1174_v18 = vpack.c.bf16 (!%p241_p9), %v333_v15, %v329_v13  ;;  %v1206_v19 = vpack.c.bf16 (!%p241_p9), %v335_v17, %v331_v16  ;;  %v328_v20 = vld [vmem:[%s2140_s3 + $0x40] sm:$0xff] (!%p241_p9)  ;;  %v330_v22 = vld [vmem:[%s2140_s3 + $0x50] sm:$0xff] (!%p241_p9)  ;;  %v337_v25 = vld [vmem:[%s2140_s3 + $0x88] sm:$0xff] (!%p241_p9)  ;;  %s2096_s16 = scalar_lea.sflag (!%p241_p9), [#allocation3], %s269_s22  ;;  %s1379_s18 = scalar_lea.vmem (!%p241_p9), %s2088_s8, 256 }
  0x12   : > { %1173 = vmatpush1.bf16.msra.mxu0 (!%p241_p9), %v1172_v10  ;;  %v332_v21 = vld [vmem:[%s2140_s3 + $0x60] sm:$0xff] (!%p241_p9)  ;;  %v334_v24 = vld [vmem:[%s2140_s3 + $0x70] sm:$0xff] (!%p241_p9)  ;;  %v341_v26 = vld [vmem:[%s2140_s3 + $0xa8] sm:$0xff] (!%p241_p9)  ;;  %p1380_p11 = scmp.ne.s32.totalorder (!%p241_p9), %s2088_s8, %s1379_s18 }
  0x13   : > { %1205 = vmatpush1.bf16.msra.mxu1 (!%p241_p9), %v1204_v14  ;;  %v1176_v23 = vpack.c.bf16 (!%p241_p9), %v332_v21, %v328_v20  ;;  %1175 = vmatprep.subr.bf16.mxu0 (!%p241_p9), %v1174_v18  ;;  %v1208_v27 = vpack.c.bf16 (!%p241_p9), %v334_v24, %v330_v22  ;;  %v1178_v28 = vpack.c.bf16 (!%p241_p9), %v341_v26, %v337_v25  ;;  %v339_v29 = vld [vmem:[%s2140_s3 + $0x98] sm:$0xff] (!%p241_p9)  ;;  %v336_v31 = vld [vmem:[%s2140_s3 + $0x80] sm:$0xff] (!%p241_p9)  ;;  %v338_v34 = vld [vmem:[%s2140_s3 + $0x90] sm:$0xff] (!%p241_p9)  ;;  %v1443_v22 = vmov (!%p241_p9), 0.0  }
  0x14   : > { %1207 = vmatprep.subr.bf16.mxu1 (!%p241_p9), %v1206_v19  ;;  %v343_v30 = vld [vmem:[%s2140_s3 + $0xb8] sm:$0xff] (!%p241_p9)  ;;  %v340_v33 = vld [vmem:[%s2140_s3 + $0xa0] sm:$0xff] (!%p241_p9)  ;;  %v342_v35 = vld [vmem:[%s2140_s3 + $0xb0] sm:$0xff] (!%p241_p9)  ;;  %470 = vmatprep.mubr.f32.mxu0 (!%p241_p9), %v1443_v22  ;;  %p1381_p12 = pnand (!%p241_p9), %p1380_p11, %p1526_p5 }
  0x15   : > { %s273_s13 = scalar_select %p272_p10, %s1509_s28, 1  ;;  %v1210_v32 = vpack.c.bf16 %v343_v30, %v339_v29  ;;  %v1180_v36 = vpack.c.bf16 %v340_v33, %v336_v31  ;;  %v1212_v37 = vpack.c.bf16 %v342_v35, %v338_v34  ;;  %v345_v46 = vld [vmem:[%s2140_s3 + $0xc8] sm:$0xff]  ;;  %v347_v48 = vld [vmem:[%s2140_s3 + $0xd8] sm:$0xff]  ;;  %v344_v51 = vld [vmem:[%s2140_s3 + $0xc0] sm:$0xff]  ;;  %547 = vmatprep.mubr.f32.mxu1 %v1443_v22 }
  0x16   : > { %1177 = vmatpush1.bf16.msra.mxu0 %v1176_v23  ;;  %v349_v47 = vld [vmem:[%s2140_s3 + $0xe8] sm:$0xff]  ;;  %v351_v50 = vld [vmem:[%s2140_s3 + $0xf8] sm:$0xff]  ;;  %v348_v52 = vld [vmem:[%s2140_s3 + $0xe0] sm:$0xff]  ;;  %p1382_p13 = pneg %p1381_p12  ;;  %s1445_s28 = smov [#allocation2]  }
  0x17   : > { %s1092_s14 = sshll.u32 %s273_s13, 4  ;;  %1209 = vmatpush1.bf16.msra.mxu1 %v1208_v27  ;;  %1179 = vmatprep.subr.bf16.mxu0 %v1178_v28  ;;  %v1182_v49 = vpack.c.bf16 %v349_v47, %v345_v46  ;;  %v1214_v53 = vpack.c.bf16 %v351_v50, %v347_v48  ;;  %v1184_v54 = vpack.c.bf16 %v348_v52, %v344_v51  ;;  %v346_v55 = vld [vmem:[%s2140_s3 + $0xd0] sm:$0xff]  ;;  %v353_v58 = vld [vmem:[%s2140_s3 + $0x108] sm:$0xff]  ;;  %v355_v60 = vld [vmem:[%s2140_s3 + $0x118] sm:$0xff]  ;;  %s1383_s19 = sshll.u32 %s1445_s28, 4  ;;  %s1384_s19 = int_to_ptr.vmem [resolvable:$false] %s1383_s19 }
  0x18   : > { %s1541_s17 = scalar_lea.vmem %s2137_s0, %s1092_s14  ;;  %1211 = vmatprep.subr.bf16.mxu1 %v1210_v32  ;;  %v350_v56 = vld [vmem:[%s2140_s3 + $0xf0] sm:$0xff]  ;;  %v357_v59 = vld [vmem:[%s2140_s3 + $0x128] sm:$0xff]  ;;  %v359_v62 = vld [vmem:[%s2140_s3 + $0x138] sm:$0xff]  ;;  %s1385_s20 = scalar_lea.vmem %s1384_s19, 512 }
  0x19   : > { %v277_v0 = vld [vmem:[%s1541_s17] sm:$0xff]  ;;  %v278_v1 = vld [vmem:[%s1541_s17 + $0x8] sm:$0xff]  ;;  %v1216_v57 = vpack.c.bf16 %v350_v56, %v346_v55  ;;  %v1186_v61 = vpack.c.bf16 %v357_v59, %v353_v58  ;;  %v354_v3 = vld [vmem:[%s2140_s3 + $0x110] sm:$0xff]  ;;  %p1386_p0 = scmp.lt.s32.totalorder %s2088_s8, %s1384_s19  ;;  %p1387_p1 = scmp.lt.s32.totalorder %s1385_s20, %s1379_s18 }
  0x1a   : > { %281 = vadd.xlane.f32.xlu0 %v277_v0  ;;  %1181 = vmatpush1.bf16.msra.mxu0 %v1180_v36  ;;  %v352_v63 = vld [vmem:[%s2140_s3 + $0x100] sm:$0xff]  ;;  %v358_v4 = vld [vmem:[%s2140_s3 + $0x130] sm:$0xff]  ;;  %v361_v6 = vld [vmem:[%s2140_s3 + $0x148] sm:$0xff] }
  0x1b   : > { %1213 = vmatpush1.bf16.msra.mxu1 %v1212_v37  ;;  %1183 = vmatprep.subr.bf16.mxu0 %v1182_v49  ;;  %v1220_v5 = vpack.c.bf16 %v358_v4, %v354_v3  ;;  %v365_v7 = vld [vmem:[%s2140_s3 + $0x168] sm:$0xff]  ;;  %v363_v8 = vld [vmem:[%s2140_s3 + $0x158] sm:$0xff]  ;;  %v360_v11 = vld [vmem:[%s2140_s3 + $0x140] sm:$0xff]  ;;  %p1388_p2 = por %p1387_p1, %p1386_p0 }
  0x1c   : > { %1215 = vmatprep.subr.bf16.mxu1 %v1214_v53  ;;  %v1190_v9 = vpack.c.bf16 %v365_v7, %v361_v6  ;;  %v367_v10 = vld [vmem:[%s2140_s3 + $0x178] sm:$0xff]  ;;  %v364_v12 = vld [vmem:[%s2140_s3 + $0x160] sm:$0xff]  ;;  %v362_v15 = vld [vmem:[%s2140_s3 + $0x150] sm:$0xff] }
  0x1d   : > { %v1222_v13 = vpack.c.bf16 %v367_v10, %v363_v8  ;;  %v1192_v14 = vpack.c.bf16 %v364_v12, %v360_v11  ;;  %v366_v16 = vld [vmem:[%s2140_s3 + $0x170] sm:$0xff]  ;;  %v369_v17 = vld [vmem:[%s2140_s3 + $0x188] sm:$0xff]  ;;  %v371_v20 = vld [vmem:[%s2140_s3 + $0x198] sm:$0xff]  ;;  %p1389_p3 = pnand %p1388_p2, %p1382_p13 }
  0x1e   : > { %283 = vadd.xlane.f32.xlu0 %v278_v1  ;;  %1185 = vmatpush1.bf16.msra.mxu0 %v1184_v54  ;;  %v1224_v18 = vpack.c.bf16 %v366_v16, %v362_v15  ;;  %v373_v19 = vld [vmem:[%s2140_s3 + $0x1a8] sm:$0xff]  ;;  %v375_v21 = vld [vmem:[%s2140_s3 + $0x1b8] sm:$0xff]  ;;  %v368_v25 = vld [vmem:[%s2140_s3 + $0x180] sm:$0xff] }
  0x1f   : > { %1217 = vmatpush1.bf16.msra.mxu1 %v1216_v57  ;;  %1187 = vmatprep.subr.bf16.mxu0 %v1186_v61  ;;  %v1194_v23 = vpack.c.bf16 %v373_v19, %v369_v17  ;;  %v1226_v24 = vpack.c.bf16 %v375_v21, %v371_v20  ;;  %v372_v26 = vld [vmem:[%s2140_s3 + $0x1a0] sm:$0xff]  ;;  %v370_v27 = vld [vmem:[%s2140_s3 + $0x190] sm:$0xff]  ;;  %v377_v30 = vld [vmem:[%s2140_s3 + $0x1c8] sm:$0xff] }
  0x20   : > { %v1196_v28 = vpack.c.bf16 %v372_v26, %v368_v25  ;;  %v374_v29 = vld [vmem:[%s2140_s3 + $0x1b0] sm:$0xff]  ;;  %v381_v31 = vld [vmem:[%s2140_s3 + $0x1e8] sm:$0xff]  ;;  %v379_v34 = vld [vmem:[%s2140_s3 + $0x1d8] sm:$0xff] }
  0x21   : > { %v1228_v32 = vpack.c.bf16 %v374_v29, %v370_v27  ;;  %v1198_v33 = vpack.c.bf16 %v381_v31, %v377_v30  ;;  %v383_v35 = vld [vmem:[%s2140_s3 + $0x1f8] sm:$0xff]  ;;  %v376_v36 = vld [vmem:[%s2140_s3 + $0x1c0] sm:$0xff]  ;;  %v793_v61 = vld [vmem:[%s2142_s5 + $0x88] sm:$0xff] }
  0x22   : > { %v1230_v37 = vpack.c.bf16 %v383_v35, %v379_v34  ;;  %v1084_v52 = vld [vmem:[%s2138_s1] ss:$0 sm:$0xff]  ;;  %v794_v7 = vld [vmem:[%s2142_s5 + $0x90] sm:$0xff]  ;;  %v795_v8 = vld [vmem:[%s2142_s5 + $0x98] sm:$0xff] }
  0x23   : > { %v1085_v54 = vld [vmem:[%s2139_s2] ss:$0 sm:$0xff]  ;;  %v1238_v10 = vpack.c.bf16 %v795_v8, %v794_v7  ;;  %v827_v11 = vld [vmem:[%s2142_s5 + $0x198] sm:$0xff]  ;;  %v778_v12 = vld [vmem:[%s2142_s5 + $0x10] sm:$0xff] }
  0x24   : > { %v808_v4 = vld [vmem:[%s2142_s5 + $0x100] sm:$0xff]  ;;  %v810_v16 = vld [vmem:[%s2142_s5 + $0x110] sm:$0xff]  ;;  %v811_v17 = vld [vmem:[%s2142_s5 + $0x118] sm:$0xff] }
  0x25   : > { %v796_v19 = vld [vmem:[%s2142_s5 + $0xa0] sm:$0xff]  ;;  %v797_v20 = vld [vmem:[%s2142_s5 + $0xa8] sm:$0xff]  ;;  %v798_v31 = vld [vmem:[%s2142_s5 + $0xb0] sm:$0xff] }
  0x26   : > { %v828_v21 = vld [vmem:[%s2142_s5 + $0x1a0] sm:$0xff]  ;;  %v781_v25 = vld [vmem:[%s2142_s5 + $0x28] sm:$0xff]  ;;  %v831_v35 = vld [vmem:[%s2142_s5 + $0x1b8] sm:$0xff] }
  0x27   : > { %v813_v29 = vld [vmem:[%s2142_s5 + $0x128] sm:$0xff]  ;;  %v788_v8 = vld [vmem:[%s2142_s5 + $0x60] sm:$0xff] }
  0x28   : > { %v837_v7 = vld [vmem:[%s2142_s5 + $0x1e8] sm:$0xff] }
  0xa7   : > { %v282_v38 = vpop.xlane.xlu0 %281 }
  0xa8   : > { %v286_v39 = vmul.f32 0.0078125, %v282_v38  ;;  %v380_v38 = vld [vmem:[%s2140_s3 + $0x1e0] sm:$0xff] }
  0xaa   : > { %v1617_v40 = vsub.f32 %v277_v0, %v286_v39  ;;  %v356_v0 = vld [vmem:[%s2140_s3 + $0x120] sm:$0xff]  ;;  %v378_v39 = vld [vmem:[%s2140_s3 + $0x1d0] sm:$0xff] }
  0xab   : > { %v284_v41 = vpop.xlane.xlu0 %283  ;;  %v1188_v2 = vpack.c.bf16 %v356_v0, %v352_v63  ;;  %v825_v63 = vld [vmem:[%s2142_s5 + $0x188] sm:$0xff]  ;;  %v776_v0 = vld [vmem:[%s2142_s5] sm:$0xff] }
  0xac   : > { %v287_v42 = vmul.f32 0.0078125, %v284_v41  ;;  %v290_v43 = vmul.f32 %v1617_v40, %v1617_v40  ;;  %v382_v41 = vld [vmem:[%s2140_s3 + $0x1f0] sm:$0xff] }
  0xad   : > { %1189 = vmatpush1.bf16.msra.mxu0 %v1188_v2 }
  0xae   : > { %v1621_v44 = vsub.f32 %v278_v1, %v287_v42  ;;  %292 = vadd.xlane.f32.xlu1 %v290_v43  ;;  %v1218_v1 = vpack.c.bf16 %v359_v62, %v355_v60  ;;  %1191 = vmatprep.subr.bf16.mxu0 %v1190_v9  ;;  %v1200_v42 = vpack.c.bf16 %v380_v38, %v376_v36  ;;  %v826_v9 = vld [vmem:[%s2142_s5 + $0x190] sm:$0xff] }
  0xaf   : > { %v1232_v43 = vpack.c.bf16 %v382_v41, %v378_v39  ;;  %v782_v36 = vld [vmem:[%s2142_s5 + $0x30] sm:$0xff] }
  0xb0   : > { %v291_v45 = vmul.f32 %v1621_v44, %v1621_v44  ;;  %1219 = vmatprep.subr.bf16.mxu1 %v1218_v1  ;;  %v777_v1 = vld [vmem:[%s2142_s5 + $0x8] sm:$0xff]  ;;  %v814_v41 = vld [vmem:[%s2142_s5 + $0x130] sm:$0xff] }
  0xb1   : > { %1221 = vmatpush1.bf16.msra.mxu1 %v1220_v5  ;;  %1193 = vmatpush1.bf16.msra.mxu0 %v1192_v14  ;;  %v1236_v3 = vpack.c.bf16 %v777_v1, %v776_v0  ;;  %v809_v5 = vld [vmem:[%s2142_s5 + $0x108] sm:$0xff]  ;;  %v1270_v14 = vpack.c.bf16 %v827_v11, %v826_v9  ;;  %v819_v1 = vld [vmem:[%s2142_s5 + $0x158] sm:$0xff]  ;;  %v820_v11 = vld [vmem:[%s2142_s5 + $0x160] sm:$0xff] }
  0xb2   : > { %294 = vadd.xlane.f32.xlu1 %v291_v45  ;;  %1223 = vmatprep.subr.bf16.mxu1 %v1222_v13  ;;  %v1268_v6 = vpack.c.bf16 %v809_v5, %v808_v4  ;;  %v779_v13 = vld [vmem:[%s2142_s5 + $0x18] sm:$0xff] }
  0xb3   : > { %1195 = vmatprep.subr.bf16.mxu0 %v1194_v23  ;;  %v1240_v15 = vpack.c.bf16 %v779_v13, %v778_v12  ;;  %v829_v23 = vld [vmem:[%s2142_s5 + $0x1a8] sm:$0xff] }
  0xb4   : > { %v1274_v26 = vpack.c.bf16 %v829_v23, %v828_v21  ;;  %v821_v12 = vld [vmem:[%s2142_s5 + $0x168] sm:$0xff]  ;;  %v791_v21 = vld [vmem:[%s2142_s5 + $0x78] sm:$0xff]  ;;  %v822_v23 = vld [vmem:[%s2142_s5 + $0x170] sm:$0xff] }
  0xb5   : > { %1225 = vmatpush1.bf16.msra.mxu1 %v1224_v18  ;;  %1197 = vmatpush1.bf16.msra.mxu0 %v1196_v28  ;;  %v1272_v18 = vpack.c.bf16 %v811_v17, %v810_v16  ;;  %v812_v28 = vld [vmem:[%s2142_s5 + $0x120] sm:$0xff]  ;;  %v838_v16 = vld [vmem:[%s2142_s5 + $0x1f0] sm:$0xff]  ;;  %v1292_v17 = vpack.c.bf16 %v821_v12, %v820_v11 }
  0xb6   : > { %1227 = vmatprep.subr.bf16.mxu1 %v1226_v24  ;;  %1199 = vmatprep.subr.bf16.mxu0 %v1198_v33  ;;  %v780_v24 = vld [vmem:[%s2142_s5 + $0x20] sm:$0xff]  ;;  %v1276_v30 = vpack.c.bf16 %v813_v29, %v812_v28  ;;  %v830_v33 = vld [vmem:[%s2142_s5 + $0x1b0] sm:$0xff] }
  0xb7   : > { %v1244_v27 = vpack.c.bf16 %v781_v25, %v780_v24  ;;  %v1278_v38 = vpack.c.bf16 %v831_v35, %v830_v33  ;;  %v823_v24 = vld [vmem:[%s2142_s5 + $0x178] sm:$0xff] }
  0xb9   : > { %1229 = vmatpush1.bf16.msra.mxu1 %v1228_v32  ;;  %1201 = vmatpush1.bf16.msra.mxu0 %v1200_v42  ;;  %v799_v32 = vld [vmem:[%s2142_s5 + $0xb8] sm:$0xff] }
  0xba   : > { %1231 = vmatprep.subr.bf16.mxu1 %v1230_v37  ;;  %v1246_v34 = vpack.c.bf16 %v799_v32, %v798_v31  ;;  %v783_v37 = vld [vmem:[%s2142_s5 + $0x38] sm:$0xff]  ;;  %v384_v31 = vld [vmem:[%s2141_s4] sm:$0xf] }
  0xbb   : > { %v1248_v39 = vpack.c.bf16 %v783_v37, %v782_v36  ;;  %v815_v42 = vld [vmem:[%s2142_s5 + $0x138] sm:$0xff] }
  0xbd   : > { %1233 = vmatpush1.bf16.msra.mxu1 %v1232_v43  ;;  %v1280_v43 = vpack.c.bf16 %v815_v42, %v814_v41 }
 0x13b   : > { %v293_v45 = vpop.xlane.xlu1 %292 }
 0x13c   : > { %v296_v46 = vmul.f32 0.0078125, %v293_v45  ;;  %v800_v45 = vld [vmem:[%s2142_s5 + $0xc0] sm:$0xff] }
 0x13e   : > { %v298_v47 = vadd.f32 1e-05, %v296_v46  ;;  %v801_v46 = vld [vmem:[%s2142_s5 + $0xc8] sm:$0xff] }
 0x13f   : > { %v295_v48 = vpop.xlane.xlu1 %294 }
 0x140   : > { %1341 = vrsqrt.f32 %v298_v47  ;;  %v297_v49 = vmul.f32 0.0078125, %v295_v48  ;;  %v832_v47 = vld [vmem:[%s2142_s5 + $0x1c0] sm:$0xff]  ;;  %v1250_v48 = vpack.c.bf16 %v801_v46, %v800_v45 }
 0x142   : > { %v299_v50 = vadd.f32 1e-05, %v297_v49  ;;  %v833_v49 = vld [vmem:[%s2142_s5 + $0x1c8] sm:$0xff] }
 0x144   : > { %1343 = vrsqrt.f32 %v299_v50  ;;  %v784_v50 = vld [vmem:[%s2142_s5 + $0x40] sm:$0xff] }
 0x14a   : > { %v1342_v51 = vpop.eup %1341 }
 0x14b   : > { %v302_v53 = vmul.f32 %v1342_v51, %v1617_v40  ;;  %v792_v40 = vld [vmem:[%s2142_s5 + $0x80] sm:$0xff]  ;;  %v785_v51 = vld [vmem:[%s2142_s5 + $0x48] sm:$0xff] }
 0x14c   : > { %v1234_v62 = vpack.c.bf16 %v793_v61, %v792_v40 }
 0x14d   : > { %v310_v55 = vmul.f32 %v1084_v52, %v302_v53  ;;  %v1252_v53 = vpack.c.bf16 %v785_v51, %v784_v50 }
 0x14e   : > { %v1344_v56 = vpop.eup %1343  ;;  %1235 = vmatprep.subr.bf16.mxu0 %v1234_v62  ;;  %v787_v62 = vld [vmem:[%s2142_s5 + $0x58] sm:$0xff] }
 0x14f   : > { %v318_v57 = vadd.f32 %v1085_v54, %v310_v55  ;;  %v303_v58 = vmul.f32 %v1344_v56, %v1621_v44  ;;  %v824_v44 = vld [vmem:[%s2142_s5 + $0x180] sm:$0xff]  ;;  %v817_v55 = vld [vmem:[%s2142_s5 + $0x148] sm:$0xff]  ;;  %v802_v56 = vld [vmem:[%s2142_s5 + $0xd0] sm:$0xff] }
 0x150   : > { %v1266_v2 = vpack.c.bf16 %v825_v63, %v824_v44  ;;  %v786_v44 = vld [vmem:[%s2142_s5 + $0x50] sm:$0xff] }
 0x151   : > { %471 = vmatmul.mubr.f32.vlgmr.msra.gmra.mrb[0].mxu0 %v318_v57  ;;  %548 = vmatmul.mubr.f32.vlgmr.msra.gmra.mrb[0].mxu1 %v318_v57  ;;  %v311_v59 = vmul.f32 %v1084_v52, %v303_v58  ;;  %v1282_v52 = vpack.c.bf16 %v833_v49, %v832_v47  ;;  %v803_v58 = vld [vmem:[%s2142_s5 + $0xd8] sm:$0xff]  ;;  %v818_v63 = vld [vmem:[%s2142_s5 + $0x150] sm:$0xff]  ;;  %v1256_v0 = vpack.c.bf16 %v787_v62, %v786_v44 }
 0x152   : > { %476 = vmatprep.mubr.f32.mxu0 %v1443_v22  ;;  %553 = vmatprep.mubr.f32.mxu1 %v1443_v22  ;;  %v1242_v22 = vpack.c.bf16 %v797_v20, %v796_v19  ;;  %v1254_v40 = vpack.c.bf16 %v803_v58, %v802_v56  ;;  %v1288_v4 = vpack.c.bf16 %v819_v1, %v818_v63  ;;  %v839_v19 = vld [vmem:[%s2142_s5 + $0x1f8] sm:$0xff]  ;;  %v790_v20 = vld [vmem:[%s2142_s5 + $0x70] sm:$0xff] }
 0x153   : > { %v319_v60 = vadd.f32 %v1085_v54, %v311_v59  ;;  %1267 = vmatprep.subr.bf16.mxu1 %v1266_v2  ;;  %1237 = vmatpush3.bf16.msra.mxu0 %v1236_v3  ;;  %v816_v54 = vld [vmem:[%s2142_s5 + $0x140] sm:$0xff]  ;;  %v834_v59 = vld [vmem:[%s2142_s5 + $0x1d0] sm:$0xff]  ;;  %v805_v3 = vld [vmem:[%s2142_s5 + $0xe8] sm:$0xff]  ;;  %v1264_v25 = vpack.c.bf16 %v791_v21, %v790_v20 }
 0x154   : > { %1269 = vmatpush3.bf16.msra.mxu1 %v1268_v6  ;;  %1239 = vmatprep.subr.bf16.mxu0 %v1238_v10  ;;  %v1284_v57 = vpack.c.bf16 %v817_v55, %v816_v54  ;;  %v804_v2 = vld [vmem:[%s2142_s5 + $0xe0] sm:$0xff]  ;;  %v789_v10 = vld [vmem:[%s2142_s5 + $0x68] sm:$0xff] }
 0x155   : > { %477 = vmatmul.mubr.f32.gmra.mrb[2].mxu0 %v319_v60  ;;  %554 = vmatmul.mubr.f32.gmra.mrb[2].mxu1 %v319_v60  ;;  %v835_v60 = vld [vmem:[%s2142_s5 + $0x1d8] sm:$0xff]  ;;  %v1258_v5 = vpack.c.bf16 %v805_v3, %v804_v2  ;;  %v836_v6 = vld [vmem:[%s2142_s5 + $0x1e0] sm:$0xff]  ;;  %v1260_v13 = vpack.c.bf16 %v789_v10, %v788_v8 }
 0x156   : > { %1271 = vmatprep.subr.bf16.mxu1 %v1270_v14  ;;  %v1286_v61 = vpack.c.bf16 %v835_v60, %v834_v59  ;;  %v1290_v9 = vpack.c.bf16 %v837_v7, %v836_v6  ;;  %v806_v14 = vld [vmem:[%s2142_s5 + $0xf0] sm:$0xff] }
 0x157   : > { %1241 = vmatpush3.bf16.msra.mxu0 %v1240_v15  ;;  %v807_v15 = vld [vmem:[%s2142_s5 + $0xf8] sm:$0xff] }
 0x158   : > { %1273 = vmatpush3.bf16.msra.mxu1 %v1272_v18  ;;  %1243 = vmatprep.subr.bf16.mxu0 %v1242_v22  ;;  %v1262_v18 = vpack.c.bf16 %v807_v15, %v806_v14  ;;  %v1294_v22 = vpack.c.bf16 %v839_v19, %v838_v16 }
 0x159   : > { %1275 = vmatprep.subr.bf16.mxu1 %v1274_v26  ;;  %v1296_v26 = vpack.c.bf16 %v823_v24, %v822_v23 }
 0x15b   : > { %1245 = vmatpush3.bf16.msra.mxu0 %v1244_v27  ;;  %v386_v27 = vlaneseq }
 0x15c   : > { %1277 = vmatpush3.bf16.msra.mxu1 %v1276_v30  ;;  %1247 = vmatprep.subr.bf16.mxu0 %v1246_v34 }
 0x15d   : > { %1279 = vmatprep.subr.bf16.mxu1 %v1278_v38  ;;  %v387_v28 = vshrl.u32 %v386_v27, 7 }
 0x15f   : > { %1249 = vmatpush3.bf16.msra.mxu0 %v1248_v39  ;;  %v388_v29 = vsub.s32 0, %v387_v28  ;;  %v396_v30 = vsub.s32 2, %v387_v28  ;;  %v392_v32 = vsub.s32 1, %v387_v28  ;;  %v400_v33 = vsub.s32 3, %v387_v28 }
 0x160   : > { %1281 = vmatpush3.bf16.msra.mxu1 %v1280_v43  ;;  %1251 = vmatprep.subr.bf16.mxu0 %v1250_v48 }
 0x161   : > { %1283 = vmatprep.subr.bf16.mxu1 %v1282_v52  ;;  %v389_v34 = vrot.slane %v384_v31, %v388_v29  ;;  %v397_v35 = vrot.slane %v384_v31, %v396_v30  ;;  %v393_v36 = vrot.slane %v384_v31, %v392_v32  ;;  %v401_v37 = vrot.slane %v384_v31, %v400_v33 }
 0x163   : > { %1253 = vmatpush3.bf16.msra.mxu0 %v1252_v53 }
 0x164   : > { %1285 = vmatpush3.bf16.msra.mxu1 %v1284_v57  ;;  %1255 = vmatprep.subr.bf16.mxu0 %v1254_v40 }
 0x165   : > { %1287 = vmatprep.subr.bf16.mxu1 %v1286_v61 }
 0x167   : > { %1257 = vmatpush3.bf16.msra.mxu0 %v1256_v0 }
 0x168   : > { %1289 = vmatpush3.bf16.msra.mxu1 %v1288_v4  ;;  %1259 = vmatprep.subr.bf16.mxu0 %v1258_v5 }
 0x169   : > { %1291 = vmatprep.subr.bf16.mxu1 %v1290_v9 }
 0x16b   : > { %1261 = vmatpush3.bf16.msra.mxu0 %v1260_v13 }
 0x16c   : > { %1293 = vmatpush3.bf16.msra.mxu1 %v1292_v17  ;;  %1263 = vmatprep.subr.bf16.mxu0 %v1262_v18 }
 0x16d   : > { %1295 = vmatprep.subr.bf16.mxu1 %v1294_v22  ;;  %v1444_v22 = vmov -1.0  }
 0x16f   : > { %1265 = vmatpush3.bf16.msra.mxu0 %v1264_v25 }
 0x170   : > { %1297 = vmatpush3.bf16.msra.mxu1 %v1296_v26 }
 0x224   : > { %v472_v38 = vpop.f32.mrb[0].mxu0  ;;  %v549_v39 = vpop.f32.mrb[0].mxu1 }
 0x225   : > { %v473_v41 = vadd.f32 %v472_v38, %v389_v34  ;;  %v1948_v42 = vadd.f32 %v549_v39, %v397_v35  ;;  %v474_v43 = vpop.f32.mrb[1].mxu0  ;;  %v551_v45 = vpop.f32.mrb[1].mxu1 }
 0x226   : > { %v475_v46 = vadd.f32 %v474_v43, %v393_v36  ;;  %v552_v47 = vadd.f32 %v551_v45, %v401_v37 }
 0x227   : > { %v568_v48 = vmul.f32 0.70710677, %v473_v41  ;;  %v570_v49 = vmul.f32 0.70710677, %v1948_v42  ;;  %v1967_v9 = vmul.f32 0.5, %v473_v41 }
 0x228   : > { %v1951_v50 = vmul.f32 0.70710677, %v475_v46  ;;  %v1954_v54 = vmul.f32 0.70710677, %v552_v47  ;;  %v478_v55 = vpop.f32.mrb[2].mxu0  ;;  %v555_v59 = vpop.f32.mrb[2].mxu1 }
 0x229   : > { %v592_v51 = vand.u32 2147483647, %v568_v48  ;;  %v594_v52 = vand.u32 2147483647, %v570_v49  ;;  %v480_v61 = vpop.f32.mrb[3].mxu0  ;;  %v557_v44 = vpop.f32.mrb[3].mxu1  ;;  %v1957_v0 = vadd.f32 %v478_v55, %v389_v34  ;;  %v1962_v4 = vadd.f32 %v555_v59, %v397_v35 }
 0x22a   : > { %v593_v53 = vand.u32 2147483647, %v1951_v50  ;;  %v595_v62 = vand.u32 2147483647, %v1954_v54  ;;  %v1964_v6 = vadd.f32 %v480_v61, %v393_v36  ;;  %vm576_vm0 = vcmp.ge.f32.partialorder %v568_v48, 0.0 }
 0x22b   : > { %v600_v56 = vmul.f32 0.3275911, %v592_v51  ;;  %v602_v57 = vmul.f32 0.3275911, %v594_v52  ;;  %v704_v2 = vsub.f32 0.0, %v592_v51  ;;  %v706_v7 = vsub.f32 0.0, %v594_v52 }
 0x22c   : > { %v601_v58 = vmul.f32 0.3275911, %v593_v53  ;;  %v603_v1 = vmul.f32 0.3275911, %v595_v62  ;;  %v1960_v3 = vmul.f32 0.70710677, %v1957_v0  ;;  %v1980_v21 = vadd.f32 %v557_v44, %v401_v37 }
 0x22d   : > { %v608_v60 = vadd.f32 1.0, %v600_v56  ;;  %v610_v40 = vadd.f32 1.0, %v602_v57  ;;  %vm578_vm1 = vcmp.ge.f32.partialorder %v570_v49, 0.0  ;;  %v1970_v10 = vmul.f32 0.70710677, %v1962_v4 }
 0x22e   : > { %v609_v63 = vadd.f32 1.0, %v601_v58  ;;  %v611_v5 = vadd.f32 1.0, %v603_v1  ;;  %v596_v8 = vand.u32 2147483647, %v1960_v3  ;;  %v712_v11 = vmul.f32 %v704_v2, %v592_v51 }
 0x22f   : > { %1345 = vrcp.f32 %v608_v60  ;;  %v705_v12 = vsub.f32 0.0, %v593_v53  ;;  %v1972_v14 = vmul.f32 0.5, %v475_v46  ;;  %v1974_v15 = vmul.f32 0.5, %v552_v47 }
 0x230   : > { %1347 = vrcp.f32 %v610_v40  ;;  %v604_v13 = vmul.f32 0.3275911, %v596_v8  ;;  %v598_v16 = vand.u32 2147483647, %v1970_v10  ;;  %v1978_v17 = vmul.f32 0.70710677, %v1964_v6 }
 0x231   : > { %1349 = vrcp.f32 %v609_v63  ;;  %v714_v18 = vmul.f32 %v706_v7, %v594_v52  ;;  %v707_v19 = vsub.f32 0.0, %v595_v62  ;;  %v1984_v23 = vsel %vm576_vm0, 1.0, %v1444_v22 }
 0x232   : > { %1351 = vrcp.f32 %v611_v5  ;;  %v612_v20 = vadd.f32 1.0, %v604_v13  ;;  %v1988_v24 = vsel %vm578_vm1, 1.0, %v1444_v22  ;;  %v606_v25 = vmul.f32 0.3275911, %v598_v16 }
 0x233   : > { %v597_v26 = vand.u32 2147483647, %v1978_v17  ;;  %v720_v28 = vmul.f32 1.442695, %v712_v11  ;;  %vm577_vm2 = vcmp.ge.f32.partialorder %v1951_v50, 0.0  ;;  %v713_v29 = vmul.f32 %v705_v12, %v593_v53 }
 0x234   : > { %1353 = vrcp.f32 %v612_v20  ;;  %v708_v32 = vsub.f32 0.0, %v596_v8  ;;  %v614_v33 = vadd.f32 1.0, %v606_v25  ;;  %v724_v36 = vmul.f32 1.442695, %v714_v18 }
 0x235   : > { %v605_v34 = vmul.f32 0.3275911, %v597_v26  ;;  %v715_v37 = vmul.f32 %v707_v19, %v595_v62  ;;  %v1999_v38 = vmul.f32 0.70710677, %v1980_v21  ;;  %v710_v41 = vsub.f32 0.0, %v598_v16 }
 0x236   : > { %1355 = vrcp.f32 %v614_v33  ;;  %v722_v47 = vmul.f32 1.442695, %v713_v29  ;;  %v716_v51 = vmul.f32 %v708_v32, %v596_v8  ;;  %v709_v60 = vsub.f32 0.0, %v597_v26 }
 0x237   : > { %v613_v43 = vadd.f32 1.0, %v605_v34  ;;  %v599_v48 = vand.u32 2147483647, %v1999_v38  ;;  %1357 = vpow2.f32 %v720_v28  ;;  %v726_v56 = vmul.f32 1.442695, %v715_v37 }
 0x238   : > { %v718_v59 = vmul.f32 %v710_v41, %v598_v16  ;;  %v728_v1 = vmul.f32 1.442695, %v716_v51  ;;  %v2018_v8 = vsel %vm577_vm2, 1.0, %v1444_v22  ;;  %v717_v16 = vmul.f32 %v709_v60, %v597_v26 }
 0x239   : > { %v1991_v27 = vpop.eup %1345  ;;  %1359 = vrcp.f32 %v613_v43  ;;  %v607_v57 = vmul.f32 0.3275911, %v599_v48  ;;  %v711_v50 = vsub.f32 0.0, %v599_v48  ;;  %vm579_vm3 = vcmp.ge.f32.partialorder %v1954_v54, 0.0 }
 0x23a   : > { %v1994_v30 = vpop.eup %1347  ;;  %v632_v31 = vmul.f32 1.0614054, %v1991_v27  ;;  %1361 = vpow2.f32 %v724_v36  ;;  %v732_v13 = vmul.f32 1.442695, %v718_v59  ;;  %v730_v37 = vmul.f32 1.442695, %v717_v16 }
 0x23b   : > { %v634_v35 = vmul.f32 1.0614054, %v1994_v30  ;;  %v2001_v45 = vpop.eup %1349  ;;  %v615_v44 = vadd.f32 1.0, %v607_v57  ;;  %1363 = vpow2.f32 %v722_v47  ;;  %vm580_vm4 = vcmp.ge.f32.partialorder %v1960_v3, 0.0 }
 0x23c   : > { %v640_v39 = vadd.f32 -1.4531521, %v632_v31  ;;  %v633_v52 = vmul.f32 1.0614054, %v2001_v45  ;;  %v2006_v53 = vpop.eup %1351  ;;  %vm581_vm5 = vcmp.ge.f32.partialorder %v1978_v17, 0.0  ;;  %vm582_vm6 = vcmp.ge.f32.partialorder %v1970_v10, 0.0 }
 0x23d   : > { %v642_v46 = vadd.f32 -1.4531521, %v634_v35  ;;  %v635_v62 = vmul.f32 1.0614054, %v2006_v53  ;;  %1365 = vrcp.f32 %v615_v44  ;;  %v589_v3 = vsel %vm581_vm5, 1.0, %v1444_v22 }
 0x23e   : > { %v648_v49 = vmul.f32 %v1991_v27, %v640_v39  ;;  %v641_v40 = vadd.f32 -1.4531521, %v633_v52  ;;  %v2012_v5 = vpop.eup %1353  ;;  %1367 = vpow2.f32 %v726_v56  ;;  %v719_v52 = vmul.f32 %v711_v50, %v599_v48 }
 0x23f   : > { %v650_v55 = vmul.f32 %v1994_v30, %v642_v46  ;;  %v643_v11 = vadd.f32 -1.4531521, %v635_v62  ;;  %v636_v25 = vmul.f32 1.0614054, %v2012_v5  ;;  %1369 = vpow2.f32 %v728_v1 }
 0x240   : > { %v656_v58 = vadd.f32 1.4214138, %v648_v49  ;;  %v649_v2 = vmul.f32 %v2001_v45, %v641_v40  ;;  %v2022_v28 = vpop.eup %1355  ;;  %1371 = vpow2.f32 %v732_v13  ;;  %vm583_vm7 = vcmp.ge.f32.partialorder %v1999_v38, 0.0 }
 0x241   : > { %v658_v61 = vadd.f32 1.4214138, %v650_v55  ;;  %v651_v20 = vmul.f32 %v2006_v53, %v643_v11  ;;  %v644_v34 = vadd.f32 -1.4531521, %v636_v25  ;;  %v638_v26 = vmul.f32 1.0614054, %v2022_v28  ;;  %v1358_v35 = vpop.eup %1357 }
 0x242   : > { %v664_v63 = vmul.f32 %v1991_v27, %v656_v58  ;;  %v657_v18 = vadd.f32 1.4214138, %v649_v2  ;;  %1373 = vpow2.f32 %v730_v37 }
 0x243   : > { %v666_v7 = vmul.f32 %v1994_v30, %v658_v61  ;;  %v659_v33 = vadd.f32 1.4214138, %v651_v20  ;;  %v2028_v41 = vpop.eup %1359  ;;  %v652_v47 = vmul.f32 %v2012_v5, %v644_v34  ;;  %v646_v49 = vadd.f32 -1.4531521, %v638_v26 }
 0x244   : > { %v672_v12 = vadd.f32 -0.28449672, %v664_v63  ;;  %v665_v31 = vmul.f32 %v2001_v45, %v657_v18  ;;  %v637_v56 = vmul.f32 1.0614054, %v2028_v41  ;;  %v1362_v57 = vpop.eup %1361  ;;  %v734_v18 = vmul.f32 1.442695, %v719_v52 }
 0x245   : > { %v674_v19 = vadd.f32 -0.28449672, %v666_v7  ;;  %v667_v46 = vmul.f32 %v2006_v53, %v659_v33  ;;  %v660_v60 = vadd.f32 1.4214138, %v652_v47  ;;  %v654_v40 = vmul.f32 %v2022_v28, %v646_v49  ;;  %v1364_v61 = vpop.eup %1363 }
 0x246   : > { %v680_v29 = vmul.f32 %v1991_v27, %v672_v12  ;;  %v673_v39 = vadd.f32 -0.28449672, %v665_v31  ;;  %v645_v63 = vadd.f32 -1.4531521, %v637_v56  ;;  %1375 = vpow2.f32 %v734_v18 }
 0x247   : > { %v682_v32 = vmul.f32 %v1994_v30, %v674_v19  ;;  %v675_v59 = vadd.f32 -0.28449672, %v667_v46  ;;  %v2037_v1 = vpop.eup %1365  ;;  %v668_v2 = vmul.f32 %v2012_v5, %v660_v60  ;;  %v662_v7 = vadd.f32 1.4214138, %v654_v40 }
 0x248   : > { %v688_v36 = vadd.f32 0.2548296, %v680_v29  ;;  %v681_v55 = vmul.f32 %v2001_v45, %v673_v39  ;;  %v653_v12 = vmul.f32 %v2028_v41, %v645_v63  ;;  %v639_v13 = vmul.f32 1.0614054, %v2037_v1  ;;  %v1368_v16 = vpop.eup %1367 }
 0x249   : > { %v690_v43 = vadd.f32 0.2548296, %v682_v32  ;;  %v683_v48 = vmul.f32 %v2006_v53, %v675_v59  ;;  %v676_v20 = vadd.f32 -0.28449672, %v668_v2  ;;  %v670_v25 = vmul.f32 %v2022_v28, %v662_v7  ;;  %v1370_v29 = vpop.eup %1369 }
 0x24a   : > { %v696_v51 = vmul.f32 %v1991_v27, %v688_v36  ;;  %v689_v62 = vadd.f32 0.2548296, %v681_v55  ;;  %v661_v32 = vadd.f32 1.4214138, %v653_v12  ;;  %v647_v33 = vadd.f32 -1.4531521, %v639_v13  ;;  %v1372_v36 = vpop.eup %1371 }
 0x24b   : > { %v698_v58 = vmul.f32 %v1994_v30, %v690_v43  ;;  %v691_v19 = vadd.f32 0.2548296, %v683_v48  ;;  %v587_v60 = vsel %vm579_vm3, 1.0, %v1444_v22 }
 0x24c   : > { %v736_v44 = vmul.f32 %v1358_v35, %v696_v51  ;;  %v697_v30 = vmul.f32 %v2001_v45, %v689_v62  ;;  %v684_v45 = vmul.f32 %v2012_v5, %v676_v20  ;;  %v678_v35 = vadd.f32 -0.28449672, %v670_v25  ;;  %v1374_v59 = vpop.eup %1373 }
 0x24d   : > { %v738_v27 = vmul.f32 %v1362_v57, %v698_v58  ;;  %v699_v26 = vmul.f32 %v2006_v53, %v691_v19  ;;  %v669_v39 = vmul.f32 %v2028_v41, %v661_v32  ;;  %v655_v43 = vmul.f32 %v2037_v1, %v647_v33 }
 0x24e   : > { %v744_v11 = vsub.f32 1.0, %v736_v44  ;;  %v737_v31 = vmul.f32 %v1364_v61, %v697_v30  ;;  %v692_v47 = vadd.f32 0.2548296, %v684_v45  ;;  %v686_v49 = vmul.f32 %v2022_v28, %v678_v35 }
 0x24f   : > { %v746_v50 = vsub.f32 1.0, %v738_v27  ;;  %v739_v46 = vmul.f32 %v1368_v16, %v699_v26  ;;  %v677_v51 = vadd.f32 -0.28449672, %v669_v39  ;;  %v663_v52 = vadd.f32 1.4214138, %v655_v43 }
 0x250   : > { %v752_v34 = vmul.f32 %v744_v11, %v1984_v23  ;;  %v745_v37 = vsub.f32 1.0, %v737_v31  ;;  %v700_v57 = vmul.f32 %v2012_v5, %v692_v47  ;;  %v694_v58 = vadd.f32 0.2548296, %v686_v49  ;;  %v1376_v19 = vpop.eup %1375 }
 0x251   : > { %v754_v23 = vmul.f32 %v746_v50, %v1988_v24  ;;  %v747_v56 = vsub.f32 1.0, %v739_v46  ;;  %v685_v61 = vmul.f32 %v2028_v41, %v677_v51  ;;  %v671_v44 = vmul.f32 %v2037_v1, %v663_v52  ;;  %v1377_v51 = vld [vmem:[%s1541_s17] sm:$0xff] }
 0x252   : > { %v753_v53 = vmul.f32 %v745_v37, %v2018_v8  ;;  %v760_v55 = vadd.f32 1.0, %v752_v34  ;;  %v740_v8 = vmul.f32 %v1370_v29, %v700_v57  ;;  %v702_v62 = vmul.f32 %v2022_v28, %v694_v58 }
 0x253   : > { %v755_v24 = vmul.f32 %v747_v56, %v587_v60  ;;  %v762_v63 = vadd.f32 1.0, %v754_v23  ;;  %v693_v27 = vadd.f32 0.2548296, %v685_v61  ;;  %v679_v48 = vadd.f32 -0.28449672, %v671_v44  ;;  %v1378_v44 = vld [vmem:[%s1541_s17 + $0x8] sm:$0xff] }
 0x254   : > { %v761_v40 = vadd.f32 1.0, %v753_v53  ;;  %v768_v2 = vmul.f32 %v760_v55, %v1967_v9  ;;  %v748_v7 = vsub.f32 1.0, %v740_v8  ;;  %v742_v11 = vmul.f32 %v1372_v36, %v702_v62 }
 0x255   : > { %v763_v54 = vadd.f32 1.0, %v755_v24  ;;  %v562_v30 = vmul.f32 0.5, %v1948_v42  ;;  %v701_v12 = vmul.f32 %v2028_v41, %v693_v27  ;;  %v687_v13 = vmul.f32 %v2037_v1, %v679_v48 }
 0x256   : > { %v769_v5 = vmul.f32 %v761_v40, %v1972_v14  ;;  %v588_v28 = vsel %vm580_vm4, 1.0, %v1444_v22  ;;  %v750_v41 = vsub.f32 1.0, %v742_v11  ;;  %v565_v32 = vmul.f32 0.5, %v1964_v6 }
 0x257   : > { %v771_v14 = vmul.f32 %v763_v54, %v1974_v15  ;;  %v770_v16 = vmul.f32 %v762_v63, %v562_v30  ;;  %v741_v9 = vmul.f32 %v1374_v59, %v701_v12  ;;  %v695_v18 = vadd.f32 0.2548296, %v687_v13 }
 0x258   : > { %911 = vmatprep.mubr.f32.mxu0 %v769_v5  ;;  %v756_v42 = vmul.f32 %v748_v7, %v588_v28  ;;  %v590_v15 = vsel %vm582_vm6, 1.0, %v1444_v22  ;;  %v564_v34 = vmul.f32 0.5, %v1957_v0  ;;  %v591_v26 = vsel %vm583_vm7, 1.0, %v1444_v22  ;;  %v1086_v22 = vld [vmem:[%s2143_s6] ss:$0 sm:$0xff] }
 0x259   : > { %912 = vmatmul.mubr.f32.vlgmr.msra.gmra.mrb[4].mxu0 %v768_v2  ;;  %986 = vmatprep.mubr.f32.mxu1 %v771_v14  ;;  %v749_v20 = vsub.f32 1.0, %v741_v9  ;;  %v703_v25 = vmul.f32 %v2037_v1, %v695_v18  ;;  %v758_v31 = vmul.f32 %v750_v41, %v590_v15  ;;  %v567_v37 = vmul.f32 0.5, %v1980_v21 }
 0x25a   : > { %987 = vmatmul.mubr.f32.vlgmr.msra.gmra.mrb[4].mxu1 %v770_v16  ;;  %v764_v50 = vadd.f32 1.0, %v756_v42  ;;  %v566_v39 = vmul.f32 0.5, %v1962_v4 }
 0x25b   : > { %v757_v29 = vmul.f32 %v749_v20, %v589_v3  ;;  %v743_v17 = vmul.f32 %v1376_v19, %v703_v25  ;;  %v766_v36 = vadd.f32 1.0, %v758_v31 }
 0x25c   : > { %v772_v35 = vmul.f32 %v764_v50, %v564_v34 }
 0x25d   : > { %v765_v10 = vadd.f32 1.0, %v757_v29  ;;  %v751_v33 = vsub.f32 1.0, %v743_v17  ;;  %v774_v43 = vmul.f32 %v766_v36, %v566_v39 }
 0x25f   : > { %v773_v45 = vmul.f32 %v765_v10, %v565_v32  ;;  %v759_v1 = vmul.f32 %v751_v33, %v591_v26 }
 0x261   : > { %916 = vmatprep.mubr.f32.mxu0 %v773_v45  ;;  %v767_v38 = vadd.f32 1.0, %v759_v1 }
 0x262   : > { %917 = vmatmul.mubr.f32.gmra.mrb[6].mxu0 %v772_v35 }
 0x263   : > { %v775_v6 = vmul.f32 %v767_v38, %v567_v37 }
 0x265   : > { %991 = vmatprep.mubr.f32.mxu1 %v775_v6 }
 0x266   : > { %992 = vmatmul.mubr.f32.gmra.mrb[6].mxu1 %v774_v43 }
 0x32c   : > { %v1126_v0 = vpop.f32.mrb[4].mxu0 }
 0x32d   : > { %v1127_v46 = vpop.f32.mrb[5].mxu0  ;;  %v1164_v49 = vpop.f32.mrb[4].mxu1 }
 0x32e   : > { %v1128_v47 = vadd.f32 %v1127_v46, %v1126_v0  ;;  %v1165_v23 = vpop.f32.mrb[5].mxu1 }
 0x32f   : > { %v1166_v4 = vadd.f32 %v1165_v23, %v1164_v49 }
 0x330   : > { %v914_v21 = vadd.f32 %v1128_v47, %v1086_v22 }
 0x332   : > { %v989_v53 = vadd.f32 %v1166_v4, %v914_v21 }
 0x334   : > { %v997_v52 = vadd.f32 %v1377_v51, %v989_v53 }
 0x335   : > { %v1129_v55 = vpop.f32.mrb[6].mxu0 }
 0x336   : > { %999 = vst [vmem:[%s271_s29] sm:$0xff] %v997_v52  ;;  %v1130_v56 = vpop.f32.mrb[7].mxu0 }
 0x337   : > { %v1131_v57 = vadd.f32 %v1130_v56, %v1129_v55 }
 0x339   : > { %v1167_v58 = vpop.f32.mrb[6].mxu1  ;;  %v919_v59 = vadd.f32 %v1131_v57, %v1086_v22 }
 0x33a   : > { %v1168_v60 = vpop.f32.mrb[7].mxu1 }
 0x33b   : > { %v1169_v40 = vadd.f32 %v1168_v60, %v1167_v58 }
 0x33d   : > { %v994_v61 = vadd.f32 %v1169_v40, %v919_v59 }
 0x33f   : > { %v998_v24 = vadd.f32 %v1378_v44, %v994_v61 }
 0x341   : > { %1000 = vst [vmem:[%s271_s29 + $0x8] sm:$0xff] %v998_v24 }
 0x342   : > { %1392 = shalt.err (!%p1389_p3)
}
 0x343   : > { %s1393_s17 = scalar_lea.hbm %s2094_s15, 256  ;;  %s1397_s23 = scalar_lea.hbm %s2144_s7, 512 }
 0x344   : > { %p1394_p4 = scmp.ne.s32.totalorder %s2094_s15, %s1393_s17  ;;  %p1398_p9 = scmp.lt.u32.totalorder %s2094_s15, %s2144_s7 }
 0x345   : > { %p1399_p10 = scmp.lt.u32.totalorder %s1397_s23, %s1393_s17  ;;  %p1401_p12 = scmp.lt.u32.totalorder %s1393_s17, %s2094_s15 }
 0x346   : > { %p1395_p7 = pnand %p1394_p4, %p1526_p5 }
 0x347   : > { %p1400_p11 = por %p1399_p10, %p1398_p9 }
 0x348   : > { %p1396_p8 = pneg %p1395_p7 }
 0x349   : > { %p1402_p13 = por %p1401_p12, %p1400_p11 }
 0x34b   : > { %p1403_p0 = pnand %p1402_p13, %p1396_p8 }
 0x34d   : > { %1406 = shalt.err (!%p1403_p0)
}
 0x34e   : > { %s1446_s13 = smov 128   ;;  %s1447_s14 = smov 8  }
 0x34f   : > { %1298 = dma.vmem_to_hbm [thread:$0]  (%p1526_p5), %s2088_s8, 256, %s2094_s15, %s2096_s16, %s1446_s13, %s1446_s13, %s1447_s14  }
 0x350 PF: > { %p1304_p1 = scmp.ge.s32.totalorder %s1441_s27, 2  ;;  %s1030_s18 = sand.u32 1, %s1429_s24  }
 0x351   : > { %s1031_s28 = scalar_lea.sflag [#allocation3], %s1030_s18 }
 0x352   : > { %p1301_p2 = pnand %p1304_p1, %p1530_p6 }
 0x354   : > { %1424 = dma.done.wait (!%p1301_p2), %s1031_s28, 256  }
 0x355   : > { %1426 = vsyncadd (!%p1301_p2), %s1031_s28, 4294967040  ;;  %p17_p3 = scmp.ge.s32.totalorder %s1513_s30, 4   ;;  %s2147_s24 = smov %s1433_s25 }
 0x356   : > { %s2148_s25 = smov %s1437_s26  ;;  %s2149_s26 = smov %s1524_s10 }
 0x357   : > { %s2150_s27 = smov %s1513_s30  ;;  %19 = sbr.rel (!%p17_p3) target bundleno = 3 (0x3), region = 83 }
 0x35e   :  { %1036 = vsyncpa [#allocation3], 1 }
 0x35f   :  { %1038 = vsyncpa [#allocation3 + $0x1], 1 }

</bundles_post_ra>
